<compile_context>
chip_gen: v7x
topology: tpu7x:2x2x1
jax: 0.10.0
libtpu: 0.0.40
codegen_flags: <defaults>
</compile_context>

<pallas_src>
import functools

import numpy as np
import jax
import jax.numpy as jnp
from jax.experimental import pallas as pl
from jax.experimental.pallas import tpu as pltpu

_VMEM_LIMIT = 32 * 1024 * 1024


def _round_up(x, m):
    return (x + m - 1) // m * m


def _pick_tile(padded, candidates):
    for c in candidates:
        if padded % c == 0:
            return c
    return padded


# ----------------------------------------------------------------------------
# Tiled matmul + bias + ReLU kernel (bf16 MXU operands, f32 accumulator)
# ----------------------------------------------------------------------------

def _mm_kernel(x_ref, w_ref, b_ref, o_ref, acc_ref, *, relu):
    @pl.when(pl.program_id(2) == 0)
    def _():
        acc_ref[...] = jnp.zeros_like(acc_ref)

    acc_ref[...] += jnp.dot(x_ref[...], w_ref[...],
                            preferred_element_type=jnp.float32)

    @pl.when(pl.program_id(2) == pl.num_programs(2) - 1)
    def _():
        y = acc_ref[...] + b_ref[...]
        if relu:
            y = jnp.maximum(y, 0.0)
        o_ref[...] = y.astype(o_ref.dtype)


def matmul_bias_act(x, w, b, relu=False, out_dtype=jnp.float32):
    """out = act(x @ w + b), tiled/pipelined, bf16 operands, f32 accumulation."""
    M, K = x.shape
    _, N = w.shape
    Mp = _round_up(M, 8)
    Kp = _round_up(K, 128)
    Np = _round_up(N, 128)          # lane-dense output stores
    tm = _pick_tile(Mp, (256, 128, 64, 32, 16, 8))
    tk = _pick_tile(Kp, (512, 256, 128))
    tn = _pick_tile(Np, (256, 128))

    xb = jnp.pad(x.astype(jnp.bfloat16), ((0, Mp - M), (0, Kp - K)))
    wb = jnp.pad(w.astype(jnp.bfloat16), ((0, Kp - K), (0, Np - N)))
    bb = jnp.pad(b.reshape(1, N).astype(jnp.float32), ((0, 0), (0, Np - N)))

    grid = (Mp // tm, Np // tn, Kp // tk)
    cost = pl.CostEstimate(
        flops=2 * Mp * Np * Kp, transcendentals=0,
        bytes_accessed=int(Mp * Kp * 2 + Kp * Np * 2
                           + Mp * Np * jnp.dtype(out_dtype).itemsize))

    out = pl.pallas_call(
        functools.partial(_mm_kernel, relu=relu),
        out_shape=jax.ShapeDtypeStruct((Mp, Np), out_dtype),
        grid=grid,
        in_specs=[
            pl.BlockSpec((tm, tk), lambda i, j, k: (i, k)),
            pl.BlockSpec((tk, tn), lambda i, j, k: (k, j)),
            pl.BlockSpec((1, tn), lambda i, j, k: (0, j)),
        ],
        out_specs=pl.BlockSpec((tm, tn), lambda i, j, k: (i, j)),
        scratch_shapes=[pltpu.VMEM((tm, tn), jnp.float32)],
        compiler_params=pltpu.CompilerParams(
            dimension_semantics=("parallel", "parallel", "arbitrary"),
            vmem_limit_bytes=_VMEM_LIMIT),
        cost_estimate=cost,
    )(xb, wb, bb)

    if (Mp, Np) != (M, N):
        out = out[:M, :N]
    return out


# ----------------------------------------------------------------------------
# Split-K dual-input matmul (FFM fusion: low @ W_low + x @ W_high, no concat)
# ----------------------------------------------------------------------------

def _mm2_kernel(x1_ref, w1_ref, x2_ref, w2_ref, b_ref, o_ref, *, relu):
    acc = jnp.dot(x1_ref[...], w1_ref[...], preferred_element_type=jnp.float32)
    acc += jnp.dot(x2_ref[...], w2_ref[...], preferred_element_type=jnp.float32)
    acc += b_ref[...]
    if relu:
        acc = jnp.maximum(acc, 0.0)
    o_ref[...] = acc.astype(o_ref.dtype)


def matmul2_bias_act(x1, w1, x2, w2, b, relu=True, out_dtype=jnp.bfloat16):
    M, K1 = x1.shape
    _, K2 = x2.shape
    N = w1.shape[1]
    Mp = _round_up(M, 8)
    Np = _round_up(N, 128)
    tm = _pick_tile(Mp, (256, 128, 64, 32, 16, 8))
    tn = _pick_tile(Np, (256, 128))

    x1b = jnp.pad(x1.astype(jnp.bfloat16), ((0, Mp - M), (0, 0)))
    x2b = jnp.pad(x2.astype(jnp.bfloat16), ((0, Mp - M), (0, 0)))
    w1b = jnp.pad(w1.astype(jnp.bfloat16), ((0, 0), (0, Np - N)))
    w2b = jnp.pad(w2.astype(jnp.bfloat16), ((0, 0), (0, Np - N)))
    bb = jnp.pad(b.reshape(1, N).astype(jnp.float32), ((0, 0), (0, Np - N)))

    cost = pl.CostEstimate(
        flops=2 * Mp * Np * (K1 + K2), transcendentals=0,
        bytes_accessed=int(Mp * (K1 + K2) * 2 + (K1 + K2) * Np * 2
                           + Mp * Np * jnp.dtype(out_dtype).itemsize))

    out = pl.pallas_call(
        functools.partial(_mm2_kernel, relu=relu),
        out_shape=jax.ShapeDtypeStruct((Mp, Np), out_dtype),
        grid=(Mp // tm, Np // tn),
        in_specs=[
            pl.BlockSpec((tm, K1), lambda i, j: (i, 0)),
            pl.BlockSpec((K1, tn), lambda i, j: (0, j)),
            pl.BlockSpec((tm, K2), lambda i, j: (i, 0)),
            pl.BlockSpec((K2, tn), lambda i, j: (0, j)),
            pl.BlockSpec((1, tn), lambda i, j: (0, j)),
        ],
        out_specs=pl.BlockSpec((tm, tn), lambda i, j: (i, j)),
        compiler_params=pltpu.CompilerParams(
            dimension_semantics=("parallel", "parallel"),
            vmem_limit_bytes=_VMEM_LIMIT),
        cost_estimate=cost,
    )(x1b, w1b, x2b, w2b, bb)

    if (Mp, Np) != (M, N):
        out = out[:M, :N]
    return out


# ----------------------------------------------------------------------------
# simam module (NHWC, channels stay in lanes, no transposes)
# ----------------------------------------------------------------------------

def _simam_kernel(x_ref, o_ref, *, n, e_lambda):
    x = x_ref[...].astype(jnp.float32)                    # (1, H, W, tc)
    mu = jnp.mean(x, axis=(1, 2), keepdims=True)
    d2 = (x - mu) * (x - mu)
    s = jnp.sum(d2, axis=(1, 2), keepdims=True)
    y = d2 / (4.0 * (s / n + e_lambda)) + 0.5
    o_ref[...] = (x * jax.nn.sigmoid(y)).astype(o_ref.dtype)


def simam(x_nhwc, e_lambda=1e-4):
    B, H, W, C = x_nhwc.shape
    tc = 128 if C % 128 == 0 else C
    n = float(H * W - 1)
    return pl.pallas_call(
        functools.partial(_simam_kernel, n=n, e_lambda=e_lambda),
        out_shape=jax.ShapeDtypeStruct(x_nhwc.shape, x_nhwc.dtype),
        grid=(B, C // tc),
        in_specs=[pl.BlockSpec((1, H, W, tc), lambda b, c: (b, 0, 0, c))],
        out_specs=pl.BlockSpec((1, H, W, tc), lambda b, c: (b, 0, 0, c)),
        compiler_params=pltpu.CompilerParams(
            dimension_semantics=("parallel", "parallel"),
            vmem_limit_bytes=_VMEM_LIMIT),
    )(x_nhwc)


# ----------------------------------------------------------------------------
# Fused bilinear resize kernel (both passes on-chip, static 2-tap lerps)
# ----------------------------------------------------------------------------

def _interp_coeffs(in_size, out_size, align_corners):
    """PyTorch bilinear semantics -> static (lo, hi, weight) per output index."""
    lo, hi, wt = [], [], []
    for o in range(out_size):
        if align_corners:
            src = 0.0 if out_size == 1 else o * (in_size - 1) / (out_size - 1)
        else:
            src = max((o + 0.5) * in_size / out_size - 0.5, 0.0)
        l = min(int(np.floor(src)), in_size - 1)
        h = min(l + 1, in_size - 1)
        lo.append(l)
        hi.append(h)
        wt.append(float(src - l))
    return lo, hi, wt


def _lerp_axis(x, axis, coeffs):
    lo, hi, wt = coeffs
    outs = []
    for o in range(len(wt)):
        a = jax.lax.index_in_dim(x, lo[o], axis, keepdims=False)
        if hi[o] == lo[o] or wt[o] == 0.0:
            outs.append(a)
        else:
            b = jax.lax.index_in_dim(x, hi[o], axis, keepdims=False)
            outs.append((1.0 - wt[o]) * a + wt[o] * b)
    return jnp.stack(outs, axis=axis)


def _resize_kernel(x_ref, o_ref, *, hc, wc):
    x = x_ref[...].astype(jnp.float32)     # (1, H, W[, tc])
    t = _lerp_axis(x, 2, wc)               # W pass (intermediate stays in VMEM)
    t = _lerp_axis(t, 1, hc)               # H pass
    o_ref[...] = t.astype(o_ref.dtype)


def bilinear_resize_nhwc(x, out_h, out_w, align_corners):
    """NHWC resize, channels stay in lanes; grid over (batch, channel tiles)."""
    B, H, W, C = x.shape
    tc = 128 if C % 128 == 0 else C
    hc = _interp_coeffs(H, out_h, align_corners)
    wc = _interp_coeffs(W, out_w, align_corners)
    return pl.pallas_call(
        functools.partial(_resize_kernel, hc=hc, wc=wc),
        out_shape=jax.ShapeDtypeStruct((B, out_h, out_w, C), x.dtype),
        grid=(B, C // tc),
        in_specs=[pl.BlockSpec((1, H, W, tc), lambda b, c: (b, 0, 0, c))],
        out_specs=pl.BlockSpec((1, out_h, out_w, tc), lambda b, c: (b, 0, 0, c)),
        compiler_params=pltpu.CompilerParams(
            dimension_semantics=("parallel", "parallel"),
            vmem_limit_bytes=_VMEM_LIMIT),
    )(x)


def bilinear_resize_rows(x_rhw, out_h, out_w, align_corners):
    """(R, H, W) resize: lane dim = width; used for the final x4 upsample so the
    result is directly NCHW (R = B*C) and stores stay wide."""
    R, H, W = x_rhw.shape
    hc = _interp_coeffs(H, out_h, align_corners)
    wc = _interp_coeffs(W, out_w, align_corners)
    return pl.pallas_call(
        functools.partial(_resize_kernel, hc=hc, wc=wc),
        out_shape=jax.ShapeDtypeStruct((R, out_h, out_w), x_rhw.dtype),
        grid=(R,),
        in_specs=[pl.BlockSpec((1, H, W), lambda r: (r, 0, 0))],
        out_specs=pl.BlockSpec((1, out_h, out_w), lambda r: (r, 0, 0)),
        compiler_params=pltpu.CompilerParams(
            dimension_semantics=("parallel",),
            vmem_limit_bytes=_VMEM_LIMIT),
    )(x_rhw)


# ----------------------------------------------------------------------------
# Convolutions: im2col (bf16) + tiled Pallas matmul, BN folded, ReLU fused
# ----------------------------------------------------------------------------

def _im2col(x_nhwc, ks, stride, padding):
    B, H, W, C = x_nhwc.shape
    xp = jnp.pad(x_nhwc, ((0, 0), (padding, padding), (padding, padding), (0, 0)))
    Ho = (H + 2 * padding - ks) // stride + 1
    Wo = (W + 2 * padding - ks) // stride + 1
    cols = []
    for ky in range(ks):
        for kx in range(ks):
            cols.append(xp[:, ky:ky + stride * Ho:stride,
                           kx:kx + stride * Wo:stride, :])
    cols = jnp.concatenate(cols, axis=-1)            # (B, Ho, Wo, ks*ks*C)
    return cols.reshape(B * Ho * Wo, ks * ks * C), Ho, Wo


def conv2d(x_nhwc, w_oihw, bias, stride, padding, relu, out_dtype=jnp.bfloat16):
    """Conv2d (PyTorch OIHW weights) via bf16 im2col + tiled Pallas matmul."""
    # TODO(synk): im2col is still materialized in HBM (bf16 halves it); a
    # halo'd direct-conv kernel with an in-kernel tap loop would remove it.
    B = x_nhwc.shape[0]
    cout, cin, kh, kw = w_oihw.shape
    cols, Ho, Wo = _im2col(x_nhwc.astype(jnp.bfloat16), kh, stride, padding)
    wmat = jnp.transpose(w_oihw, (2, 3, 1, 0)).reshape(kh * kw * cin, cout)
    y = matmul_bias_act(cols, wmat, bias, relu=relu, out_dtype=out_dtype)
    return y.reshape(B, Ho, Wo, cout)


def _fold_bn(p):
    scale = p["gamma"] / jnp.sqrt(p["var"] + 1e-5)
    w = p["w"] * scale[:, None, None, None]
    b = p["beta"] - p["mean"] * scale
    return w, b


def conv_bn_relu(x_nhwc, p, stride, relu=True, out_dtype=jnp.bfloat16):
    """ConvBNReLU (Conv2d bias=False, pad=ks//2 + BatchNorm(eval) + ReLU)."""
    w, b = _fold_bn(p)
    ks = p["w"].shape[2]
    return conv2d(x_nhwc, w, b, stride=stride, padding=ks // 2, relu=relu,
                  out_dtype=out_dtype)


def ffm_fuse(low, h, p):
    """FFM stand-in: concat([low, h]) + 1x1 ConvBNReLU, done as a split-K matmul
    so the 320-channel concatenated tensor never hits HBM."""
    # TODO(synk): FeatureFusionModule(320,256) internals not provided;
    # channel-attention branch omitted.
    B, H, W, C1 = low.shape
    C2 = h.shape[-1]
    w, b = _fold_bn(p)
    cout = w.shape[0]
    wmat = w.reshape(cout, C1 + C2)                 # 1x1 conv
    w1 = jnp.transpose(wmat[:, :C1])                # (C1, cout)
    w2 = jnp.transpose(wmat[:, C1:])                # (C2, cout)
    y = matmul2_bias_act(low.reshape(B * H * W, C1), w1,
                         h.reshape(B * H * W, C2), w2, b,
                         relu=True, out_dtype=jnp.bfloat16)
    return y.reshape(B, H, W, cout)


# ----------------------------------------------------------------------------
# Deterministic parameter init (PyTorch OIHW weight layout + BN stats)
# ----------------------------------------------------------------------------

def _init_convbnrelu(key, cin, cout, ks):
    kw, kg, kb, km, kv = jax.random.split(key, 5)
    return {
        "w": 0.05 * jax.random.normal(kw, (cout, cin, ks, ks), jnp.float32),
        "gamma": 1.0 + 0.1 * jax.random.normal(kg, (cout,), jnp.float32),
        "beta": 0.1 * jax.random.normal(kb, (cout,), jnp.float32),
        "mean": 0.1 * jax.random.normal(km, (cout,), jnp.float32),
        "var": 0.5 + jnp.abs(jax.random.normal(kv, (cout,), jnp.float32)),
    }


def init_params(key):
    ks = jax.random.split(key, 13)
    P = {}
    P["stem"] = _init_convbnrelu(ks[0], 3, 64, 3)        # Spatial_down(3,64,k=3) stand-in
    P["s2_0"] = _init_convbnrelu(ks[1], 64, 64, 3)       # S2: ConvBNReLU(64,64,3,s=2)
    P["s2_1"] = _init_convbnrelu(ks[2], 64, 64, 3)       #     ConvBNReLU(64,64,3,s=1)
    P["s2_2"] = _init_convbnrelu(ks[3], 64, 64, 3)       #     ConvBNReLU(64,64,3,s=1)
    P["bb_0"] = _init_convbnrelu(ks[4], 3, 32, 3)        # backbone stand-in (/16 -> 320ch)
    P["bb_1"] = _init_convbnrelu(ks[5], 32, 64, 3)
    P["bb_2"] = _init_convbnrelu(ks[6], 64, 160, 3)
    P["bb_3"] = _init_convbnrelu(ks[7], 160, 320, 3)
    P["stage1"] = _init_convbnrelu(ks[8], 320, 256, 3)   # RSU4F(320,32,256) stand-in
    P["ffm"] = _init_convbnrelu(ks[9], 320, 256, 1)      # FFM(320,256) stand-in
    P["oup_conv"] = _init_convbnrelu(ks[10], 256, 64, 3) # Output.conv
    P["oup_out_w"] = 0.05 * jax.random.normal(ks[11], (2, 64, 1, 1), jnp.float32)
    P["oup_out_b"] = 0.05 * jax.random.normal(ks[12], (2,), jnp.float32)
    return P


# ----------------------------------------------------------------------------
# LEIPNet forward
# ----------------------------------------------------------------------------

def leipnet_forward(x_nchw, P):
    x = jnp.transpose(x_nchw, (0, 2, 3, 1)).astype(jnp.bfloat16)   # -> NHWC

    # low_level_features = self.stem(x)
    # TODO(synk): Spatial_down(3,64,k=3) definition not provided; stride-2 ConvBNReLU stand-in.
    low = conv_bn_relu(x, P["stem"], stride=2)

    # low_level_features = self.S2(low_level_features)
    low = conv_bn_relu(low, P["s2_0"], stride=2)
    low = conv_bn_relu(low, P["s2_1"], stride=1)
    low = conv_bn_relu(low, P["s2_2"], stride=1)

    # low_level_features = self.positioning(low_level_features)   (simam, exact)
    low = simam(low)

    # x = self.backbone(x)
    # TODO(synk): MobileNetV2(downsample_factor=16) definition/weights not provided;
    #             strided ConvBNReLU stand-ins producing 320 channels at H/16.
    h = x
    for name in ("bb_0", "bb_1", "bb_2", "bb_3"):
        h = conv_bn_relu(h, P[name], stride=2)

    # x = self.stage1(x)
    # TODO(synk): RSU4F(320,32,256) definition not provided; ConvBNReLU(320->256) stand-in.
    h = conv_bn_relu(h, P["stage1"], stride=1)

    # x = self.positioning(x)   (simam, exact)
    h = simam(h)

    # x = F.interpolate(x, size=low.shape, mode='bilinear', align_corners=True)  (exact)
    h = bilinear_resize_nhwc(h, low.shape[1], low.shape[2], align_corners=True)

    # P00 = self.ffm(low_level_features, x)   (stand-in, split-K fused)
    p00 = ffm_fuse(low, h, P["ffm"])

    # x = self.oup(P00)   -- Output(256, 64, 2, up_factor=4), exact per reference
    y = conv_bn_relu(p00, P["oup_conv"], stride=1)                      # ConvBNReLU 3x3
    y = conv2d(y, P["oup_out_w"], P["oup_out_b"], stride=1, padding=0,
               relu=False, out_dtype=jnp.float32)                       # 1x1 conv + bias
    # Upsample x4 (align_corners=False) in (B*C, H, W) layout -> output is NCHW.
    B, Hq, Wq, C2 = y.shape
    yr = jnp.transpose(y, (0, 3, 1, 2)).reshape(B * C2, Hq, Wq)
    out = bilinear_resize_rows(yr, Hq * 4, Wq * 4, align_corners=False)
    return out.reshape(B, C2, Hq * 4, Wq * 4).astype(jnp.float32)       # NCHW


# ----------------------------------------------------------------------------

if __name__ == "__main__":
    key = jax.random.PRNGKey(0)
    pkey, xkey = jax.random.split(key)
    params = init_params(pkey)

    x = jax.random.normal(xkey, (2, 3, 32, 32), jnp.float32)   # NCHW input image
    out = jax.jit(leipnet_forward)(x, params)
    out = jax.block_until_ready(out)

    assert out.shape == (2, 2, 32, 32), out.shape
    assert bool(jnp.all(jnp.isfinite(out)))
    print("KERNEL_OK")
</pallas_src>

<mosaic_0001>
module attributes {stable_mosaic.version = 11 : i64} {
  func.func @_mm_kernel(%arg0: i32, %arg1: i32, %arg2: i32, %arg3: memref<256x128xbf16, #tpu.memory_space<vmem>>, %arg4: memref<128x128xbf16, #tpu.memory_space<vmem>>, %arg5: memref<1x128xf32, #tpu.memory_space<vmem>>, %arg6: memref<256x128xbf16, #tpu.memory_space<vmem>>, %arg7: memref<256x128xf32, #tpu.memory_space<vmem>>) attributes {dimension_semantics = [#tpu.dimension_semantics<parallel>, #tpu.dimension_semantics<parallel>, #tpu.dimension_semantics<arbitrary>], iteration_bounds = array<i64: 2, 1, 1>, scalar_prefetch = 0 : i64, scratch_operands = 1 : i64, tpu.core_type = #tpu.core_type<tc>, window_params = [{transform_indices = @transform_0, window_bounds = array<i64: 256, 128>}, {transform_indices = @transform_1, window_bounds = array<i64: 128, 128>}, {transform_indices = @transform_2, window_bounds = array<i64: 1, 128>}, {transform_indices = @transform_3, window_bounds = array<i64: 256, 128>}]} {
    %c0_i32 = arith.constant 0 : i32
    %0 = arith.cmpi eq, %arg2, %c0_i32 : i32
    %1 = arith.extui %0 : i1 to i32
    %c0_i32_0 = arith.constant 0 : i32
    %2 = arith.cmpi ne, %1, %c0_i32_0 : i32
    scf.if %2 {
      %cst_10 = arith.constant 0.000000e+00 : f32
      %12 = vector.broadcast %cst_10 : f32 to vector<256x128xf32>
      %c0_11 = arith.constant 0 : index
      %c0_12 = arith.constant 0 : index
      %13 = vector.load %arg7[%c0_11, %c0_12] : memref<256x128xf32, #tpu.memory_space<vmem>>, vector<256x128xf32>
      tpu.vector_store %arg7[%c0_11, %c0_12], %12 {strides = array<i32>} : memref<256x128xf32, #tpu.memory_space<vmem>>, vector<256x128xf32>,
    } else {
    }
    %c0 = arith.constant 0 : index
    %c0_1 = arith.constant 0 : index
    %3 = vector.load %arg7[%c0, %c0_1] : memref<256x128xf32, #tpu.memory_space<vmem>>, vector<256x128xf32>
    %c0_2 = arith.constant 0 : index
    %c0_3 = arith.constant 0 : index
    %4 = vector.load %arg3[%c0_2, %c0_3] : memref<256x128xbf16, #tpu.memory_space<vmem>>, vector<256x128xbf16>
    %c0_4 = arith.constant 0 : index
    %c0_5 = arith.constant 0 : index
    %5 = vector.load %arg4[%c0_4, %c0_5] : memref<128x128xbf16, #tpu.memory_space<vmem>>, vector<128x128xbf16>
    %cst = arith.constant dense<0.000000e+00> : vector<256x128xf32>
    %6 = tpu.matmul %4, %5, %cst {dimension_numbers = #tpu.dot_dimension_numbers<[1], [0], [0], [1], [0, 0, 1, 1], [], []>} : vector<256x128xbf16>, vector<128x128xbf16>, vector<256x128xf32> -> vector<256x128xf32>
    %7 = arith.addf %3, %6 : vector<256x128xf32>
    %c0_6 = arith.constant 0 : index
    %c0_7 = arith.constant 0 : index
    %8 = vector.load %arg7[%c0_6, %c0_7] : memref<256x128xf32, #tpu.memory_space<vmem>>, vector<256x128xf32>
    tpu.vector_store %arg7[%c0_6, %c0_7], %7 {strides = array<i32>} : memref<256x128xf32, #tpu.memory_space<vmem>>, vector<256x128xf32>,
    %c0_i32_8 = arith.constant 0 : i32
    %9 = arith.cmpi eq, %arg2, %c0_i32_8 : i32
    %10 = arith.extui %9 : i1 to i32
    %c0_i32_9 = arith.constant 0 : i32
    %11 = arith.cmpi ne, %10, %c0_i32_9 : i32
    scf.if %11 {
      %c0_10 = arith.constant 0 : index
      %c0_11 = arith.constant 0 : index
      %12 = vector.load %arg7[%c0_10, %c0_11] : memref<256x128xf32, #tpu.memory_space<vmem>>, vector<256x128xf32>
      %c0_12 = arith.constant 0 : index
      %c0_13 = arith.constant 0 : index
      %13 = vector.load %arg5[%c0_12, %c0_13] : memref<1x128xf32, #tpu.memory_space<vmem>>, vector<1x128xf32>
      %14 = vector.broadcast %13 : vector<1x128xf32> to vector<256x128xf32>
      %15 = arith.addf %12, %14 : vector<256x128xf32>
      %cst_14 = arith.constant 0.000000e+00 : f32
      %16 = vector.broadcast %cst_14 : f32 to vector<256x128xf32>
      %17 = arith.maximumf %15, %16 : vector<256x128xf32>
      %18 = arith.truncf %17 : vector<256x128xf32> to vector<256x128xbf16>
      %c0_15 = arith.constant 0 : index
      %c0_16 = arith.constant 0 : index
      %19 = vector.load %arg6[%c0_15, %c0_16] : memref<256x128xbf16, #tpu.memory_space<vmem>>, vector<256x128xbf16>
      tpu.vector_store %arg6[%c0_15, %c0_16], %18 {strides = array<i32>} : memref<256x128xbf16, #tpu.memory_space<vmem>>, vector<256x128xbf16>,
    } else {
    }
    return
  }
  func.func @transform_0(%arg0: i32, %arg1: i32, %arg2: i32) -> (i32, i32) {
    %c0_i32 = arith.constant 0 : i32
    return %arg0, %arg2 : i32, i32
  }
  func.func @transform_1(%arg0: i32, %arg1: i32, %arg2: i32) -> (i32, i32) {
    %c0_i32 = arith.constant 0 : i32
    return %arg2, %arg1 : i32, i32
  }
  func.func @transform_2(%arg0: i32, %arg1: i32, %arg2: i32) -> (i32, i32) {
    %c0_i32 = arith.constant 0 : i32
    %c0_i32_0 = arith.constant 0 : i32
    return %c0_i32, %arg1 : i32, i32
  }
  func.func @transform_3(%arg0: i32, %arg1: i32, %arg2: i32) -> (i32, i32) {
    %c0_i32 = arith.constant 0 : i32
    return %arg0, %arg1 : i32, i32
  }
}

module attributes {stable_mosaic.version = 11 : i64} {
  func.func @_mm_kernel(%arg0: i32, %arg1: i32, %arg2: i32, %arg3: memref<128x128xbf16, #tpu.memory_space<vmem>>, %arg4: memref<128x128xbf16, #tpu.memory_space<vmem>>, %arg5: memref<1x128xf32, #tpu.memory_space<vmem>>, %arg6: memref<128x128xbf16, #tpu.memory_space<vmem>>, %arg7: memref<128x128xf32, #tpu.memory_space<vmem>>) attributes {dimension_semantics = [#tpu.dimension_semantics<parallel>, #tpu.dimension_semantics<parallel>, #tpu.dimension_semantics<arbitrary>], iteration_bounds = array<i64: 1, 1, 3>, scalar_prefetch = 0 : i64, scratch_operands = 1 : i64, tpu.core_type = #tpu.core_type<tc>, window_params = [{transform_indices = @transform_0, window_bounds = array<i64: 128, 128>}, {transform_indices = @transform_1, window_bounds = array<i64: 128, 128>}, {transform_indices = @transform_2, window_bounds = array<i64: 1, 128>}, {transform_indices = @transform_3, window_bounds = array<i64: 128, 128>}]} {
    %c0_i32 = arith.constant 0 : i32
    %0 = arith.cmpi eq, %arg2, %c0_i32 : i32
    %1 = arith.extui %0 : i1 to i32
    %c0_i32_0 = arith.constant 0 : i32
    %2 = arith.cmpi ne, %1, %c0_i32_0 : i32
    scf.if %2 {
      %cst_9 = arith.constant 0.000000e+00 : f32
      %12 = vector.broadcast %cst_9 : f32 to vector<128x128xf32>
      %c0_10 = arith.constant 0 : index
      %c0_11 = arith.constant 0 : index
      %13 = vector.load %arg7[%c0_10, %c0_11] : memref<128x128xf32, #tpu.memory_space<vmem>>, vector<128x128xf32>
      tpu.vector_store %arg7[%c0_10, %c0_11], %12 {strides = array<i32>} : memref<128x128xf32, #tpu.memory_space<vmem>>, vector<128x128xf32>,
    } else {
    }
    %c0 = arith.constant 0 : index
    %c0_1 = arith.constant 0 : index
    %3 = vector.load %arg7[%c0, %c0_1] : memref<128x128xf32, #tpu.memory_space<vmem>>, vector<128x128xf32>
    %c0_2 = arith.constant 0 : index
    %c0_3 = arith.constant 0 : index
    %4 = vector.load %arg3[%c0_2, %c0_3] : memref<128x128xbf16, #tpu.memory_space<vmem>>, vector<128x128xbf16>
    %c0_4 = arith.constant 0 : index
    %c0_5 = arith.constant 0 : index
    %5 = vector.load %arg4[%c0_4, %c0_5] : memref<128x128xbf16, #tpu.memory_space<vmem>>, vector<128x128xbf16>
    %cst = arith.constant dense<0.000000e+00> : vector<128x128xf32>
    %6 = tpu.matmul %4, %5, %cst {dimension_numbers = #tpu.dot_dimension_numbers<[1], [0], [0], [1], [0, 0, 1, 1], [], []>} : vector<128x128xbf16>, vector<128x128xbf16>, vector<128x128xf32> -> vector<128x128xf32>
    %7 = arith.addf %3, %6 : vector<128x128xf32>
    %c0_6 = arith.constant 0 : index
    %c0_7 = arith.constant 0 : index
    %8 = vector.load %arg7[%c0_6, %c0_7] : memref<128x128xf32, #tpu.memory_space<vmem>>, vector<128x128xf32>
    tpu.vector_store %arg7[%c0_6, %c0_7], %7 {strides = array<i32>} : memref<128x128xf32, #tpu.memory_space<vmem>>, vector<128x128xf32>,
    %c2_i32 = arith.constant 2 : i32
    %9 = arith.cmpi eq, %arg2, %c2_i32 : i32
    %10 = arith.extui %9 : i1 to i32
    %c0_i32_8 = arith.constant 0 : i32
    %11 = arith.cmpi ne, %10, %c0_i32_8 : i32
    scf.if %11 {
      %c0_9 = arith.constant 0 : index
      %c0_10 = arith.constant 0 : index
      %12 = vector.load %arg7[%c0_9, %c0_10] : memref<128x128xf32, #tpu.memory_space<vmem>>, vector<128x128xf32>
      %c0_11 = arith.constant 0 : index
      %c0_12 = arith.constant 0 : index
      %13 = vector.load %arg5[%c0_11, %c0_12] : memref<1x128xf32, #tpu.memory_space<vmem>>, vector<1x128xf32>
      %14 = vector.broadcast %13 : vector<1x128xf32> to vector<128x128xf32>
      %15 = arith.addf %12, %14 : vector<128x128xf32>
      %cst_13 = arith.constant 0.000000e+00 : f32
      %16 = vector.broadcast %cst_13 : f32 to vector<128x128xf32>
      %17 = arith.maximumf %15, %16 : vector<128x128xf32>
      %18 = arith.truncf %17 : vector<128x128xf32> to vector<128x128xbf16>
      %c0_14 = arith.constant 0 : index
      %c0_15 = arith.constant 0 : index
      %19 = vector.load %arg6[%c0_14, %c0_15] : memref<128x128xbf16, #tpu.memory_space<vmem>>, vector<128x128xbf16>
      tpu.vector_store %arg6[%c0_14, %c0_15], %18 {strides = array<i32>} : memref<128x128xbf16, #tpu.memory_space<vmem>>, vector<128x128xbf16>,
    } else {
    }
    return
  }
  func.func @transform_0(%arg0: i32, %arg1: i32, %arg2: i32) -> (i32, i32) {
    %c0_i32 = arith.constant 0 : i32
    return %arg0, %arg2 : i32, i32
  }
  func.func @transform_1(%arg0: i32, %arg1: i32, %arg2: i32) -> (i32, i32) {
    %c0_i32 = arith.constant 0 : i32
    return %arg2, %arg1 : i32, i32
  }
  func.func @transform_2(%arg0: i32, %arg1: i32, %arg2: i32) -> (i32, i32) {
    %c0_i32 = arith.constant 0 : i32
    %c0_i32_0 = arith.constant 0 : i32
    return %c0_i32, %arg1 : i32, i32
  }
  func.func @transform_3(%arg0: i32, %arg1: i32, %arg2: i32) -> (i32, i32) {
    %c0_i32 = arith.constant 0 : i32
    return %arg0, %arg1 : i32, i32
  }
}

module attributes {stable_mosaic.version = 11 : i64} {
  func.func @_mm_kernel(%arg0: i32, %arg1: i32, %arg2: i32, %arg3: memref<32x128xbf16, #tpu.memory_space<vmem>>, %arg4: memref<128x256xbf16, #tpu.memory_space<vmem>>, %arg5: memref<1x256xf32, #tpu.memory_space<vmem>>, %arg6: memref<32x256xbf16, #tpu.memory_space<vmem>>, %arg7: memref<32x256xf32, #tpu.memory_space<vmem>>) attributes {dimension_semantics = [#tpu.dimension_semantics<parallel>, #tpu.dimension_semantics<parallel>, #tpu.dimension_semantics<arbitrary>], iteration_bounds = array<i64: 1, 1, 5>, scalar_prefetch = 0 : i64, scratch_operands = 1 : i64, tpu.core_type = #tpu.core_type<tc>, window_params = [{transform_indices = @transform_0, window_bounds = array<i64: 32, 128>}, {transform_indices = @transform_1, window_bounds = array<i64: 128, 256>}, {transform_indices = @transform_2, window_bounds = array<i64: 1, 256>}, {transform_indices = @transform_3, window_bounds = array<i64: 32, 256>}]} {
    %c0_i32 = arith.constant 0 : i32
    %0 = arith.cmpi eq, %arg2, %c0_i32 : i32
    %1 = arith.extui %0 : i1 to i32
    %c0_i32_0 = arith.constant 0 : i32
    %2 = arith.cmpi ne, %1, %c0_i32_0 : i32
    scf.if %2 {
      %cst_9 = arith.constant 0.000000e+00 : f32
      %12 = vector.broadcast %cst_9 : f32 to vector<32x256xf32>
      %c0_10 = arith.constant 0 : index
      %c0_11 = arith.constant 0 : index
      %13 = vector.load %arg7[%c0_10, %c0_11] : memref<32x256xf32, #tpu.memory_space<vmem>>, vector<32x256xf32>
      tpu.vector_store %arg7[%c0_10, %c0_11], %12 {strides = array<i32>} : memref<32x256xf32, #tpu.memory_space<vmem>>, vector<32x256xf32>,
    } else {
    }
    %c0 = arith.constant 0 : index
    %c0_1 = arith.constant 0 : index
    %3 = vector.load %arg7[%c0, %c0_1] : memref<32x256xf32, #tpu.memory_space<vmem>>, vector<32x256xf32>
    %c0_2 = arith.constant 0 : index
    %c0_3 = arith.constant 0 : index
    %4 = vector.load %arg3[%c0_2, %c0_3] : memref<32x128xbf16, #tpu.memory_space<vmem>>, vector<32x128xbf16>
    %c0_4 = arith.constant 0 : index
    %c0_5 = arith.constant 0 : index
    %5 = vector.load %arg4[%c0_4, %c0_5] : memref<128x256xbf16, #tpu.memory_space<vmem>>, vector<128x256xbf16>
    %cst = arith.constant dense<0.000000e+00> : vector<32x256xf32>
    %6 = tpu.matmul %4, %5, %cst {dimension_numbers = #tpu.dot_dimension_numbers<[1], [0], [0], [1], [0, 0, 1, 1], [], []>} : vector<32x128xbf16>, vector<128x256xbf16>, vector<32x256xf32> -> vector<32x256xf32>
    %7 = arith.addf %3, %6 : vector<32x256xf32>
    %c0_6 = arith.constant 0 : index
    %c0_7 = arith.constant 0 : index
    %8 = vector.load %arg7[%c0_6, %c0_7] : memref<32x256xf32, #tpu.memory_space<vmem>>, vector<32x256xf32>
    tpu.vector_store %arg7[%c0_6, %c0_7], %7 {strides = array<i32>} : memref<32x256xf32, #tpu.memory_space<vmem>>, vector<32x256xf32>,
    %c4_i32 = arith.constant 4 : i32
    %9 = arith.cmpi eq, %arg2, %c4_i32 : i32
    %10 = arith.extui %9 : i1 to i32
    %c0_i32_8 = arith.constant 0 : i32
    %11 = arith.cmpi ne, %10, %c0_i32_8 : i32
    scf.if %11 {
      %c0_9 = arith.constant 0 : index
      %c0_10 = arith.constant 0 : index
      %12 = vector.load %arg7[%c0_9, %c0_10] : memref<32x256xf32, #tpu.memory_space<vmem>>, vector<32x256xf32>
      %c0_11 = arith.constant 0 : index
      %c0_12 = arith.constant 0 : index
      %13 = vector.load %arg5[%c0_11, %c0_12] : memref<1x256xf32, #tpu.memory_space<vmem>>, vector<1x256xf32>
      %14 = vector.broadcast %13 : vector<1x256xf32> to vector<32x256xf32>
      %15 = arith.addf %12, %14 : vector<32x256xf32>
      %cst_13 = arith.constant 0.000000e+00 : f32
      %16 = vector.broadcast %cst_13 : f32 to vector<32x256xf32>
      %17 = arith.maximumf %15, %16 : vector<32x256xf32>
      %18 = arith.truncf %17 : vector<32x256xf32> to vector<32x256xbf16>
      %c0_14 = arith.constant 0 : index
      %c0_15 = arith.constant 0 : index
      %19 = vector.load %arg6[%c0_14, %c0_15] : memref<32x256xbf16, #tpu.memory_space<vmem>>, vector<32x256xbf16>
      tpu.vector_store %arg6[%c0_14, %c0_15], %18 {strides = array<i32>} : memref<32x256xbf16, #tpu.memory_space<vmem>>, vector<32x256xbf16>,
    } else {
    }
    return
  }
  func.func @transform_0(%arg0: i32, %arg1: i32, %arg2: i32) -> (i32, i32) {
    %c0_i32 = arith.constant 0 : i32
    return %arg0, %arg2 : i32, i32
  }
  func.func @transform_1(%arg0: i32, %arg1: i32, %arg2: i32) -> (i32, i32) {
    %c0_i32 = arith.constant 0 : i32
    return %arg2, %arg1 : i32, i32
  }
  func.func @transform_2(%arg0: i32, %arg1: i32, %arg2: i32) -> (i32, i32) {
    %c0_i32 = arith.constant 0 : i32
    %c0_i32_0 = arith.constant 0 : i32
    return %c0_i32, %arg1 : i32, i32
  }
  func.func @transform_3(%arg0: i32, %arg1: i32, %arg2: i32) -> (i32, i32) {
    %c0_i32 = arith.constant 0 : i32
    return %arg0, %arg1 : i32, i32
  }
}

module attributes {stable_mosaic.version = 11 : i64} {
  func.func @_mm_kernel(%arg0: i32, %arg1: i32, %arg2: i32, %arg3: memref<8x512xbf16, #tpu.memory_space<vmem>>, %arg4: memref<512x128xbf16, #tpu.memory_space<vmem>>, %arg5: memref<1x128xf32, #tpu.memory_space<vmem>>, %arg6: memref<8x128xbf16, #tpu.memory_space<vmem>>, %arg7: memref<8x128xf32, #tpu.memory_space<vmem>>) attributes {dimension_semantics = [#tpu.dimension_semantics<parallel>, #tpu.dimension_semantics<parallel>, #tpu.dimension_semantics<arbitrary>], iteration_bounds = array<i64: 1, 3, 3>, scalar_prefetch = 0 : i64, scratch_operands = 1 : i64, tpu.core_type = #tpu.core_type<tc>, window_params = [{transform_indices = @transform_0, window_bounds = array<i64: 8, 512>}, {transform_indices = @transform_1, window_bounds = array<i64: 512, 128>}, {transform_indices = @transform_2, window_bounds = array<i64: 1, 128>}, {transform_indices = @transform_3, window_bounds = array<i64: 8, 128>}]} {
    %c0_i32 = arith.constant 0 : i32
    %0 = arith.cmpi eq, %arg2, %c0_i32 : i32
    %1 = arith.extui %0 : i1 to i32
    %c0_i32_0 = arith.constant 0 : i32
    %2 = arith.cmpi ne, %1, %c0_i32_0 : i32
    scf.if %2 {
      %cst_9 = arith.constant 0.000000e+00 : f32
      %12 = vector.broadcast %cst_9 : f32 to vector<8x128xf32>
      %c0_10 = arith.constant 0 : index
      %c0_11 = arith.constant 0 : index
      %13 = vector.load %arg7[%c0_10, %c0_11] : memref<8x128xf32, #tpu.memory_space<vmem>>, vector<8x128xf32>
      tpu.vector_store %arg7[%c0_10, %c0_11], %12 {strides = array<i32>} : memref<8x128xf32, #tpu.memory_space<vmem>>, vector<8x128xf32>,
    } else {
    }
    %c0 = arith.constant 0 : index
    %c0_1 = arith.constant 0 : index
    %3 = vector.load %arg7[%c0, %c0_1] : memref<8x128xf32, #tpu.memory_space<vmem>>, vector<8x128xf32>
    %c0_2 = arith.constant 0 : index
    %c0_3 = arith.constant 0 : index
    %4 = vector.load %arg3[%c0_2, %c0_3] : memref<8x512xbf16, #tpu.memory_space<vmem>>, vector<8x512xbf16>
    %c0_4 = arith.constant 0 : index
    %c0_5 = arith.constant 0 : index
    %5 = vector.load %arg4[%c0_4, %c0_5] : memref<512x128xbf16, #tpu.memory_space<vmem>>, vector<512x128xbf16>
    %cst = arith.constant dense<0.000000e+00> : vector<8x128xf32>
    %6 = tpu.matmul %4, %5, %cst {dimension_numbers = #tpu.dot_dimension_numbers<[1], [0], [0], [1], [0, 0, 1, 1], [], []>} : vector<8x512xbf16>, vector<512x128xbf16>, vector<8x128xf32> -> vector<8x128xf32>
    %7 = arith.addf %3, %6 : vector<8x128xf32>
    %c0_6 = arith.constant 0 : index
    %c0_7 = arith.constant 0 : index
    %8 = vector.load %arg7[%c0_6, %c0_7] : memref<8x128xf32, #tpu.memory_space<vmem>>, vector<8x128xf32>
    tpu.vector_store %arg7[%c0_6, %c0_7], %7 {strides = array<i32>} : memref<8x128xf32, #tpu.memory_space<vmem>>, vector<8x128xf32>,
    %c2_i32 = arith.constant 2 : i32
    %9 = arith.cmpi eq, %arg2, %c2_i32 : i32
    %10 = arith.extui %9 : i1 to i32
    %c0_i32_8 = arith.constant 0 : i32
    %11 = arith.cmpi ne, %10, %c0_i32_8 : i32
    scf.if %11 {
      %c0_9 = arith.constant 0 : index
      %c0_10 = arith.constant 0 : index
      %12 = vector.load %arg7[%c0_9, %c0_10] : memref<8x128xf32, #tpu.memory_space<vmem>>, vector<8x128xf32>
      %c0_11 = arith.constant 0 : index
      %c0_12 = arith.constant 0 : index
      %13 = vector.load %arg5[%c0_11, %c0_12] : memref<1x128xf32, #tpu.memory_space<vmem>>, vector<1x128xf32>
      %14 = vector.broadcast %13 : vector<1x128xf32> to vector<8x128xf32>
      %15 = arith.addf %12, %14 : vector<8x128xf32>
      %cst_13 = arith.constant 0.000000e+00 : f32
      %16 = vector.broadcast %cst_13 : f32 to vector<8x128xf32>
      %17 = arith.maximumf %15, %16 : vector<8x128xf32>
      %18 = arith.truncf %17 : vector<8x128xf32> to vector<8x128xbf16>
      %c0_14 = arith.constant 0 : index
      %c0_15 = arith.constant 0 : index
      %19 = vector.load %arg6[%c0_14, %c0_15] : memref<8x128xbf16, #tpu.memory_space<vmem>>, vector<8x128xbf16>
      tpu.vector_store %arg6[%c0_14, %c0_15], %18 {strides = array<i32>} : memref<8x128xbf16, #tpu.memory_space<vmem>>, vector<8x128xbf16>,
    } else {
    }
    return
  }
  func.func @transform_0(%arg0: i32, %arg1: i32, %arg2: i32) -> (i32, i32) {
    %c0_i32 = arith.constant 0 : i32
    return %arg0, %arg2 : i32, i32
  }
  func.func @transform_1(%arg0: i32, %arg1: i32, %arg2: i32) -> (i32, i32) {
    %c0_i32 = arith.constant 0 : i32
    return %arg2, %arg1 : i32, i32
  }
  func.func @transform_2(%arg0: i32, %arg1: i32, %arg2: i32) -> (i32, i32) {
    %c0_i32 = arith.constant 0 : i32
    %c0_i32_0 = arith.constant 0 : i32
    return %c0_i32, %arg1 : i32, i32
  }
  func.func @transform_3(%arg0: i32, %arg1: i32, %arg2: i32) -> (i32, i32) {
    %c0_i32 = arith.constant 0 : i32
    return %arg0, %arg1 : i32, i32
  }
}

module attributes {stable_mosaic.version = 11 : i64} {
  func.func @_mm_kernel(%arg0: i32, %arg1: i32, %arg2: i32, %arg3: memref<8x128xbf16, #tpu.memory_space<vmem>>, %arg4: memref<128x256xbf16, #tpu.memory_space<vmem>>, %arg5: memref<1x256xf32, #tpu.memory_space<vmem>>, %arg6: memref<8x256xbf16, #tpu.memory_space<vmem>>, %arg7: memref<8x256xf32, #tpu.memory_space<vmem>>) attributes {dimension_semantics = [#tpu.dimension_semantics<parallel>, #tpu.dimension_semantics<parallel>, #tpu.dimension_semantics<arbitrary>], iteration_bounds = array<i64: 1, 1, 23>, scalar_prefetch = 0 : i64, scratch_operands = 1 : i64, tpu.core_type = #tpu.core_type<tc>, window_params = [{transform_indices = @transform_0, window_bounds = array<i64: 8, 128>}, {transform_indices = @transform_1, window_bounds = array<i64: 128, 256>}, {transform_indices = @transform_2, window_bounds = array<i64: 1, 256>}, {transform_indices = @transform_3, window_bounds = array<i64: 8, 256>}]} {
    %c0_i32 = arith.constant 0 : i32
    %0 = arith.cmpi eq, %arg2, %c0_i32 : i32
    %1 = arith.extui %0 : i1 to i32
    %c0_i32_0 = arith.constant 0 : i32
    %2 = arith.cmpi ne, %1, %c0_i32_0 : i32
    scf.if %2 {
      %cst_9 = arith.constant 0.000000e+00 : f32
      %12 = vector.broadcast %cst_9 : f32 to vector<8x256xf32>
      %c0_10 = arith.constant 0 : index
      %c0_11 = arith.constant 0 : index
      %13 = vector.load %arg7[%c0_10, %c0_11] : memref<8x256xf32, #tpu.memory_space<vmem>>, vector<8x256xf32>
      tpu.vector_store %arg7[%c0_10, %c0_11], %12 {strides = array<i32>} : memref<8x256xf32, #tpu.memory_space<vmem>>, vector<8x256xf32>,
    } else {
    }
    %c0 = arith.constant 0 : index
    %c0_1 = arith.constant 0 : index
    %3 = vector.load %arg7[%c0, %c0_1] : memref<8x256xf32, #tpu.memory_space<vmem>>, vector<8x256xf32>
    %c0_2 = arith.constant 0 : index
    %c0_3 = arith.constant 0 : index
    %4 = vector.load %arg3[%c0_2, %c0_3] : memref<8x128xbf16, #tpu.memory_space<vmem>>, vector<8x128xbf16>
    %c0_4 = arith.constant 0 : index
    %c0_5 = arith.constant 0 : index
    %5 = vector.load %arg4[%c0_4, %c0_5] : memref<128x256xbf16, #tpu.memory_space<vmem>>, vector<128x256xbf16>
    %cst = arith.constant dense<0.000000e+00> : vector<8x256xf32>
    %6 = tpu.matmul %4, %5, %cst {dimension_numbers = #tpu.dot_dimension_numbers<[1], [0], [0], [1], [0, 0, 1, 1], [], []>} : vector<8x128xbf16>, vector<128x256xbf16>, vector<8x256xf32> -> vector<8x256xf32>
    %7 = arith.addf %3, %6 : vector<8x256xf32>
    %c0_6 = arith.constant 0 : index
    %c0_7 = arith.constant 0 : index
    %8 = vector.load %arg7[%c0_6, %c0_7] : memref<8x256xf32, #tpu.memory_space<vmem>>, vector<8x256xf32>
    tpu.vector_store %arg7[%c0_6, %c0_7], %7 {strides = array<i32>} : memref<8x256xf32, #tpu.memory_space<vmem>>, vector<8x256xf32>,
    %c22_i32 = arith.constant 22 : i32
    %9 = arith.cmpi eq, %arg2, %c22_i32 : i32
    %10 = arith.extui %9 : i1 to i32
    %c0_i32_8 = arith.constant 0 : i32
    %11 = arith.cmpi ne, %10, %c0_i32_8 : i32
    scf.if %11 {
      %c0_9 = arith.constant 0 : index
      %c0_10 = arith.constant 0 : index
      %12 = vector.load %arg7[%c0_9, %c0_10] : memref<8x256xf32, #tpu.memory_space<vmem>>, vector<8x256xf32>
      %c0_11 = arith.constant 0 : index
      %c0_12 = arith.constant 0 : index
      %13 = vector.load %arg5[%c0_11, %c0_12] : memref<1x256xf32, #tpu.memory_space<vmem>>, vector<1x256xf32>
      %14 = vector.broadcast %13 : vector<1x256xf32> to vector<8x256xf32>
      %15 = arith.addf %12, %14 : vector<8x256xf32>
      %cst_13 = arith.constant 0.000000e+00 : f32
      %16 = vector.broadcast %cst_13 : f32 to vector<8x256xf32>
      %17 = arith.maximumf %15, %16 : vector<8x256xf32>
      %18 = arith.truncf %17 : vector<8x256xf32> to vector<8x256xbf16>
      %c0_14 = arith.constant 0 : index
      %c0_15 = arith.constant 0 : index
      %19 = vector.load %arg6[%c0_14, %c0_15] : memref<8x256xbf16, #tpu.memory_space<vmem>>, vector<8x256xbf16>
      tpu.vector_store %arg6[%c0_14, %c0_15], %18 {strides = array<i32>} : memref<8x256xbf16, #tpu.memory_space<vmem>>, vector<8x256xbf16>,
    } else {
    }
    return
  }
  func.func @transform_0(%arg0: i32, %arg1: i32, %arg2: i32) -> (i32, i32) {
    %c0_i32 = arith.constant 0 : i32
    return %arg0, %arg2 : i32, i32
  }
  func.func @transform_1(%arg0: i32, %arg1: i32, %arg2: i32) -> (i32, i32) {
    %c0_i32 = arith.constant 0 : i32
    return %arg2, %arg1 : i32, i32
  }
  func.func @transform_2(%arg0: i32, %arg1: i32, %arg2: i32) -> (i32, i32) {
    %c0_i32 = arith.constant 0 : i32
    %c0_i32_0 = arith.constant 0 : i32
    return %c0_i32, %arg1 : i32, i32
  }
  func.func @transform_3(%arg0: i32, %arg1: i32, %arg2: i32) -> (i32, i32) {
    %c0_i32 = arith.constant 0 : i32
    return %arg0, %arg1 : i32, i32
  }
}

module attributes {stable_mosaic.version = 11 : i64} {
  func.func @_simam_kernel(%arg0: i32, %arg1: i32, %arg2: memref<1x2x2x128xbf16, #tpu.memory_space<vmem>>, %arg3: memref<1x2x2x128xbf16, #tpu.memory_space<vmem>>) attributes {dimension_semantics = [#tpu.dimension_semantics<parallel>, #tpu.dimension_semantics<parallel>], iteration_bounds = array<i64: 2, 2>, scalar_prefetch = 0 : i64, scratch_operands = 0 : i64, tpu.core_type = #tpu.core_type<tc>, window_params = [{transform_indices = @transform_0, window_bounds = array<i64: 1, 2, 2, 128>}, {transform_indices = @transform_1, window_bounds = array<i64: 1, 2, 2, 128>}]} {
    %c0 = arith.constant 0 : index
    %c0_0 = arith.constant 0 : index
    %c0_1 = arith.constant 0 : index
    %c0_2 = arith.constant 0 : index
    %0 = vector.load %arg2[%c0, %c0_0, %c0_1, %c0_2] : memref<1x2x2x128xbf16, #tpu.memory_space<vmem>>, vector<1x2x2x128xbf16>
    %1 = arith.extf %0 : vector<1x2x2x128xbf16> to vector<1x2x2x128xf32>
    %cst = arith.constant dense<0.000000e+00> : vector<1x128xf32>
    %2 = vector.multi_reduction <add>, %1, %cst [1, 2] : vector<1x2x2x128xf32> to vector<1x128xf32>
    %3 = vector.shape_cast %2 : vector<1x128xf32> to vector<1x1x1x128xf32>
    %cst_3 = arith.constant 4.000000e+00 : f32
    %4 = vector.broadcast %cst_3 : f32 to vector<1x1x1x128xf32>
    %5 = arith.divf %3, %4 : vector<1x1x1x128xf32>
    %6 = vector.broadcast %5 : vector<1x1x1x128xf32> to vector<1x2x2x128xf32>
    %7 = arith.subf %1, %6 : vector<1x2x2x128xf32>
    %8 = vector.broadcast %5 : vector<1x1x1x128xf32> to vector<1x2x2x128xf32>
    %9 = arith.subf %1, %8 : vector<1x2x2x128xf32>
    %10 = arith.mulf %7, %9 : vector<1x2x2x128xf32>
    %cst_4 = arith.constant dense<0.000000e+00> : vector<1x128xf32>
    %11 = vector.multi_reduction <add>, %10, %cst_4 [1, 2] : vector<1x2x2x128xf32> to vector<1x128xf32>
    %12 = vector.shape_cast %11 : vector<1x128xf32> to vector<1x1x1x128xf32>
    %cst_5 = arith.constant 3.000000e+00 : f32
    %13 = vector.broadcast %cst_5 : f32 to vector<1x1x1x128xf32>
    %14 = arith.divf %12, %13 : vector<1x1x1x128xf32>
    %cst_6 = arith.constant 9.99999974E-5 : f32
    %15 = vector.broadcast %cst_6 : f32 to vector<1x1x1x128xf32>
    %16 = arith.addf %14, %15 : vector<1x1x1x128xf32>
    %cst_7 = arith.constant 4.000000e+00 : f32
    %17 = vector.broadcast %cst_7 : f32 to vector<1x1x1x128xf32>
    %18 = arith.mulf %17, %16 : vector<1x1x1x128xf32>
    %19 = vector.broadcast %18 : vector<1x1x1x128xf32> to vector<1x2x2x128xf32>
    %20 = arith.divf %10, %19 : vector<1x2x2x128xf32>
    %cst_8 = arith.constant 5.000000e-01 : f32
    %21 = vector.broadcast %cst_8 : f32 to vector<1x2x2x128xf32>
    %22 = arith.addf %20, %21 : vector<1x2x2x128xf32>
    %23 = arith.negf %22 : vector<1x2x2x128xf32>
    %24 = math.exp %23 : vector<1x2x2x128xf32>
    %cst_9 = arith.constant 1.000000e+00 : f32
    %25 = vector.broadcast %cst_9 : f32 to vector<1x2x2x128xf32>
    %26 = arith.addf %25, %24 : vector<1x2x2x128xf32>
    %27 = arith.divf %25, %26 : vector<1x2x2x128xf32>
    %28 = arith.mulf %1, %27 : vector<1x2x2x128xf32>
    %29 = arith.truncf %28 : vector<1x2x2x128xf32> to vector<1x2x2x128xbf16>
    %c0_10 = arith.constant 0 : index
    %c0_11 = arith.constant 0 : index
    %c0_12 = arith.constant 0 : index
    %c0_13 = arith.constant 0 : index
    %30 = vector.load %arg3[%c0_10, %c0_11, %c0_12, %c0_13] : memref<1x2x2x128xbf16, #tpu.memory_space<vmem>>, vector<1x2x2x128xbf16>
    tpu.vector_store %arg3[%c0_10, %c0_11, %c0_12, %c0_13], %29 {strides = array<i32>} : memref<1x2x2x128xbf16, #tpu.memory_space<vmem>>, vector<1x2x2x128xbf16>,
    return
  }
  func.func @transform_0(%arg0: i32, %arg1: i32) -> (i32, i32, i32, i32) {
    %c0_i32 = arith.constant 0 : i32
    %c0_i32_0 = arith.constant 0 : i32
    %c0_i32_1 = arith.constant 0 : i32
    return %arg0, %c0_i32, %c0_i32_0, %arg1 : i32, i32, i32, i32
  }
  func.func @transform_1(%arg0: i32, %arg1: i32) -> (i32, i32, i32, i32) {
    %c0_i32 = arith.constant 0 : i32
    %c0_i32_0 = arith.constant 0 : i32
    %c0_i32_1 = arith.constant 0 : i32
    return %arg0, %c0_i32, %c0_i32_0, %arg1 : i32, i32, i32, i32
  }
}

module attributes {stable_mosaic.version = 11 : i64} {
  func.func @_resize_kernel(%arg0: i32, %arg1: i32, %arg2: memref<1x2x2x128xbf16, #tpu.memory_space<vmem>>, %arg3: memref<1x8x8x128xbf16, #tpu.memory_space<vmem>>) attributes {dimension_semantics = [#tpu.dimension_semantics<parallel>, #tpu.dimension_semantics<parallel>], iteration_bounds = array<i64: 2, 2>, scalar_prefetch = 0 : i64, scratch_operands = 0 : i64, tpu.core_type = #tpu.core_type<tc>, window_params = [{transform_indices = @transform_0, window_bounds = array<i64: 1, 2, 2, 128>}, {transform_indices = @transform_1, window_bounds = array<i64: 1, 8, 8, 128>}]} {
    %c0 = arith.constant 0 : index
    %c0_0 = arith.constant 0 : index
    %c0_1 = arith.constant 0 : index
    %c0_2 = arith.constant 0 : index
    %0 = vector.load %arg2[%c0, %c0_0, %c0_1, %c0_2] : memref<1x2x2x128xbf16, #tpu.memory_space<vmem>>, vector<1x2x2x128xbf16>
    %1 = arith.extf %0 : vector<1x2x2x128xbf16> to vector<1x2x2x128xf32>
    %2 = vector.extract_strided_slice %1 {offsets = [0, 0, 0, 0], sizes = [1, 2, 1, 128], strides = [1, 1, 1, 1]} : vector<1x2x2x128xf32> to vector<1x2x1x128xf32>
    %3 = vector.shape_cast %2 : vector<1x2x1x128xf32> to vector<1x2x128xf32>
    %4 = vector.extract_strided_slice %1 {offsets = [0, 0, 0, 0], sizes = [1, 2, 1, 128], strides = [1, 1, 1, 1]} : vector<1x2x2x128xf32> to vector<1x2x1x128xf32>
    %5 = vector.shape_cast %4 : vector<1x2x1x128xf32> to vector<1x2x128xf32>
    %6 = vector.extract_strided_slice %1 {offsets = [0, 0, 1, 0], sizes = [1, 2, 1, 128], strides = [1, 1, 1, 1]} : vector<1x2x2x128xf32> to vector<1x2x1x128xf32>
    %7 = vector.shape_cast %6 : vector<1x2x1x128xf32> to vector<1x2x128xf32>
    %cst = arith.constant 0.857142865 : f32
    %8 = vector.broadcast %cst : f32 to vector<1x2x128xf32>
    %9 = arith.mulf %8, %5 : vector<1x2x128xf32>
    %cst_3 = arith.constant 0.142857149 : f32
    %10 = vector.broadcast %cst_3 : f32 to vector<1x2x128xf32>
    %11 = arith.mulf %10, %7 : vector<1x2x128xf32>
    %12 = arith.addf %9, %11 : vector<1x2x128xf32>
    %13 = vector.extract_strided_slice %1 {offsets = [0, 0, 0, 0], sizes = [1, 2, 1, 128], strides = [1, 1, 1, 1]} : vector<1x2x2x128xf32> to vector<1x2x1x128xf32>
    %14 = vector.shape_cast %13 : vector<1x2x1x128xf32> to vector<1x2x128xf32>
    %15 = vector.extract_strided_slice %1 {offsets = [0, 0, 1, 0], sizes = [1, 2, 1, 128], strides = [1, 1, 1, 1]} : vector<1x2x2x128xf32> to vector<1x2x1x128xf32>
    %16 = vector.shape_cast %15 : vector<1x2x1x128xf32> to vector<1x2x128xf32>
    %cst_4 = arith.constant 0.714285731 : f32
    %17 = vector.broadcast %cst_4 : f32 to vector<1x2x128xf32>
    %18 = arith.mulf %17, %14 : vector<1x2x128xf32>
    %cst_5 = arith.constant 0.285714298 : f32
    %19 = vector.broadcast %cst_5 : f32 to vector<1x2x128xf32>
    %20 = arith.mulf %19, %16 : vector<1x2x128xf32>
    %21 = arith.addf %18, %20 : vector<1x2x128xf32>
    %22 = vector.extract_strided_slice %1 {offsets = [0, 0, 0, 0], sizes = [1, 2, 1, 128], strides = [1, 1, 1, 1]} : vector<1x2x2x128xf32> to vector<1x2x1x128xf32>
    %23 = vector.shape_cast %22 : vector<1x2x1x128xf32> to vector<1x2x128xf32>
    %24 = vector.extract_strided_slice %1 {offsets = [0, 0, 1, 0], sizes = [1, 2, 1, 128], strides = [1, 1, 1, 1]} : vector<1x2x2x128xf32> to vector<1x2x1x128xf32>
    %25 = vector.shape_cast %24 : vector<1x2x1x128xf32> to vector<1x2x128xf32>
    %cst_6 = arith.constant 0.571428597 : f32
    %26 = vector.broadcast %cst_6 : f32 to vector<1x2x128xf32>
    %27 = arith.mulf %26, %23 : vector<1x2x128xf32>
    %cst_7 = arith.constant 0.428571433 : f32
    %28 = vector.broadcast %cst_7 : f32 to vector<1x2x128xf32>
    %29 = arith.mulf %28, %25 : vector<1x2x128xf32>
    %30 = arith.addf %27, %29 : vector<1x2x128xf32>
    %31 = vector.extract_strided_slice %1 {offsets = [0, 0, 0, 0], sizes = [1, 2, 1, 128], strides = [1, 1, 1, 1]} : vector<1x2x2x128xf32> to vector<1x2x1x128xf32>
    %32 = vector.shape_cast %31 : vector<1x2x1x128xf32> to vector<1x2x128xf32>
    %33 = vector.extract_strided_slice %1 {offsets = [0, 0, 1, 0], sizes = [1, 2, 1, 128], strides = [1, 1, 1, 1]} : vector<1x2x2x128xf32> to vector<1x2x1x128xf32>
    %34 = vector.shape_cast %33 : vector<1x2x1x128xf32> to vector<1x2x128xf32>
    %cst_8 = arith.constant 0.428571433 : f32
    %35 = vector.broadcast %cst_8 : f32 to vector<1x2x128xf32>
    %36 = arith.mulf %35, %32 : vector<1x2x128xf32>
    %cst_9 = arith.constant 0.571428597 : f32
    %37 = vector.broadcast %cst_9 : f32 to vector<1x2x128xf32>
    %38 = arith.mulf %37, %34 : vector<1x2x128xf32>
    %39 = arith.addf %36, %38 : vector<1x2x128xf32>
    %40 = vector.extract_strided_slice %1 {offsets = [0, 0, 0, 0], sizes = [1, 2, 1, 128], strides = [1, 1, 1, 1]} : vector<1x2x2x128xf32> to vector<1x2x1x128xf32>
    %41 = vector.shape_cast %40 : vector<1x2x1x128xf32> to vector<1x2x128xf32>
    %42 = vector.extract_strided_slice %1 {offsets = [0, 0, 1, 0], sizes = [1, 2, 1, 128], strides = [1, 1, 1, 1]} : vector<1x2x2x128xf32> to vector<1x2x1x128xf32>
    %43 = vector.shape_cast %42 : vector<1x2x1x128xf32> to vector<1x2x128xf32>
    %cst_10 = arith.constant 0.285714298 : f32
    %44 = vector.broadcast %cst_10 : f32 to vector<1x2x128xf32>
    %45 = arith.mulf %44, %41 : vector<1x2x128xf32>
    %cst_11 = arith.constant 0.714285731 : f32
    %46 = vector.broadcast %cst_11 : f32 to vector<1x2x128xf32>
    %47 = arith.mulf %46, %43 : vector<1x2x128xf32>
    %48 = arith.addf %45, %47 : vector<1x2x128xf32>
    %49 = vector.extract_strided_slice %1 {offsets = [0, 0, 0, 0], sizes = [1, 2, 1, 128], strides = [1, 1, 1, 1]} : vector<1x2x2x128xf32> to vector<1x2x1x128xf32>
    %50 = vector.shape_cast %49 : vector<1x2x1x128xf32> to vector<1x2x128xf32>
    %51 = vector.extract_strided_slice %1 {offsets = [0, 0, 1, 0], sizes = [1, 2, 1, 128], strides = [1, 1, 1, 1]} : vector<1x2x2x128xf32> to vector<1x2x1x128xf32>
    %52 = vector.shape_cast %51 : vector<1x2x1x128xf32> to vector<1x2x128xf32>
    %cst_12 = arith.constant 0.142857149 : f32
    %53 = vector.broadcast %cst_12 : f32 to vector<1x2x128xf32>
    %54 = arith.mulf %53, %50 : vector<1x2x128xf32>
    %cst_13 = arith.constant 0.857142865 : f32
    %55 = vector.broadcast %cst_13 : f32 to vector<1x2x128xf32>
    %56 = arith.mulf %55, %52 : vector<1x2x128xf32>
    %57 = arith.addf %54, %56 : vector<1x2x128xf32>
    %58 = vector.extract_strided_slice %1 {offsets = [0, 0, 1, 0], sizes = [1, 2, 1, 128], strides = [1, 1, 1, 1]} : vector<1x2x2x128xf32> to vector<1x2x1x128xf32>
    %59 = vector.shape_cast %58 : vector<1x2x1x128xf32> to vector<1x2x128xf32>
    %60 = vector.shape_cast %3 : vector<1x2x128xf32> to vector<1x2x1x128xf32>
    %61 = vector.shape_cast %12 : vector<1x2x128xf32> to vector<1x2x1x128xf32>
    %62 = vector.shape_cast %21 : vector<1x2x128xf32> to vector<1x2x1x128xf32>
    %63 = vector.shape_cast %30 : vector<1x2x128xf32> to vector<1x2x1x128xf32>
    %64 = vector.shape_cast %39 : vector<1x2x128xf32> to vector<1x2x1x128xf32>
    %65 = vector.shape_cast %48 : vector<1x2x128xf32> to vector<1x2x1x128xf32>
    %66 = vector.shape_cast %57 : vector<1x2x128xf32> to vector<1x2x1x128xf32>
    %67 = vector.shape_cast %59 : vector<1x2x128xf32> to vector<1x2x1x128xf32>
    %68 = tpu.concatenate %60, %61, %62, %63, %64, %65, %66, %67 in 2 : vector<1x2x1x128xf32>, vector<1x2x1x128xf32>, vector<1x2x1x128xf32>, vector<1x2x1x128xf32>, vector<1x2x1x128xf32>, vector<1x2x1x128xf32>, vector<1x2x1x128xf32>, vector<1x2x1x128xf32> -> vector<1x2x8x128xf32>
    %69 = vector.extract_strided_slice %68 {offsets = [0, 0, 0, 0], sizes = [1, 1, 8, 128], strides = [1, 1, 1, 1]} : vector<1x2x8x128xf32> to vector<1x1x8x128xf32>
    %70 = vector.shape_cast %69 : vector<1x1x8x128xf32> to vector<1x8x128xf32>
    %71 = vector.extract_strided_slice %68 {offsets = [0, 0, 0, 0], sizes = [1, 1, 8, 128], strides = [1, 1, 1, 1]} : vector<1x2x8x128xf32> to vector<1x1x8x128xf32>
    %72 = vector.shape_cast %71 : vector<1x1x8x128xf32> to vector<1x8x128xf32>
    %73 = vector.extract_strided_slice %68 {offsets = [0, 1, 0, 0], sizes = [1, 1, 8, 128], strides = [1, 1, 1, 1]} : vector<1x2x8x128xf32> to vector<1x1x8x128xf32>
    %74 = vector.shape_cast %73 : vector<1x1x8x128xf32> to vector<1x8x128xf32>
    %cst_14 = arith.constant 0.857142865 : f32
    %75 = vector.broadcast %cst_14 : f32 to vector<1x8x128xf32>
    %76 = arith.mulf %75, %72 : vector<1x8x128xf32>
    %cst_15 = arith.constant 0.142857149 : f32
    %77 = vector.broadcast %cst_15 : f32 to vector<1x8x128xf32>
    %78 = arith.mulf %77, %74 : vector<1x8x128xf32>
    %79 = arith.addf %76, %78 : vector<1x8x128xf32>
    %80 = vector.extract_strided_slice %68 {offsets = [0, 0, 0, 0], sizes = [1, 1, 8, 128], strides = [1, 1, 1, 1]} : vector<1x2x8x128xf32> to vector<1x1x8x128xf32>
    %81 = vector.shape_cast %80 : vector<1x1x8x128xf32> to vector<1x8x128xf32>
    %82 = vector.extract_strided_slice %68 {offsets = [0, 1, 0, 0], sizes = [1, 1, 8, 128], strides = [1, 1, 1, 1]} : vector<1x2x8x128xf32> to vector<1x1x8x128xf32>
    %83 = vector.shape_cast %82 : vector<1x1x8x128xf32> to vector<1x8x128xf32>
    %cst_16 = arith.constant 0.714285731 : f32
    %84 = vector.broadcast %cst_16 : f32 to vector<1x8x128xf32>
    %85 = arith.mulf %84, %81 : vector<1x8x128xf32>
    %cst_17 = arith.constant 0.285714298 : f32
    %86 = vector.broadcast %cst_17 : f32 to vector<1x8x128xf32>
    %87 = arith.mulf %86, %83 : vector<1x8x128xf32>
    %88 = arith.addf %85, %87 : vector<1x8x128xf32>
    %89 = vector.extract_strided_slice %68 {offsets = [0, 0, 0, 0], sizes = [1, 1, 8, 128], strides = [1, 1, 1, 1]} : vector<1x2x8x128xf32> to vector<1x1x8x128xf32>
    %90 = vector.shape_cast %89 : vector<1x1x8x128xf32> to vector<1x8x128xf32>
    %91 = vector.extract_strided_slice %68 {offsets = [0, 1, 0, 0], sizes = [1, 1, 8, 128], strides = [1, 1, 1, 1]} : vector<1x2x8x128xf32> to vector<1x1x8x128xf32>
    %92 = vector.shape_cast %91 : vector<1x1x8x128xf32> to vector<1x8x128xf32>
    %cst_18 = arith.constant 0.571428597 : f32
    %93 = vector.broadcast %cst_18 : f32 to vector<1x8x128xf32>
    %94 = arith.mulf %93, %90 : vector<1x8x128xf32>
    %cst_19 = arith.constant 0.428571433 : f32
    %95 = vector.broadcast %cst_19 : f32 to vector<1x8x128xf32>
    %96 = arith.mulf %95, %92 : vector<1x8x128xf32>
    %97 = arith.addf %94, %96 : vector<1x8x128xf32>
    %98 = vector.extract_strided_slice %68 {offsets = [0, 0, 0, 0], sizes = [1, 1, 8, 128], strides = [1, 1, 1, 1]} : vector<1x2x8x128xf32> to vector<1x1x8x128xf32>
    %99 = vector.shape_cast %98 : vector<1x1x8x128xf32> to vector<1x8x128xf32>
    %100 = vector.extract_strided_slice %68 {offsets = [0, 1, 0, 0], sizes = [1, 1, 8, 128], strides = [1, 1, 1, 1]} : vector<1x2x8x128xf32> to vector<1x1x8x128xf32>
    %101 = vector.shape_cast %100 : vector<1x1x8x128xf32> to vector<1x8x128xf32>
    %cst_20 = arith.constant 0.428571433 : f32
    %102 = vector.broadcast %cst_20 : f32 to vector<1x8x128xf32>
    %103 = arith.mulf %102, %99 : vector<1x8x128xf32>
    %cst_21 = arith.constant 0.571428597 : f32
    %104 = vector.broadcast %cst_21 : f32 to vector<1x8x128xf32>
    %105 = arith.mulf %104, %101 : vector<1x8x128xf32>
    %106 = arith.addf %103, %105 : vector<1x8x128xf32>
    %107 = vector.extract_strided_slice %68 {offsets = [0, 0, 0, 0], sizes = [1, 1, 8, 128], strides = [1, 1, 1, 1]} : vector<1x2x8x128xf32> to vector<1x1x8x128xf32>
    %108 = vector.shape_cast %107 : vector<1x1x8x128xf32> to vector<1x8x128xf32>
    %109 = vector.extract_strided_slice %68 {offsets = [0, 1, 0, 0], sizes = [1, 1, 8, 128], strides = [1, 1, 1, 1]} : vector<1x2x8x128xf32> to vector<1x1x8x128xf32>
    %110 = vector.shape_cast %109 : vector<1x1x8x128xf32> to vector<1x8x128xf32>
    %cst_22 = arith.constant 0.285714298 : f32
    %111 = vector.broadcast %cst_22 : f32 to vector<1x8x128xf32>
    %112 = arith.mulf %111, %108 : vector<1x8x128xf32>
    %cst_23 = arith.constant 0.714285731 : f32
    %113 = vector.broadcast %cst_23 : f32 to vector<1x8x128xf32>
    %114 = arith.mulf %113, %110 : vector<1x8x128xf32>
    %115 = arith.addf %112, %114 : vector<1x8x128xf32>
    %116 = vector.extract_strided_slice %68 {offsets = [0, 0, 0, 0], sizes = [1, 1, 8, 128], strides = [1, 1, 1, 1]} : vector<1x2x8x128xf32> to vector<1x1x8x128xf32>
    %117 = vector.shape_cast %116 : vector<1x1x8x128xf32> to vector<1x8x128xf32>
    %118 = vector.extract_strided_slice %68 {offsets = [0, 1, 0, 0], sizes = [1, 1, 8, 128], strides = [1, 1, 1, 1]} : vector<1x2x8x128xf32> to vector<1x1x8x128xf32>
    %119 = vector.shape_cast %118 : vector<1x1x8x128xf32> to vector<1x8x128xf32>
    %cst_24 = arith.constant 0.142857149 : f32
    %120 = vector.broadcast %cst_24 : f32 to vector<1x8x128xf32>
    %121 = arith.mulf %120, %117 : vector<1x8x128xf32>
    %cst_25 = arith.constant 0.857142865 : f32
    %122 = vector.broadcast %cst_25 : f32 to vector<1x8x128xf32>
    %123 = arith.mulf %122, %119 : vector<1x8x128xf32>
    %124 = arith.addf %121, %123 : vector<1x8x128xf32>
    %125 = vector.extract_strided_slice %68 {offsets = [0, 1, 0, 0], sizes = [1, 1, 8, 128], strides = [1, 1, 1, 1]} : vector<1x2x8x128xf32> to vector<1x1x8x128xf32>
    %126 = vector.shape_cast %125 : vector<1x1x8x128xf32> to vector<1x8x128xf32>
    %127 = vector.shape_cast %70 : vector<1x8x128xf32> to vector<1x1x8x128xf32>
    %128 = vector.shape_cast %79 : vector<1x8x128xf32> to vector<1x1x8x128xf32>
    %129 = vector.shape_cast %88 : vector<1x8x128xf32> to vector<1x1x8x128xf32>
    %130 = vector.shape_cast %97 : vector<1x8x128xf32> to vector<1x1x8x128xf32>
    %131 = vector.shape_cast %106 : vector<1x8x128xf32> to vector<1x1x8x128xf32>
    %132 = vector.shape_cast %115 : vector<1x8x128xf32> to vector<1x1x8x128xf32>
    %133 = vector.shape_cast %124 : vector<1x8x128xf32> to vector<1x1x8x128xf32>
    %134 = vector.shape_cast %126 : vector<1x8x128xf32> to vector<1x1x8x128xf32>
    %135 = tpu.concatenate %127, %128, %129, %130, %131, %132, %133, %134 in 1 : vector<1x1x8x128xf32>, vector<1x1x8x128xf32>, vector<1x1x8x128xf32>, vector<1x1x8x128xf32>, vector<1x1x8x128xf32>, vector<1x1x8x128xf32>, vector<1x1x8x128xf32>, vector<1x1x8x128xf32> -> vector<1x8x8x128xf32>
    %136 = arith.truncf %135 : vector<1x8x8x128xf32> to vector<1x8x8x128xbf16>
    %c0_26 = arith.constant 0 : index
    %c0_27 = arith.constant 0 : index
    %c0_28 = arith.constant 0 : index
    %c0_29 = arith.constant 0 : index
    %137 = vector.load %arg3[%c0_26, %c0_27, %c0_28, %c0_29] : memref<1x8x8x128xbf16, #tpu.memory_space<vmem>>, vector<1x8x8x128xbf16>
    tpu.vector_store %arg3[%c0_26, %c0_27, %c0_28, %c0_29], %136 {strides = array<i32>} : memref<1x8x8x128xbf16, #tpu.memory_space<vmem>>, vector<1x8x8x128xbf16>,
    return
  }
  func.func @transform_0(%arg0: i32, %arg1: i32) -> (i32, i32, i32, i32) {
    %c0_i32 = arith.constant 0 : i32
    %c0_i32_0 = arith.constant 0 : i32
    %c0_i32_1 = arith.constant 0 : i32
    return %arg0, %c0_i32, %c0_i32_0, %arg1 : i32, i32, i32, i32
  }
  func.func @transform_1(%arg0: i32, %arg1: i32) -> (i32, i32, i32, i32) {
    %c0_i32 = arith.constant 0 : i32
    %c0_i32_0 = arith.constant 0 : i32
    %c0_i32_1 = arith.constant 0 : i32
    return %arg0, %c0_i32, %c0_i32_0, %arg1 : i32, i32, i32, i32
  }
}

module attributes {stable_mosaic.version = 11 : i64} {
  func.func @_mm_kernel(%arg0: i32, %arg1: i32, %arg2: i32, %arg3: memref<128x128xbf16, #tpu.memory_space<vmem>>, %arg4: memref<128x128xbf16, #tpu.memory_space<vmem>>, %arg5: memref<1x128xf32, #tpu.memory_space<vmem>>, %arg6: memref<128x128xbf16, #tpu.memory_space<vmem>>, %arg7: memref<128x128xf32, #tpu.memory_space<vmem>>) attributes {dimension_semantics = [#tpu.dimension_semantics<parallel>, #tpu.dimension_semantics<parallel>, #tpu.dimension_semantics<arbitrary>], iteration_bounds = array<i64: 1, 1, 5>, scalar_prefetch = 0 : i64, scratch_operands = 1 : i64, tpu.core_type = #tpu.core_type<tc>, window_params = [{transform_indices = @transform_0, window_bounds = array<i64: 128, 128>}, {transform_indices = @transform_1, window_bounds = array<i64: 128, 128>}, {transform_indices = @transform_2, window_bounds = array<i64: 1, 128>}, {transform_indices = @transform_3, window_bounds = array<i64: 128, 128>}]} {
    %c0_i32 = arith.constant 0 : i32
    %0 = arith.cmpi eq, %arg2, %c0_i32 : i32
    %1 = arith.extui %0 : i1 to i32
    %c0_i32_0 = arith.constant 0 : i32
    %2 = arith.cmpi ne, %1, %c0_i32_0 : i32
    scf.if %2 {
      %cst_9 = arith.constant 0.000000e+00 : f32
      %12 = vector.broadcast %cst_9 : f32 to vector<128x128xf32>
      %c0_10 = arith.constant 0 : index
      %c0_11 = arith.constant 0 : index
      %13 = vector.load %arg7[%c0_10, %c0_11] : memref<128x128xf32, #tpu.memory_space<vmem>>, vector<128x128xf32>
      tpu.vector_store %arg7[%c0_10, %c0_11], %12 {strides = array<i32>} : memref<128x128xf32, #tpu.memory_space<vmem>>, vector<128x128xf32>,
    } else {
    }
    %c0 = arith.constant 0 : index
    %c0_1 = arith.constant 0 : index
    %3 = vector.load %arg7[%c0, %c0_1] : memref<128x128xf32, #tpu.memory_space<vmem>>, vector<128x128xf32>
    %c0_2 = arith.constant 0 : index
    %c0_3 = arith.constant 0 : index
    %4 = vector.load %arg3[%c0_2, %c0_3] : memref<128x128xbf16, #tpu.memory_space<vmem>>, vector<128x128xbf16>
    %c0_4 = arith.constant 0 : index
    %c0_5 = arith.constant 0 : index
    %5 = vector.load %arg4[%c0_4, %c0_5] : memref<128x128xbf16, #tpu.memory_space<vmem>>, vector<128x128xbf16>
    %cst = arith.constant dense<0.000000e+00> : vector<128x128xf32>
    %6 = tpu.matmul %4, %5, %cst {dimension_numbers = #tpu.dot_dimension_numbers<[1], [0], [0], [1], [0, 0, 1, 1], [], []>} : vector<128x128xbf16>, vector<128x128xbf16>, vector<128x128xf32> -> vector<128x128xf32>
    %7 = arith.addf %3, %6 : vector<128x128xf32>
    %c0_6 = arith.constant 0 : index
    %c0_7 = arith.constant 0 : index
    %8 = vector.load %arg7[%c0_6, %c0_7] : memref<128x128xf32, #tpu.memory_space<vmem>>, vector<128x128xf32>
    tpu.vector_store %arg7[%c0_6, %c0_7], %7 {strides = array<i32>} : memref<128x128xf32, #tpu.memory_space<vmem>>, vector<128x128xf32>,
    %c4_i32 = arith.constant 4 : i32
    %9 = arith.cmpi eq, %arg2, %c4_i32 : i32
    %10 = arith.extui %9 : i1 to i32
    %c0_i32_8 = arith.constant 0 : i32
    %11 = arith.cmpi ne, %10, %c0_i32_8 : i32
    scf.if %11 {
      %c0_9 = arith.constant 0 : index
      %c0_10 = arith.constant 0 : index
      %12 = vector.load %arg7[%c0_9, %c0_10] : memref<128x128xf32, #tpu.memory_space<vmem>>, vector<128x128xf32>
      %c0_11 = arith.constant 0 : index
      %c0_12 = arith.constant 0 : index
      %13 = vector.load %arg5[%c0_11, %c0_12] : memref<1x128xf32, #tpu.memory_space<vmem>>, vector<1x128xf32>
      %14 = vector.broadcast %13 : vector<1x128xf32> to vector<128x128xf32>
      %15 = arith.addf %12, %14 : vector<128x128xf32>
      %cst_13 = arith.constant 0.000000e+00 : f32
      %16 = vector.broadcast %cst_13 : f32 to vector<128x128xf32>
      %17 = arith.maximumf %15, %16 : vector<128x128xf32>
      %18 = arith.truncf %17 : vector<128x128xf32> to vector<128x128xbf16>
      %c0_14 = arith.constant 0 : index
      %c0_15 = arith.constant 0 : index
      %19 = vector.load %arg6[%c0_14, %c0_15] : memref<128x128xbf16, #tpu.memory_space<vmem>>, vector<128x128xbf16>
      tpu.vector_store %arg6[%c0_14, %c0_15], %18 {strides = array<i32>} : memref<128x128xbf16, #tpu.memory_space<vmem>>, vector<128x128xbf16>,
    } else {
    }
    return
  }
  func.func @transform_0(%arg0: i32, %arg1: i32, %arg2: i32) -> (i32, i32) {
    %c0_i32 = arith.constant 0 : i32
    return %arg0, %arg2 : i32, i32
  }
  func.func @transform_1(%arg0: i32, %arg1: i32, %arg2: i32) -> (i32, i32) {
    %c0_i32 = arith.constant 0 : i32
    return %arg2, %arg1 : i32, i32
  }
  func.func @transform_2(%arg0: i32, %arg1: i32, %arg2: i32) -> (i32, i32) {
    %c0_i32 = arith.constant 0 : i32
    %c0_i32_0 = arith.constant 0 : i32
    return %c0_i32, %arg1 : i32, i32
  }
  func.func @transform_3(%arg0: i32, %arg1: i32, %arg2: i32) -> (i32, i32) {
    %c0_i32 = arith.constant 0 : i32
    return %arg0, %arg1 : i32, i32
  }
}

module attributes {stable_mosaic.version = 11 : i64} {
  func.func @_simam_kernel(%arg0: i32, %arg1: i32, %arg2: memref<1x8x8x64xbf16, #tpu.memory_space<vmem>>, %arg3: memref<1x8x8x64xbf16, #tpu.memory_space<vmem>>) attributes {dimension_semantics = [#tpu.dimension_semantics<parallel>, #tpu.dimension_semantics<parallel>], iteration_bounds = array<i64: 2, 1>, scalar_prefetch = 0 : i64, scratch_operands = 0 : i64, tpu.core_type = #tpu.core_type<tc>, window_params = [{transform_indices = @transform_0, window_bounds = array<i64: 1, 8, 8, 64>}, {transform_indices = @transform_1, window_bounds = array<i64: 1, 8, 8, 64>}]} {
    %c0 = arith.constant 0 : index
    %c0_0 = arith.constant 0 : index
    %c0_1 = arith.constant 0 : index
    %c0_2 = arith.constant 0 : index
    %0 = vector.load %arg2[%c0, %c0_0, %c0_1, %c0_2] : memref<1x8x8x64xbf16, #tpu.memory_space<vmem>>, vector<1x8x8x64xbf16>
    %1 = arith.extf %0 : vector<1x8x8x64xbf16> to vector<1x8x8x64xf32>
    %cst = arith.constant dense<0.000000e+00> : vector<1x64xf32>
    %2 = vector.multi_reduction <add>, %1, %cst [1, 2] : vector<1x8x8x64xf32> to vector<1x64xf32>
    %3 = vector.shape_cast %2 : vector<1x64xf32> to vector<1x1x1x64xf32>
    %cst_3 = arith.constant 6.400000e+01 : f32
    %4 = vector.broadcast %cst_3 : f32 to vector<1x1x1x64xf32>
    %5 = arith.divf %3, %4 : vector<1x1x1x64xf32>
    %6 = vector.broadcast %5 : vector<1x1x1x64xf32> to vector<1x8x8x64xf32>
    %7 = arith.subf %1, %6 : vector<1x8x8x64xf32>
    %8 = vector.broadcast %5 : vector<1x1x1x64xf32> to vector<1x8x8x64xf32>
    %9 = arith.subf %1, %8 : vector<1x8x8x64xf32>
    %10 = arith.mulf %7, %9 : vector<1x8x8x64xf32>
    %cst_4 = arith.constant dense<0.000000e+00> : vector<1x64xf32>
    %11 = vector.multi_reduction <add>, %10, %cst_4 [1, 2] : vector<1x8x8x64xf32> to vector<1x64xf32>
    %12 = vector.shape_cast %11 : vector<1x64xf32> to vector<1x1x1x64xf32>
    %cst_5 = arith.constant 6.300000e+01 : f32
    %13 = vector.broadcast %cst_5 : f32 to vector<1x1x1x64xf32>
    %14 = arith.divf %12, %13 : vector<1x1x1x64xf32>
    %cst_6 = arith.constant 9.99999974E-5 : f32
    %15 = vector.broadcast %cst_6 : f32 to vector<1x1x1x64xf32>
    %16 = arith.addf %14, %15 : vector<1x1x1x64xf32>
    %cst_7 = arith.constant 4.000000e+00 : f32
    %17 = vector.broadcast %cst_7 : f32 to vector<1x1x1x64xf32>
    %18 = arith.mulf %17, %16 : vector<1x1x1x64xf32>
    %19 = vector.broadcast %18 : vector<1x1x1x64xf32> to vector<1x8x8x64xf32>
    %20 = arith.divf %10, %19 : vector<1x8x8x64xf32>
    %cst_8 = arith.constant 5.000000e-01 : f32
    %21 = vector.broadcast %cst_8 : f32 to vector<1x8x8x64xf32>
    %22 = arith.addf %20, %21 : vector<1x8x8x64xf32>
    %23 = arith.negf %22 : vector<1x8x8x64xf32>
    %24 = math.exp %23 : vector<1x8x8x64xf32>
    %cst_9 = arith.constant 1.000000e+00 : f32
    %25 = vector.broadcast %cst_9 : f32 to vector<1x8x8x64xf32>
    %26 = arith.addf %25, %24 : vector<1x8x8x64xf32>
    %27 = arith.divf %25, %26 : vector<1x8x8x64xf32>
    %28 = arith.mulf %1, %27 : vector<1x8x8x64xf32>
    %29 = arith.truncf %28 : vector<1x8x8x64xf32> to vector<1x8x8x64xbf16>
    %c0_10 = arith.constant 0 : index
    %c0_11 = arith.constant 0 : index
    %c0_12 = arith.constant 0 : index
    %c0_13 = arith.constant 0 : index
    %30 = vector.load %arg3[%c0_10, %c0_11, %c0_12, %c0_13] : memref<1x8x8x64xbf16, #tpu.memory_space<vmem>>, vector<1x8x8x64xbf16>
    tpu.vector_store %arg3[%c0_10, %c0_11, %c0_12, %c0_13], %29 {strides = array<i32>} : memref<1x8x8x64xbf16, #tpu.memory_space<vmem>>, vector<1x8x8x64xbf16>,
    return
  }
  func.func @transform_0(%arg0: i32, %arg1: i32) -> (i32, i32, i32, i32) {
    %c0_i32 = arith.constant 0 : i32
    %c0_i32_0 = arith.constant 0 : i32
    %c0_i32_1 = arith.constant 0 : i32
    return %arg0, %c0_i32, %c0_i32_0, %arg1 : i32, i32, i32, i32
  }
  func.func @transform_1(%arg0: i32, %arg1: i32) -> (i32, i32, i32, i32) {
    %c0_i32 = arith.constant 0 : i32
    %c0_i32_0 = arith.constant 0 : i32
    %c0_i32_1 = arith.constant 0 : i32
    return %arg0, %c0_i32, %c0_i32_0, %arg1 : i32, i32, i32, i32
  }
}

module attributes {stable_mosaic.version = 11 : i64} {
  func.func @_mm2_kernel(%arg0: i32, %arg1: i32, %arg2: memref<128x64xbf16, #tpu.memory_space<vmem>>, %arg3: memref<64x256xbf16, #tpu.memory_space<vmem>>, %arg4: memref<128x256xbf16, #tpu.memory_space<vmem>>, %arg5: memref<256x256xbf16, #tpu.memory_space<vmem>>, %arg6: memref<1x256xf32, #tpu.memory_space<vmem>>, %arg7: memref<128x256xbf16, #tpu.memory_space<vmem>>) attributes {dimension_semantics = [#tpu.dimension_semantics<parallel>, #tpu.dimension_semantics<parallel>], iteration_bounds = array<i64: 1, 1>, scalar_prefetch = 0 : i64, scratch_operands = 0 : i64, tpu.core_type = #tpu.core_type<tc>, window_params = [{transform_indices = @transform_0, window_bounds = array<i64: 128, 64>}, {transform_indices = @transform_1, window_bounds = array<i64: 64, 256>}, {transform_indices = @transform_2, window_bounds = array<i64: 128, 256>}, {transform_indices = @transform_3, window_bounds = array<i64: 256, 256>}, {transform_indices = @transform_4, window_bounds = array<i64: 1, 256>}, {transform_indices = @transform_5, window_bounds = array<i64: 128, 256>}]} {
    %c0 = arith.constant 0 : index
    %c0_0 = arith.constant 0 : index
    %0 = vector.load %arg2[%c0, %c0_0] : memref<128x64xbf16, #tpu.memory_space<vmem>>, vector<128x64xbf16>
    %c0_1 = arith.constant 0 : index
    %c0_2 = arith.constant 0 : index
    %1 = vector.load %arg3[%c0_1, %c0_2] : memref<64x256xbf16, #tpu.memory_space<vmem>>, vector<64x256xbf16>
    %cst = arith.constant dense<0.000000e+00> : vector<128x256xf32>
    %2 = tpu.matmul %0, %1, %cst {dimension_numbers = #tpu.dot_dimension_numbers<[1], [0], [0], [1], [0, 0, 1, 1], [], []>} : vector<128x64xbf16>, vector<64x256xbf16>, vector<128x256xf32> -> vector<128x256xf32>
    %c0_3 = arith.constant 0 : index
    %c0_4 = arith.constant 0 : index
    %3 = vector.load %arg4[%c0_3, %c0_4] : memref<128x256xbf16, #tpu.memory_space<vmem>>, vector<128x256xbf16>
    %c0_5 = arith.constant 0 : index
    %c0_6 = arith.constant 0 : index
    %4 = vector.load %arg5[%c0_5, %c0_6] : memref<256x256xbf16, #tpu.memory_space<vmem>>, vector<256x256xbf16>
    %cst_7 = arith.constant dense<0.000000e+00> : vector<128x256xf32>
    %5 = tpu.matmul %3, %4, %cst_7 {dimension_numbers = #tpu.dot_dimension_numbers<[1], [0], [0], [1], [0, 0, 1, 1], [], []>} : vector<128x256xbf16>, vector<256x256xbf16>, vector<128x256xf32> -> vector<128x256xf32>
    %6 = arith.addf %2, %5 : vector<128x256xf32>
    %c0_8 = arith.constant 0 : index
    %c0_9 = arith.constant 0 : index
    %7 = vector.load %arg6[%c0_8, %c0_9] : memref<1x256xf32, #tpu.memory_space<vmem>>, vector<1x256xf32>
    %8 = vector.broadcast %7 : vector<1x256xf32> to vector<128x256xf32>
    %9 = arith.addf %6, %8 : vector<128x256xf32>
    %cst_10 = arith.constant 0.000000e+00 : f32
    %10 = vector.broadcast %cst_10 : f32 to vector<128x256xf32>
    %11 = arith.maximumf %9, %10 : vector<128x256xf32>
    %12 = arith.truncf %11 : vector<128x256xf32> to vector<128x256xbf16>
    %c0_11 = arith.constant 0 : index
    %c0_12 = arith.constant 0 : index
    %13 = vector.load %arg7[%c0_11, %c0_12] : memref<128x256xbf16, #tpu.memory_space<vmem>>, vector<128x256xbf16>
    tpu.vector_store %arg7[%c0_11, %c0_12], %12 {strides = array<i32>} : memref<128x256xbf16, #tpu.memory_space<vmem>>, vector<128x256xbf16>,
    return
  }
  func.func @transform_0(%arg0: i32, %arg1: i32) -> (i32, i32) {
    %c0_i32 = arith.constant 0 : i32
    %c0_i32_0 = arith.constant 0 : i32
    return %arg0, %c0_i32 : i32, i32
  }
  func.func @transform_1(%arg0: i32, %arg1: i32) -> (i32, i32) {
    %c0_i32 = arith.constant 0 : i32
    %c0_i32_0 = arith.constant 0 : i32
    return %c0_i32, %arg1 : i32, i32
  }
  func.func @transform_2(%arg0: i32, %arg1: i32) -> (i32, i32) {
    %c0_i32 = arith.constant 0 : i32
    %c0_i32_0 = arith.constant 0 : i32
    return %arg0, %c0_i32 : i32, i32
  }
  func.func @transform_3(%arg0: i32, %arg1: i32) -> (i32, i32) {
    %c0_i32 = arith.constant 0 : i32
    %c0_i32_0 = arith.constant 0 : i32
    return %c0_i32, %arg1 : i32, i32
  }
  func.func @transform_4(%arg0: i32, %arg1: i32) -> (i32, i32) {
    %c0_i32 = arith.constant 0 : i32
    %c0_i32_0 = arith.constant 0 : i32
    return %c0_i32, %arg1 : i32, i32
  }
  func.func @transform_5(%arg0: i32, %arg1: i32) -> (i32, i32) {
    %c0_i32 = arith.constant 0 : i32
    return %arg0, %arg1 : i32, i32
  }
}

module attributes {stable_mosaic.version = 11 : i64} {
  func.func @_mm_kernel(%arg0: i32, %arg1: i32, %arg2: i32, %arg3: memref<128x256xbf16, #tpu.memory_space<vmem>>, %arg4: memref<256x128xbf16, #tpu.memory_space<vmem>>, %arg5: memref<1x128xf32, #tpu.memory_space<vmem>>, %arg6: memref<128x128xbf16, #tpu.memory_space<vmem>>, %arg7: memref<128x128xf32, #tpu.memory_space<vmem>>) attributes {dimension_semantics = [#tpu.dimension_semantics<parallel>, #tpu.dimension_semantics<parallel>, #tpu.dimension_semantics<arbitrary>], iteration_bounds = array<i64: 1, 1, 9>, scalar_prefetch = 0 : i64, scratch_operands = 1 : i64, tpu.core_type = #tpu.core_type<tc>, window_params = [{transform_indices = @transform_0, window_bounds = array<i64: 128, 256>}, {transform_indices = @transform_1, window_bounds = array<i64: 256, 128>}, {transform_indices = @transform_2, window_bounds = array<i64: 1, 128>}, {transform_indices = @transform_3, window_bounds = array<i64: 128, 128>}]} {
    %c0_i32 = arith.constant 0 : i32
    %0 = arith.cmpi eq, %arg2, %c0_i32 : i32
    %1 = arith.extui %0 : i1 to i32
    %c0_i32_0 = arith.constant 0 : i32
    %2 = arith.cmpi ne, %1, %c0_i32_0 : i32
    scf.if %2 {
      %cst_9 = arith.constant 0.000000e+00 : f32
      %12 = vector.broadcast %cst_9 : f32 to vector<128x128xf32>
      %c0_10 = arith.constant 0 : index
      %c0_11 = arith.constant 0 : index
      %13 = vector.load %arg7[%c0_10, %c0_11] : memref<128x128xf32, #tpu.memory_space<vmem>>, vector<128x128xf32>
      tpu.vector_store %arg7[%c0_10, %c0_11], %12 {strides = array<i32>} : memref<128x128xf32, #tpu.memory_space<vmem>>, vector<128x128xf32>,
    } else {
    }
    %c0 = arith.constant 0 : index
    %c0_1 = arith.constant 0 : index
    %3 = vector.load %arg7[%c0, %c0_1] : memref<128x128xf32, #tpu.memory_space<vmem>>, vector<128x128xf32>
    %c0_2 = arith.constant 0 : index
    %c0_3 = arith.constant 0 : index
    %4 = vector.load %arg3[%c0_2, %c0_3] : memref<128x256xbf16, #tpu.memory_space<vmem>>, vector<128x256xbf16>
    %c0_4 = arith.constant 0 : index
    %c0_5 = arith.constant 0 : index
    %5 = vector.load %arg4[%c0_4, %c0_5] : memref<256x128xbf16, #tpu.memory_space<vmem>>, vector<256x128xbf16>
    %cst = arith.constant dense<0.000000e+00> : vector<128x128xf32>
    %6 = tpu.matmul %4, %5, %cst {dimension_numbers = #tpu.dot_dimension_numbers<[1], [0], [0], [1], [0, 0, 1, 1], [], []>} : vector<128x256xbf16>, vector<256x128xbf16>, vector<128x128xf32> -> vector<128x128xf32>
    %7 = arith.addf %3, %6 : vector<128x128xf32>
    %c0_6 = arith.constant 0 : index
    %c0_7 = arith.constant 0 : index
    %8 = vector.load %arg7[%c0_6, %c0_7] : memref<128x128xf32, #tpu.memory_space<vmem>>, vector<128x128xf32>
    tpu.vector_store %arg7[%c0_6, %c0_7], %7 {strides = array<i32>} : memref<128x128xf32, #tpu.memory_space<vmem>>, vector<128x128xf32>,
    %c8_i32 = arith.constant 8 : i32
    %9 = arith.cmpi eq, %arg2, %c8_i32 : i32
    %10 = arith.extui %9 : i1 to i32
    %c0_i32_8 = arith.constant 0 : i32
    %11 = arith.cmpi ne, %10, %c0_i32_8 : i32
    scf.if %11 {
      %c0_9 = arith.constant 0 : index
      %c0_10 = arith.constant 0 : index
      %12 = vector.load %arg7[%c0_9, %c0_10] : memref<128x128xf32, #tpu.memory_space<vmem>>, vector<128x128xf32>
      %c0_11 = arith.constant 0 : index
      %c0_12 = arith.constant 0 : index
      %13 = vector.load %arg5[%c0_11, %c0_12] : memref<1x128xf32, #tpu.memory_space<vmem>>, vector<1x128xf32>
      %14 = vector.broadcast %13 : vector<1x128xf32> to vector<128x128xf32>
      %15 = arith.addf %12, %14 : vector<128x128xf32>
      %cst_13 = arith.constant 0.000000e+00 : f32
      %16 = vector.broadcast %cst_13 : f32 to vector<128x128xf32>
      %17 = arith.maximumf %15, %16 : vector<128x128xf32>
      %18 = arith.truncf %17 : vector<128x128xf32> to vector<128x128xbf16>
      %c0_14 = arith.constant 0 : index
      %c0_15 = arith.constant 0 : index
      %19 = vector.load %arg6[%c0_14, %c0_15] : memref<128x128xbf16, #tpu.memory_space<vmem>>, vector<128x128xbf16>
      tpu.vector_store %arg6[%c0_14, %c0_15], %18 {strides = array<i32>} : memref<128x128xbf16, #tpu.memory_space<vmem>>, vector<128x128xbf16>,
    } else {
    }
    return
  }
  func.func @transform_0(%arg0: i32, %arg1: i32, %arg2: i32) -> (i32, i32) {
    %c0_i32 = arith.constant 0 : i32
    return %arg0, %arg2 : i32, i32
  }
  func.func @transform_1(%arg0: i32, %arg1: i32, %arg2: i32) -> (i32, i32) {
    %c0_i32 = arith.constant 0 : i32
    return %arg2, %arg1 : i32, i32
  }
  func.func @transform_2(%arg0: i32, %arg1: i32, %arg2: i32) -> (i32, i32) {
    %c0_i32 = arith.constant 0 : i32
    %c0_i32_0 = arith.constant 0 : i32
    return %c0_i32, %arg1 : i32, i32
  }
  func.func @transform_3(%arg0: i32, %arg1: i32, %arg2: i32) -> (i32, i32) {
    %c0_i32 = arith.constant 0 : i32
    return %arg0, %arg1 : i32, i32
  }
}

module attributes {stable_mosaic.version = 11 : i64} {
  func.func @_mm_kernel(%arg0: i32, %arg1: i32, %arg2: i32, %arg3: memref<128x128xbf16, #tpu.memory_space<vmem>>, %arg4: memref<128x128xbf16, #tpu.memory_space<vmem>>, %arg5: memref<1x128xf32, #tpu.memory_space<vmem>>, %arg6: memref<128x128xf32, #tpu.memory_space<vmem>>, %arg7: memref<128x128xf32, #tpu.memory_space<vmem>>) attributes {dimension_semantics = [#tpu.dimension_semantics<parallel>, #tpu.dimension_semantics<parallel>, #tpu.dimension_semantics<arbitrary>], iteration_bounds = array<i64: 1, 1, 1>, scalar_prefetch = 0 : i64, scratch_operands = 1 : i64, tpu.core_type = #tpu.core_type<tc>, window_params = [{transform_indices = @transform_0, window_bounds = array<i64: 128, 128>}, {transform_indices = @transform_1, window_bounds = array<i64: 128, 128>}, {transform_indices = @transform_2, window_bounds = array<i64: 1, 128>}, {transform_indices = @transform_3, window_bounds = array<i64: 128, 128>}]} {
    %c0_i32 = arith.constant 0 : i32
    %0 = arith.cmpi eq, %arg2, %c0_i32 : i32
    %1 = arith.extui %0 : i1 to i32
    %c0_i32_0 = arith.constant 0 : i32
    %2 = arith.cmpi ne, %1, %c0_i32_0 : i32
    scf.if %2 {
      %cst_10 = arith.constant 0.000000e+00 : f32
      %12 = vector.broadcast %cst_10 : f32 to vector<128x128xf32>
      %c0_11 = arith.constant 0 : index
      %c0_12 = arith.constant 0 : index
      %13 = vector.load %arg7[%c0_11, %c0_12] : memref<128x128xf32, #tpu.memory_space<vmem>>, vector<128x128xf32>
      tpu.vector_store %arg7[%c0_11, %c0_12], %12 {strides = array<i32>} : memref<128x128xf32, #tpu.memory_space<vmem>>, vector<128x128xf32>,
    } else {
    }
    %c0 = arith.constant 0 : index
    %c0_1 = arith.constant 0 : index
    %3 = vector.load %arg7[%c0, %c0_1] : memref<128x128xf32, #tpu.memory_space<vmem>>, vector<128x128xf32>
    %c0_2 = arith.constant 0 : index
    %c0_3 = arith.constant 0 : index
    %4 = vector.load %arg3[%c0_2, %c0_3] : memref<128x128xbf16, #tpu.memory_space<vmem>>, vector<128x128xbf16>
    %c0_4 = arith.constant 0 : index
    %c0_5 = arith.constant 0 : index
    %5 = vector.load %arg4[%c0_4, %c0_5] : memref<128x128xbf16, #tpu.memory_space<vmem>>, vector<128x128xbf16>
    %cst = arith.constant dense<0.000000e+00> : vector<128x128xf32>
    %6 = tpu.matmul %4, %5, %cst {dimension_numbers = #tpu.dot_dimension_numbers<[1], [0], [0], [1], [0, 0, 1, 1], [], []>} : vector<128x128xbf16>, vector<128x128xbf16>, vector<128x128xf32> -> vector<128x128xf32>
    %7 = arith.addf %3, %6 : vector<128x128xf32>
    %c0_6 = arith.constant 0 : index
    %c0_7 = arith.constant 0 : index
    %8 = vector.load %arg7[%c0_6, %c0_7] : memref<128x128xf32, #tpu.memory_space<vmem>>, vector<128x128xf32>
    tpu.vector_store %arg7[%c0_6, %c0_7], %7 {strides = array<i32>} : memref<128x128xf32, #tpu.memory_space<vmem>>, vector<128x128xf32>,
    %c0_i32_8 = arith.constant 0 : i32
    %9 = arith.cmpi eq, %arg2, %c0_i32_8 : i32
    %10 = arith.extui %9 : i1 to i32
    %c0_i32_9 = arith.constant 0 : i32
    %11 = arith.cmpi ne, %10, %c0_i32_9 : i32
    scf.if %11 {
      %c0_10 = arith.constant 0 : index
      %c0_11 = arith.constant 0 : index
      %12 = vector.load %arg7[%c0_10, %c0_11] : memref<128x128xf32, #tpu.memory_space<vmem>>, vector<128x128xf32>
      %c0_12 = arith.constant 0 : index
      %c0_13 = arith.constant 0 : index
      %13 = vector.load %arg5[%c0_12, %c0_13] : memref<1x128xf32, #tpu.memory_space<vmem>>, vector<1x128xf32>
      %14 = vector.broadcast %13 : vector<1x128xf32> to vector<128x128xf32>
      %15 = arith.addf %12, %14 : vector<128x128xf32>
      %c0_14 = arith.constant 0 : index
      %c0_15 = arith.constant 0 : index
      %16 = vector.load %arg6[%c0_14, %c0_15] : memref<128x128xf32, #tpu.memory_space<vmem>>, vector<128x128xf32>
      tpu.vector_store %arg6[%c0_14, %c0_15], %15 {strides = array<i32>} : memref<128x128xf32, #tpu.memory_space<vmem>>, vector<128x128xf32>,
    } else {
    }
    return
  }
  func.func @transform_0(%arg0: i32, %arg1: i32, %arg2: i32) -> (i32, i32) {
    %c0_i32 = arith.constant 0 : i32
    return %arg0, %arg2 : i32, i32
  }
  func.func @transform_1(%arg0: i32, %arg1: i32, %arg2: i32) -> (i32, i32) {
    %c0_i32 = arith.constant 0 : i32
    return %arg2, %arg1 : i32, i32
  }
  func.func @transform_2(%arg0: i32, %arg1: i32, %arg2: i32) -> (i32, i32) {
    %c0_i32 = arith.constant 0 : i32
    %c0_i32_0 = arith.constant 0 : i32
    return %c0_i32, %arg1 : i32, i32
  }
  func.func @transform_3(%arg0: i32, %arg1: i32, %arg2: i32) -> (i32, i32) {
    %c0_i32 = arith.constant 0 : i32
    return %arg0, %arg1 : i32, i32
  }
}

module attributes {stable_mosaic.version = 11 : i64} {
  func.func @_resize_kernel(%arg0: i32, %arg1: memref<1x8x8xf32, #tpu.memory_space<vmem>>, %arg2: memref<1x32x32xf32, #tpu.memory_space<vmem>>) attributes {dimension_semantics = [#tpu.dimension_semantics<parallel>], iteration_bounds = array<i64: 4>, scalar_prefetch = 0 : i64, scratch_operands = 0 : i64, tpu.core_type = #tpu.core_type<tc>, window_params = [{transform_indices = @transform_0, window_bounds = array<i64: 1, 8, 8>}, {transform_indices = @transform_1, window_bounds = array<i64: 1, 32, 32>}]} {
    %c0 = arith.constant 0 : index
    %c0_0 = arith.constant 0 : index
    %c0_1 = arith.constant 0 : index
    %0 = vector.load %arg1[%c0, %c0_0, %c0_1] : memref<1x8x8xf32, #tpu.memory_space<vmem>>, vector<1x8x8xf32>
    %1 = vector.extract_strided_slice %0 {offsets = [0, 0, 0], sizes = [1, 8, 1], strides = [1, 1, 1]} : vector<1x8x8xf32> to vector<1x8x1xf32>
    %2 = vector.shape_cast %1 : vector<1x8x1xf32> to vector<1x8xf32>
    %3 = vector.extract_strided_slice %0 {offsets = [0, 0, 0], sizes = [1, 8, 1], strides = [1, 1, 1]} : vector<1x8x8xf32> to vector<1x8x1xf32>
    %4 = vector.shape_cast %3 : vector<1x8x1xf32> to vector<1x8xf32>
    %5 = vector.extract_strided_slice %0 {offsets = [0, 0, 0], sizes = [1, 8, 1], strides = [1, 1, 1]} : vector<1x8x8xf32> to vector<1x8x1xf32>
    %6 = vector.shape_cast %5 : vector<1x8x1xf32> to vector<1x8xf32>
    %7 = vector.extract_strided_slice %0 {offsets = [0, 0, 1], sizes = [1, 8, 1], strides = [1, 1, 1]} : vector<1x8x8xf32> to vector<1x8x1xf32>
    %8 = vector.shape_cast %7 : vector<1x8x1xf32> to vector<1x8xf32>
    %cst = arith.constant 8.750000e-01 : f32
    %9 = vector.broadcast %cst : f32 to vector<1x8xf32>
    %10 = arith.mulf %9, %6 : vector<1x8xf32>
    %cst_2 = arith.constant 1.250000e-01 : f32
    %11 = vector.broadcast %cst_2 : f32 to vector<1x8xf32>
    %12 = arith.mulf %11, %8 : vector<1x8xf32>
    %13 = arith.addf %10, %12 : vector<1x8xf32>
    %14 = vector.extract_strided_slice %0 {offsets = [0, 0, 0], sizes = [1, 8, 1], strides = [1, 1, 1]} : vector<1x8x8xf32> to vector<1x8x1xf32>
    %15 = vector.shape_cast %14 : vector<1x8x1xf32> to vector<1x8xf32>
    %16 = vector.extract_strided_slice %0 {offsets = [0, 0, 1], sizes = [1, 8, 1], strides = [1, 1, 1]} : vector<1x8x8xf32> to vector<1x8x1xf32>
    %17 = vector.shape_cast %16 : vector<1x8x1xf32> to vector<1x8xf32>
    %cst_3 = arith.constant 6.250000e-01 : f32
    %18 = vector.broadcast %cst_3 : f32 to vector<1x8xf32>
    %19 = arith.mulf %18, %15 : vector<1x8xf32>
    %cst_4 = arith.constant 3.750000e-01 : f32
    %20 = vector.broadcast %cst_4 : f32 to vector<1x8xf32>
    %21 = arith.mulf %20, %17 : vector<1x8xf32>
    %22 = arith.addf %19, %21 : vector<1x8xf32>
    %23 = vector.extract_strided_slice %0 {offsets = [0, 0, 0], sizes = [1, 8, 1], strides = [1, 1, 1]} : vector<1x8x8xf32> to vector<1x8x1xf32>
    %24 = vector.shape_cast %23 : vector<1x8x1xf32> to vector<1x8xf32>
    %25 = vector.extract_strided_slice %0 {offsets = [0, 0, 1], sizes = [1, 8, 1], strides = [1, 1, 1]} : vector<1x8x8xf32> to vector<1x8x1xf32>
    %26 = vector.shape_cast %25 : vector<1x8x1xf32> to vector<1x8xf32>
    %cst_5 = arith.constant 3.750000e-01 : f32
    %27 = vector.broadcast %cst_5 : f32 to vector<1x8xf32>
    %28 = arith.mulf %27, %24 : vector<1x8xf32>
    %cst_6 = arith.constant 6.250000e-01 : f32
    %29 = vector.broadcast %cst_6 : f32 to vector<1x8xf32>
    %30 = arith.mulf %29, %26 : vector<1x8xf32>
    %31 = arith.addf %28, %30 : vector<1x8xf32>
    %32 = vector.extract_strided_slice %0 {offsets = [0, 0, 0], sizes = [1, 8, 1], strides = [1, 1, 1]} : vector<1x8x8xf32> to vector<1x8x1xf32>
    %33 = vector.shape_cast %32 : vector<1x8x1xf32> to vector<1x8xf32>
    %34 = vector.extract_strided_slice %0 {offsets = [0, 0, 1], sizes = [1, 8, 1], strides = [1, 1, 1]} : vector<1x8x8xf32> to vector<1x8x1xf32>
    %35 = vector.shape_cast %34 : vector<1x8x1xf32> to vector<1x8xf32>
    %cst_7 = arith.constant 1.250000e-01 : f32
    %36 = vector.broadcast %cst_7 : f32 to vector<1x8xf32>
    %37 = arith.mulf %36, %33 : vector<1x8xf32>
    %cst_8 = arith.constant 8.750000e-01 : f32
    %38 = vector.broadcast %cst_8 : f32 to vector<1x8xf32>
    %39 = arith.mulf %38, %35 : vector<1x8xf32>
    %40 = arith.addf %37, %39 : vector<1x8xf32>
    %41 = vector.extract_strided_slice %0 {offsets = [0, 0, 1], sizes = [1, 8, 1], strides = [1, 1, 1]} : vector<1x8x8xf32> to vector<1x8x1xf32>
    %42 = vector.shape_cast %41 : vector<1x8x1xf32> to vector<1x8xf32>
    %43 = vector.extract_strided_slice %0 {offsets = [0, 0, 2], sizes = [1, 8, 1], strides = [1, 1, 1]} : vector<1x8x8xf32> to vector<1x8x1xf32>
    %44 = vector.shape_cast %43 : vector<1x8x1xf32> to vector<1x8xf32>
    %cst_9 = arith.constant 8.750000e-01 : f32
    %45 = vector.broadcast %cst_9 : f32 to vector<1x8xf32>
    %46 = arith.mulf %45, %42 : vector<1x8xf32>
    %cst_10 = arith.constant 1.250000e-01 : f32
    %47 = vector.broadcast %cst_10 : f32 to vector<1x8xf32>
    %48 = arith.mulf %47, %44 : vector<1x8xf32>
    %49 = arith.addf %46, %48 : vector<1x8xf32>
    %50 = vector.extract_strided_slice %0 {offsets = [0, 0, 1], sizes = [1, 8, 1], strides = [1, 1, 1]} : vector<1x8x8xf32> to vector<1x8x1xf32>
    %51 = vector.shape_cast %50 : vector<1x8x1xf32> to vector<1x8xf32>
    %52 = vector.extract_strided_slice %0 {offsets = [0, 0, 2], sizes = [1, 8, 1], strides = [1, 1, 1]} : vector<1x8x8xf32> to vector<1x8x1xf32>
    %53 = vector.shape_cast %52 : vector<1x8x1xf32> to vector<1x8xf32>
    %cst_11 = arith.constant 6.250000e-01 : f32
    %54 = vector.broadcast %cst_11 : f32 to vector<1x8xf32>
    %55 = arith.mulf %54, %51 : vector<1x8xf32>
    %cst_12 = arith.constant 3.750000e-01 : f32
    %56 = vector.broadcast %cst_12 : f32 to vector<1x8xf32>
    %57 = arith.mulf %56, %53 : vector<1x8xf32>
    %58 = arith.addf %55, %57 : vector<1x8xf32>
    %59 = vector.extract_strided_slice %0 {offsets = [0, 0, 1], sizes = [1, 8, 1], strides = [1, 1, 1]} : vector<1x8x8xf32> to vector<1x8x1xf32>
    %60 = vector.shape_cast %59 : vector<1x8x1xf32> to vector<1x8xf32>
    %61 = vector.extract_strided_slice %0 {offsets = [0, 0, 2], sizes = [1, 8, 1], strides = [1, 1, 1]} : vector<1x8x8xf32> to vector<1x8x1xf32>
    %62 = vector.shape_cast %61 : vector<1x8x1xf32> to vector<1x8xf32>
    %cst_13 = arith.constant 3.750000e-01 : f32
    %63 = vector.broadcast %cst_13 : f32 to vector<1x8xf32>
    %64 = arith.mulf %63, %60 : vector<1x8xf32>
    %cst_14 = arith.constant 6.250000e-01 : f32
    %65 = vector.broadcast %cst_14 : f32 to vector<1x8xf32>
    %66 = arith.mulf %65, %62 : vector<1x8xf32>
    %67 = arith.addf %64, %66 : vector<1x8xf32>
    %68 = vector.extract_strided_slice %0 {offsets = [0, 0, 1], sizes = [1, 8, 1], strides = [1, 1, 1]} : vector<1x8x8xf32> to vector<1x8x1xf32>
    %69 = vector.shape_cast %68 : vector<1x8x1xf32> to vector<1x8xf32>
    %70 = vector.extract_strided_slice %0 {offsets = [0, 0, 2], sizes = [1, 8, 1], strides = [1, 1, 1]} : vector<1x8x8xf32> to vector<1x8x1xf32>
    %71 = vector.shape_cast %70 : vector<1x8x1xf32> to vector<1x8xf32>
    %cst_15 = arith.constant 1.250000e-01 : f32
    %72 = vector.broadcast %cst_15 : f32 to vector<1x8xf32>
    %73 = arith.mulf %72, %69 : vector<1x8xf32>
    %cst_16 = arith.constant 8.750000e-01 : f32
    %74 = vector.broadcast %cst_16 : f32 to vector<1x8xf32>
    %75 = arith.mulf %74, %71 : vector<1x8xf32>
    %76 = arith.addf %73, %75 : vector<1x8xf32>
    %77 = vector.extract_strided_slice %0 {offsets = [0, 0, 2], sizes = [1, 8, 1], strides = [1, 1, 1]} : vector<1x8x8xf32> to vector<1x8x1xf32>
    %78 = vector.shape_cast %77 : vector<1x8x1xf32> to vector<1x8xf32>
    %79 = vector.extract_strided_slice %0 {offsets = [0, 0, 3], sizes = [1, 8, 1], strides = [1, 1, 1]} : vector<1x8x8xf32> to vector<1x8x1xf32>
    %80 = vector.shape_cast %79 : vector<1x8x1xf32> to vector<1x8xf32>
    %cst_17 = arith.constant 8.750000e-01 : f32
    %81 = vector.broadcast %cst_17 : f32 to vector<1x8xf32>
    %82 = arith.mulf %81, %78 : vector<1x8xf32>
    %cst_18 = arith.constant 1.250000e-01 : f32
    %83 = vector.broadcast %cst_18 : f32 to vector<1x8xf32>
    %84 = arith.mulf %83, %80 : vector<1x8xf32>
    %85 = arith.addf %82, %84 : vector<1x8xf32>
    %86 = vector.extract_strided_slice %0 {offsets = [0, 0, 2], sizes = [1, 8, 1], strides = [1, 1, 1]} : vector<1x8x8xf32> to vector<1x8x1xf32>
    %87 = vector.shape_cast %86 : vector<1x8x1xf32> to vector<1x8xf32>
    %88 = vector.extract_strided_slice %0 {offsets = [0, 0, 3], sizes = [1, 8, 1], strides = [1, 1, 1]} : vector<1x8x8xf32> to vector<1x8x1xf32>
    %89 = vector.shape_cast %88 : vector<1x8x1xf32> to vector<1x8xf32>
    %cst_19 = arith.constant 6.250000e-01 : f32
    %90 = vector.broadcast %cst_19 : f32 to vector<1x8xf32>
    %91 = arith.mulf %90, %87 : vector<1x8xf32>
    %cst_20 = arith.constant 3.750000e-01 : f32
    %92 = vector.broadcast %cst_20 : f32 to vector<1x8xf32>
    %93 = arith.mulf %92, %89 : vector<1x8xf32>
    %94 = arith.addf %91, %93 : vector<1x8xf32>
    %95 = vector.extract_strided_slice %0 {offsets = [0, 0, 2], sizes = [1, 8, 1], strides = [1, 1, 1]} : vector<1x8x8xf32> to vector<1x8x1xf32>
    %96 = vector.shape_cast %95 : vector<1x8x1xf32> to vector<1x8xf32>
    %97 = vector.extract_strided_slice %0 {offsets = [0, 0, 3], sizes = [1, 8, 1], strides = [1, 1, 1]} : vector<1x8x8xf32> to vector<1x8x1xf32>
    %98 = vector.shape_cast %97 : vector<1x8x1xf32> to vector<1x8xf32>
    %cst_21 = arith.constant 3.750000e-01 : f32
    %99 = vector.broadcast %cst_21 : f32 to vector<1x8xf32>
    %100 = arith.mulf %99, %96 : vector<1x8xf32>
    %cst_22 = arith.constant 6.250000e-01 : f32
    %101 = vector.broadcast %cst_22 : f32 to vector<1x8xf32>
    %102 = arith.mulf %101, %98 : vector<1x8xf32>
    %103 = arith.addf %100, %102 : vector<1x8xf32>
    %104 = vector.extract_strided_slice %0 {offsets = [0, 0, 2], sizes = [1, 8, 1], strides = [1, 1, 1]} : vector<1x8x8xf32> to vector<1x8x1xf32>
    %105 = vector.shape_cast %104 : vector<1x8x1xf32> to vector<1x8xf32>
    %106 = vector.extract_strided_slice %0 {offsets = [0, 0, 3], sizes = [1, 8, 1], strides = [1, 1, 1]} : vector<1x8x8xf32> to vector<1x8x1xf32>
    %107 = vector.shape_cast %106 : vector<1x8x1xf32> to vector<1x8xf32>
    %cst_23 = arith.constant 1.250000e-01 : f32
    %108 = vector.broadcast %cst_23 : f32 to vector<1x8xf32>
    %109 = arith.mulf %108, %105 : vector<1x8xf32>
    %cst_24 = arith.constant 8.750000e-01 : f32
    %110 = vector.broadcast %cst_24 : f32 to vector<1x8xf32>
    %111 = arith.mulf %110, %107 : vector<1x8xf32>
    %112 = arith.addf %109, %111 : vector<1x8xf32>
    %113 = vector.extract_strided_slice %0 {offsets = [0, 0, 3], sizes = [1, 8, 1], strides = [1, 1, 1]} : vector<1x8x8xf32> to vector<1x8x1xf32>
    %114 = vector.shape_cast %113 : vector<1x8x1xf32> to vector<1x8xf32>
    %115 = vector.extract_strided_slice %0 {offsets = [0, 0, 4], sizes = [1, 8, 1], strides = [1, 1, 1]} : vector<1x8x8xf32> to vector<1x8x1xf32>
    %116 = vector.shape_cast %115 : vector<1x8x1xf32> to vector<1x8xf32>
    %cst_25 = arith.constant 8.750000e-01 : f32
    %117 = vector.broadcast %cst_25 : f32 to vector<1x8xf32>
    %118 = arith.mulf %117, %114 : vector<1x8xf32>
    %cst_26 = arith.constant 1.250000e-01 : f32
    %119 = vector.broadcast %cst_26 : f32 to vector<1x8xf32>
    %120 = arith.mulf %119, %116 : vector<1x8xf32>
    %121 = arith.addf %118, %120 : vector<1x8xf32>
    %122 = vector.extract_strided_slice %0 {offsets = [0, 0, 3], sizes = [1, 8, 1], strides = [1, 1, 1]} : vector<1x8x8xf32> to vector<1x8x1xf32>
    %123 = vector.shape_cast %122 : vector<1x8x1xf32> to vector<1x8xf32>
    %124 = vector.extract_strided_slice %0 {offsets = [0, 0, 4], sizes = [1, 8, 1], strides = [1, 1, 1]} : vector<1x8x8xf32> to vector<1x8x1xf32>
    %125 = vector.shape_cast %124 : vector<1x8x1xf32> to vector<1x8xf32>
    %cst_27 = arith.constant 6.250000e-01 : f32
    %126 = vector.broadcast %cst_27 : f32 to vector<1x8xf32>
    %127 = arith.mulf %126, %123 : vector<1x8xf32>
    %cst_28 = arith.constant 3.750000e-01 : f32
    %128 = vector.broadcast %cst_28 : f32 to vector<1x8xf32>
    %129 = arith.mulf %128, %125 : vector<1x8xf32>
    %130 = arith.addf %127, %129 : vector<1x8xf32>
    %131 = vector.extract_strided_slice %0 {offsets = [0, 0, 3], sizes = [1, 8, 1], strides = [1, 1, 1]} : vector<1x8x8xf32> to vector<1x8x1xf32>
    %132 = vector.shape_cast %131 : vector<1x8x1xf32> to vector<1x8xf32>
    %133 = vector.extract_strided_slice %0 {offsets = [0, 0, 4], sizes = [1, 8, 1], strides = [1, 1, 1]} : vector<1x8x8xf32> to vector<1x8x1xf32>
    %134 = vector.shape_cast %133 : vector<1x8x1xf32> to vector<1x8xf32>
    %cst_29 = arith.constant 3.750000e-01 : f32
    %135 = vector.broadcast %cst_29 : f32 to vector<1x8xf32>
    %136 = arith.mulf %135, %132 : vector<1x8xf32>
    %cst_30 = arith.constant 6.250000e-01 : f32
    %137 = vector.broadcast %cst_30 : f32 to vector<1x8xf32>
    %138 = arith.mulf %137, %134 : vector<1x8xf32>
    %139 = arith.addf %136, %138 : vector<1x8xf32>
    %140 = vector.extract_strided_slice %0 {offsets = [0, 0, 3], sizes = [1, 8, 1], strides = [1, 1, 1]} : vector<1x8x8xf32> to vector<1x8x1xf32>
    %141 = vector.shape_cast %140 : vector<1x8x1xf32> to vector<1x8xf32>
    %142 = vector.extract_strided_slice %0 {offsets = [0, 0, 4], sizes = [1, 8, 1], strides = [1, 1, 1]} : vector<1x8x8xf32> to vector<1x8x1xf32>
    %143 = vector.shape_cast %142 : vector<1x8x1xf32> to vector<1x8xf32>
    %cst_31 = arith.constant 1.250000e-01 : f32
    %144 = vector.broadcast %cst_31 : f32 to vector<1x8xf32>
    %145 = arith.mulf %144, %141 : vector<1x8xf32>
    %cst_32 = arith.constant 8.750000e-01 : f32
    %146 = vector.broadcast %cst_32 : f32 to vector<1x8xf32>
    %147 = arith.mulf %146, %143 : vector<1x8xf32>
    %148 = arith.addf %145, %147 : vector<1x8xf32>
    %149 = vector.extract_strided_slice %0 {offsets = [0, 0, 4], sizes = [1, 8, 1], strides = [1, 1, 1]} : vector<1x8x8xf32> to vector<1x8x1xf32>
    %150 = vector.shape_cast %149 : vector<1x8x1xf32> to vector<1x8xf32>
    %151 = vector.extract_strided_slice %0 {offsets = [0, 0, 5], sizes = [1, 8, 1], strides = [1, 1, 1]} : vector<1x8x8xf32> to vector<1x8x1xf32>
    %152 = vector.shape_cast %151 : vector<1x8x1xf32> to vector<1x8xf32>
    %cst_33 = arith.constant 8.750000e-01 : f32
    %153 = vector.broadcast %cst_33 : f32 to vector<1x8xf32>
    %154 = arith.mulf %153, %150 : vector<1x8xf32>
    %cst_34 = arith.constant 1.250000e-01 : f32
    %155 = vector.broadcast %cst_34 : f32 to vector<1x8xf32>
    %156 = arith.mulf %155, %152 : vector<1x8xf32>
    %157 = arith.addf %154, %156 : vector<1x8xf32>
    %158 = vector.extract_strided_slice %0 {offsets = [0, 0, 4], sizes = [1, 8, 1], strides = [1, 1, 1]} : vector<1x8x8xf32> to vector<1x8x1xf32>
    %159 = vector.shape_cast %158 : vector<1x8x1xf32> to vector<1x8xf32>
    %160 = vector.extract_strided_slice %0 {offsets = [0, 0, 5], sizes = [1, 8, 1], strides = [1, 1, 1]} : vector<1x8x8xf32> to vector<1x8x1xf32>
    %161 = vector.shape_cast %160 : vector<1x8x1xf32> to vector<1x8xf32>
    %cst_35 = arith.constant 6.250000e-01 : f32
    %162 = vector.broadcast %cst_35 : f32 to vector<1x8xf32>
    %163 = arith.mulf %162, %159 : vector<1x8xf32>
    %cst_36 = arith.constant 3.750000e-01 : f32
    %164 = vector.broadcast %cst_36 : f32 to vector<1x8xf32>
    %165 = arith.mulf %164, %161 : vector<1x8xf32>
    %166 = arith.addf %163, %165 : vector<1x8xf32>
    %167 = vector.extract_strided_slice %0 {offsets = [0, 0, 4], sizes = [1, 8, 1], strides = [1, 1, 1]} : vector<1x8x8xf32> to vector<1x8x1xf32>
    %168 = vector.shape_cast %167 : vector<1x8x1xf32> to vector<1x8xf32>
    %169 = vector.extract_strided_slice %0 {offsets = [0, 0, 5], sizes = [1, 8, 1], strides = [1, 1, 1]} : vector<1x8x8xf32> to vector<1x8x1xf32>
    %170 = vector.shape_cast %169 : vector<1x8x1xf32> to vector<1x8xf32>
    %cst_37 = arith.constant 3.750000e-01 : f32
    %171 = vector.broadcast %cst_37 : f32 to vector<1x8xf32>
    %172 = arith.mulf %171, %168 : vector<1x8xf32>
    %cst_38 = arith.constant 6.250000e-01 : f32
    %173 = vector.broadcast %cst_38 : f32 to vector<1x8xf32>
    %174 = arith.mulf %173, %170 : vector<1x8xf32>
    %175 = arith.addf %172, %174 : vector<1x8xf32>
    %176 = vector.extract_strided_slice %0 {offsets = [0, 0, 4], sizes = [1, 8, 1], strides = [1, 1, 1]} : vector<1x8x8xf32> to vector<1x8x1xf32>
    %177 = vector.shape_cast %176 : vector<1x8x1xf32> to vector<1x8xf32>
    %178 = vector.extract_strided_slice %0 {offsets = [0, 0, 5], sizes = [1, 8, 1], strides = [1, 1, 1]} : vector<1x8x8xf32> to vector<1x8x1xf32>
    %179 = vector.shape_cast %178 : vector<1x8x1xf32> to vector<1x8xf32>
    %cst_39 = arith.constant 1.250000e-01 : f32
    %180 = vector.broadcast %cst_39 : f32 to vector<1x8xf32>
    %181 = arith.mulf %180, %177 : vector<1x8xf32>
    %cst_40 = arith.constant 8.750000e-01 : f32
    %182 = vector.broadcast %cst_40 : f32 to vector<1x8xf32>
    %183 = arith.mulf %182, %179 : vector<1x8xf32>
    %184 = arith.addf %181, %183 : vector<1x8xf32>
    %185 = vector.extract_strided_slice %0 {offsets = [0, 0, 5], sizes = [1, 8, 1], strides = [1, 1, 1]} : vector<1x8x8xf32> to vector<1x8x1xf32>
    %186 = vector.shape_cast %185 : vector<1x8x1xf32> to vector<1x8xf32>
    %187 = vector.extract_strided_slice %0 {offsets = [0, 0, 6], sizes = [1, 8, 1], strides = [1, 1, 1]} : vector<1x8x8xf32> to vector<1x8x1xf32>
    %188 = vector.shape_cast %187 : vector<1x8x1xf32> to vector<1x8xf32>
    %cst_41 = arith.constant 8.750000e-01 : f32
    %189 = vector.broadcast %cst_41 : f32 to vector<1x8xf32>
    %190 = arith.mulf %189, %186 : vector<1x8xf32>
    %cst_42 = arith.constant 1.250000e-01 : f32
    %191 = vector.broadcast %cst_42 : f32 to vector<1x8xf32>
    %192 = arith.mulf %191, %188 : vector<1x8xf32>
    %193 = arith.addf %190, %192 : vector<1x8xf32>
    %194 = vector.extract_strided_slice %0 {offsets = [0, 0, 5], sizes = [1, 8, 1], strides = [1, 1, 1]} : vector<1x8x8xf32> to vector<1x8x1xf32>
    %195 = vector.shape_cast %194 : vector<1x8x1xf32> to vector<1x8xf32>
    %196 = vector.extract_strided_slice %0 {offsets = [0, 0, 6], sizes = [1, 8, 1], strides = [1, 1, 1]} : vector<1x8x8xf32> to vector<1x8x1xf32>
    %197 = vector.shape_cast %196 : vector<1x8x1xf32> to vector<1x8xf32>
    %cst_43 = arith.constant 6.250000e-01 : f32
    %198 = vector.broadcast %cst_43 : f32 to vector<1x8xf32>
    %199 = arith.mulf %198, %195 : vector<1x8xf32>
    %cst_44 = arith.constant 3.750000e-01 : f32
    %200 = vector.broadcast %cst_44 : f32 to vector<1x8xf32>
    %201 = arith.mulf %200, %197 : vector<1x8xf32>
    %202 = arith.addf %199, %201 : vector<1x8xf32>
    %203 = vector.extract_strided_slice %0 {offsets = [0, 0, 5], sizes = [1, 8, 1], strides = [1, 1, 1]} : vector<1x8x8xf32> to vector<1x8x1xf32>
    %204 = vector.shape_cast %203 : vector<1x8x1xf32> to vector<1x8xf32>
    %205 = vector.extract_strided_slice %0 {offsets = [0, 0, 6], sizes = [1, 8, 1], strides = [1, 1, 1]} : vector<1x8x8xf32> to vector<1x8x1xf32>
    %206 = vector.shape_cast %205 : vector<1x8x1xf32> to vector<1x8xf32>
    %cst_45 = arith.constant 3.750000e-01 : f32
    %207 = vector.broadcast %cst_45 : f32 to vector<1x8xf32>
    %208 = arith.mulf %207, %204 : vector<1x8xf32>
    %cst_46 = arith.constant 6.250000e-01 : f32
    %209 = vector.broadcast %cst_46 : f32 to vector<1x8xf32>
    %210 = arith.mulf %209, %206 : vector<1x8xf32>
    %211 = arith.addf %208, %210 : vector<1x8xf32>
    %212 = vector.extract_strided_slice %0 {offsets = [0, 0, 5], sizes = [1, 8, 1], strides = [1, 1, 1]} : vector<1x8x8xf32> to vector<1x8x1xf32>
    %213 = vector.shape_cast %212 : vector<1x8x1xf32> to vector<1x8xf32>
    %214 = vector.extract_strided_slice %0 {offsets = [0, 0, 6], sizes = [1, 8, 1], strides = [1, 1, 1]} : vector<1x8x8xf32> to vector<1x8x1xf32>
    %215 = vector.shape_cast %214 : vector<1x8x1xf32> to vector<1x8xf32>
    %cst_47 = arith.constant 1.250000e-01 : f32
    %216 = vector.broadcast %cst_47 : f32 to vector<1x8xf32>
    %217 = arith.mulf %216, %213 : vector<1x8xf32>
    %cst_48 = arith.constant 8.750000e-01 : f32
    %218 = vector.broadcast %cst_48 : f32 to vector<1x8xf32>
    %219 = arith.mulf %218, %215 : vector<1x8xf32>
    %220 = arith.addf %217, %219 : vector<1x8xf32>
    %221 = vector.extract_strided_slice %0 {offsets = [0, 0, 6], sizes = [1, 8, 1], strides = [1, 1, 1]} : vector<1x8x8xf32> to vector<1x8x1xf32>
    %222 = vector.shape_cast %221 : vector<1x8x1xf32> to vector<1x8xf32>
    %223 = vector.extract_strided_slice %0 {offsets = [0, 0, 7], sizes = [1, 8, 1], strides = [1, 1, 1]} : vector<1x8x8xf32> to vector<1x8x1xf32>
    %224 = vector.shape_cast %223 : vector<1x8x1xf32> to vector<1x8xf32>
    %cst_49 = arith.constant 8.750000e-01 : f32
    %225 = vector.broadcast %cst_49 : f32 to vector<1x8xf32>
    %226 = arith.mulf %225, %222 : vector<1x8xf32>
    %cst_50 = arith.constant 1.250000e-01 : f32
    %227 = vector.broadcast %cst_50 : f32 to vector<1x8xf32>
    %228 = arith.mulf %227, %224 : vector<1x8xf32>
    %229 = arith.addf %226, %228 : vector<1x8xf32>
    %230 = vector.extract_strided_slice %0 {offsets = [0, 0, 6], sizes = [1, 8, 1], strides = [1, 1, 1]} : vector<1x8x8xf32> to vector<1x8x1xf32>
    %231 = vector.shape_cast %230 : vector<1x8x1xf32> to vector<1x8xf32>
    %232 = vector.extract_strided_slice %0 {offsets = [0, 0, 7], sizes = [1, 8, 1], strides = [1, 1, 1]} : vector<1x8x8xf32> to vector<1x8x1xf32>
    %233 = vector.shape_cast %232 : vector<1x8x1xf32> to vector<1x8xf32>
    %cst_51 = arith.constant 6.250000e-01 : f32
    %234 = vector.broadcast %cst_51 : f32 to vector<1x8xf32>
    %235 = arith.mulf %234, %231 : vector<1x8xf32>
    %cst_52 = arith.constant 3.750000e-01 : f32
    %236 = vector.broadcast %cst_52 : f32 to vector<1x8xf32>
    %237 = arith.mulf %236, %233 : vector<1x8xf32>
    %238 = arith.addf %235, %237 : vector<1x8xf32>
    %239 = vector.extract_strided_slice %0 {offsets = [0, 0, 6], sizes = [1, 8, 1], strides = [1, 1, 1]} : vector<1x8x8xf32> to vector<1x8x1xf32>
    %240 = vector.shape_cast %239 : vector<1x8x1xf32> to vector<1x8xf32>
    %241 = vector.extract_strided_slice %0 {offsets = [0, 0, 7], sizes = [1, 8, 1], strides = [1, 1, 1]} : vector<1x8x8xf32> to vector<1x8x1xf32>
    %242 = vector.shape_cast %241 : vector<1x8x1xf32> to vector<1x8xf32>
    %cst_53 = arith.constant 3.750000e-01 : f32
    %243 = vector.broadcast %cst_53 : f32 to vector<1x8xf32>
    %244 = arith.mulf %243, %240 : vector<1x8xf32>
    %cst_54 = arith.constant 6.250000e-01 : f32
    %245 = vector.broadcast %cst_54 : f32 to vector<1x8xf32>
    %246 = arith.mulf %245, %242 : vector<1x8xf32>
    %247 = arith.addf %244, %246 : vector<1x8xf32>
    %248 = vector.extract_strided_slice %0 {offsets = [0, 0, 6], sizes = [1, 8, 1], strides = [1, 1, 1]} : vector<1x8x8xf32> to vector<1x8x1xf32>
    %249 = vector.shape_cast %248 : vector<1x8x1xf32> to vector<1x8xf32>
    %250 = vector.extract_strided_slice %0 {offsets = [0, 0, 7], sizes = [1, 8, 1], strides = [1, 1, 1]} : vector<1x8x8xf32> to vector<1x8x1xf32>
    %251 = vector.shape_cast %250 : vector<1x8x1xf32> to vector<1x8xf32>
    %cst_55 = arith.constant 1.250000e-01 : f32
    %252 = vector.broadcast %cst_55 : f32 to vector<1x8xf32>
    %253 = arith.mulf %252, %249 : vector<1x8xf32>
    %cst_56 = arith.constant 8.750000e-01 : f32
    %254 = vector.broadcast %cst_56 : f32 to vector<1x8xf32>
    %255 = arith.mulf %254, %251 : vector<1x8xf32>
    %256 = arith.addf %253, %255 : vector<1x8xf32>
    %257 = vector.extract_strided_slice %0 {offsets = [0, 0, 7], sizes = [1, 8, 1], strides = [1, 1, 1]} : vector<1x8x8xf32> to vector<1x8x1xf32>
    %258 = vector.shape_cast %257 : vector<1x8x1xf32> to vector<1x8xf32>
    %259 = vector.extract_strided_slice %0 {offsets = [0, 0, 7], sizes = [1, 8, 1], strides = [1, 1, 1]} : vector<1x8x8xf32> to vector<1x8x1xf32>
    %260 = vector.shape_cast %259 : vector<1x8x1xf32> to vector<1x8xf32>
    %261 = vector.shape_cast %2 : vector<1x8xf32> to vector<1x8x1xf32>
    %262 = vector.shape_cast %4 : vector<1x8xf32> to vector<1x8x1xf32>
    %263 = vector.shape_cast %13 : vector<1x8xf32> to vector<1x8x1xf32>
    %264 = vector.shape_cast %22 : vector<1x8xf32> to vector<1x8x1xf32>
    %265 = vector.shape_cast %31 : vector<1x8xf32> to vector<1x8x1xf32>
    %266 = vector.shape_cast %40 : vector<1x8xf32> to vector<1x8x1xf32>
    %267 = vector.shape_cast %49 : vector<1x8xf32> to vector<1x8x1xf32>
    %268 = vector.shape_cast %58 : vector<1x8xf32> to vector<1x8x1xf32>
    %269 = vector.shape_cast %67 : vector<1x8xf32> to vector<1x8x1xf32>
    %270 = vector.shape_cast %76 : vector<1x8xf32> to vector<1x8x1xf32>
    %271 = vector.shape_cast %85 : vector<1x8xf32> to vector<1x8x1xf32>
    %272 = vector.shape_cast %94 : vector<1x8xf32> to vector<1x8x1xf32>
    %273 = vector.shape_cast %103 : vector<1x8xf32> to vector<1x8x1xf32>
    %274 = vector.shape_cast %112 : vector<1x8xf32> to vector<1x8x1xf32>
    %275 = vector.shape_cast %121 : vector<1x8xf32> to vector<1x8x1xf32>
    %276 = vector.shape_cast %130 : vector<1x8xf32> to vector<1x8x1xf32>
    %277 = vector.shape_cast %139 : vector<1x8xf32> to vector<1x8x1xf32>
    %278 = vector.shape_cast %148 : vector<1x8xf32> to vector<1x8x1xf32>
    %279 = vector.shape_cast %157 : vector<1x8xf32> to vector<1x8x1xf32>
    %280 = vector.shape_cast %166 : vector<1x8xf32> to vector<1x8x1xf32>
    %281 = vector.shape_cast %175 : vector<1x8xf32> to vector<1x8x1xf32>
    %282 = vector.shape_cast %184 : vector<1x8xf32> to vector<1x8x1xf32>
    %283 = vector.shape_cast %193 : vector<1x8xf32> to vector<1x8x1xf32>
    %284 = vector.shape_cast %202 : vector<1x8xf32> to vector<1x8x1xf32>
    %285 = vector.shape_cast %211 : vector<1x8xf32> to vector<1x8x1xf32>
    %286 = vector.shape_cast %220 : vector<1x8xf32> to vector<1x8x1xf32>
    %287 = vector.shape_cast %229 : vector<1x8xf32> to vector<1x8x1xf32>
    %288 = vector.shape_cast %238 : vector<1x8xf32> to vector<1x8x1xf32>
    %289 = vector.shape_cast %247 : vector<1x8xf32> to vector<1x8x1xf32>
    %290 = vector.shape_cast %256 : vector<1x8xf32> to vector<1x8x1xf32>
    %291 = vector.shape_cast %258 : vector<1x8xf32> to vector<1x8x1xf32>
    %292 = vector.shape_cast %260 : vector<1x8xf32> to vector<1x8x1xf32>
    %293 = tpu.concatenate %261, %262, %263, %264, %265, %266, %267, %268, %269, %270, %271, %272, %273, %274, %275, %276 in 2 : vector<1x8x1xf32>, vector<1x8x1xf32>, vector<1x8x1xf32>, vector<1x8x1xf32>, vector<1x8x1xf32>, vector<1x8x1xf32>, vector<1x8x1xf32>, vector<1x8x1xf32>, vector<1x8x1xf32>, vector<1x8x1xf32>, vector<1x8x1xf32>, vector<1x8x1xf32>, vector<1x8x1xf32>, vector<1x8x1xf32>, vector<1x8x1xf32>, vector<1x8x1xf32> -> vector<1x8x16xf32>
    %294 = tpu.concatenate %277, %278, %279, %280, %281, %282, %283, %284, %285, %286, %287, %288, %289, %290, %291, %292 in 2 : vector<1x8x1xf32>, vector<1x8x1xf32>, vector<1x8x1xf32>, vector<1x8x1xf32>, vector<1x8x1xf32>, vector<1x8x1xf32>, vector<1x8x1xf32>, vector<1x8x1xf32>, vector<1x8x1xf32>, vector<1x8x1xf32>, vector<1x8x1xf32>, vector<1x8x1xf32>, vector<1x8x1xf32>, vector<1x8x1xf32>, vector<1x8x1xf32>, vector<1x8x1xf32> -> vector<1x8x16xf32>
    %295 = tpu.concatenate %293, %294 in 2 : vector<1x8x16xf32>, vector<1x8x16xf32> -> vector<1x8x32xf32>
    %296 = vector.extract_strided_slice %295 {offsets = [0, 0, 0], sizes = [1, 1, 32], strides = [1, 1, 1]} : vector<1x8x32xf32> to vector<1x1x32xf32>
    %297 = vector.shape_cast %296 : vector<1x1x32xf32> to vector<1x32xf32>
    %298 = vector.extract_strided_slice %295 {offsets = [0, 0, 0], sizes = [1, 1, 32], strides = [1, 1, 1]} : vector<1x8x32xf32> to vector<1x1x32xf32>
    %299 = vector.shape_cast %298 : vector<1x1x32xf32> to vector<1x32xf32>
    %300 = vector.extract_strided_slice %295 {offsets = [0, 0, 0], sizes = [1, 1, 32], strides = [1, 1, 1]} : vector<1x8x32xf32> to vector<1x1x32xf32>
    %301 = vector.shape_cast %300 : vector<1x1x32xf32> to vector<1x32xf32>
    %302 = vector.extract_strided_slice %295 {offsets = [0, 1, 0], sizes = [1, 1, 32], strides = [1, 1, 1]} : vector<1x8x32xf32> to vector<1x1x32xf32>
    %303 = vector.shape_cast %302 : vector<1x1x32xf32> to vector<1x32xf32>
    %cst_57 = arith.constant 8.750000e-01 : f32
    %304 = vector.broadcast %cst_57 : f32 to vector<1x32xf32>
    %305 = arith.mulf %304, %301 : vector<1x32xf32>
    %cst_58 = arith.constant 1.250000e-01 : f32
    %306 = vector.broadcast %cst_58 : f32 to vector<1x32xf32>
    %307 = arith.mulf %306, %303 : vector<1x32xf32>
    %308 = arith.addf %305, %307 : vector<1x32xf32>
    %309 = vector.extract_strided_slice %295 {offsets = [0, 0, 0], sizes = [1, 1, 32], strides = [1, 1, 1]} : vector<1x8x32xf32> to vector<1x1x32xf32>
    %310 = vector.shape_cast %309 : vector<1x1x32xf32> to vector<1x32xf32>
    %311 = vector.extract_strided_slice %295 {offsets = [0, 1, 0], sizes = [1, 1, 32], strides = [1, 1, 1]} : vector<1x8x32xf32> to vector<1x1x32xf32>
    %312 = vector.shape_cast %311 : vector<1x1x32xf32> to vector<1x32xf32>
    %cst_59 = arith.constant 6.250000e-01 : f32
    %313 = vector.broadcast %cst_59 : f32 to vector<1x32xf32>
    %314 = arith.mulf %313, %310 : vector<1x32xf32>
    %cst_60 = arith.constant 3.750000e-01 : f32
    %315 = vector.broadcast %cst_60 : f32 to vector<1x32xf32>
    %316 = arith.mulf %315, %312 : vector<1x32xf32>
    %317 = arith.addf %314, %316 : vector<1x32xf32>
    %318 = vector.extract_strided_slice %295 {offsets = [0, 0, 0], sizes = [1, 1, 32], strides = [1, 1, 1]} : vector<1x8x32xf32> to vector<1x1x32xf32>
    %319 = vector.shape_cast %318 : vector<1x1x32xf32> to vector<1x32xf32>
    %320 = vector.extract_strided_slice %295 {offsets = [0, 1, 0], sizes = [1, 1, 32], strides = [1, 1, 1]} : vector<1x8x32xf32> to vector<1x1x32xf32>
    %321 = vector.shape_cast %320 : vector<1x1x32xf32> to vector<1x32xf32>
    %cst_61 = arith.constant 3.750000e-01 : f32
    %322 = vector.broadcast %cst_61 : f32 to vector<1x32xf32>
    %323 = arith.mulf %322, %319 : vector<1x32xf32>
    %cst_62 = arith.constant 6.250000e-01 : f32
    %324 = vector.broadcast %cst_62 : f32 to vector<1x32xf32>
    %325 = arith.mulf %324, %321 : vector<1x32xf32>
    %326 = arith.addf %323, %325 : vector<1x32xf32>
    %327 = vector.extract_strided_slice %295 {offsets = [0, 0, 0], sizes = [1, 1, 32], strides = [1, 1, 1]} : vector<1x8x32xf32> to vector<1x1x32xf32>
    %328 = vector.shape_cast %327 : vector<1x1x32xf32> to vector<1x32xf32>
    %329 = vector.extract_strided_slice %295 {offsets = [0, 1, 0], sizes = [1, 1, 32], strides = [1, 1, 1]} : vector<1x8x32xf32> to vector<1x1x32xf32>
    %330 = vector.shape_cast %329 : vector<1x1x32xf32> to vector<1x32xf32>
    %cst_63 = arith.constant 1.250000e-01 : f32
    %331 = vector.broadcast %cst_63 : f32 to vector<1x32xf32>
    %332 = arith.mulf %331, %328 : vector<1x32xf32>
    %cst_64 = arith.constant 8.750000e-01 : f32
    %333 = vector.broadcast %cst_64 : f32 to vector<1x32xf32>
    %334 = arith.mulf %333, %330 : vector<1x32xf32>
    %335 = arith.addf %332, %334 : vector<1x32xf32>
    %336 = vector.extract_strided_slice %295 {offsets = [0, 1, 0], sizes = [1, 1, 32], strides = [1, 1, 1]} : vector<1x8x32xf32> to vector<1x1x32xf32>
    %337 = vector.shape_cast %336 : vector<1x1x32xf32> to vector<1x32xf32>
    %338 = vector.extract_strided_slice %295 {offsets = [0, 2, 0], sizes = [1, 1, 32], strides = [1, 1, 1]} : vector<1x8x32xf32> to vector<1x1x32xf32>
    %339 = vector.shape_cast %338 : vector<1x1x32xf32> to vector<1x32xf32>
    %cst_65 = arith.constant 8.750000e-01 : f32
    %340 = vector.broadcast %cst_65 : f32 to vector<1x32xf32>
    %341 = arith.mulf %340, %337 : vector<1x32xf32>
    %cst_66 = arith.constant 1.250000e-01 : f32
    %342 = vector.broadcast %cst_66 : f32 to vector<1x32xf32>
    %343 = arith.mulf %342, %339 : vector<1x32xf32>
    %344 = arith.addf %341, %343 : vector<1x32xf32>
    %345 = vector.extract_strided_slice %295 {offsets = [0, 1, 0], sizes = [1, 1, 32], strides = [1, 1, 1]} : vector<1x8x32xf32> to vector<1x1x32xf32>
    %346 = vector.shape_cast %345 : vector<1x1x32xf32> to vector<1x32xf32>
    %347 = vector.extract_strided_slice %295 {offsets = [0, 2, 0], sizes = [1, 1, 32], strides = [1, 1, 1]} : vector<1x8x32xf32> to vector<1x1x32xf32>
    %348 = vector.shape_cast %347 : vector<1x1x32xf32> to vector<1x32xf32>
    %cst_67 = arith.constant 6.250000e-01 : f32
    %349 = vector.broadcast %cst_67 : f32 to vector<1x32xf32>
    %350 = arith.mulf %349, %346 : vector<1x32xf32>
    %cst_68 = arith.constant 3.750000e-01 : f32
    %351 = vector.broadcast %cst_68 : f32 to vector<1x32xf32>
    %352 = arith.mulf %351, %348 : vector<1x32xf32>
    %353 = arith.addf %350, %352 : vector<1x32xf32>
    %354 = vector.extract_strided_slice %295 {offsets = [0, 1, 0], sizes = [1, 1, 32], strides = [1, 1, 1]} : vector<1x8x32xf32> to vector<1x1x32xf32>
    %355 = vector.shape_cast %354 : vector<1x1x32xf32> to vector<1x32xf32>
    %356 = vector.extract_strided_slice %295 {offsets = [0, 2, 0], sizes = [1, 1, 32], strides = [1, 1, 1]} : vector<1x8x32xf32> to vector<1x1x32xf32>
    %357 = vector.shape_cast %356 : vector<1x1x32xf32> to vector<1x32xf32>
    %cst_69 = arith.constant 3.750000e-01 : f32
    %358 = vector.broadcast %cst_69 : f32 to vector<1x32xf32>
    %359 = arith.mulf %358, %355 : vector<1x32xf32>
    %cst_70 = arith.constant 6.250000e-01 : f32
    %360 = vector.broadcast %cst_70 : f32 to vector<1x32xf32>
    %361 = arith.mulf %360, %357 : vector<1x32xf32>
    %362 = arith.addf %359, %361 : vector<1x32xf32>
    %363 = vector.extract_strided_slice %295 {offsets = [0, 1, 0], sizes = [1, 1, 32], strides = [1, 1, 1]} : vector<1x8x32xf32> to vector<1x1x32xf32>
    %364 = vector.shape_cast %363 : vector<1x1x32xf32> to vector<1x32xf32>
    %365 = vector.extract_strided_slice %295 {offsets = [0, 2, 0], sizes = [1, 1, 32], strides = [1, 1, 1]} : vector<1x8x32xf32> to vector<1x1x32xf32>
    %366 = vector.shape_cast %365 : vector<1x1x32xf32> to vector<1x32xf32>
    %cst_71 = arith.constant 1.250000e-01 : f32
    %367 = vector.broadcast %cst_71 : f32 to vector<1x32xf32>
    %368 = arith.mulf %367, %364 : vector<1x32xf32>
    %cst_72 = arith.constant 8.750000e-01 : f32
    %369 = vector.broadcast %cst_72 : f32 to vector<1x32xf32>
    %370 = arith.mulf %369, %366 : vector<1x32xf32>
    %371 = arith.addf %368, %370 : vector<1x32xf32>
    %372 = vector.extract_strided_slice %295 {offsets = [0, 2, 0], sizes = [1, 1, 32], strides = [1, 1, 1]} : vector<1x8x32xf32> to vector<1x1x32xf32>
    %373 = vector.shape_cast %372 : vector<1x1x32xf32> to vector<1x32xf32>
    %374 = vector.extract_strided_slice %295 {offsets = [0, 3, 0], sizes = [1, 1, 32], strides = [1, 1, 1]} : vector<1x8x32xf32> to vector<1x1x32xf32>
    %375 = vector.shape_cast %374 : vector<1x1x32xf32> to vector<1x32xf32>
    %cst_73 = arith.constant 8.750000e-01 : f32
    %376 = vector.broadcast %cst_73 : f32 to vector<1x32xf32>
    %377 = arith.mulf %376, %373 : vector<1x32xf32>
    %cst_74 = arith.constant 1.250000e-01 : f32
    %378 = vector.broadcast %cst_74 : f32 to vector<1x32xf32>
    %379 = arith.mulf %378, %375 : vector<1x32xf32>
    %380 = arith.addf %377, %379 : vector<1x32xf32>
    %381 = vector.extract_strided_slice %295 {offsets = [0, 2, 0], sizes = [1, 1, 32], strides = [1, 1, 1]} : vector<1x8x32xf32> to vector<1x1x32xf32>
    %382 = vector.shape_cast %381 : vector<1x1x32xf32> to vector<1x32xf32>
    %383 = vector.extract_strided_slice %295 {offsets = [0, 3, 0], sizes = [1, 1, 32], strides = [1, 1, 1]} : vector<1x8x32xf32> to vector<1x1x32xf32>
    %384 = vector.shape_cast %383 : vector<1x1x32xf32> to vector<1x32xf32>
    %cst_75 = arith.constant 6.250000e-01 : f32
    %385 = vector.broadcast %cst_75 : f32 to vector<1x32xf32>
    %386 = arith.mulf %385, %382 : vector<1x32xf32>
    %cst_76 = arith.constant 3.750000e-01 : f32
    %387 = vector.broadcast %cst_76 : f32 to vector<1x32xf32>
    %388 = arith.mulf %387, %384 : vector<1x32xf32>
    %389 = arith.addf %386, %388 : vector<1x32xf32>
    %390 = vector.extract_strided_slice %295 {offsets = [0, 2, 0], sizes = [1, 1, 32], strides = [1, 1, 1]} : vector<1x8x32xf32> to vector<1x1x32xf32>
    %391 = vector.shape_cast %390 : vector<1x1x32xf32> to vector<1x32xf32>
    %392 = vector.extract_strided_slice %295 {offsets = [0, 3, 0], sizes = [1, 1, 32], strides = [1, 1, 1]} : vector<1x8x32xf32> to vector<1x1x32xf32>
    %393 = vector.shape_cast %392 : vector<1x1x32xf32> to vector<1x32xf32>
    %cst_77 = arith.constant 3.750000e-01 : f32
    %394 = vector.broadcast %cst_77 : f32 to vector<1x32xf32>
    %395 = arith.mulf %394, %391 : vector<1x32xf32>
    %cst_78 = arith.constant 6.250000e-01 : f32
    %396 = vector.broadcast %cst_78 : f32 to vector<1x32xf32>
    %397 = arith.mulf %396, %393 : vector<1x32xf32>
    %398 = arith.addf %395, %397 : vector<1x32xf32>
    %399 = vector.extract_strided_slice %295 {offsets = [0, 2, 0], sizes = [1, 1, 32], strides = [1, 1, 1]} : vector<1x8x32xf32> to vector<1x1x32xf32>
    %400 = vector.shape_cast %399 : vector<1x1x32xf32> to vector<1x32xf32>
    %401 = vector.extract_strided_slice %295 {offsets = [0, 3, 0], sizes = [1, 1, 32], strides = [1, 1, 1]} : vector<1x8x32xf32> to vector<1x1x32xf32>
    %402 = vector.shape_cast %401 : vector<1x1x32xf32> to vector<1x32xf32>
    %cst_79 = arith.constant 1.250000e-01 : f32
    %403 = vector.broadcast %cst_79 : f32 to vector<1x32xf32>
    %404 = arith.mulf %403, %400 : vector<1x32xf32>
    %cst_80 = arith.constant 8.750000e-01 : f32
    %405 = vector.broadcast %cst_80 : f32 to vector<1x32xf32>
    %406 = arith.mulf %405, %402 : vector<1x32xf32>
    %407 = arith.addf %404, %406 : vector<1x32xf32>
    %408 = vector.extract_strided_slice %295 {offsets = [0, 3, 0], sizes = [1, 1, 32], strides = [1, 1, 1]} : vector<1x8x32xf32> to vector<1x1x32xf32>
    %409 = vector.shape_cast %408 : vector<1x1x32xf32> to vector<1x32xf32>
    %410 = vector.extract_strided_slice %295 {offsets = [0, 4, 0], sizes = [1, 1, 32], strides = [1, 1, 1]} : vector<1x8x32xf32> to vector<1x1x32xf32>
    %411 = vector.shape_cast %410 : vector<1x1x32xf32> to vector<1x32xf32>
    %cst_81 = arith.constant 8.750000e-01 : f32
    %412 = vector.broadcast %cst_81 : f32 to vector<1x32xf32>
    %413 = arith.mulf %412, %409 : vector<1x32xf32>
    %cst_82 = arith.constant 1.250000e-01 : f32
    %414 = vector.broadcast %cst_82 : f32 to vector<1x32xf32>
    %415 = arith.mulf %414, %411 : vector<1x32xf32>
    %416 = arith.addf %413, %415 : vector<1x32xf32>
    %417 = vector.extract_strided_slice %295 {offsets = [0, 3, 0], sizes = [1, 1, 32], strides = [1, 1, 1]} : vector<1x8x32xf32> to vector<1x1x32xf32>
    %418 = vector.shape_cast %417 : vector<1x1x32xf32> to vector<1x32xf32>
    %419 = vector.extract_strided_slice %295 {offsets = [0, 4, 0], sizes = [1, 1, 32], strides = [1, 1, 1]} : vector<1x8x32xf32> to vector<1x1x32xf32>
    %420 = vector.shape_cast %419 : vector<1x1x32xf32> to vector<1x32xf32>
    %cst_83 = arith.constant 6.250000e-01 : f32
    %421 = vector.broadcast %cst_83 : f32 to vector<1x32xf32>
    %422 = arith.mulf %421, %418 : vector<1x32xf32>
    %cst_84 = arith.constant 3.750000e-01 : f32
    %423 = vector.broadcast %cst_84 : f32 to vector<1x32xf32>
    %424 = arith.mulf %423, %420 : vector<1x32xf32>
    %425 = arith.addf %422, %424 : vector<1x32xf32>
    %426 = vector.extract_strided_slice %295 {offsets = [0, 3, 0], sizes = [1, 1, 32], strides = [1, 1, 1]} : vector<1x8x32xf32> to vector<1x1x32xf32>
    %427 = vector.shape_cast %426 : vector<1x1x32xf32> to vector<1x32xf32>
    %428 = vector.extract_strided_slice %295 {offsets = [0, 4, 0], sizes = [1, 1, 32], strides = [1, 1, 1]} : vector<1x8x32xf32> to vector<1x1x32xf32>
    %429 = vector.shape_cast %428 : vector<1x1x32xf32> to vector<1x32xf32>
    %cst_85 = arith.constant 3.750000e-01 : f32
    %430 = vector.broadcast %cst_85 : f32 to vector<1x32xf32>
    %431 = arith.mulf %430, %427 : vector<1x32xf32>
    %cst_86 = arith.constant 6.250000e-01 : f32
    %432 = vector.broadcast %cst_86 : f32 to vector<1x32xf32>
    %433 = arith.mulf %432, %429 : vector<1x32xf32>
    %434 = arith.addf %431, %433 : vector<1x32xf32>
    %435 = vector.extract_strided_slice %295 {offsets = [0, 3, 0], sizes = [1, 1, 32], strides = [1, 1, 1]} : vector<1x8x32xf32> to vector<1x1x32xf32>
    %436 = vector.shape_cast %435 : vector<1x1x32xf32> to vector<1x32xf32>
    %437 = vector.extract_strided_slice %295 {offsets = [0, 4, 0], sizes = [1, 1, 32], strides = [1, 1, 1]} : vector<1x8x32xf32> to vector<1x1x32xf32>
    %438 = vector.shape_cast %437 : vector<1x1x32xf32> to vector<1x32xf32>
    %cst_87 = arith.constant 1.250000e-01 : f32
    %439 = vector.broadcast %cst_87 : f32 to vector<1x32xf32>
    %440 = arith.mulf %439, %436 : vector<1x32xf32>
    %cst_88 = arith.constant 8.750000e-01 : f32
    %441 = vector.broadcast %cst_88 : f32 to vector<1x32xf32>
    %442 = arith.mulf %441, %438 : vector<1x32xf32>
    %443 = arith.addf %440, %442 : vector<1x32xf32>
    %444 = vector.extract_strided_slice %295 {offsets = [0, 4, 0], sizes = [1, 1, 32], strides = [1, 1, 1]} : vector<1x8x32xf32> to vector<1x1x32xf32>
    %445 = vector.shape_cast %444 : vector<1x1x32xf32> to vector<1x32xf32>
    %446 = vector.extract_strided_slice %295 {offsets = [0, 5, 0], sizes = [1, 1, 32], strides = [1, 1, 1]} : vector<1x8x32xf32> to vector<1x1x32xf32>
    %447 = vector.shape_cast %446 : vector<1x1x32xf32> to vector<1x32xf32>
    %cst_89 = arith.constant 8.750000e-01 : f32
    %448 = vector.broadcast %cst_89 : f32 to vector<1x32xf32>
    %449 = arith.mulf %448, %445 : vector<1x32xf32>
    %cst_90 = arith.constant 1.250000e-01 : f32
    %450 = vector.broadcast %cst_90 : f32 to vector<1x32xf32>
    %451 = arith.mulf %450, %447 : vector<1x32xf32>
    %452 = arith.addf %449, %451 : vector<1x32xf32>
    %453 = vector.extract_strided_slice %295 {offsets = [0, 4, 0], sizes = [1, 1, 32], strides = [1, 1, 1]} : vector<1x8x32xf32> to vector<1x1x32xf32>
    %454 = vector.shape_cast %453 : vector<1x1x32xf32> to vector<1x32xf32>
    %455 = vector.extract_strided_slice %295 {offsets = [0, 5, 0], sizes = [1, 1, 32], strides = [1, 1, 1]} : vector<1x8x32xf32> to vector<1x1x32xf32>
    %456 = vector.shape_cast %455 : vector<1x1x32xf32> to vector<1x32xf32>
    %cst_91 = arith.constant 6.250000e-01 : f32
    %457 = vector.broadcast %cst_91 : f32 to vector<1x32xf32>
    %458 = arith.mulf %457, %454 : vector<1x32xf32>
    %cst_92 = arith.constant 3.750000e-01 : f32
    %459 = vector.broadcast %cst_92 : f32 to vector<1x32xf32>
    %460 = arith.mulf %459, %456 : vector<1x32xf32>
    %461 = arith.addf %458, %460 : vector<1x32xf32>
    %462 = vector.extract_strided_slice %295 {offsets = [0, 4, 0], sizes = [1, 1, 32], strides = [1, 1, 1]} : vector<1x8x32xf32> to vector<1x1x32xf32>
    %463 = vector.shape_cast %462 : vector<1x1x32xf32> to vector<1x32xf32>
    %464 = vector.extract_strided_slice %295 {offsets = [0, 5, 0], sizes = [1, 1, 32], strides = [1, 1, 1]} : vector<1x8x32xf32> to vector<1x1x32xf32>
    %465 = vector.shape_cast %464 : vector<1x1x32xf32> to vector<1x32xf32>
    %cst_93 = arith.constant 3.750000e-01 : f32
    %466 = vector.broadcast %cst_93 : f32 to vector<1x32xf32>
    %467 = arith.mulf %466, %463 : vector<1x32xf32>
    %cst_94 = arith.constant 6.250000e-01 : f32
    %468 = vector.broadcast %cst_94 : f32 to vector<1x32xf32>
    %469 = arith.mulf %468, %465 : vector<1x32xf32>
    %470 = arith.addf %467, %469 : vector<1x32xf32>
    %471 = vector.extract_strided_slice %295 {offsets = [0, 4, 0], sizes = [1, 1, 32], strides = [1, 1, 1]} : vector<1x8x32xf32> to vector<1x1x32xf32>
    %472 = vector.shape_cast %471 : vector<1x1x32xf32> to vector<1x32xf32>
    %473 = vector.extract_strided_slice %295 {offsets = [0, 5, 0], sizes = [1, 1, 32], strides = [1, 1, 1]} : vector<1x8x32xf32> to vector<1x1x32xf32>
    %474 = vector.shape_cast %473 : vector<1x1x32xf32> to vector<1x32xf32>
    %cst_95 = arith.constant 1.250000e-01 : f32
    %475 = vector.broadcast %cst_95 : f32 to vector<1x32xf32>
    %476 = arith.mulf %475, %472 : vector<1x32xf32>
    %cst_96 = arith.constant 8.750000e-01 : f32
    %477 = vector.broadcast %cst_96 : f32 to vector<1x32xf32>
    %478 = arith.mulf %477, %474 : vector<1x32xf32>
    %479 = arith.addf %476, %478 : vector<1x32xf32>
    %480 = vector.extract_strided_slice %295 {offsets = [0, 5, 0], sizes = [1, 1, 32], strides = [1, 1, 1]} : vector<1x8x32xf32> to vector<1x1x32xf32>
    %481 = vector.shape_cast %480 : vector<1x1x32xf32> to vector<1x32xf32>
    %482 = vector.extract_strided_slice %295 {offsets = [0, 6, 0], sizes = [1, 1, 32], strides = [1, 1, 1]} : vector<1x8x32xf32> to vector<1x1x32xf32>
    %483 = vector.shape_cast %482 : vector<1x1x32xf32> to vector<1x32xf32>
    %cst_97 = arith.constant 8.750000e-01 : f32
    %484 = vector.broadcast %cst_97 : f32 to vector<1x32xf32>
    %485 = arith.mulf %484, %481 : vector<1x32xf32>
    %cst_98 = arith.constant 1.250000e-01 : f32
    %486 = vector.broadcast %cst_98 : f32 to vector<1x32xf32>
    %487 = arith.mulf %486, %483 : vector<1x32xf32>
    %488 = arith.addf %485, %487 : vector<1x32xf32>
    %489 = vector.extract_strided_slice %295 {offsets = [0, 5, 0], sizes = [1, 1, 32], strides = [1, 1, 1]} : vector<1x8x32xf32> to vector<1x1x32xf32>
    %490 = vector.shape_cast %489 : vector<1x1x32xf32> to vector<1x32xf32>
    %491 = vector.extract_strided_slice %295 {offsets = [0, 6, 0], sizes = [1, 1, 32], strides = [1, 1, 1]} : vector<1x8x32xf32> to vector<1x1x32xf32>
    %492 = vector.shape_cast %491 : vector<1x1x32xf32> to vector<1x32xf32>
    %cst_99 = arith.constant 6.250000e-01 : f32
    %493 = vector.broadcast %cst_99 : f32 to vector<1x32xf32>
    %494 = arith.mulf %493, %490 : vector<1x32xf32>
    %cst_100 = arith.constant 3.750000e-01 : f32
    %495 = vector.broadcast %cst_100 : f32 to vector<1x32xf32>
    %496 = arith.mulf %495, %492 : vector<1x32xf32>
    %497 = arith.addf %494, %496 : vector<1x32xf32>
    %498 = vector.extract_strided_slice %295 {offsets = [0, 5, 0], sizes = [1, 1, 32], strides = [1, 1, 1]} : vector<1x8x32xf32> to vector<1x1x32xf32>
    %499 = vector.shape_cast %498 : vector<1x1x32xf32> to vector<1x32xf32>
    %500 = vector.extract_strided_slice %295 {offsets = [0, 6, 0], sizes = [1, 1, 32], strides = [1, 1, 1]} : vector<1x8x32xf32> to vector<1x1x32xf32>
    %501 = vector.shape_cast %500 : vector<1x1x32xf32> to vector<1x32xf32>
    %cst_101 = arith.constant 3.750000e-01 : f32
    %502 = vector.broadcast %cst_101 : f32 to vector<1x32xf32>
    %503 = arith.mulf %502, %499 : vector<1x32xf32>
    %cst_102 = arith.constant 6.250000e-01 : f32
    %504 = vector.broadcast %cst_102 : f32 to vector<1x32xf32>
    %505 = arith.mulf %504, %501 : vector<1x32xf32>
    %506 = arith.addf %503, %505 : vector<1x32xf32>
    %507 = vector.extract_strided_slice %295 {offsets = [0, 5, 0], sizes = [1, 1, 32], strides = [1, 1, 1]} : vector<1x8x32xf32> to vector<1x1x32xf32>
    %508 = vector.shape_cast %507 : vector<1x1x32xf32> to vector<1x32xf32>
    %509 = vector.extract_strided_slice %295 {offsets = [0, 6, 0], sizes = [1, 1, 32], strides = [1, 1, 1]} : vector<1x8x32xf32> to vector<1x1x32xf32>
    %510 = vector.shape_cast %509 : vector<1x1x32xf32> to vector<1x32xf32>
    %cst_103 = arith.constant 1.250000e-01 : f32
    %511 = vector.broadcast %cst_103 : f32 to vector<1x32xf32>
    %512 = arith.mulf %511, %508 : vector<1x32xf32>
    %cst_104 = arith.constant 8.750000e-01 : f32
    %513 = vector.broadcast %cst_104 : f32 to vector<1x32xf32>
    %514 = arith.mulf %513, %510 : vector<1x32xf32>
    %515 = arith.addf %512, %514 : vector<1x32xf32>
    %516 = vector.extract_strided_slice %295 {offsets = [0, 6, 0], sizes = [1, 1, 32], strides = [1, 1, 1]} : vector<1x8x32xf32> to vector<1x1x32xf32>
    %517 = vector.shape_cast %516 : vector<1x1x32xf32> to vector<1x32xf32>
    %518 = vector.extract_strided_slice %295 {offsets = [0, 7, 0], sizes = [1, 1, 32], strides = [1, 1, 1]} : vector<1x8x32xf32> to vector<1x1x32xf32>
    %519 = vector.shape_cast %518 : vector<1x1x32xf32> to vector<1x32xf32>
    %cst_105 = arith.constant 8.750000e-01 : f32
    %520 = vector.broadcast %cst_105 : f32 to vector<1x32xf32>
    %521 = arith.mulf %520, %517 : vector<1x32xf32>
    %cst_106 = arith.constant 1.250000e-01 : f32
    %522 = vector.broadcast %cst_106 : f32 to vector<1x32xf32>
    %523 = arith.mulf %522, %519 : vector<1x32xf32>
    %524 = arith.addf %521, %523 : vector<1x32xf32>
    %525 = vector.extract_strided_slice %295 {offsets = [0, 6, 0], sizes = [1, 1, 32], strides = [1, 1, 1]} : vector<1x8x32xf32> to vector<1x1x32xf32>
    %526 = vector.shape_cast %525 : vector<1x1x32xf32> to vector<1x32xf32>
    %527 = vector.extract_strided_slice %295 {offsets = [0, 7, 0], sizes = [1, 1, 32], strides = [1, 1, 1]} : vector<1x8x32xf32> to vector<1x1x32xf32>
    %528 = vector.shape_cast %527 : vector<1x1x32xf32> to vector<1x32xf32>
    %cst_107 = arith.constant 6.250000e-01 : f32
    %529 = vector.broadcast %cst_107 : f32 to vector<1x32xf32>
    %530 = arith.mulf %529, %526 : vector<1x32xf32>
    %cst_108 = arith.constant 3.750000e-01 : f32
    %531 = vector.broadcast %cst_108 : f32 to vector<1x32xf32>
    %532 = arith.mulf %531, %528 : vector<1x32xf32>
    %533 = arith.addf %530, %532 : vector<1x32xf32>
    %534 = vector.extract_strided_slice %295 {offsets = [0, 6, 0], sizes = [1, 1, 32], strides = [1, 1, 1]} : vector<1x8x32xf32> to vector<1x1x32xf32>
    %535 = vector.shape_cast %534 : vector<1x1x32xf32> to vector<1x32xf32>
    %536 = vector.extract_strided_slice %295 {offsets = [0, 7, 0], sizes = [1, 1, 32], strides = [1, 1, 1]} : vector<1x8x32xf32> to vector<1x1x32xf32>
    %537 = vector.shape_cast %536 : vector<1x1x32xf32> to vector<1x32xf32>
    %cst_109 = arith.constant 3.750000e-01 : f32
    %538 = vector.broadcast %cst_109 : f32 to vector<1x32xf32>
    %539 = arith.mulf %538, %535 : vector<1x32xf32>
    %cst_110 = arith.constant 6.250000e-01 : f32
    %540 = vector.broadcast %cst_110 : f32 to vector<1x32xf32>
    %541 = arith.mulf %540, %537 : vector<1x32xf32>
    %542 = arith.addf %539, %541 : vector<1x32xf32>
    %543 = vector.extract_strided_slice %295 {offsets = [0, 6, 0], sizes = [1, 1, 32], strides = [1, 1, 1]} : vector<1x8x32xf32> to vector<1x1x32xf32>
    %544 = vector.shape_cast %543 : vector<1x1x32xf32> to vector<1x32xf32>
    %545 = vector.extract_strided_slice %295 {offsets = [0, 7, 0], sizes = [1, 1, 32], strides = [1, 1, 1]} : vector<1x8x32xf32> to vector<1x1x32xf32>
    %546 = vector.shape_cast %545 : vector<1x1x32xf32> to vector<1x32xf32>
    %cst_111 = arith.constant 1.250000e-01 : f32
    %547 = vector.broadcast %cst_111 : f32 to vector<1x32xf32>
    %548 = arith.mulf %547, %544 : vector<1x32xf32>
    %cst_112 = arith.constant 8.750000e-01 : f32
    %549 = vector.broadcast %cst_112 : f32 to vector<1x32xf32>
    %550 = arith.mulf %549, %546 : vector<1x32xf32>
    %551 = arith.addf %548, %550 : vector<1x32xf32>
    %552 = vector.extract_strided_slice %295 {offsets = [0, 7, 0], sizes = [1, 1, 32], strides = [1, 1, 1]} : vector<1x8x32xf32> to vector<1x1x32xf32>
    %553 = vector.shape_cast %552 : vector<1x1x32xf32> to vector<1x32xf32>
    %554 = vector.extract_strided_slice %295 {offsets = [0, 7, 0], sizes = [1, 1, 32], strides = [1, 1, 1]} : vector<1x8x32xf32> to vector<1x1x32xf32>
    %555 = vector.shape_cast %554 : vector<1x1x32xf32> to vector<1x32xf32>
    %556 = vector.shape_cast %297 : vector<1x32xf32> to vector<1x1x32xf32>
    %557 = vector.shape_cast %299 : vector<1x32xf32> to vector<1x1x32xf32>
    %558 = vector.shape_cast %308 : vector<1x32xf32> to vector<1x1x32xf32>
    %559 = vector.shape_cast %317 : vector<1x32xf32> to vector<1x1x32xf32>
    %560 = vector.shape_cast %326 : vector<1x32xf32> to vector<1x1x32xf32>
    %561 = vector.shape_cast %335 : vector<1x32xf32> to vector<1x1x32xf32>
    %562 = vector.shape_cast %344 : vector<1x32xf32> to vector<1x1x32xf32>
    %563 = vector.shape_cast %353 : vector<1x32xf32> to vector<1x1x32xf32>
    %564 = vector.shape_cast %362 : vector<1x32xf32> to vector<1x1x32xf32>
    %565 = vector.shape_cast %371 : vector<1x32xf32> to vector<1x1x32xf32>
    %566 = vector.shape_cast %380 : vector<1x32xf32> to vector<1x1x32xf32>
    %567 = vector.shape_cast %389 : vector<1x32xf32> to vector<1x1x32xf32>
    %568 = vector.shape_cast %398 : vector<1x32xf32> to vector<1x1x32xf32>
    %569 = vector.shape_cast %407 : vector<1x32xf32> to vector<1x1x32xf32>
    %570 = vector.shape_cast %416 : vector<1x32xf32> to vector<1x1x32xf32>
    %571 = vector.shape_cast %425 : vector<1x32xf32> to vector<1x1x32xf32>
    %572 = vector.shape_cast %434 : vector<1x32xf32> to vector<1x1x32xf32>
    %573 = vector.shape_cast %443 : vector<1x32xf32> to vector<1x1x32xf32>
    %574 = vector.shape_cast %452 : vector<1x32xf32> to vector<1x1x32xf32>
    %575 = vector.shape_cast %461 : vector<1x32xf32> to vector<1x1x32xf32>
    %576 = vector.shape_cast %470 : vector<1x32xf32> to vector<1x1x32xf32>
    %577 = vector.shape_cast %479 : vector<1x32xf32> to vector<1x1x32xf32>
    %578 = vector.shape_cast %488 : vector<1x32xf32> to vector<1x1x32xf32>
    %579 = vector.shape_cast %497 : vector<1x32xf32> to vector<1x1x32xf32>
    %580 = vector.shape_cast %506 : vector<1x32xf32> to vector<1x1x32xf32>
    %581 = vector.shape_cast %515 : vector<1x32xf32> to vector<1x1x32xf32>
    %582 = vector.shape_cast %524 : vector<1x32xf32> to vector<1x1x32xf32>
    %583 = vector.shape_cast %533 : vector<1x32xf32> to vector<1x1x32xf32>
    %584 = vector.shape_cast %542 : vector<1x32xf32> to vector<1x1x32xf32>
    %585 = vector.shape_cast %551 : vector<1x32xf32> to vector<1x1x32xf32>
    %586 = vector.shape_cast %553 : vector<1x32xf32> to vector<1x1x32xf32>
    %587 = vector.shape_cast %555 : vector<1x32xf32> to vector<1x1x32xf32>
    %588 = tpu.concatenate %556, %557, %558, %559, %560, %561, %562, %563, %564, %565, %566, %567, %568, %569, %570, %571 in 1 : vector<1x1x32xf32>, vector<1x1x32xf32>, vector<1x1x32xf32>, vector<1x1x32xf32>, vector<1x1x32xf32>, vector<1x1x32xf32>, vector<1x1x32xf32>, vector<1x1x32xf32>, vector<1x1x32xf32>, vector<1x1x32xf32>, vector<1x1x32xf32>, vector<1x1x32xf32>, vector<1x1x32xf32>, vector<1x1x32xf32>, vector<1x1x32xf32>, vector<1x1x32xf32> -> vector<1x16x32xf32>
    %589 = tpu.concatenate %572, %573, %574, %575, %576, %577, %578, %579, %580, %581, %582, %583, %584, %585, %586, %587 in 1 : vector<1x1x32xf32>, vector<1x1x32xf32>, vector<1x1x32xf32>, vector<1x1x32xf32>, vector<1x1x32xf32>, vector<1x1x32xf32>, vector<1x1x32xf32>, vector<1x1x32xf32>, vector<1x1x32xf32>, vector<1x1x32xf32>, vector<1x1x32xf32>, vector<1x1x32xf32>, vector<1x1x32xf32>, vector<1x1x32xf32>, vector<1x1x32xf32>, vector<1x1x32xf32> -> vector<1x16x32xf32>
    %590 = tpu.concatenate %588, %589 in 1 : vector<1x16x32xf32>, vector<1x16x32xf32> -> vector<1x32x32xf32>
    %c0_113 = arith.constant 0 : index
    %c0_114 = arith.constant 0 : index
    %c0_115 = arith.constant 0 : index
    %591 = vector.load %arg2[%c0_113, %c0_114, %c0_115] : memref<1x32x32xf32, #tpu.memory_space<vmem>>, vector<1x32x32xf32>
    tpu.vector_store %arg2[%c0_113, %c0_114, %c0_115], %590 {strides = array<i32>} : memref<1x32x32xf32, #tpu.memory_space<vmem>>, vector<1x32x32xf32>,
    return
  }
  func.func @transform_0(%arg0: i32) -> (i32, i32, i32) {
    %c0_i32 = arith.constant 0 : i32
    %c0_i32_0 = arith.constant 0 : i32
    %c0_i32_1 = arith.constant 0 : i32
    return %arg0, %c0_i32, %c0_i32_0 : i32, i32, i32
  }
  func.func @transform_1(%arg0: i32) -> (i32, i32, i32) {
    %c0_i32 = arith.constant 0 : i32
    %c0_i32_0 = arith.constant 0 : i32
    %c0_i32_1 = arith.constant 0 : i32
    return %arg0, %c0_i32, %c0_i32_0 : i32, i32, i32
  }
}

</mosaic_0001>

<bundles_post_ra>
// kernel: leipnet_forward.21
= control target key start
LH: loop header
LB: loop body
LE: loop exit
PB: predicated region body
PF: predicated region fallthrough
CT: control target
= control target key end

     0   :  { %s1499_s12 = smov 0   ;;  %s1501_s13 = smov 0   ;;  %s1636_s0 = inlined_call_operand.vmem [shape: bf16[512,128], index: 0, kind: input, shape index: {}]   ;;  %s1637_s1 = inlined_call_operand.vmem [shape: bf16[128,128], index: 1, kind: input, shape index: {}]   ;;  %s1638_s2 = inlined_call_operand.vmem [shape: f32[1,128], index: 2, kind: input, shape index: {}]   ;;  %s1639_s3 = inlined_call_operand.vmem [shape: bf16[512,128], index: 3, kind: output, shape index: {}]  }
   0x1   :  { %s1503_s14 = smov 0  }
   0x2 LB: > { %s32_s15 = sadd.s32 1, %s1473_s13  ;;  %p1128_p0 = scmp.ge.s32.totalorder %s1477_s14, 1  ;;  %s1477_s14 = sphi %s1503_s14, %s13_s14   ;;  %s1473_s13 = sphi %s1501_s13, %s1641_s13   ;;  %s1469_s12 = sphi %s1499_s12, %s1640_s12  }
   0x3   : > { %p34_p1 = scmp.ge.s32.totalorder %s32_s15, 2  ;;  %p188_p2 = scmp.lt.s32.totalorder %s1477_s14, 3 }
   0x5   : > { %s1643_s15 = smov (%p34_p1, %s32_s15), 0  ;;  %p189_p3 = pnand %p1128_p0, %p188_p2 }
   0x6   : > { %v1431_v0 = vld [vmem:[%s1637_s1] sm:$0xff] (!%p189_p3)   ;;  %s1129_s18 = sshll.u32 (!%p189_p3), %s1469_s12, 5  ;;  %v1432_v1 = vld [vmem:[%s1637_s1 + $0x8] sm:$0xff] (!%p189_p3)   ;;  %v1433_v2 = vld [vmem:[%s1637_s1 + $0x10] sm:$0xff] (!%p189_p3)  }
   0x7   : > { %192 = sbr.rel (%p189_p3) target bundleno = 285 (0x11d), region = 32  ;;  %p230_p4 = scmp.lt.s32.totalorder (!%p189_p3), %s1129_s18, 63  ;;  %1343 = vmatprep.subr.bf16.mxu0 (!%p189_p3), %v1431_v0  ;;  %1391 = vmatprep.subr.bf16.mxu1 (!%p189_p3), %v1431_v0  ;;  %v1434_v3 = vld [vmem:[%s1637_s1 + $0x18] sm:$0xff] (!%p189_p3)   ;;  %v1435_v6 = vld [vmem:[%s1637_s1 + $0x20] sm:$0xff] (!%p189_p3)   ;;  %v1436_v7 = vld [vmem:[%s1637_s1 + $0x28] sm:$0xff] (!%p189_p3)  }
   0x8   : > { %1344 = vmatpush3.bf16.msra.mxu0 (!%p189_p3), %v1431_v0  ;;  %1399 = vmatpush3.bf16.msra.mxu1 (!%p189_p3), %v1431_v0  ;;  %v1437_v8 = vld [vmem:[%s1637_s1 + $0x30] sm:$0xff] (!%p189_p3)   ;;  %v1438_v9 = vld [vmem:[%s1637_s1 + $0x38] sm:$0xff] (!%p189_p3)   ;;  %v1570_v24 = vld [vmem:[%s1638_s2] ss:$0 sm:$0xff] (!%p189_p3) }
   0x9   : > { %1345 = vmatprep.subr.bf16.mxu0 (!%p189_p3), %v1432_v1  ;;  %1392 = vmatprep.subr.bf16.mxu1 (!%p189_p3), %v1432_v1 }
   0xc   : > { %1346 = vmatpush3.bf16.msra.mxu0 (!%p189_p3), %v1432_v1  ;;  %1400 = vmatpush3.bf16.msra.mxu1 (!%p189_p3), %v1432_v1 }
   0xd   : > { %1347 = vmatprep.subr.bf16.mxu0 (!%p189_p3), %v1433_v2  ;;  %1393 = vmatprep.subr.bf16.mxu1 (!%p189_p3), %v1433_v2 }
   0xe   : > { %s1645_s18 = smov (!%p230_p4, %s1129_s18), 63 }
   0xf   : > { %s1130_s23 = sshll.u32 %s1645_s18, 2 }
  0x10   : > { %s1534_s26 = scalar_lea.vmem %s1636_s0, %s1130_s23  ;;  %1348 = vmatpush3.bf16.msra.mxu0 %v1433_v2  ;;  %1401 = vmatpush3.bf16.msra.mxu1 %v1433_v2  ;;  %s1585_s17 = scalar_lea.vmem %s1639_s3, %s1130_s23 }
  0x11   : > { %v1439_v4 = vld [vmem:[%s1534_s26] sm:$0xff]   ;;  %1349 = vmatprep.subr.bf16.mxu0 %v1434_v3  ;;  %1394 = vmatprep.subr.bf16.mxu1 %v1434_v3  ;;  %v1441_v10 = vld [vmem:[%s1534_s26 + $0x8] sm:$0xff]   ;;  %v1443_v12 = vld [vmem:[%s1534_s26 + $0x10] sm:$0xff]  }
  0x12   : > { %v1440_v5 = vld [vmem:[%s1534_s26 + $0x40] sm:$0xff]   ;;  %1359 = vmatprep.mubr.bf16.mxu0 %v1439_v4  ;;  %v1442_v11 = vld [vmem:[%s1534_s26 + $0x48] sm:$0xff]   ;;  %v1444_v13 = vld [vmem:[%s1534_s26 + $0x50] sm:$0xff]  }
  0x13   : > { %1375 = vmatprep.mubr.bf16.mxu1 %v1440_v5  ;;  %v1445_v14 = vld [vmem:[%s1534_s26 + $0x18] sm:$0xff]   ;;  %v1447_v16 = vld [vmem:[%s1534_s26 + $0x20] sm:$0xff]   ;;  %v1449_v18 = vld [vmem:[%s1534_s26 + $0x28] sm:$0xff]  }
  0x14   : > { %1350 = vmatpush3.bf16.msra.mxu0 %v1434_v3  ;;  %1402 = vmatpush3.bf16.msra.mxu1 %v1434_v3  ;;  %v1446_v15 = vld [vmem:[%s1534_s26 + $0x58] sm:$0xff]   ;;  %v1448_v17 = vld [vmem:[%s1534_s26 + $0x60] sm:$0xff]   ;;  %v1450_v19 = vld [vmem:[%s1534_s26 + $0x68] sm:$0xff]  }
  0x15   : > { %1351 = vmatprep.subr.bf16.mxu0 %v1435_v6  ;;  %1395 = vmatprep.subr.bf16.mxu1 %v1435_v6  ;;  %v1451_v20 = vld [vmem:[%s1534_s26 + $0x30] sm:$0xff]   ;;  %v1453_v22 = vld [vmem:[%s1534_s26 + $0x38] sm:$0xff]  }
  0x16   : > { %v1452_v21 = vld [vmem:[%s1534_s26 + $0x70] sm:$0xff]   ;;  %v1454_v23 = vld [vmem:[%s1534_s26 + $0x78] sm:$0xff]  }
  0x18   : > { %1352 = vmatpush3.bf16.msra.mxu0 %v1435_v6  ;;  %1403 = vmatpush3.bf16.msra.mxu1 %v1435_v6 }
  0x19   : > { %1353 = vmatprep.subr.bf16.mxu0 %v1436_v7  ;;  %1396 = vmatprep.subr.bf16.mxu1 %v1436_v7 }
  0x1c   : > { %1354 = vmatpush3.bf16.msra.mxu0 %v1436_v7  ;;  %1404 = vmatpush3.bf16.msra.mxu1 %v1436_v7 }
  0x1d   : > { %1355 = vmatprep.subr.bf16.mxu0 %v1437_v8  ;;  %1397 = vmatprep.subr.bf16.mxu1 %v1437_v8 }
  0x20   : > { %1356 = vmatpush3.bf16.msra.mxu0 %v1437_v8  ;;  %1405 = vmatpush3.bf16.msra.mxu1 %v1437_v8 }
  0x21   : > { %1357 = vmatprep.subr.bf16.mxu0 %v1438_v9  ;;  %1398 = vmatprep.subr.bf16.mxu1 %v1438_v9 }
  0x24   : > { %1358 = vmatpush3.bf16.msra.mxu0 %v1438_v9  ;;  %1406 = vmatpush3.bf16.msra.mxu1 %v1438_v9 }
  0x27   : > { %1360 = vmatmul.mubr.bf16.vlgmr.msra.gmra.mrb[0].mxu0 %v1441_v10  ;;  %1376 = vmatmul.mubr.bf16.vlgmr.msra.gmra.mrb[0].mxu1 %v1442_v11 }
  0x28   : > { %1363 = vmatprep.mubr.bf16.mxu0 %v1443_v12  ;;  %1379 = vmatprep.mubr.bf16.mxu1 %v1444_v13 }
  0x2f   : > { %1364 = vmatmul.mubr.bf16.gmra.mrb[4].mxu0 %v1445_v14  ;;  %1380 = vmatmul.mubr.bf16.gmra.mrb[4].mxu1 %v1446_v15 }
  0x30   : > { %1367 = vmatprep.mubr.bf16.mxu0 %v1447_v16  ;;  %1383 = vmatprep.mubr.bf16.mxu1 %v1448_v17 }
  0x37   : > { %1368 = vmatmul.mubr.bf16.gmra.mrb[8].mxu0 %v1449_v18  ;;  %1384 = vmatmul.mubr.bf16.gmra.mrb[8].mxu1 %v1450_v19 }
  0x38   : > { %1371 = vmatprep.mubr.bf16.mxu0 %v1451_v20  ;;  %1387 = vmatprep.mubr.bf16.mxu1 %v1452_v21 }
  0x3f   : > { %1372 = vmatmul.mubr.bf16.gmra.mrb[12].mxu0 %v1453_v22  ;;  %1388 = vmatmul.mubr.bf16.gmra.mrb[12].mxu1 %v1454_v23 }
  0xfa   : > { %v1361_v25 = vpop.f32.mrb[0].mxu0  ;;  %v1377_v26 = vpop.f32.mrb[0].mxu1 }
  0xfb   : > { %v789_v27 = vadd.f32 %v1361_v25, %v1570_v24  ;;  %v805_v28 = vadd.f32 %v1377_v26, %v1570_v24  ;;  %v554_v29 = vpop.f32.mrb[1].mxu0  ;;  %v618_v30 = vpop.f32.mrb[1].mxu1 }
  0xfc   : > { %v787_v31 = vadd.f32 %v1570_v24, %v554_v29  ;;  %v803_v32 = vadd.f32 %v1570_v24, %v618_v30  ;;  %v1362_v33 = vpop.f32.mrb[2].mxu0  ;;  %v1378_v34 = vpop.f32.mrb[2].mxu1 }
  0xfd   : > { %v790_v35 = vadd.f32 %v1362_v33, %v1570_v24  ;;  %v806_v36 = vadd.f32 %v1378_v34, %v1570_v24  ;;  %v557_v37 = vpop.f32.mrb[3].mxu0  ;;  %v621_v38 = vpop.f32.mrb[3].mxu1  ;;  %v821_v41 = vmax.f32 %v789_v27, 0.0  ;;  %v837_v42 = vmax.f32 %v805_v28, 0.0 }
  0xfe   : > { %v788_v39 = vadd.f32 %v1570_v24, %v557_v37  ;;  %v804_v40 = vadd.f32 %v1570_v24, %v621_v38  ;;  %v819_v45 = vmax.f32 %v787_v31, 0.0  ;;  %v835_v46 = vmax.f32 %v803_v32, 0.0 }
  0xff   : > { %v822_v43 = vmax.f32 %v790_v35, 0.0  ;;  %v838_v44 = vmax.f32 %v806_v36, 0.0 }
 0x100   : > { %v820_v47 = vmax.f32 %v788_v39, 0.0  ;;  %v836_v48 = vmax.f32 %v804_v40, 0.0 }
 0x101   : > { %v1232_v49 = vpack.c.bf16 %v822_v43, %v821_v41  ;;  %v1272_v50 = vpack.c.bf16 %v838_v44, %v837_v42 }
 0x102   : > { %v1227_v51 = vpack.c.bf16 %v820_v47, %v819_v45  ;;  %v1267_v52 = vpack.c.bf16 %v836_v48, %v835_v46  ;;  %v1365_v53 = vpop.f32.mrb[4].mxu0  ;;  %v1381_v54 = vpop.f32.mrb[4].mxu1 }
 0x103   : > { %1304 = vst [vmem:[%s1585_s17 + $0x8] sm:$0xff] %v1232_v49   ;;  %1312 = vst [vmem:[%s1585_s17 + $0x48] sm:$0xff] %v1272_v50   ;;  %v793_v55 = vadd.f32 %v1365_v53, %v1570_v24  ;;  %v809_v56 = vadd.f32 %v1381_v54, %v1570_v24  ;;  %v570_v57 = vpop.f32.mrb[5].mxu0  ;;  %v634_v58 = vpop.f32.mrb[5].mxu1 }
 0x104   : > { %1228 = vst [vmem:[%s1585_s17] sm:$0xff] %v1227_v51   ;;  %1311 = vst [vmem:[%s1585_s17 + $0x40] sm:$0xff] %v1267_v52   ;;  %v791_v59 = vadd.f32 %v1570_v24, %v570_v57  ;;  %v807_v60 = vadd.f32 %v1570_v24, %v634_v58  ;;  %v1366_v61 = vpop.f32.mrb[6].mxu0  ;;  %v1382_v62 = vpop.f32.mrb[6].mxu1 }
 0x105   : > { %v794_v63 = vadd.f32 %v1366_v61, %v1570_v24  ;;  %v810_v0 = vadd.f32 %v1382_v62, %v1570_v24  ;;  %v573_v1 = vpop.f32.mrb[7].mxu0  ;;  %v637_v2 = vpop.f32.mrb[7].mxu1  ;;  %v825_v5 = vmax.f32 %v793_v55, 0.0  ;;  %v841_v6 = vmax.f32 %v809_v56, 0.0 }
 0x106   : > { %v792_v3 = vadd.f32 %v1570_v24, %v573_v1  ;;  %v808_v4 = vadd.f32 %v1570_v24, %v637_v2  ;;  %v823_v9 = vmax.f32 %v791_v59, 0.0  ;;  %v839_v10 = vmax.f32 %v807_v60, 0.0 }
 0x107   : > { %v826_v7 = vmax.f32 %v794_v63, 0.0  ;;  %v842_v8 = vmax.f32 %v810_v0, 0.0 }
 0x108   : > { %v824_v11 = vmax.f32 %v792_v3, 0.0  ;;  %v840_v12 = vmax.f32 %v808_v4, 0.0 }
 0x109   : > { %v1242_v13 = vpack.c.bf16 %v826_v7, %v825_v5  ;;  %v1282_v14 = vpack.c.bf16 %v842_v8, %v841_v6 }
 0x10a   : > { %v1237_v15 = vpack.c.bf16 %v824_v11, %v823_v9  ;;  %v1277_v16 = vpack.c.bf16 %v840_v12, %v839_v10  ;;  %v1369_v17 = vpop.f32.mrb[8].mxu0  ;;  %v1385_v18 = vpop.f32.mrb[8].mxu1 }
 0x10b   : > { %1306 = vst [vmem:[%s1585_s17 + $0x18] sm:$0xff] %v1242_v13   ;;  %1314 = vst [vmem:[%s1585_s17 + $0x58] sm:$0xff] %v1282_v14   ;;  %v797_v19 = vadd.f32 %v1369_v17, %v1570_v24  ;;  %v813_v20 = vadd.f32 %v1385_v18, %v1570_v24  ;;  %v586_v21 = vpop.f32.mrb[9].mxu0  ;;  %v650_v22 = vpop.f32.mrb[9].mxu1 }
 0x10c   : > { %1305 = vst [vmem:[%s1585_s17 + $0x10] sm:$0xff] %v1237_v15   ;;  %1313 = vst [vmem:[%s1585_s17 + $0x50] sm:$0xff] %v1277_v16   ;;  %v795_v23 = vadd.f32 %v1570_v24, %v586_v21  ;;  %v811_v25 = vadd.f32 %v1570_v24, %v650_v22  ;;  %v1370_v26 = vpop.f32.mrb[10].mxu0  ;;  %v1386_v27 = vpop.f32.mrb[10].mxu1 }
 0x10d   : > { %v798_v28 = vadd.f32 %v1370_v26, %v1570_v24  ;;  %v814_v29 = vadd.f32 %v1386_v27, %v1570_v24  ;;  %v589_v30 = vpop.f32.mrb[11].mxu0  ;;  %v653_v31 = vpop.f32.mrb[11].mxu1  ;;  %v829_v34 = vmax.f32 %v797_v19, 0.0  ;;  %v845_v35 = vmax.f32 %v813_v20, 0.0 }
 0x10e   : > { %v796_v32 = vadd.f32 %v1570_v24, %v589_v30  ;;  %v812_v33 = vadd.f32 %v1570_v24, %v653_v31  ;;  %v827_v38 = vmax.f32 %v795_v23, 0.0  ;;  %v843_v39 = vmax.f32 %v811_v25, 0.0 }
 0x10f   : > { %v830_v36 = vmax.f32 %v798_v28, 0.0  ;;  %v846_v37 = vmax.f32 %v814_v29, 0.0 }
 0x110   : > { %v828_v40 = vmax.f32 %v796_v32, 0.0  ;;  %v844_v41 = vmax.f32 %v812_v33, 0.0 }
 0x111   : > { %v1252_v42 = vpack.c.bf16 %v830_v36, %v829_v34  ;;  %v1292_v43 = vpack.c.bf16 %v846_v37, %v845_v35 }
 0x112   : > { %v1247_v44 = vpack.c.bf16 %v828_v40, %v827_v38  ;;  %v1287_v45 = vpack.c.bf16 %v844_v41, %v843_v39  ;;  %v1373_v46 = vpop.f32.mrb[12].mxu0  ;;  %v1389_v47 = vpop.f32.mrb[12].mxu1 }
 0x113   : > { %1308 = vst [vmem:[%s1585_s17 + $0x28] sm:$0xff] %v1252_v42   ;;  %1316 = vst [vmem:[%s1585_s17 + $0x68] sm:$0xff] %v1292_v43   ;;  %v801_v48 = vadd.f32 %v1373_v46, %v1570_v24  ;;  %v817_v49 = vadd.f32 %v1389_v47, %v1570_v24  ;;  %v602_v50 = vpop.f32.mrb[13].mxu0  ;;  %v666_v51 = vpop.f32.mrb[13].mxu1 }
 0x114   : > { %1307 = vst [vmem:[%s1585_s17 + $0x20] sm:$0xff] %v1247_v44   ;;  %1315 = vst [vmem:[%s1585_s17 + $0x60] sm:$0xff] %v1287_v45   ;;  %v799_v52 = vadd.f32 %v1570_v24, %v602_v50  ;;  %v815_v53 = vadd.f32 %v1570_v24, %v666_v51  ;;  %v1374_v54 = vpop.f32.mrb[14].mxu0  ;;  %v1390_v55 = vpop.f32.mrb[14].mxu1 }
 0x115   : > { %v802_v56 = vadd.f32 %v1374_v54, %v1570_v24  ;;  %v818_v57 = vadd.f32 %v1390_v55, %v1570_v24  ;;  %v605_v58 = vpop.f32.mrb[15].mxu0  ;;  %v669_v59 = vpop.f32.mrb[15].mxu1  ;;  %v833_v62 = vmax.f32 %v801_v48, 0.0  ;;  %v849_v63 = vmax.f32 %v817_v49, 0.0 }
 0x116   : > { %v800_v60 = vadd.f32 %v1570_v24, %v605_v58  ;;  %v816_v61 = vadd.f32 %v1570_v24, %v669_v59  ;;  %v831_v2 = vmax.f32 %v799_v52, 0.0  ;;  %v847_v3 = vmax.f32 %v815_v53, 0.0 }
 0x117   : > { %v834_v0 = vmax.f32 %v802_v56, 0.0  ;;  %v850_v1 = vmax.f32 %v818_v57, 0.0 }
 0x118   : > { %v832_v4 = vmax.f32 %v800_v60, 0.0  ;;  %v848_v5 = vmax.f32 %v816_v61, 0.0 }
 0x119   : > { %v1262_v6 = vpack.c.bf16 %v834_v0, %v833_v62  ;;  %v1302_v7 = vpack.c.bf16 %v850_v1, %v849_v63 }
 0x11a   : > { %v1257_v8 = vpack.c.bf16 %v832_v4, %v831_v2  ;;  %v1297_v9 = vpack.c.bf16 %v848_v5, %v847_v3 }
 0x11b   : > { %1310 = vst [vmem:[%s1585_s17 + $0x38] sm:$0xff] %v1262_v6   ;;  %1318 = vst [vmem:[%s1585_s17 + $0x78] sm:$0xff] %v1302_v7  }
 0x11c   : > { %1309 = vst [vmem:[%s1585_s17 + $0x30] sm:$0xff] %v1257_v8   ;;  %1317 = vst [vmem:[%s1585_s17 + $0x70] sm:$0xff] %v1297_v9  }
 0x11d PF: > { %s13_s14 = sadd.s32 1, %s1477_s14   ;;  %s1640_s12 = smov %s1473_s13 }
 0x11e   : > { %p10_p5 = scmp.ge.s32.totalorder %s13_s14, 4   ;;  %s1641_s13 = smov %s1643_s15 }
 0x120   :  { %12 = sbr.rel (!%p10_p5) target bundleno = 2 (0x2), region = 76 }

// kernel: leipnet_forward.22
= control target key start
LH: loop header
LB: loop body
LE: loop exit
PB: predicated region body
PF: predicated region fallthrough
CT: control target
= control target key end

     0   :  { %s1190_s12 = smov 0   ;;  %s1192_s13 = smov 0   ;;  %s1322_s0 = inlined_call_operand.vmem [shape: bf16[128,384], index: 0, kind: input, shape index: {}]   ;;  %s1323_s1 = inlined_call_operand.vmem [shape: bf16[384,128], index: 1, kind: input, shape index: {}]   ;;  %s1324_s2 = inlined_call_operand.vmem [shape: f32[1,128], index: 2, kind: input, shape index: {}]   ;;  %s1325_s3 = inlined_call_operand.vmem [shape: bf16[128,128], index: 3, kind: output, shape index: {}]  }
   0x1   :  { %s1194_s14 = smov 0   ;;  %s1196_s15 = smov 0  }
   0x2   :  { %s1198_s16 = smov 0  }
   0x3 LB: > { %s25_s17 = sadd.s32 1, %s1163_s15  ;;  %p48_p1 = scmp.ne.s32.totalorder %s1155_s13, %s1151_s12  ;;  %s1167_s16 = sphi %s1198_s16, %s13_s16   ;;  %s1163_s15 = sphi %s1196_s15, %s1329_s15   ;;  %s1159_s14 = sphi %s1194_s14, %s1328_s14   ;;  %s1155_s13 = sphi %s1192_s13, %s1327_s13   ;;  %s1151_s12 = sphi %s1190_s12, %s1326_s12  }
   0x4   : > { %p26_p0 = scmp.ge.s32.totalorder %s25_s17, 3  ;;  %p49_p2 = scmp.eq.s32.totalorder %s1167_s16, 0 }
   0x5   : > { %s41_s19 = sadd.s32 1, %s1155_s13  ;;  %p899_p5 = scmp.ge.s32.totalorder %s1167_s16, 3 }
   0x6   : > { %s1331_s17 = smov (%p26_p0, %s25_s17), 0  ;;  %p50_p3 = por %p49_p2, %p48_p1 }
   0x7   : > { %s37_s18 = ssub.s32 %s1163_s15, %s1331_s17  ;;  %162 = sbr.rel (%p899_p5) target bundleno = 28 (0x1c), region = 20 }
   0x8   : > { %p39_p4 = scmp.eq.s32.totalorder %s37_s18, 0 }
   0xa   : > { %s1225_s20 = scalar_select %p39_p4, %s1155_s13, %s41_s19  }
   0xe   : > { %165 = sbr.rel (!%p50_p3) target bundleno = 28 (0x1c), region = 24  ;;  %s167_s21 = sand.u32 (%p50_p3), 1, %s1155_s13  }
   0xf   : > { %s901_s22 = sshll.u32 (%p50_p3), %s1163_s15, 2  ;;  %s900_s23 = sshll.u32 (%p50_p3), %s167_s21, 6 }
  0x10   : > { %s1233_s26 = scalar_lea.vmem (%p50_p3), %s1322_s0, %s901_s22  ;;  %s169_s27 = scalar_lea.vmem (%p50_p3), [#allocation3], %s900_s23 }
  0x11   : > { %v190_v0 = vld [vmem:[%s1233_s26] sm:$0xf] (%p50_p3)  ;;  %v192_v1 = vld [vmem:[%s1233_s26 + $0xc] sm:$0xf] (%p50_p3)  ;;  %v194_v2 = vld [vmem:[%s1233_s26 + $0x18] sm:$0xf] (%p50_p3) }
  0x12   : > { %191 = vst [vmem:[%s169_s27] sm:$0xf] (%p50_p3), %v190_v0  ;;  %193 = vst [vmem:[%s169_s27 + $0x4] sm:$0xf] (%p50_p3), %v192_v1  ;;  %v196_v3 = vld [vmem:[%s1233_s26 + $0x24] sm:$0xf] (%p50_p3) }
  0x13   : > { %v198_v4 = vld [vmem:[%s1233_s26 + $0x30] sm:$0xf] (%p50_p3)  ;;  %195 = vst [vmem:[%s169_s27 + $0x8] sm:$0xf] (%p50_p3), %v194_v2  ;;  %197 = vst [vmem:[%s169_s27 + $0xc] sm:$0xf] (%p50_p3), %v196_v3 }
  0x14   : > { %199 = vst [vmem:[%s169_s27 + $0x10] sm:$0xf] (%p50_p3), %v198_v4  ;;  %v200_v5 = vld [vmem:[%s1233_s26 + $0x3c] sm:$0xf] (%p50_p3)  ;;  %v202_v6 = vld [vmem:[%s1233_s26 + $0x48] sm:$0xf] (%p50_p3) }
  0x15   : > { %v204_v7 = vld [vmem:[%s1233_s26 + $0x54] sm:$0xf]  ;;  %201 = vst [vmem:[%s169_s27 + $0x14] sm:$0xf] %v200_v5  ;;  %203 = vst [vmem:[%s169_s27 + $0x18] sm:$0xf] %v202_v6 }
  0x16   : > { %205 = vst [vmem:[%s169_s27 + $0x1c] sm:$0xf] %v204_v7  ;;  %v206_v8 = vld [vmem:[%s1233_s26 + $0x60] sm:$0xf]  ;;  %v208_v9 = vld [vmem:[%s1233_s26 + $0x6c] sm:$0xf] }
  0x17   : > { %v210_v10 = vld [vmem:[%s1233_s26 + $0x78] sm:$0xf]  ;;  %207 = vst [vmem:[%s169_s27 + $0x20] sm:$0xf] %v206_v8  ;;  %209 = vst [vmem:[%s169_s27 + $0x24] sm:$0xf] %v208_v9 }
  0x18   : > { %211 = vst [vmem:[%s169_s27 + $0x28] sm:$0xf] %v210_v10  ;;  %v212_v11 = vld [vmem:[%s1233_s26 + $0x84] sm:$0xf]  ;;  %v214_v12 = vld [vmem:[%s1233_s26 + $0x90] sm:$0xf] }
  0x19   : > { %v216_v13 = vld [vmem:[%s1233_s26 + $0x9c] sm:$0xf]  ;;  %213 = vst [vmem:[%s169_s27 + $0x2c] sm:$0xf] %v212_v11  ;;  %215 = vst [vmem:[%s169_s27 + $0x30] sm:$0xf] %v214_v12 }
  0x1a   : > { %217 = vst [vmem:[%s169_s27 + $0x34] sm:$0xf] %v216_v13  ;;  %v218_v14 = vld [vmem:[%s1233_s26 + $0xa8] sm:$0xf]  ;;  %v220_v15 = vld [vmem:[%s1233_s26 + $0xb4] sm:$0xf] }
  0x1b   : > { %219 = vst [vmem:[%s169_s27 + $0x38] sm:$0xf] %v218_v14  ;;  %221 = vst [vmem:[%s169_s27 + $0x3c] sm:$0xf] %v220_v15 }
  0x1c PF: > { %p902_p6 = scmp.ge.s32.totalorder %s1167_s16, 1  ;;  %p287_p7 = scmp.lt.s32.totalorder %s1167_s16, 4 }
  0x1e   : > { %p288_p8 = pnand %p902_p6, %p287_p7 }
  0x1f   : > { %s294_s28 = sand.u32 (!%p288_p8), 1, %s1151_s12   ;;  %s904_s29 = sshll.u32 (!%p288_p8), %s1159_s14, 4 }
  0x20   : > { %291 = sbr.rel (%p288_p8) target bundleno = 323 (0x143), region = 69  ;;  %s903_s30 = sshll.u32 (!%p288_p8), %s294_s28, 6 }
  0x21   : > { %p333_p9 = scmp.lt.s32.totalorder (!%p288_p8), %s904_s29, 47  ;;  %s1260_s8 = scalar_lea.vmem (!%p288_p8), [#allocation3], %s903_s30 }
  0x22   : > { %p906_p10 = scmp.ne.s32.totalorder (!%p288_p8), %s1159_s14, 0 }
  0x27   : > { %s1333_s29 = smov (!%p333_p9, %s904_s29), 47  ;;  %357 = sbr.rel (%p906_p10) target bundleno = 49 (0x31), region = 77 }
  0x28   : > { %s905_s4 = sshll.u32 %s1333_s29, 2  ;;  %v1169_v16 = vmov (!%p906_p10), 0.0  }
  0x29   : > { %s1258_s7 = scalar_lea.vmem %s1323_s1, %s905_s4  ;;  %358 = vst [vmem:[#allocation2] sm:$0xff] (!%p906_p10), %v1169_v16  ;;  %359 = vst [vmem:[#allocation2 + $0x8] sm:$0xff] (!%p906_p10), %v1169_v16 }
  0x2a   : > { %360 = vst [vmem:[#allocation2 + $0x10] sm:$0xff] (!%p906_p10), %v1169_v16  ;;  %361 = vst [vmem:[#allocation2 + $0x18] sm:$0xff] (!%p906_p10), %v1169_v16 }
  0x2b   : > { %362 = vst [vmem:[#allocation2 + $0x20] sm:$0xff] (!%p906_p10), %v1169_v16  ;;  %363 = vst [vmem:[#allocation2 + $0x28] sm:$0xff] (!%p906_p10), %v1169_v16 }
  0x2c   : > { %364 = vst [vmem:[#allocation2 + $0x30] sm:$0xff] (!%p906_p10), %v1169_v16  ;;  %365 = vst [vmem:[#allocation2 + $0x38] sm:$0xff] (!%p906_p10), %v1169_v16 }
  0x2d   : > { %366 = vst [vmem:[#allocation2 + $0x40] sm:$0xff] (!%p906_p10), %v1169_v16  ;;  %367 = vst [vmem:[#allocation2 + $0x48] sm:$0xff] (!%p906_p10), %v1169_v16 }
  0x2e   : > { %368 = vst [vmem:[#allocation2 + $0x50] sm:$0xff] %v1169_v16  ;;  %369 = vst [vmem:[#allocation2 + $0x58] sm:$0xff] %v1169_v16 }
  0x2f   : > { %370 = vst [vmem:[#allocation2 + $0x60] sm:$0xff] %v1169_v16  ;;  %371 = vst [vmem:[#allocation2 + $0x68] sm:$0xff] %v1169_v16 }
  0x30   : > { %372 = vst [vmem:[#allocation2 + $0x70] sm:$0xff] %v1169_v16  ;;  %373 = vst [vmem:[#allocation2 + $0x78] sm:$0xff] %v1169_v16 }
  0x31 PF: > { %v1113_v17 = vld [vmem:[%s1258_s7] sm:$0xff]   ;;  %v1114_v18 = vld [vmem:[%s1258_s7 + $0x8] sm:$0xff]   ;;  %v1115_v19 = vld [vmem:[%s1258_s7 + $0x10] sm:$0xff]   ;;  %p923_p11 = scmp.ne.s32.totalorder %s1159_s14, 2 }
  0x32   : > { %1024 = vmatprep.subr.bf16.mxu0 %v1113_v17  ;;  %1056 = vmatprep.subr.bf16.mxu1 %v1113_v17  ;;  %v1116_v20 = vld [vmem:[%s1258_s7 + $0x18] sm:$0xff]   ;;  %v1121_v21 = vld [vmem:[%s1260_s8] sm:$0xff]   ;;  %v1118_v24 = vld [vmem:[%s1258_s7 + $0x28] sm:$0xff]  }
  0x33   : > { %1025 = vmatpush3.bf16.msra.mxu0 %v1113_v17  ;;  %1064 = vmatpush3.bf16.msra.mxu1 %v1113_v17  ;;  %v1122_v22 = vld [vmem:[%s1260_s8 + $0x20] sm:$0xff]   ;;  %v1119_v25 = vld [vmem:[%s1258_s7 + $0x30] sm:$0xff]   ;;  %v1120_v26 = vld [vmem:[%s1258_s7 + $0x38] sm:$0xff]  }
  0x34   : > { %1026 = vmatprep.subr.bf16.mxu0 %v1114_v18  ;;  %1057 = vmatprep.subr.bf16.mxu1 %v1114_v18  ;;  %v1117_v23 = vld [vmem:[%s1258_s7 + $0x20] sm:$0xff]   ;;  %v1123_v27 = vld [vmem:[%s1260_s8 + $0x8] sm:$0xff]   ;;  %v1125_v29 = vld [vmem:[%s1260_s8 + $0x10] sm:$0xff]  }
  0x35   : > { %1040 = vmatprep.mubr.bf16.mxu0 %v1121_v21  ;;  %1048 = vmatprep.mubr.bf16.mxu1 %v1122_v22  ;;  %v1124_v28 = vld [vmem:[%s1260_s8 + $0x28] sm:$0xff]   ;;  %v1126_v30 = vld [vmem:[%s1260_s8 + $0x30] sm:$0xff]   ;;  %v1127_v31 = vld [vmem:[%s1260_s8 + $0x18] sm:$0xff]  }
  0x36   : > { %v1128_v32 = vld [vmem:[%s1260_s8 + $0x38] sm:$0xff]   ;;  %v376_v33 = vld [vmem:[#allocation2 + $0x10] sm:$0xff]  ;;  %v374_v35 = vld [vmem:[#allocation2] sm:$0xff] }
  0x37   : > { %1027 = vmatpush3.bf16.msra.mxu0 %v1114_v18  ;;  %1065 = vmatpush3.bf16.msra.mxu1 %v1114_v18  ;;  %v384_v34 = vld [vmem:[#allocation2 + $0x50] sm:$0xff]  ;;  %v382_v36 = vld [vmem:[#allocation2 + $0x40] sm:$0xff]  ;;  %v377_v39 = vld [vmem:[#allocation2 + $0x18] sm:$0xff] }
  0x38   : > { %1028 = vmatprep.subr.bf16.mxu0 %v1115_v19  ;;  %1058 = vmatprep.subr.bf16.mxu1 %v1115_v19  ;;  %v385_v40 = vld [vmem:[#allocation2 + $0x58] sm:$0xff]  ;;  %v375_v45 = vld [vmem:[#allocation2 + $0x8] sm:$0xff]  ;;  %v380_v57 = vld [vmem:[#allocation2 + $0x30] sm:$0xff] }
  0x39   : > { %v383_v46 = vld [vmem:[#allocation2 + $0x48] sm:$0xff]  ;;  %v388_v58 = vld [vmem:[#allocation2 + $0x70] sm:$0xff]  ;;  %v378_v59 = vld [vmem:[#allocation2 + $0x20] sm:$0xff] }
  0x3a   : > { %v386_v60 = vld [vmem:[#allocation2 + $0x60] sm:$0xff]  ;;  %v381_v63 = vld [vmem:[#allocation2 + $0x38] sm:$0xff]  ;;  %v379_v5 = vld [vmem:[#allocation2 + $0x28] sm:$0xff] }
  0x3b   : > { %1029 = vmatpush3.bf16.msra.mxu0 %v1115_v19  ;;  %1066 = vmatpush3.bf16.msra.mxu1 %v1115_v19  ;;  %v389_v0 = vld [vmem:[#allocation2 + $0x78] sm:$0xff]  ;;  %v387_v6 = vld [vmem:[#allocation2 + $0x68] sm:$0xff]  ;;  %v924_v19 = vld [vmem:[%s1324_s2] ss:$0 sm:$0xff] (!%p923_p11) }
  0x3c   : > { %1030 = vmatprep.subr.bf16.mxu0 %v1116_v20  ;;  %1059 = vmatprep.subr.bf16.mxu1 %v1116_v20 }
  0x3f   : > { %1031 = vmatpush3.bf16.msra.mxu0 %v1116_v20  ;;  %1067 = vmatpush3.bf16.msra.mxu1 %v1116_v20 }
  0x40   : > { %1032 = vmatprep.subr.bf16.mxu0 %v1117_v23  ;;  %1060 = vmatprep.subr.bf16.mxu1 %v1117_v23 }
  0x43   : > { %1033 = vmatpush3.bf16.msra.mxu0 %v1117_v23  ;;  %1068 = vmatpush3.bf16.msra.mxu1 %v1117_v23 }
  0x44   : > { %1034 = vmatprep.subr.bf16.mxu0 %v1118_v24  ;;  %1061 = vmatprep.subr.bf16.mxu1 %v1118_v24 }
  0x47   : > { %1035 = vmatpush3.bf16.msra.mxu0 %v1118_v24  ;;  %1069 = vmatpush3.bf16.msra.mxu1 %v1118_v24 }
  0x48   : > { %1036 = vmatprep.subr.bf16.mxu0 %v1119_v25  ;;  %1062 = vmatprep.subr.bf16.mxu1 %v1119_v25 }
  0x4b   : > { %1037 = vmatpush3.bf16.msra.mxu0 %v1119_v25  ;;  %1070 = vmatpush3.bf16.msra.mxu1 %v1119_v25 }
  0x4c   : > { %1038 = vmatprep.subr.bf16.mxu0 %v1120_v26  ;;  %1063 = vmatprep.subr.bf16.mxu1 %v1120_v26 }
  0x4f   : > { %1039 = vmatpush3.bf16.msra.mxu0 %v1120_v26  ;;  %1071 = vmatpush3.bf16.msra.mxu1 %v1120_v26 }
  0x52   : > { %1041 = vmatmul.mubr.bf16.vlgmr.msra.gmra.mrb[0].mxu0 %v1123_v27  ;;  %1049 = vmatmul.mubr.bf16.vlgmr.msra.gmra.mrb[0].mxu1 %v1124_v28 }
  0x53   : > { %1044 = vmatprep.mubr.bf16.mxu0 %v1125_v29  ;;  %1052 = vmatprep.mubr.bf16.mxu1 %v1126_v30 }
  0x5a   : > { %1045 = vmatmul.mubr.bf16.gmra.mrb[4].mxu0 %v1127_v31  ;;  %1053 = vmatmul.mubr.bf16.gmra.mrb[4].mxu1 %v1128_v32 }
 0x125   : > { %v1042_v37 = vpop.f32.mrb[0].mxu0  ;;  %v1050_v38 = vpop.f32.mrb[0].mxu1 }
 0x126   : > { %v617_v41 = vadd.f32 %v1042_v37, %v376_v33  ;;  %v625_v42 = vadd.f32 %v1050_v38, %v384_v34  ;;  %v552_v43 = vpop.f32.mrb[1].mxu0  ;;  %v584_v44 = vpop.f32.mrb[1].mxu1 }
 0x127   : > { %v615_v47 = vadd.f32 %v552_v43, %v374_v35  ;;  %v623_v48 = vadd.f32 %v584_v44, %v382_v36  ;;  %v1043_v49 = vpop.f32.mrb[2].mxu0  ;;  %v1051_v50 = vpop.f32.mrb[2].mxu1 }
 0x128   : > { %633 = vst [vmem:[#allocation2 + $0x10] sm:$0xff] %v617_v41  ;;  %641 = vst [vmem:[#allocation2 + $0x50] sm:$0xff] %v625_v42  ;;  %v618_v51 = vadd.f32 %v1043_v49, %v377_v39  ;;  %v626_v52 = vadd.f32 %v1051_v50, %v385_v40  ;;  %v555_v53 = vpop.f32.mrb[3].mxu0  ;;  %v587_v54 = vpop.f32.mrb[3].mxu1 }
 0x129   : > { %631 = vst [vmem:[#allocation2] sm:$0xff] %v615_v47  ;;  %639 = vst [vmem:[#allocation2 + $0x40] sm:$0xff] %v623_v48  ;;  %v616_v55 = vadd.f32 %v555_v53, %v375_v45  ;;  %v624_v56 = vadd.f32 %v587_v54, %v383_v46 }
 0x12a   : > { %634 = vst [vmem:[#allocation2 + $0x18] sm:$0xff] %v618_v51  ;;  %642 = vst [vmem:[#allocation2 + $0x58] sm:$0xff] %v626_v52 }
 0x12b   : > { %632 = vst [vmem:[#allocation2 + $0x8] sm:$0xff] %v616_v55  ;;  %640 = vst [vmem:[#allocation2 + $0x48] sm:$0xff] %v624_v56 }
 0x12d   : > { %v1046_v61 = vpop.f32.mrb[4].mxu0  ;;  %v1054_v62 = vpop.f32.mrb[4].mxu1  ;;  %650 = sbr.rel (%p923_p11) target bundleno = 323 (0x143), region = 81 }
 0x12e   : > { %v621_v1 = vadd.f32 %v1046_v61, %v380_v57  ;;  %v629_v2 = vadd.f32 %v1054_v62, %v388_v58  ;;  %v568_v3 = vpop.f32.mrb[5].mxu0  ;;  %v600_v4 = vpop.f32.mrb[5].mxu1 }
 0x12f   : > { %v619_v7 = vadd.f32 %v568_v3, %v378_v59  ;;  %v627_v8 = vadd.f32 %v600_v4, %v386_v60  ;;  %v1047_v9 = vpop.f32.mrb[6].mxu0  ;;  %v1055_v10 = vpop.f32.mrb[6].mxu1  ;;  %v653_v22 = vld [vmem:[#allocation2 + $0x10] sm:$0xff] (!%p923_p11) }
 0x130   : > { %637 = vst [vmem:[#allocation2 + $0x30] sm:$0xff] %v621_v1  ;;  %645 = vst [vmem:[#allocation2 + $0x70] sm:$0xff] %v629_v2  ;;  %v622_v11 = vadd.f32 %v1047_v9, %v381_v63  ;;  %v630_v12 = vadd.f32 %v1055_v10, %v389_v0  ;;  %v571_v13 = vpop.f32.mrb[7].mxu0  ;;  %v603_v14 = vpop.f32.mrb[7].mxu1  ;;  %v651_v17 = vld [vmem:[#allocation2] sm:$0xff] (!%p923_p11)  ;;  %v676_v25 = vadd.f32 (!%p923_p11), %v924_v19, %v653_v22  ;;  %v661_v37 = vld [vmem:[#allocation2 + $0x50] sm:$0xff] (!%p923_p11) }
 0x131   : > { %635 = vst [vmem:[#allocation2 + $0x20] sm:$0xff] %v619_v7  ;;  %643 = vst [vmem:[#allocation2 + $0x60] sm:$0xff] %v627_v8  ;;  %v620_v15 = vadd.f32 %v571_v13, %v379_v5  ;;  %v628_v16 = vadd.f32 %v603_v14, %v387_v6  ;;  %v674_v20 = vadd.f32 (!%p923_p11), %v924_v19, %v651_v17  ;;  %v654_v23 = vld [vmem:[#allocation2 + $0x18] sm:$0xff] (!%p923_p11)  ;;  %v659_v35 = vld [vmem:[#allocation2 + $0x40] sm:$0xff] (!%p923_p11) }
 0x132   : > { %638 = vst [vmem:[#allocation2 + $0x38] sm:$0xff] %v622_v11  ;;  %646 = vst [vmem:[#allocation2 + $0x78] sm:$0xff] %v630_v12  ;;  %v652_v18 = vld [vmem:[#allocation2 + $0x8] sm:$0xff] (!%p923_p11)  ;;  %v677_v26 = vadd.f32 (!%p923_p11), %v924_v19, %v654_v23  ;;  %v692_v38 = vmax.f32 (!%p923_p11), %v676_v25, 0.0  ;;  %v662_v42 = vld [vmem:[#allocation2 + $0x58] sm:$0xff] (!%p923_p11)  ;;  %v682_v47 = vadd.f32 (!%p923_p11), %v924_v19, %v659_v35  ;;  %v684_v52 = vadd.f32 (!%p923_p11), %v924_v19, %v661_v37 }
 0x133   : > { %636 = vst [vmem:[#allocation2 + $0x28] sm:$0xff] %v620_v15  ;;  %644 = vst [vmem:[#allocation2 + $0x68] sm:$0xff] %v628_v16  ;;  %v675_v21 = vadd.f32 (!%p923_p11), %v924_v19, %v652_v18  ;;  %v690_v31 = vmax.f32 (!%p923_p11), %v674_v20, 0.0  ;;  %v660_v36 = vld [vmem:[#allocation2 + $0x48] sm:$0xff] (!%p923_p11)  ;;  %v685_v57 = vadd.f32 (!%p923_p11), %v924_v19, %v662_v42 }
 0x134   : > { %v693_v39 = vmax.f32 %v677_v26, 0.0  ;;  %v683_v51 = vadd.f32 %v924_v19, %v660_v36  ;;  %v698_v56 = vmax.f32 %v682_v47, 0.0  ;;  %v700_v61 = vmax.f32 %v684_v52, 0.0 }
 0x135   : > { %v691_v32 = vmax.f32 %v675_v21, 0.0  ;;  %v701_v63 = vmax.f32 %v685_v57, 0.0 }
 0x136   : > { %v969_v49 = vpack.c.bf16 %v693_v39, %v692_v38  ;;  %v699_v60 = vmax.f32 %v683_v51, 0.0 }
 0x137   : > { %v657_v29 = vld [vmem:[#allocation2 + $0x30] sm:$0xff]  ;;  %v964_v44 = vpack.c.bf16 %v691_v32, %v690_v31  ;;  %v989_v5 = vpack.c.bf16 %v701_v63, %v700_v61 }
 0x138   : > { %v655_v24 = vld [vmem:[#allocation2 + $0x20] sm:$0xff]  ;;  %v680_v34 = vadd.f32 %v924_v19, %v657_v29  ;;  %v665_v53 = vld [vmem:[#allocation2 + $0x70] sm:$0xff]  ;;  %1001 = vst [vmem:[%s1325_s3 + $0x8] sm:$0xff] %v969_v49   ;;  %v984_v3 = vpack.c.bf16 %v699_v60, %v698_v56 }
 0x139   : > { %v678_v28 = vadd.f32 %v924_v19, %v655_v24  ;;  %v658_v30 = vld [vmem:[#allocation2 + $0x38] sm:$0xff]  ;;  %v663_v43 = vld [vmem:[#allocation2 + $0x60] sm:$0xff]  ;;  %965 = vst [vmem:[%s1325_s3] sm:$0xff] %v964_v44   ;;  %v688_v1 = vadd.f32 %v924_v19, %v665_v53  ;;  %1005 = vst [vmem:[%s1325_s3 + $0x28] sm:$0xff] %v989_v5  }
 0x13a   : > { %v656_v27 = vld [vmem:[#allocation2 + $0x28] sm:$0xff]  ;;  %v681_v41 = vadd.f32 %v924_v19, %v658_v30  ;;  %v696_v46 = vmax.f32 %v680_v34, 0.0  ;;  %v666_v54 = vld [vmem:[#allocation2 + $0x78] sm:$0xff]  ;;  %v686_v58 = vadd.f32 %v924_v19, %v663_v43  ;;  %1004 = vst [vmem:[%s1325_s3 + $0x20] sm:$0xff] %v984_v3  }
 0x13b   : > { %v679_v33 = vadd.f32 %v924_v19, %v656_v27  ;;  %v694_v40 = vmax.f32 %v678_v28, 0.0  ;;  %v664_v48 = vld [vmem:[#allocation2 + $0x68] sm:$0xff]  ;;  %v689_v2 = vadd.f32 %v924_v19, %v666_v54  ;;  %v704_v6 = vmax.f32 %v688_v1, 0.0 }
 0x13c   : > { %v697_v50 = vmax.f32 %v681_v41, 0.0  ;;  %v687_v62 = vadd.f32 %v924_v19, %v664_v48  ;;  %v702_v0 = vmax.f32 %v686_v58, 0.0 }
 0x13d   : > { %v695_v45 = vmax.f32 %v679_v33, 0.0  ;;  %v705_v7 = vmax.f32 %v689_v2, 0.0 }
 0x13e   : > { %v979_v59 = vpack.c.bf16 %v697_v50, %v696_v46  ;;  %v703_v4 = vmax.f32 %v687_v62, 0.0 }
 0x13f   : > { %v974_v55 = vpack.c.bf16 %v695_v45, %v694_v40  ;;  %v999_v9 = vpack.c.bf16 %v705_v7, %v704_v6 }
 0x140   : > { %1003 = vst [vmem:[%s1325_s3 + $0x18] sm:$0xff] %v979_v59   ;;  %v994_v8 = vpack.c.bf16 %v703_v4, %v702_v0 }
 0x141   : > { %1002 = vst [vmem:[%s1325_s3 + $0x10] sm:$0xff] %v974_v55   ;;  %1007 = vst [vmem:[%s1325_s3 + $0x38] sm:$0xff] %v999_v9  }
 0x142   : > { %1006 = vst [vmem:[%s1325_s3 + $0x30] sm:$0xff] %v994_v8  }
 0x143 PF: > { %s13_s16 = sadd.s32 1, %s1167_s16   ;;  %s1326_s12 = smov %s1155_s13 }
 0x144   : > { %p10_p12 = scmp.ge.s32.totalorder %s13_s16, 5   ;;  %s1327_s13 = smov %s1225_s20 }
 0x145   : > { %s1328_s14 = smov %s1163_s15  ;;  %s1329_s15 = smov %s1331_s17 }
 0x146   :  { %12 = sbr.rel (!%p10_p12) target bundleno = 3 (0x3), region = 122 }

// kernel: leipnet_forward.23
= control target key start
LH: loop header
LB: loop body
LE: loop exit
PB: predicated region body
PF: predicated region fallthrough
CT: control target
= control target key end

     0   :  { %s905_s12 = smov 0   ;;  %s907_s13 = smov 0   ;;  %s1012_s0 = inlined_call_operand.vmem [shape: bf16[32,640], index: 0, kind: input, shape index: {}]   ;;  %s1013_s1 = inlined_call_operand.vmem [shape: bf16[640,256], index: 1, kind: input, shape index: {}]   ;;  %s1014_s2 = inlined_call_operand.vmem [shape: f32[1,256], index: 2, kind: input, shape index: {}]   ;;  %s1015_s3 = inlined_call_operand.vmem [shape: bf16[32,256], index: 3, kind: output, shape index: {}]  }
   0x1   :  { %s909_s14 = smov 0   ;;  %s911_s15 = smov 0  }
   0x2   :  { %s913_s16 = smov 0  }
   0x3 LB: > { %s25_s17 = sadd.s32 1, %s877_s15  ;;  %p48_p1 = scmp.ne.s32.totalorder %s869_s13, %s865_s12  ;;  %s881_s16 = sphi %s913_s16, %s13_s16   ;;  %s877_s15 = sphi %s911_s15, %s1019_s15   ;;  %s873_s14 = sphi %s909_s14, %s1018_s14   ;;  %s869_s13 = sphi %s907_s13, %s1017_s13   ;;  %s865_s12 = sphi %s905_s12, %s1016_s12  }
   0x4   : > { %p26_p0 = scmp.ge.s32.totalorder %s25_s17, 5  ;;  %p49_p2 = scmp.eq.s32.totalorder %s881_s16, 0 }
   0x5   : > { %s41_s19 = sadd.s32 1, %s869_s13  ;;  %p718_p5 = scmp.ge.s32.totalorder %s881_s16, 5 }
   0x6   : > { %s1021_s17 = smov (%p26_p0, %s25_s17), 0  ;;  %p50_p3 = por %p49_p2, %p48_p1 }
   0x7   : > { %s37_s18 = ssub.s32 %s877_s15, %s1021_s17  ;;  %164 = sbr.rel (%p718_p5) target bundleno = 21 (0x15), region = 20 }
   0x8   : > { %p39_p4 = scmp.eq.s32.totalorder %s37_s18, 0 }
   0xa   : > { %s940_s20 = scalar_select %p39_p4, %s869_s13, %s41_s19  }
   0xe   : > { %167 = sbr.rel (!%p50_p3) target bundleno = 21 (0x15), region = 24  ;;  %s169_s21 = sand.u32 (%p50_p3), 1, %s869_s13  }
   0xf   : > { %s720_s22 = sshll.u32 (%p50_p3), %s877_s15, 2  ;;  %s719_s23 = sshll.u32 (%p50_p3), %s169_s21, 4 }
  0x10   : > { %s176_s26 = scalar_lea.vmem (%p50_p3), %s1012_s0, %s720_s22  ;;  %s171_s27 = scalar_lea.vmem (%p50_p3), [#allocation3], %s719_s23 }
  0x11   : > { %v192_v0 = vld [vmem:[%s176_s26] sm:$0xf] (%p50_p3)  ;;  %v194_v1 = vld [vmem:[%s176_s26 + $0x14] sm:$0xf] (%p50_p3)  ;;  %v196_v2 = vld [vmem:[%s176_s26 + $0x28] sm:$0xf] (%p50_p3) }
  0x12   : > { %193 = vst [vmem:[%s171_s27] sm:$0xf] (%p50_p3), %v192_v0  ;;  %195 = vst [vmem:[%s171_s27 + $0x4] sm:$0xf] (%p50_p3), %v194_v1  ;;  %v198_v3 = vld [vmem:[%s176_s26 + $0x3c] sm:$0xf] (%p50_p3) }
  0x13   : > { %197 = vst [vmem:[%s171_s27 + $0x8] sm:$0xf] (%p50_p3), %v196_v2  ;;  %199 = vst [vmem:[%s171_s27 + $0xc] sm:$0xf] (%p50_p3), %v198_v3 }
  0x15 PF: > { %p721_p6 = scmp.ge.s32.totalorder %s881_s16, 1  ;;  %p244_p7 = scmp.lt.s32.totalorder %s881_s16, 6 }
  0x17   : > { %p245_p8 = pnand %p721_p6, %p244_p7 }
  0x18   : > { %s251_s28 = sand.u32 (!%p245_p8), 1, %s865_s12   ;;  %s723_s29 = sshll.u32 (!%p245_p8), %s873_s14, 4 }
  0x19   : > { %248 = sbr.rel (%p245_p8) target bundleno = 306 (0x132), region = 69  ;;  %s952_s30 = sshll.u32 (!%p245_p8), %s251_s28, 4 }
  0x1a   : > { %p296_p9 = scmp.lt.s32.totalorder (!%p245_p8), %s723_s29, 79  ;;  %s253_s8 = scalar_lea.vmem (!%p245_p8), [#allocation3], %s952_s30 }
  0x1b   : > { %p726_p10 = scmp.ne.s32.totalorder (!%p245_p8), %s873_s14, 0 }
  0x20   : > { %s1023_s29 = smov (!%p296_p9, %s723_s29), 79  ;;  %327 = sbr.rel (%p726_p10) target bundleno = 39 (0x27), region = 77 }
  0x21   : > { %s754_s4 = sshll.u32 %s1023_s29, 3  ;;  %v883_v4 = vmov (!%p726_p10), 0.0  }
  0x22   : > { %s957_s7 = scalar_lea.vmem %s1013_s1, %s754_s4  ;;  %328 = vst [vmem:[#allocation2] sm:$0xff] (!%p726_p10), %v883_v4  ;;  %329 = vst [vmem:[#allocation2 + $0x8] sm:$0xff] (!%p726_p10), %v883_v4 }
  0x23   : > { %330 = vst [vmem:[#allocation2 + $0x10] sm:$0xff] (!%p726_p10), %v883_v4  ;;  %331 = vst [vmem:[#allocation2 + $0x18] sm:$0xff] (!%p726_p10), %v883_v4 }
  0x24   : > { %332 = vst [vmem:[#allocation2 + $0x20] sm:$0xff] (!%p726_p10), %v883_v4  ;;  %333 = vst [vmem:[#allocation2 + $0x28] sm:$0xff] (!%p726_p10), %v883_v4 }
  0x25   : > { %334 = vst [vmem:[#allocation2 + $0x30] sm:$0xff] (!%p726_p10), %v883_v4  ;;  %335 = vst [vmem:[#allocation2 + $0x38] sm:$0xff] (!%p726_p10), %v883_v4 }
  0x27 PF: > { %v817_v5 = vld [vmem:[%s957_s7 + $0x4] ss:$8 sps:$4 sm:$0xff]   ;;  %v819_v6 = vld [vmem:[%s957_s7] ss:$8 sps:$4 sm:$0xff]   ;;  %v884_v7 = vmov 0   ;;  %p745_p11 = scmp.ne.s32.totalorder %s873_s14, 4 }
  0x28   : > { %488 = vmatprep.mubr.bf16.mxu0 %v884_v7  ;;  %498 = vmatprep.mubr.bf16.mxu1 %v884_v7  ;;  %v820_v8 = vld [vmem:[%s957_s7 + $0x14] ss:$8 sps:$4 sm:$0xff]   ;;  %v822_v9 = vld [vmem:[%s957_s7 + $0x10] ss:$8 sps:$4 sm:$0xff]   ;;  %v823_v10 = vld [vmem:[%s957_s7 + $0x24] ss:$8 sps:$4 sm:$0xff]   ;;  %v539_v48 = vlaneseq (!%p745_p11) }
  0x29   : > { %456 = vmatprep.subr.bf16.mxu0 %v817_v5  ;;  %759 = vmatprep.subr.bf16.mxu1 %v817_v5  ;;  %v825_v11 = vld [vmem:[%s957_s7 + $0x20] ss:$8 sps:$4 sm:$0xff]   ;;  %v826_v12 = vld [vmem:[%s957_s7 + $0x34] ss:$8 sps:$4 sm:$0xff]   ;;  %v828_v13 = vld [vmem:[%s957_s7 + $0x30] ss:$8 sps:$4 sm:$0xff]  }
  0x2a   : > { %457 = vmatpush1.bf16.msra.mxu0 %v819_v6  ;;  %767 = vmatpush1.bf16.msra.mxu1 %v819_v6  ;;  %v829_v14 = vld [vmem:[%s957_s7 + $0x44] ss:$8 sps:$4 sm:$0xff]   ;;  %v831_v15 = vld [vmem:[%s957_s7 + $0x40] ss:$8 sps:$4 sm:$0xff]   ;;  %v832_v16 = vld [vmem:[%s957_s7 + $0x54] ss:$8 sps:$4 sm:$0xff]  }
  0x2b   : > { %458 = vmatprep.subr.bf16.mxu0 %v820_v8  ;;  %760 = vmatprep.subr.bf16.mxu1 %v820_v8  ;;  %v834_v17 = vld [vmem:[%s957_s7 + $0x50] ss:$8 sps:$4 sm:$0xff]   ;;  %v835_v18 = vld [vmem:[%s957_s7 + $0x64] ss:$8 sps:$4 sm:$0xff]   ;;  %v837_v19 = vld [vmem:[%s957_s7 + $0x60] ss:$8 sps:$4 sm:$0xff]  }
  0x2c   : > { %v838_v20 = vld [vmem:[%s957_s7 + $0x74] ss:$8 sps:$4 sm:$0xff]   ;;  %v840_v21 = vld [vmem:[%s957_s7 + $0x70] ss:$8 sps:$4 sm:$0xff]   ;;  %v336_v24 = vld [vmem:[#allocation2] sm:$0xff]  ;;  %v540_v49 = vshrl.u32 (!%p745_p11), %v539_v48, 7 }
  0x2d   : > { %v841_v22 = vld [vmem:[%s253_s8] sm:$0xff]   ;;  %v842_v23 = vld [vmem:[%s253_s8 + $0x8] sm:$0xff]  }
  0x2e   : > { %459 = vmatpush1.bf16.msra.mxu0 %v822_v9  ;;  %768 = vmatpush1.bf16.msra.mxu1 %v822_v9  ;;  %v340_v25 = vld [vmem:[#allocation2 + $0x20] sm:$0xff]  ;;  %v337_v26 = vld [vmem:[#allocation2 + $0x8] sm:$0xff]  ;;  %v338_v30 = vld [vmem:[#allocation2 + $0x10] sm:$0xff]  ;;  %v541_v53 = vsub.s32 (!%p745_p11), 0, %v540_v49  ;;  %v545_v54 = vsub.s32 (!%p745_p11), 1, %v540_v49 }
  0x2f   : > { %460 = vmatprep.subr.bf16.mxu0 %v823_v10  ;;  %761 = vmatprep.subr.bf16.mxu1 %v823_v10  ;;  %v341_v27 = vld [vmem:[#allocation2 + $0x28] sm:$0xff]  ;;  %v342_v31 = vld [vmem:[#allocation2 + $0x30] sm:$0xff]  ;;  %v339_v36 = vld [vmem:[#allocation2 + $0x18] sm:$0xff] }
  0x30   : > { %v343_v37 = vld [vmem:[#allocation2 + $0x38] sm:$0xff]  ;;  %v537_v50 = vld [vmem:[%s1014_s2] sm:$0x3] (!%p745_p11) }
  0x31   : > { %v542_v58 = vrot.slane (!%p745_p11), %v537_v50, %v541_v53  ;;  %v546_v59 = vrot.slane (!%p745_p11), %v537_v50, %v545_v54 }
  0x32   : > { %461 = vmatpush1.bf16.msra.mxu0 %v825_v11  ;;  %769 = vmatpush1.bf16.msra.mxu1 %v825_v11 }
  0x33   : > { %462 = vmatprep.subr.bf16.mxu0 %v826_v12  ;;  %762 = vmatprep.subr.bf16.mxu1 %v826_v12 }
  0x36   : > { %463 = vmatpush1.bf16.msra.mxu0 %v828_v13  ;;  %770 = vmatpush1.bf16.msra.mxu1 %v828_v13 }
  0x37   : > { %464 = vmatprep.subr.bf16.mxu0 %v829_v14  ;;  %763 = vmatprep.subr.bf16.mxu1 %v829_v14 }
  0x3a   : > { %465 = vmatpush1.bf16.msra.mxu0 %v831_v15  ;;  %771 = vmatpush1.bf16.msra.mxu1 %v831_v15 }
  0x3b   : > { %466 = vmatprep.subr.bf16.mxu0 %v832_v16  ;;  %764 = vmatprep.subr.bf16.mxu1 %v832_v16 }
  0x3e   : > { %467 = vmatpush1.bf16.msra.mxu0 %v834_v17  ;;  %772 = vmatpush1.bf16.msra.mxu1 %v834_v17 }
  0x3f   : > { %468 = vmatprep.subr.bf16.mxu0 %v835_v18  ;;  %765 = vmatprep.subr.bf16.mxu1 %v835_v18 }
  0x42   : > { %469 = vmatpush1.bf16.msra.mxu0 %v837_v19  ;;  %773 = vmatpush1.bf16.msra.mxu1 %v837_v19 }
  0x43   : > { %470 = vmatprep.subr.bf16.mxu0 %v838_v20  ;;  %766 = vmatprep.subr.bf16.mxu1 %v838_v20 }
  0x46   : > { %471 = vmatpush1.bf16.msra.mxu0 %v840_v21  ;;  %774 = vmatpush1.bf16.msra.mxu1 %v840_v21 }
  0x49   : > { %489 = vmatmul.mubr.bf16.vlgmr.msra.gmra.mrb[0].mxu0 %v841_v22  ;;  %499 = vmatmul.mubr.bf16.vlgmr.msra.gmra.mrb[0].mxu1 %v842_v23 }
 0x11c   : > { %v490_v28 = vpop.f32.mrb[0].mxu0  ;;  %v500_v29 = vpop.f32.mrb[0].mxu1  ;;  %528 = sbr.rel (%p745_p11) target bundleno = 306 (0x132), region = 81 }
 0x11d   : > { %v509_v32 = vadd.f32 %v490_v28, %v336_v24  ;;  %v513_v33 = vadd.f32 %v500_v29, %v340_v25  ;;  %v492_v34 = vpop.f32.mrb[1].mxu0  ;;  %v502_v35 = vpop.f32.mrb[1].mxu1 }
 0x11e   : > { %v510_v38 = vadd.f32 %v492_v34, %v337_v26  ;;  %v514_v39 = vadd.f32 %v502_v35, %v341_v27  ;;  %v494_v40 = vpop.f32.mrb[2].mxu0  ;;  %v504_v41 = vpop.f32.mrb[2].mxu1 }
 0x11f   : > { %517 = vst [vmem:[#allocation2] sm:$0xff] %v509_v32  ;;  %521 = vst [vmem:[#allocation2 + $0x20] sm:$0xff] %v513_v33  ;;  %v511_v42 = vadd.f32 %v494_v40, %v338_v30  ;;  %v515_v43 = vadd.f32 %v504_v41, %v342_v31  ;;  %v496_v44 = vpop.f32.mrb[3].mxu0  ;;  %v506_v45 = vpop.f32.mrb[3].mxu1 }
 0x120   : > { %518 = vst [vmem:[#allocation2 + $0x8] sm:$0xff] %v510_v38  ;;  %522 = vst [vmem:[#allocation2 + $0x28] sm:$0xff] %v514_v39  ;;  %v512_v46 = vadd.f32 %v496_v44, %v339_v36  ;;  %v516_v47 = vadd.f32 %v506_v45, %v343_v37 }
 0x121   : > { %519 = vst [vmem:[#allocation2 + $0x10] sm:$0xff] %v511_v42  ;;  %523 = vst [vmem:[#allocation2 + $0x30] sm:$0xff] %v515_v43 }
 0x122   : > { %520 = vst [vmem:[#allocation2 + $0x18] sm:$0xff] %v512_v46  ;;  %524 = vst [vmem:[#allocation2 + $0x38] sm:$0xff] %v516_v47 }
 0x126   : > { %v529_v51 = vld [vmem:[#allocation2] sm:$0xff] }
 0x127   : > { %v530_v52 = vld [vmem:[#allocation2 + $0x8] sm:$0xff]  ;;  %v533_v57 = vld [vmem:[#allocation2 + $0x20] sm:$0xff]  ;;  %v549_v63 = vadd.f32 %v542_v58, %v529_v51 }
 0x128   : > { %v531_v55 = vld [vmem:[#allocation2 + $0x10] sm:$0xff]  ;;  %v534_v60 = vld [vmem:[#allocation2 + $0x28] sm:$0xff]  ;;  %v550_v0 = vadd.f32 %v546_v59, %v530_v52  ;;  %v553_v3 = vadd.f32 %v542_v58, %v533_v57 }
 0x129   : > { %v532_v56 = vld [vmem:[#allocation2 + $0x18] sm:$0xff]  ;;  %v535_v61 = vld [vmem:[#allocation2 + $0x30] sm:$0xff]  ;;  %v551_v1 = vadd.f32 %v542_v58, %v531_v55  ;;  %v554_v4 = vadd.f32 %v546_v59, %v534_v60  ;;  %v557_v7 = vmax.f32 %v549_v63, 0.0 }
 0x12a   : > { %v536_v62 = vld [vmem:[#allocation2 + $0x38] sm:$0xff]  ;;  %v552_v2 = vadd.f32 %v546_v59, %v532_v56  ;;  %v555_v5 = vadd.f32 %v542_v58, %v535_v61  ;;  %v558_v8 = vmax.f32 %v550_v0, 0.0  ;;  %v561_v11 = vmax.f32 %v553_v3, 0.0 }
 0x12b   : > { %v556_v6 = vadd.f32 %v546_v59, %v536_v62  ;;  %v559_v9 = vmax.f32 %v551_v1, 0.0  ;;  %v562_v12 = vmax.f32 %v554_v4, 0.0 }
 0x12c   : > { %v560_v10 = vmax.f32 %v552_v2, 0.0  ;;  %v563_v13 = vmax.f32 %v555_v5, 0.0  ;;  %v755_v15 = vpack.c.bf16 %v558_v8, %v557_v7 }
 0x12d   : > { %v564_v14 = vmax.f32 %v556_v6, 0.0  ;;  %v757_v17 = vpack.c.bf16 %v562_v12, %v561_v11 }
 0x12e   : > { %v756_v16 = vpack.c.bf16 %v560_v10, %v559_v9  ;;  %589 = vst [vmem:[%s1015_s3] sm:$0xff] %v755_v15 }
 0x12f   : > { %v758_v18 = vpack.c.bf16 %v564_v14, %v563_v13  ;;  %591 = vst [vmem:[%s1015_s3 + $0x10] sm:$0xff] %v757_v17 }
 0x130   : > { %590 = vst [vmem:[%s1015_s3 + $0x8] sm:$0xff] %v756_v16 }
 0x131   : > { %592 = vst [vmem:[%s1015_s3 + $0x18] sm:$0xff] %v758_v18 }
 0x132 PF: > { %s13_s16 = sadd.s32 1, %s881_s16   ;;  %s1016_s12 = smov %s869_s13 }
 0x133   : > { %p10_p12 = scmp.ge.s32.totalorder %s13_s16, 7   ;;  %s1017_s13 = smov %s940_s20 }
 0x134   : > { %s1018_s14 = smov %s877_s15  ;;  %s1019_s15 = smov %s1021_s17 }
 0x135   :  { %12 = sbr.rel (!%p10_p12) target bundleno = 3 (0x3), region = 122 }

// kernel: leipnet_forward.24
= control target key start
LH: loop header
LB: loop body
LE: loop exit
PB: predicated region body
PF: predicated region fallthrough
CT: control target
= control target key end

     0   :  { %s1311_s12 = smov 0   ;;  %s1313_s13 = smov 0   ;;  %s1591_s0 = inlined_call_operand.vmem [shape: bf16[8,1536], index: 0, kind: input, shape index: {}]   ;;  %s1592_s1 = inlined_call_operand.vmem [shape: bf16[1536,384], index: 1, kind: input, shape index: {}]   ;;  %s1593_s2 = inlined_call_operand.vmem [shape: f32[1,384], index: 2, kind: input, shape index: {}]   ;;  %s1594_s3 = inlined_call_operand.vmem [shape: bf16[8,384], index: 3, kind: output, shape index: {}]  }
   0x1   :  { %s1315_s14 = smov 0   ;;  %s1317_s15 = smov 0  }
   0x2   :  { %s1319_s16 = smov 0   ;;  %s1321_s17 = smov 0  }
   0x3   :  { %s1323_s18 = smov 0  }
   0x4 LB: > { %s25_s19 = sadd.s32 1, %s1280_s16  ;;  %s28_s20 = sadd.s32 1, %s1284_s17  ;;  %s1288_s18 = sphi %s1323_s18, %s13_s18   ;;  %s1284_s17 = sphi %s1321_s17, %s1600_s17   ;;  %s1280_s16 = sphi %s1319_s16, %s1599_s16   ;;  %s1276_s15 = sphi %s1317_s15, %s1598_s15   ;;  %s1272_s14 = sphi %s1315_s14, %s1597_s14   ;;  %s1268_s13 = sphi %s1313_s13, %s1596_s13   ;;  %s1264_s12 = sphi %s1311_s12, %s1595_s12  }
   0x5   : > { %p26_p0 = scmp.ge.s32.totalorder %s25_s19, 3  ;;  %p76_p1 = scmp.ne.s32.totalorder %s1268_s13, %s1264_s12 }
   0x6   : > { %p77_p2 = scmp.eq.s32.totalorder %s1288_s18, 0  ;;  %s69_s24 = sadd.s32 1, %s1268_s13 }
   0x7   : > { %s1602_s19 = smov (%p26_p0, %s25_s19), 0  ;;  %s1604_s20 = smov (!%p26_p0, %s28_s20), %s1284_s17 }
   0x8   : > { %p78_p3 = por %p77_p2, %p76_p1  ;;  %p30_p4 = scmp.ge.s32.totalorder %s1604_s20, 3 }
   0x9   : > { %s64_s21 = ssub.s32 %s1280_s16, %s1602_s19  ;;  %p1045_p6 = scmp.ge.s32.totalorder %s1288_s18, 9 }
   0xa   : > { %s1606_s20 = smov (%p30_p4, %s1604_s20), 0 }
   0xb   : > { %s65_s22 = ssub.s32 %s1284_s17, %s1606_s20  ;;  %156 = sbr.rel (%p1045_p6) target bundleno = 67 (0x43), region = 16 }
   0xc   : > { %s66_s23 = sor.u32 %s65_s22, %s64_s21 }
   0xd   : > { %p67_p5 = scmp.eq.s32.totalorder %s66_s23, 0 }
   0xf   : > { %s1362_s25 = scalar_select %p67_p5, %s1268_s13, %s69_s24  }
  0x12   : > { %172 = sbr.rel (!%p78_p3) target bundleno = 67 (0x43), region = 24  ;;  %s174_s26 = sand.u32 (%p78_p3), 1, %s1268_s13  }
  0x13   : > { %s1140_s27 = smul.u32 (%p78_p3), 192, %s1280_s16  ;;  %s1046_s28 = sshll.u32 (%p78_p3), %s174_s26, 8 }
  0x14   : > { %s1376_s7 = scalar_lea.vmem (%p78_p3), [#allocation3], %s1046_s28 }
  0x15   : > { %s179_s29 = sadd.s32 (%p78_p3), %s1284_s17, %s1140_s27 }
  0x16   : > { %s1049_s30 = sshll.u32 (%p78_p3), %s179_s29, 2 }
  0x17   : > { %s1371_s6 = scalar_lea.vmem (%p78_p3), %s1592_s1, %s1049_s30 }
  0x18   : > { %v197_v0 = vld [vmem:[%s1371_s6] sm:$0xf] (%p78_p3)  ;;  %v199_v1 = vld [vmem:[%s1371_s6 + $0xc] sm:$0xf] (%p78_p3)  ;;  %v201_v2 = vld [vmem:[%s1371_s6 + $0x18] sm:$0xf] (%p78_p3) }
  0x19   : > { %198 = vst [vmem:[%s1376_s7] sm:$0xf] %v197_v0  ;;  %200 = vst [vmem:[%s1376_s7 + $0x4] sm:$0xf] %v199_v1  ;;  %v203_v3 = vld [vmem:[%s1371_s6 + $0x24] sm:$0xf] }
  0x1a   : > { %202 = vst [vmem:[%s1376_s7 + $0x8] sm:$0xf] %v201_v2  ;;  %v205_v4 = vld [vmem:[%s1371_s6 + $0x30] sm:$0xf]  ;;  %v207_v5 = vld [vmem:[%s1371_s6 + $0x3c] sm:$0xf] }
  0x1b   : > { %204 = vst [vmem:[%s1376_s7 + $0xc] sm:$0xf] %v203_v3  ;;  %206 = vst [vmem:[%s1376_s7 + $0x10] sm:$0xf] %v205_v4  ;;  %v209_v6 = vld [vmem:[%s1371_s6 + $0x48] sm:$0xf] }
  0x1c   : > { %208 = vst [vmem:[%s1376_s7 + $0x14] sm:$0xf] %v207_v5  ;;  %v211_v7 = vld [vmem:[%s1371_s6 + $0x54] sm:$0xf]  ;;  %v213_v8 = vld [vmem:[%s1371_s6 + $0x60] sm:$0xf] }
  0x1d   : > { %210 = vst [vmem:[%s1376_s7 + $0x18] sm:$0xf] %v209_v6  ;;  %212 = vst [vmem:[%s1376_s7 + $0x1c] sm:$0xf] %v211_v7  ;;  %v215_v9 = vld [vmem:[%s1371_s6 + $0x6c] sm:$0xf] }
  0x1e   : > { %214 = vst [vmem:[%s1376_s7 + $0x20] sm:$0xf] %v213_v8  ;;  %v217_v10 = vld [vmem:[%s1371_s6 + $0x78] sm:$0xf]  ;;  %v219_v11 = vld [vmem:[%s1371_s6 + $0x84] sm:$0xf] }
  0x1f   : > { %216 = vst [vmem:[%s1376_s7 + $0x24] sm:$0xf] %v215_v9  ;;  %218 = vst [vmem:[%s1376_s7 + $0x28] sm:$0xf] %v217_v10  ;;  %v221_v12 = vld [vmem:[%s1371_s6 + $0x90] sm:$0xf] }
  0x20   : > { %220 = vst [vmem:[%s1376_s7 + $0x2c] sm:$0xf] %v219_v11  ;;  %v223_v13 = vld [vmem:[%s1371_s6 + $0x9c] sm:$0xf]  ;;  %v225_v14 = vld [vmem:[%s1371_s6 + $0xa8] sm:$0xf] }
  0x21   : > { %222 = vst [vmem:[%s1376_s7 + $0x30] sm:$0xf] %v221_v12  ;;  %224 = vst [vmem:[%s1376_s7 + $0x34] sm:$0xf] %v223_v13  ;;  %v227_v15 = vld [vmem:[%s1371_s6 + $0xb4] sm:$0xf] }
  0x22   : > { %226 = vst [vmem:[%s1376_s7 + $0x38] sm:$0xf] %v225_v14  ;;  %v229_v16 = vld [vmem:[%s1371_s6 + $0xc0] sm:$0xf]  ;;  %v231_v17 = vld [vmem:[%s1371_s6 + $0xcc] sm:$0xf] }
  0x23   : > { %228 = vst [vmem:[%s1376_s7 + $0x3c] sm:$0xf] %v227_v15  ;;  %230 = vst [vmem:[%s1376_s7 + $0x40] sm:$0xf] %v229_v16  ;;  %v233_v18 = vld [vmem:[%s1371_s6 + $0xd8] sm:$0xf] }
  0x24   : > { %232 = vst [vmem:[%s1376_s7 + $0x44] sm:$0xf] %v231_v17  ;;  %v235_v19 = vld [vmem:[%s1371_s6 + $0xe4] sm:$0xf]  ;;  %v237_v20 = vld [vmem:[%s1371_s6 + $0xf0] sm:$0xf] }
  0x25   : > { %234 = vst [vmem:[%s1376_s7 + $0x48] sm:$0xf] %v233_v18  ;;  %236 = vst [vmem:[%s1376_s7 + $0x4c] sm:$0xf] %v235_v19  ;;  %v239_v21 = vld [vmem:[%s1371_s6 + $0xfc] sm:$0xf] }
  0x26   : > { %238 = vst [vmem:[%s1376_s7 + $0x50] sm:$0xf] %v237_v20  ;;  %v241_v22 = vld [vmem:[%s1371_s6 + $0x108] sm:$0xf]  ;;  %v243_v23 = vld [vmem:[%s1371_s6 + $0x114] sm:$0xf] }
  0x27   : > { %240 = vst [vmem:[%s1376_s7 + $0x54] sm:$0xf] %v239_v21  ;;  %242 = vst [vmem:[%s1376_s7 + $0x58] sm:$0xf] %v241_v22  ;;  %v245_v24 = vld [vmem:[%s1371_s6 + $0x120] sm:$0xf] }
  0x28   : > { %244 = vst [vmem:[%s1376_s7 + $0x5c] sm:$0xf] %v243_v23  ;;  %v247_v25 = vld [vmem:[%s1371_s6 + $0x12c] sm:$0xf]  ;;  %v249_v26 = vld [vmem:[%s1371_s6 + $0x138] sm:$0xf] }
  0x29   : > { %246 = vst [vmem:[%s1376_s7 + $0x60] sm:$0xf] %v245_v24  ;;  %248 = vst [vmem:[%s1376_s7 + $0x64] sm:$0xf] %v247_v25  ;;  %v251_v27 = vld [vmem:[%s1371_s6 + $0x144] sm:$0xf] }
  0x2a   : > { %250 = vst [vmem:[%s1376_s7 + $0x68] sm:$0xf] %v249_v26  ;;  %v253_v28 = vld [vmem:[%s1371_s6 + $0x150] sm:$0xf]  ;;  %v255_v29 = vld [vmem:[%s1371_s6 + $0x15c] sm:$0xf] }
  0x2b   : > { %252 = vst [vmem:[%s1376_s7 + $0x6c] sm:$0xf] %v251_v27  ;;  %254 = vst [vmem:[%s1376_s7 + $0x70] sm:$0xf] %v253_v28  ;;  %v257_v30 = vld [vmem:[%s1371_s6 + $0x168] sm:$0xf] }
  0x2c   : > { %256 = vst [vmem:[%s1376_s7 + $0x74] sm:$0xf] %v255_v29  ;;  %v259_v31 = vld [vmem:[%s1371_s6 + $0x174] sm:$0xf]  ;;  %v261_v32 = vld [vmem:[%s1371_s6 + $0x180] sm:$0xf] }
  0x2d   : > { %258 = vst [vmem:[%s1376_s7 + $0x78] sm:$0xf] %v257_v30  ;;  %260 = vst [vmem:[%s1376_s7 + $0x7c] sm:$0xf] %v259_v31  ;;  %v263_v33 = vld [vmem:[%s1371_s6 + $0x18c] sm:$0xf] }
  0x2e   : > { %262 = vst [vmem:[%s1376_s7 + $0x80] sm:$0xf] %v261_v32  ;;  %v265_v34 = vld [vmem:[%s1371_s6 + $0x198] sm:$0xf]  ;;  %v267_v35 = vld [vmem:[%s1371_s6 + $0x1a4] sm:$0xf] }
  0x2f   : > { %264 = vst [vmem:[%s1376_s7 + $0x84] sm:$0xf] %v263_v33  ;;  %266 = vst [vmem:[%s1376_s7 + $0x88] sm:$0xf] %v265_v34  ;;  %v269_v36 = vld [vmem:[%s1371_s6 + $0x1b0] sm:$0xf] }
  0x30   : > { %268 = vst [vmem:[%s1376_s7 + $0x8c] sm:$0xf] %v267_v35  ;;  %v271_v37 = vld [vmem:[%s1371_s6 + $0x1bc] sm:$0xf]  ;;  %v273_v38 = vld [vmem:[%s1371_s6 + $0x1c8] sm:$0xf] }
  0x31   : > { %270 = vst [vmem:[%s1376_s7 + $0x90] sm:$0xf] %v269_v36  ;;  %272 = vst [vmem:[%s1376_s7 + $0x94] sm:$0xf] %v271_v37  ;;  %v275_v39 = vld [vmem:[%s1371_s6 + $0x1d4] sm:$0xf] }
  0x32   : > { %274 = vst [vmem:[%s1376_s7 + $0x98] sm:$0xf] %v273_v38  ;;  %v277_v40 = vld [vmem:[%s1371_s6 + $0x1e0] sm:$0xf]  ;;  %v279_v41 = vld [vmem:[%s1371_s6 + $0x1ec] sm:$0xf] }
  0x33   : > { %276 = vst [vmem:[%s1376_s7 + $0x9c] sm:$0xf] %v275_v39  ;;  %278 = vst [vmem:[%s1376_s7 + $0xa0] sm:$0xf] %v277_v40  ;;  %v281_v42 = vld [vmem:[%s1371_s6 + $0x1f8] sm:$0xf] }
  0x34   : > { %280 = vst [vmem:[%s1376_s7 + $0xa4] sm:$0xf] %v279_v41  ;;  %v283_v43 = vld [vmem:[%s1371_s6 + $0x204] sm:$0xf]  ;;  %v285_v44 = vld [vmem:[%s1371_s6 + $0x210] sm:$0xf] }
  0x35   : > { %282 = vst [vmem:[%s1376_s7 + $0xa8] sm:$0xf] %v281_v42  ;;  %284 = vst [vmem:[%s1376_s7 + $0xac] sm:$0xf] %v283_v43  ;;  %v287_v45 = vld [vmem:[%s1371_s6 + $0x21c] sm:$0xf] }
  0x36   : > { %286 = vst [vmem:[%s1376_s7 + $0xb0] sm:$0xf] %v285_v44  ;;  %v289_v46 = vld [vmem:[%s1371_s6 + $0x228] sm:$0xf]  ;;  %v291_v47 = vld [vmem:[%s1371_s6 + $0x234] sm:$0xf] }
  0x37   : > { %288 = vst [vmem:[%s1376_s7 + $0xb4] sm:$0xf] %v287_v45  ;;  %290 = vst [vmem:[%s1376_s7 + $0xb8] sm:$0xf] %v289_v46  ;;  %v293_v48 = vld [vmem:[%s1371_s6 + $0x240] sm:$0xf] }
  0x38   : > { %292 = vst [vmem:[%s1376_s7 + $0xbc] sm:$0xf] %v291_v47  ;;  %v295_v49 = vld [vmem:[%s1371_s6 + $0x24c] sm:$0xf]  ;;  %v297_v50 = vld [vmem:[%s1371_s6 + $0x258] sm:$0xf] }
  0x39   : > { %294 = vst [vmem:[%s1376_s7 + $0xc0] sm:$0xf] %v293_v48  ;;  %296 = vst [vmem:[%s1376_s7 + $0xc4] sm:$0xf] %v295_v49  ;;  %v299_v51 = vld [vmem:[%s1371_s6 + $0x264] sm:$0xf] }
  0x3a   : > { %298 = vst [vmem:[%s1376_s7 + $0xc8] sm:$0xf] %v297_v50  ;;  %v301_v52 = vld [vmem:[%s1371_s6 + $0x270] sm:$0xf]  ;;  %v303_v53 = vld [vmem:[%s1371_s6 + $0x27c] sm:$0xf] }
  0x3b   : > { %300 = vst [vmem:[%s1376_s7 + $0xcc] sm:$0xf] %v299_v51  ;;  %302 = vst [vmem:[%s1376_s7 + $0xd0] sm:$0xf] %v301_v52  ;;  %v305_v54 = vld [vmem:[%s1371_s6 + $0x288] sm:$0xf] }
  0x3c   : > { %304 = vst [vmem:[%s1376_s7 + $0xd4] sm:$0xf] %v303_v53  ;;  %v307_v55 = vld [vmem:[%s1371_s6 + $0x294] sm:$0xf]  ;;  %v309_v56 = vld [vmem:[%s1371_s6 + $0x2a0] sm:$0xf] }
  0x3d   : > { %306 = vst [vmem:[%s1376_s7 + $0xd8] sm:$0xf] %v305_v54  ;;  %308 = vst [vmem:[%s1376_s7 + $0xdc] sm:$0xf] %v307_v55  ;;  %v311_v57 = vld [vmem:[%s1371_s6 + $0x2ac] sm:$0xf] }
  0x3e   : > { %310 = vst [vmem:[%s1376_s7 + $0xe0] sm:$0xf] %v309_v56  ;;  %v313_v58 = vld [vmem:[%s1371_s6 + $0x2b8] sm:$0xf]  ;;  %v315_v59 = vld [vmem:[%s1371_s6 + $0x2c4] sm:$0xf] }
  0x3f   : > { %312 = vst [vmem:[%s1376_s7 + $0xe4] sm:$0xf] %v311_v57  ;;  %314 = vst [vmem:[%s1376_s7 + $0xe8] sm:$0xf] %v313_v58  ;;  %v317_v60 = vld [vmem:[%s1371_s6 + $0x2d0] sm:$0xf] }
  0x40   : > { %316 = vst [vmem:[%s1376_s7 + $0xec] sm:$0xf] %v315_v59  ;;  %v319_v61 = vld [vmem:[%s1371_s6 + $0x2dc] sm:$0xf]  ;;  %v321_v62 = vld [vmem:[%s1371_s6 + $0x2e8] sm:$0xf] }
  0x41   : > { %318 = vst [vmem:[%s1376_s7 + $0xf0] sm:$0xf] %v317_v60  ;;  %320 = vst [vmem:[%s1376_s7 + $0xf4] sm:$0xf] %v319_v61  ;;  %v323_v63 = vld [vmem:[%s1371_s6 + $0x2f4] sm:$0xf] }
  0x42   : > { %322 = vst [vmem:[%s1376_s7 + $0xf8] sm:$0xf] %v321_v62  ;;  %324 = vst [vmem:[%s1376_s7 + $0xfc] sm:$0xf] %v323_v63 }
  0x43 PF: > { %p1050_p7 = scmp.ge.s32.totalorder %s1288_s18, 1  ;;  %p480_p8 = scmp.lt.s32.totalorder %s1288_s18, 10 }
  0x45   : > { %p481_p9 = pnand %p1050_p7, %p480_p8 }
  0x46   : > { %s487_s8 = sand.u32 (!%p481_p9), 1, %s1264_s12   ;;  %s1052_s9 = sshll.u32 (!%p481_p9), %s1272_s14, 2 }
  0x47   : > { %484 = sbr.rel (%p481_p9) target bundleno = 357 (0x165), region = 69  ;;  %s1051_s10 = sshll.u32 (!%p481_p9), %s487_s8, 8 }
  0x48   : > { %p528_p10 = scmp.lt.s32.totalorder (!%p481_p9), %s1052_s9, 11  ;;  %p536_p11 = scmp.lt.s32.totalorder (!%p481_p9), %s1276_s15, 2 }
  0x49   : > { %s1526_s4 = scalar_lea.vmem (!%p481_p9), [#allocation3], %s1051_s10  ;;  %p1055_p12 = scmp.ne.s32.totalorder (!%p481_p9), %s1272_s14, 0 }
  0x4e   : > { %s1608_s9 = smov (!%p528_p10, %s1052_s9), 11  ;;  %s1610_s15 = smov (!%p536_p11, %s1276_s15), 2 }
  0x4f   : > { %s1053_s11 = sshll.u32 %s1608_s9, 2  ;;  %s538_s27 = scalar_lea.vmem %s1593_s2, %s1610_s15  ;;  %v1290_v0 = vmov (!%p1055_p12), 0.0  }
  0x50   : > { %s1514_s23 = scalar_lea.vmem %s1591_s0, %s1053_s11  ;;  %s1054_s12 = sshll.u32 %s1610_s15, 2  ;;  %552 = vst [vmem:[#allocation2] sm:$0xff] (!%p1055_p12), %v1290_v0 }
  0x51   : > { %s1524_s30 = scalar_lea.vmem %s1594_s3, %s1054_s12  ;;  %551 = sbr.rel (%p1055_p12) target bundleno = 88 (0x58), region = 77 }
  0x58 PF: > { %v1198_v1 = vld [vmem:[%s1526_s4 + $0x40] sm:$0xff]   ;;  %v1202_v5 = vld [vmem:[%s1526_s4 + $0x48] sm:$0xff]   ;;  %v1206_v9 = vld [vmem:[%s1526_s4 + $0x50] sm:$0xff]   ;;  %p1092_p13 = scmp.ne.s32.totalorder %s1272_s14, 2 }
  0x59   : > { %v1199_v2 = vld [vmem:[%s1526_s4 + $0xc0] sm:$0xff]   ;;  %1096 = vmatprep.subr.bf16.mxu0 %v1198_v1  ;;  %v1203_v6 = vld [vmem:[%s1526_s4 + $0xc8] sm:$0xff]   ;;  %v1207_v10 = vld [vmem:[%s1526_s4 + $0xd0] sm:$0xff]  }
  0x5a   : > { %v1200_v3 = vld [vmem:[%s1526_s4] sm:$0xff]   ;;  %1118 = vmatprep.subr.bf16.mxu1 %v1199_v2  ;;  %v1204_v7 = vld [vmem:[%s1526_s4 + $0x8] sm:$0xff]   ;;  %v1208_v11 = vld [vmem:[%s1526_s4 + $0x10] sm:$0xff]  }
  0x5b   : > { %v1201_v4 = vld [vmem:[%s1526_s4 + $0x80] sm:$0xff]   ;;  %1097 = vmatpush3.bf16.msra.mxu0 %v1200_v3  ;;  %v1205_v8 = vld [vmem:[%s1526_s4 + $0x88] sm:$0xff]   ;;  %v1209_v12 = vld [vmem:[%s1526_s4 + $0x90] sm:$0xff]  }
  0x5c   : > { %1119 = vmatpush3.bf16.msra.mxu1 %v1201_v4  ;;  %1098 = vmatprep.subr.bf16.mxu0 %v1202_v5  ;;  %v1210_v13 = vld [vmem:[%s1526_s4 + $0x58] sm:$0xff]   ;;  %v1214_v17 = vld [vmem:[%s1526_s4 + $0x60] sm:$0xff]   ;;  %v1218_v21 = vld [vmem:[%s1526_s4 + $0x68] sm:$0xff]  }
  0x5d   : > { %1120 = vmatprep.subr.bf16.mxu1 %v1203_v6  ;;  %v1211_v14 = vld [vmem:[%s1526_s4 + $0xd8] sm:$0xff]   ;;  %v1215_v18 = vld [vmem:[%s1526_s4 + $0xe0] sm:$0xff]   ;;  %v1219_v22 = vld [vmem:[%s1526_s4 + $0xe8] sm:$0xff]  }
  0x5e   : > { %v1212_v15 = vld [vmem:[%s1526_s4 + $0x18] sm:$0xff]   ;;  %v1216_v19 = vld [vmem:[%s1526_s4 + $0x20] sm:$0xff]   ;;  %v1220_v23 = vld [vmem:[%s1526_s4 + $0x28] sm:$0xff]  }
  0x5f   : > { %1099 = vmatpush3.bf16.msra.mxu0 %v1204_v7  ;;  %v1213_v16 = vld [vmem:[%s1526_s4 + $0x98] sm:$0xff]   ;;  %v1217_v20 = vld [vmem:[%s1526_s4 + $0xa0] sm:$0xff]   ;;  %v1221_v24 = vld [vmem:[%s1526_s4 + $0xa8] sm:$0xff]  }
  0x60   : > { %1121 = vmatpush3.bf16.msra.mxu1 %v1205_v8  ;;  %1100 = vmatprep.subr.bf16.mxu0 %v1206_v9  ;;  %v1222_v25 = vld [vmem:[%s1526_s4 + $0x70] sm:$0xff]   ;;  %v1226_v29 = vld [vmem:[%s1526_s4 + $0x78] sm:$0xff]   ;;  %v555_v34 = vld [vmem:[%s1514_s23 + $0x8] sm:$0xff] }
  0x61   : > { %1122 = vmatprep.subr.bf16.mxu1 %v1207_v10  ;;  %v1223_v26 = vld [vmem:[%s1526_s4 + $0xf0] sm:$0xff]   ;;  %v1227_v30 = vld [vmem:[%s1526_s4 + $0xf8] sm:$0xff]   ;;  %v1058_v37 = vcombine.low %v555_v34, %v555_v34  ;;  %v1059_v38 = vcombine.high %v555_v34, %v555_v34 }
  0x62   : > { %v1224_v27 = vld [vmem:[%s1526_s4 + $0x30] sm:$0xff]   ;;  %v1228_v31 = vld [vmem:[%s1526_s4 + $0x38] sm:$0xff]  }
  0x63   : > { %1101 = vmatpush3.bf16.msra.mxu0 %v1208_v11  ;;  %v1225_v28 = vld [vmem:[%s1526_s4 + $0xb0] sm:$0xff]   ;;  %v1229_v32 = vld [vmem:[%s1526_s4 + $0xb8] sm:$0xff]   ;;  %898 = vmatprep.mubr.bf16.mxu1 %v1059_v38 }
  0x64   : > { %1123 = vmatpush3.bf16.msra.mxu1 %v1209_v12  ;;  %1102 = vmatprep.subr.bf16.mxu0 %v1210_v13  ;;  %v554_v33 = vld [vmem:[%s1514_s23] sm:$0xff] }
  0x65   : > { %1124 = vmatprep.subr.bf16.mxu1 %v1211_v14  ;;  %v1056_v35 = vcombine.low %v554_v33, %v554_v33  ;;  %v1057_v36 = vcombine.high %v554_v33, %v554_v33  ;;  %v553_v47 = vld [vmem:[#allocation2] sm:$0xff] }
  0x66   : > { %v1093_v53 = vld [vmem:[%s538_s27] ss:$0 sm:$0xff] (!%p1092_p13) }
  0x67   : > { %1103 = vmatpush3.bf16.msra.mxu0 %v1212_v15  ;;  %858 = vmatprep.mubr.bf16.mxu0 %v1057_v36 }
  0x68   : > { %1125 = vmatpush3.bf16.msra.mxu1 %v1213_v16  ;;  %1104 = vmatprep.subr.bf16.mxu0 %v1214_v17 }
  0x69   : > { %1126 = vmatprep.subr.bf16.mxu1 %v1215_v18 }
  0x6b   : > { %1105 = vmatpush3.bf16.msra.mxu0 %v1216_v19 }
  0x6c   : > { %1127 = vmatpush3.bf16.msra.mxu1 %v1217_v20  ;;  %1106 = vmatprep.subr.bf16.mxu0 %v1218_v21 }
  0x6d   : > { %1128 = vmatprep.subr.bf16.mxu1 %v1219_v22 }
  0x6f   : > { %1107 = vmatpush3.bf16.msra.mxu0 %v1220_v23 }
  0x70   : > { %1129 = vmatpush3.bf16.msra.mxu1 %v1221_v24  ;;  %1108 = vmatprep.subr.bf16.mxu0 %v1222_v25 }
  0x71   : > { %1130 = vmatprep.subr.bf16.mxu1 %v1223_v26 }
  0x73   : > { %1109 = vmatpush3.bf16.msra.mxu0 %v1224_v27 }
  0x74   : > { %1131 = vmatpush3.bf16.msra.mxu1 %v1225_v28  ;;  %1110 = vmatprep.subr.bf16.mxu0 %v1226_v29 }
  0x75   : > { %1132 = vmatprep.subr.bf16.mxu1 %v1227_v30 }
  0x77   : > { %1111 = vmatpush3.bf16.msra.mxu0 %v1228_v31 }
  0x78   : > { %1133 = vmatpush3.bf16.msra.mxu1 %v1229_v32 }
  0x7a   : > { %859 = vmatmul.mubr.bf16.vlgmr.msra.gmra.mrb[0].mxu0 %v1056_v35 }
  0x7b   : > { %899 = vmatmul.mubr.bf16.vlgmr.msra.gmra.mrb[0].mxu1 %v1058_v37 }
 0x14d   : > { %v1112_v39 = vpop.f32.mrb[0].mxu0 }
 0x14e   : > { %v1134_v40 = vpop.f32.mrb[0].mxu1  ;;  %v1113_v41 = vpop.f32.mrb[1].mxu0 }
 0x14f   : > { %v1135_v42 = vpop.f32.mrb[1].mxu1  ;;  %v1114_v43 = vadd.f32 %v1113_v41, %v1112_v39  ;;  %v1115_v45 = vpop.f32.mrb[2].mxu0 }
 0x150   : > { %v1136_v44 = vadd.f32 %v1135_v42, %v1134_v40  ;;  %v1137_v46 = vpop.f32.mrb[2].mxu1  ;;  %v1116_v48 = vpop.f32.mrb[3].mxu0  ;;  %911 = sbr.rel (%p1092_p13) target bundleno = 357 (0x165), region = 81 }
 0x151   : > { %v1138_v49 = vpop.f32.mrb[3].mxu1 }
 0x152   : > { %v901_v50 = vadd.f32 %v1136_v44, %v1114_v43 }
 0x154   : > { %v906_v51 = vadd.f32 %v901_v50, %v553_v47 }
 0x156   : > { %907 = vst [vmem:[#allocation2] sm:$0xff] %v906_v51 }
 0x15d   : > { %v912_v52 = vld [vmem:[#allocation2] sm:$0xff] }
 0x15e   : > { %v920_v54 = vadd.f32 %v1093_v53, %v912_v52 }
 0x160   : > { %v921_v55 = vmax.f32 %v920_v54, 0.0 }
 0x162   : > { %v922_v56 = vpack.c.bf16 %v921_v55, %v921_v55 }
 0x164   : > { %923 = vst [vmem:[%s1524_s30] sm:$0xf] %v922_v56 }
 0x165 PF: > { %s13_s18 = sadd.s32 1, %s1288_s18   ;;  %s1595_s12 = smov %s1268_s13 }
 0x166   : > { %p10_p0 = scmp.ge.s32.totalorder %s13_s18, 11   ;;  %s1596_s13 = smov %s1362_s25 }
 0x167   : > { %s1597_s14 = smov %s1280_s16  ;;  %s1598_s15 = smov %s1284_s17 }
 0x168   : > { %s1599_s16 = smov %s1602_s19  ;;  %s1600_s17 = smov %s1606_s20 }
 0x169   :  { %12 = sbr.rel (!%p10_p0) target bundleno = 4 (0x4), region = 122 }

// kernel: leipnet_forward.25
= control target key start
LH: loop header
LB: loop body
LE: loop exit
PB: predicated region body
PF: predicated region fallthrough
CT: control target
= control target key end

     0   :  { %s701_s12 = smov 0   ;;  %s703_s13 = smov 0   ;;  %s768_s0 = inlined_call_operand.vmem [shape: bf16[8,2944], index: 0, kind: input, shape index: {}]   ;;  %s769_s1 = inlined_call_operand.vmem [shape: bf16[2944,256], index: 1, kind: input, shape index: {}]   ;;  %s770_s2 = inlined_call_operand.vmem [shape: f32[1,256], index: 2, kind: input, shape index: {}]   ;;  %s771_s3 = inlined_call_operand.vmem [shape: bf16[8,256], index: 3, kind: output, shape index: {}]  }
   0x1   :  { %s705_s14 = smov 0  }
   0x2 LB: > { %s25_s15 = sadd.s32 1, %s673_s13  ;;  %p575_p0 = scmp.ge.s32.totalorder %s677_s14, 1  ;;  %s677_s14 = sphi %s705_s14, %s13_s14   ;;  %s673_s13 = sphi %s703_s13, %s773_s13   ;;  %s669_s12 = sphi %s701_s12, %s772_s12  }
   0x3   : > { %p26_p1 = scmp.ge.s32.totalorder %s25_s15, 23  ;;  %p192_p2 = scmp.lt.s32.totalorder %s677_s14, 24 }
   0x5   : > { %s775_s15 = smov (%p26_p1, %s25_s15), 0  ;;  %p193_p3 = pnand %p575_p0, %p192_p2 }
   0x6   : > { %p239_p4 = scmp.lt.s32.totalorder (!%p193_p3), %s669_s12, 22  ;;  %s577_s16 = sshll.u32 (!%p193_p3), %s669_s12, 4 }
   0x7   : > { %196 = sbr.rel (%p193_p3) target bundleno = 285 (0x11d), region = 32  ;;  %p247_p5 = scmp.lt.s32.totalorder (!%p193_p3), %s577_s16, 367 }
   0x8   : > { %p580_p6 = scmp.ne.s32.totalorder (!%p193_p3), %s669_s12, 0 }
   0xe   : > { %s240_s17 = scalar_select %p239_p4, %s669_s12, 22 }
   0xf   : > { %s777_s16 = smov (!%p247_p5, %s577_s16), 367  ;;  %276 = sbr.rel (%p580_p6) target bundleno = 22 (0x16), region = 36 }
  0x10   : > { %s576_s18 = sshll.u32 %s240_s17, 2  ;;  %s603_s22 = sshll.u32 %s777_s16, 3  ;;  %v679_v0 = vmov (!%p580_p6), 0.0  }
  0x11   : > { %s727_s21 = scalar_lea.vmem %s768_s0, %s576_s18  ;;  %s732_s25 = scalar_lea.vmem %s769_s1, %s603_s22  ;;  %277 = vst [vmem:[#allocation2] sm:$0xff] (!%p580_p6), %v679_v0  ;;  %278 = vst [vmem:[#allocation2 + $0x8] sm:$0xff] (!%p580_p6), %v679_v0 }
  0x16 PF: > { %v631_v1 = vld [vmem:[%s732_s25 + $0x4] ss:$8 sps:$4 sm:$0xff]   ;;  %v633_v2 = vld [vmem:[%s732_s25] ss:$8 sps:$4 sm:$0xff]   ;;  %v680_v3 = vmov 0   ;;  %p597_p7 = scmp.ne.s32.totalorder %s669_s12, 22 }
  0x17   : > { %410 = vmatprep.mubr.bf16.mxu0 %v680_v3  ;;  %378 = vmatprep.subr.bf16.mxu0 %v631_v1  ;;  %v634_v4 = vld [vmem:[%s732_s25 + $0x14] ss:$8 sps:$4 sm:$0xff]   ;;  %v636_v5 = vld [vmem:[%s732_s25 + $0x10] ss:$8 sps:$4 sm:$0xff]   ;;  %v637_v6 = vld [vmem:[%s732_s25 + $0x24] ss:$8 sps:$4 sm:$0xff]   ;;  %v431_v27 = vlaneseq (!%p597_p7) }
  0x18   : > { %379 = vmatpush1.bf16.msra.mxu0 %v633_v2  ;;  %v639_v7 = vld [vmem:[%s732_s25 + $0x20] ss:$8 sps:$4 sm:$0xff]   ;;  %v640_v8 = vld [vmem:[%s732_s25 + $0x34] ss:$8 sps:$4 sm:$0xff]   ;;  %v642_v9 = vld [vmem:[%s732_s25 + $0x30] ss:$8 sps:$4 sm:$0xff]  }
  0x19   : > { %380 = vmatprep.subr.bf16.mxu0 %v634_v4  ;;  %v643_v10 = vld [vmem:[%s732_s25 + $0x44] ss:$8 sps:$4 sm:$0xff]   ;;  %v645_v11 = vld [vmem:[%s732_s25 + $0x40] ss:$8 sps:$4 sm:$0xff]   ;;  %v646_v12 = vld [vmem:[%s732_s25 + $0x54] ss:$8 sps:$4 sm:$0xff]  }
  0x1a   : > { %v648_v13 = vld [vmem:[%s732_s25 + $0x50] ss:$8 sps:$4 sm:$0xff]   ;;  %v649_v14 = vld [vmem:[%s732_s25 + $0x64] ss:$8 sps:$4 sm:$0xff]   ;;  %v651_v15 = vld [vmem:[%s732_s25 + $0x60] ss:$8 sps:$4 sm:$0xff]  }
  0x1b   : > { %v652_v16 = vld [vmem:[%s732_s25 + $0x74] ss:$8 sps:$4 sm:$0xff]   ;;  %v654_v17 = vld [vmem:[%s732_s25 + $0x70] ss:$8 sps:$4 sm:$0xff]   ;;  %v281_v18 = vld [vmem:[%s727_s21] sm:$0xf] }
  0x1c   : > { %381 = vmatpush1.bf16.msra.mxu0 %v636_v5  ;;  %v279_v19 = vld [vmem:[#allocation2] sm:$0xff]  ;;  %v280_v20 = vld [vmem:[#allocation2 + $0x8] sm:$0xff]  ;;  %v432_v28 = vshrl.u32 (!%p597_p7), %v431_v27, 7 }
  0x1d   : > { %382 = vmatprep.subr.bf16.mxu0 %v637_v6  ;;  %v429_v29 = vld [vmem:[%s770_s2] sm:$0x3] (!%p597_p7) }
  0x1e   : > { %v433_v30 = vsub.s32 (!%p597_p7), 0, %v432_v28  ;;  %v437_v31 = vsub.s32 (!%p597_p7), 1, %v432_v28 }
  0x20   : > { %383 = vmatpush1.bf16.msra.mxu0 %v639_v7  ;;  %v434_v34 = vrot.slane (!%p597_p7), %v429_v29, %v433_v30  ;;  %v438_v35 = vrot.slane (!%p597_p7), %v429_v29, %v437_v31 }
  0x21   : > { %384 = vmatprep.subr.bf16.mxu0 %v640_v8 }
  0x24   : > { %385 = vmatpush1.bf16.msra.mxu0 %v642_v9 }
  0x25   : > { %386 = vmatprep.subr.bf16.mxu0 %v643_v10 }
  0x28   : > { %387 = vmatpush1.bf16.msra.mxu0 %v645_v11 }
  0x29   : > { %388 = vmatprep.subr.bf16.mxu0 %v646_v12 }
  0x2c   : > { %389 = vmatpush1.bf16.msra.mxu0 %v648_v13 }
  0x2d   : > { %390 = vmatprep.subr.bf16.mxu0 %v649_v14 }
  0x30   : > { %391 = vmatpush1.bf16.msra.mxu0 %v651_v15 }
  0x31   : > { %392 = vmatprep.subr.bf16.mxu0 %v652_v16 }
  0x34   : > { %393 = vmatpush1.bf16.msra.mxu0 %v654_v17 }
  0x37   : > { %411 = vmatmul.mubr.bf16.vlgmr.msra.gmra.mrb[0].mxu0 %v281_v18 }
 0x108   : > { %426 = sbr.rel (%p597_p7) target bundleno = 285 (0x11d), region = 40 }
 0x10a   : > { %v412_v21 = vpop.f32.mrb[0].mxu0 }
 0x10b   : > { %v419_v22 = vadd.f32 %v412_v21, %v279_v19  ;;  %v414_v23 = vpop.f32.mrb[1].mxu0 }
 0x10c   : > { %v420_v24 = vadd.f32 %v414_v23, %v280_v20  ;;  %v416_v25 = vpop.f32.mrb[2].mxu0 }
 0x10d   : > { %421 = vst [vmem:[#allocation2] sm:$0xff] %v419_v22  ;;  %v417_v26 = vpop.f32.mrb[3].mxu0 }
 0x10e   : > { %422 = vst [vmem:[#allocation2 + $0x8] sm:$0xff] %v420_v24 }
 0x114   : > { %v427_v32 = vld [vmem:[#allocation2] sm:$0xff] }
 0x115   : > { %v428_v33 = vld [vmem:[#allocation2 + $0x8] sm:$0xff]  ;;  %v441_v36 = vadd.f32 %v434_v34, %v427_v32 }
 0x116   : > { %v442_v37 = vadd.f32 %v438_v35, %v428_v33 }
 0x117   : > { %v443_v38 = vmax.f32 %v441_v36, 0.0 }
 0x118   : > { %v444_v39 = vmax.f32 %v442_v37, 0.0 }
 0x11a   : > { %v604_v40 = vpack.c.bf16 %v444_v39, %v443_v38 }
 0x11c   : > { %453 = vst [vmem:[%s771_s3] sm:$0xff] %v604_v40 }
 0x11d PF: > { %s13_s14 = sadd.s32 1, %s677_s14   ;;  %s772_s12 = smov %s673_s13 }
 0x11e   : > { %p10_p8 = scmp.ge.s32.totalorder %s13_s14, 25   ;;  %s773_s13 = smov %s775_s15 }
 0x120   :  { %12 = sbr.rel (!%p10_p8) target bundleno = 2 (0x2), region = 76 }

// kernel: leipnet_forward.26
= control target key start
LH: loop header
LB: loop body
LE: loop exit
PB: predicated region body
PF: predicated region fallthrough
CT: control target
= control target key end

     0   :  { %s483_s6 = smov 0   ;;  %s485_s7 = smov 0   ;;  %s587_s0 = inlined_call_operand.vmem [shape: bf16[2,2,2,256], index: 0, kind: input, shape index: {}]   ;;  %s588_s1 = inlined_call_operand.vmem [shape: bf16[2,2,2,256], index: 1, kind: output, shape index: {}]  }
   0x1   :  { %s487_s8 = smov 0   ;;  %s489_s9 = smov 0  }
   0x2   :  { %s491_s10 = smov 0   ;;  %s493_s11 = smov 0  }
   0x3   :  { %s495_s12 = smov 0  }
   0x4 LB: > { %s20_s13 = sadd.s32 1, %s463_s10  ;;  %s23_s14 = sadd.s32 1, %s467_s11  ;;  %s471_s12 = sphi %s495_s12, %s11_s12   ;;  %s467_s11 = sphi %s493_s11, %s595_s11   ;;  %s463_s10 = sphi %s491_s10, %s594_s10   ;;  %s459_s9 = sphi %s489_s9, %s593_s9   ;;  %s455_s8 = sphi %s487_s8, %s592_s8   ;;  %s451_s7 = sphi %s485_s7, %s591_s7   ;;  %s447_s6 = sphi %s483_s6, %s590_s6  }
   0x5   : > { %p21_p0 = scmp.ge.s32.totalorder %s20_s13, 2  ;;  %s336_s15 = sadd.s32 4294967295, %s471_s12  }
   0x6   : > { %p39_p1 = scmp.ne.s32.totalorder %s451_s7, %s447_s6  ;;  %p40_p2 = scmp.eq.s32.totalorder %s471_s12, 0 }
   0x7   : > { %s597_s13 = smov (%p21_p0, %s20_s13), 0  ;;  %s599_s14 = smov (!%p21_p0, %s23_s14), %s467_s11 }
   0x8   : > { %p25_p3 = scmp.ge.s32.totalorder %s599_s14, 2  ;;  %p71_p4 = scmp.eq.s32.totalorder %s336_s15, 3 }
   0x9   : > { %s28_s16 = ssub.s32 %s463_s10, %s597_s13  ;;  %p41_p5 = por %p40_p2, %p39_p1 }
   0xa   : > { %s601_s14 = smov (%p25_p3, %s599_s14), 0  ;;  %p531_p6 = por %p71_p4, %p39_p1 }
   0xb   : > { %s27_s18 = ssub.s32 %s467_s11, %s601_s14  ;;  %s32_s20 = sadd.s32 1, %s451_s7 }
   0xc   : > { %s29_s19 = sor.u32 %s28_s16, %s27_s18  ;;  %p339_p8 = scmp.ge.s32.totalorder %s471_s12, 4 }
   0xd   : > { %p30_p7 = scmp.eq.s32.totalorder %s29_s19, 0 }
   0xe   : > { %93 = sbr.rel (%p339_p8) target bundleno = 28 (0x1c), region = 16 }
   0xf   : > { %s539_s21 = scalar_select %p30_p7, %s451_s7, %s32_s20  }
  0x15   : > { %96 = sbr.rel (!%p41_p5) target bundleno = 28 (0x1c), region = 20  ;;  %s98_s22 = sand.u32 (%p41_p5), 1, %s451_s7  }
  0x16   : > { %s341_s23 = sshll.u32 (%p41_p5), %s467_s11, 2  ;;  %s340_s24 = sshll.u32 (%p41_p5), %s98_s22, 1 }
  0x17   : > { %s102_s25 = sadd.s32 (%p41_p5), %s463_s10, %s341_s23  ;;  %s100_s29 = scalar_lea.vmem (%p41_p5), [#allocation2], %s340_s24 }
  0x18   : > { %s103_s28 = scalar_lea.vmem (%p41_p5), %s587_s0, %s102_s25 }
  0x19   : > { %v119_v0 = vld [vmem:[%s103_s28] sm:$0x1] (%p41_p5)  ;;  %v121_v1 = vld [vmem:[%s103_s28 + $0x2] sm:$0x1] (%p41_p5) }
  0x1a   : > { %120 = vst [vmem:[%s100_s29] sm:$0x1] (%p41_p5), %v119_v0  ;;  %122 = vst [vmem:[%s100_s29 + $0x1] sm:$0x1] (%p41_p5), %v121_v1 }
  0x1c PF: > { %p342_p9 = scmp.ge.s32.totalorder %s471_s12, 1  ;;  %p140_p10 = scmp.lt.s32.totalorder %s471_s12, 5 }
  0x1e   : > { %p141_p11 = pnand %p342_p9, %p140_p10 }
  0x1f   : > { %s147_s30 = sand.u32 (!%p141_p11), 1, %s447_s6   ;;  %vm169_vm0 = vcmask (!%p141_p11), 1041408  }
  0x20   : > { %144 = sbr.rel (%p141_p11) target bundleno = 134 (0x86), region = 54  ;;  %s551_s2 = sshll.u32 (!%p141_p11), %s147_s30, 1 }
  0x21   : > { %s149_s3 = scalar_lea.vmem (!%p141_p11), [#allocation2], %s551_s2  ;;  %s164_s4 = scalar_lea.vmem (!%p141_p11), [#allocation3], %s551_s2 }
  0x22   : > { %v165_v2 = vld [vmem:[%s149_s3] sm:$0x1] (!%p141_p11)  ;;  %v166_v3 = vld [vmem:[%s149_s3 + $0x1] sm:$0x1] (!%p141_p11) }
  0x23   : > { %v167_v4 = vunpack.c.l.bf16 (!%p141_p11), %v165_v2  ;;  %v168_v5 = vunpack.c.l.bf16 (!%p141_p11), %v166_v3 }
  0x25   : > { %v170_v6 = vsel (!%p141_p11), %vm169_vm0, %v167_v4, 0.0  ;;  %v171_v7 = vsel (!%p141_p11), %vm169_vm0, %v168_v5, 0.0 }
  0x26   : > { %v172_v8 = vadd.f32 (!%p141_p11), %v171_v7, %v170_v6 }
  0x27   : > { %s348_s5 = sshll.u32 (%p531_p6), %s459_s9, 2 }
  0x28   : > { %v173_v9 = vrot.slane %v172_v8, 4  ;;  %s229_s6 = sadd.s32 (%p531_p6), %s455_s8, %s348_s5 }
  0x29   : > { %s230_s18 = scalar_lea.vmem (%p531_p6), %s588_s1, %s229_s6 }
  0x2a   : > { %v174_v10 = vadd.f32 %v173_v9, %v172_v8 }
  0x2c   : > { %v175_v11 = vrot.slane %v174_v10, 2 }
  0x2e   : > { %v176_v12 = vadd.f32 %v175_v11, %v174_v10 }
  0x30   : > { %v177_v13 = vrot.slane %v176_v12, 1 }
  0x32   : > { %v178_v14 = vadd.f32 %v177_v13, %v176_v12 }
  0x34   : > { %v180_v15 = vmul.f32 0.25, %v178_v14 }
  0x36   : > { %v181_v16 = vsub.f32 %v167_v4, %v180_v15  ;;  %v182_v17 = vsub.f32 %v168_v5, %v180_v15 }
  0x38   : > { %v183_v18 = vmul.f32 %v181_v16, %v181_v16  ;;  %v184_v19 = vmul.f32 %v182_v17, %v182_v17 }
  0x3a   : > { %v185_v20 = vsel %vm169_vm0, %v183_v18, 0.0  ;;  %v186_v21 = vsel %vm169_vm0, %v184_v19, 0.0 }
  0x3b   : > { %v187_v22 = vadd.f32 %v186_v21, %v185_v20 }
  0x3d   : > { %v188_v23 = vrot.slane %v187_v22, 4 }
  0x3f   : > { %v189_v24 = vadd.f32 %v188_v23, %v187_v22 }
  0x41   : > { %v190_v25 = vrot.slane %v189_v24, 2 }
  0x43   : > { %v191_v26 = vadd.f32 %v190_v25, %v189_v24 }
  0x45   : > { %v192_v27 = vrot.slane %v191_v26, 1 }
  0x47   : > { %v193_v28 = vadd.f32 %v192_v27, %v191_v26 }
  0x49   : > { %v195_v29 = vmul.f32 0.33333334, %v193_v28 }
  0x4b   : > { %v196_v30 = vadd.f32 0.0001, %v195_v29 }
  0x4d   : > { %v197_v31 = vmul.f32 4.0, %v196_v30 }
  0x4f   : > { %407 = vrcp.f32 %v197_v31 }
  0x59   : > { %v408_v32 = vpop.eup %407 }
  0x5a   : > { %v199_v33 = vmul.f32 %v408_v32, %v183_v18  ;;  %v200_v34 = vmul.f32 %v408_v32, %v184_v19 }
  0x5c   : > { %v201_v35 = vadd.f32 0.5, %v199_v33  ;;  %v202_v36 = vadd.f32 0.5, %v200_v34 }
  0x5e   : > { %v345_v37 = vmul.f32 -1.442695, %v201_v35  ;;  %v346_v38 = vmul.f32 -1.442695, %v202_v36 }
  0x60   : > { %409 = vpow2.f32 %v345_v37 }
  0x61   : > { %411 = vpow2.f32 %v346_v38 }
  0x6a   : > { %v410_v39 = vpop.eup %409 }
  0x6b   : > { %v412_v40 = vpop.eup %411  ;;  %v209_v41 = vadd.f32 1.0, %v410_v39 }
  0x6c   : > { %v210_v42 = vadd.f32 1.0, %v412_v40 }
  0x6d   : > { %413 = vrcp.f32 %v209_v41 }
  0x6e   : > { %415 = vrcp.f32 %v210_v42 }
  0x77   : > { %v414_v43 = vpop.eup %413  ;;  %227 = sbr.rel (!%p531_p6) target bundleno = 134 (0x86), region = 62 }
  0x78   : > { %v416_v44 = vpop.eup %415  ;;  %v215_v45 = vmul.f32 %v414_v43, %v167_v4 }
  0x79   : > { %v216_v46 = vmul.f32 %v416_v44, %v168_v5 }
  0x7a   : > { %v217_v47 = vpack.c.bf16 %v215_v45, %v215_v45 }
  0x7b   : > { %v218_v48 = vpack.c.bf16 %v216_v46, %v216_v46 }
  0x7c   : > { %219 = vst [vmem:[%s164_s4] sm:$0x1] %v217_v47 }
  0x7d   : > { %220 = vst [vmem:[%s164_s4 + $0x1] sm:$0x1] %v218_v48 }
  0x83   : > { %v246_v49 = vld [vmem:[%s164_s4] sm:$0x1] }
  0x84   : > { %v248_v50 = vld [vmem:[%s164_s4 + $0x1] sm:$0x1]  ;;  %247 = vst [vmem:[%s230_s18] sm:$0x1] %v246_v49 }
  0x85   : > { %249 = vst [vmem:[%s230_s18 + $0x2] sm:$0x1] %v248_v50 }
  0x86 PF: > { %s11_s12 = sadd.s32 1, %s471_s12   ;;  %s590_s6 = smov %s451_s7 }
  0x87   : > { %p8_p12 = scmp.ge.s32.totalorder %s11_s12, 6   ;;  %s591_s7 = smov %s539_s21 }
  0x88   : > { %s592_s8 = smov %s463_s10  ;;  %s593_s9 = smov %s467_s11 }
  0x89   : > { %s594_s10 = smov %s597_s13  ;;  %s595_s11 = smov %s601_s14 }
  0x8a   :  { %10 = sbr.rel (!%p8_p12) target bundleno = 4 (0x4), region = 127 }

// kernel: leipnet_forward.27
= control target key start
LH: loop header
LB: loop body
LE: loop exit
PB: predicated region body
PF: predicated region fallthrough
CT: control target
= control target key end

     0   :  { %s700_s6 = smov 0   ;;  %s702_s7 = smov 0   ;;  %s840_s0 = inlined_call_operand.vmem [shape: bf16[2,2,2,256], index: 0, kind: input, shape index: {}]   ;;  %s841_s1 = inlined_call_operand.vmem [shape: bf16[2,8,8,256], index: 1, kind: output, shape index: {}]  }
   0x1   :  { %s704_s8 = smov 0   ;;  %s706_s9 = smov 0  }
   0x2   :  { %s708_s10 = smov 0   ;;  %s710_s11 = smov 0  }
   0x3   :  { %s712_s12 = smov 0  }
   0x4 LB: > { %s20_s13 = sadd.s32 1, %s680_s10  ;;  %s23_s14 = sadd.s32 1, %s684_s11  ;;  %s688_s12 = sphi %s712_s12, %s11_s12   ;;  %s684_s11 = sphi %s710_s11, %s848_s11   ;;  %s680_s10 = sphi %s708_s10, %s847_s10   ;;  %s676_s9 = sphi %s706_s9, %s846_s9   ;;  %s672_s8 = sphi %s704_s8, %s845_s8   ;;  %s668_s7 = sphi %s702_s7, %s844_s7   ;;  %s664_s6 = sphi %s700_s6, %s843_s6  }
   0x5   : > { %p21_p0 = scmp.ge.s32.totalorder %s20_s13, 2  ;;  %s529_s15 = sadd.s32 4294967295, %s688_s12  }
   0x6   : > { %p39_p1 = scmp.ne.s32.totalorder %s668_s7, %s664_s6  ;;  %p40_p2 = scmp.eq.s32.totalorder %s688_s12, 0 }
   0x7   : > { %s850_s13 = smov (%p21_p0, %s20_s13), 0  ;;  %s852_s14 = smov (!%p21_p0, %s23_s14), %s684_s11 }
   0x8   : > { %p25_p3 = scmp.ge.s32.totalorder %s852_s14, 2  ;;  %p71_p4 = scmp.eq.s32.totalorder %s529_s15, 3 }
   0x9   : > { %s28_s16 = ssub.s32 %s680_s10, %s850_s13  ;;  %p41_p5 = por %p40_p2, %p39_p1 }
   0xa   : > { %s854_s14 = smov (%p25_p3, %s852_s14), 0  ;;  %p748_p6 = por %p71_p4, %p39_p1 }
   0xb   : > { %s27_s18 = ssub.s32 %s684_s11, %s854_s14  ;;  %s32_s20 = sadd.s32 1, %s668_s7 }
   0xc   : > { %s29_s19 = sor.u32 %s28_s16, %s27_s18  ;;  %p532_p8 = scmp.ge.s32.totalorder %s688_s12, 4 }
   0xd   : > { %p30_p7 = scmp.eq.s32.totalorder %s29_s19, 0 }
   0xe   : > { %93 = sbr.rel (%p532_p8) target bundleno = 28 (0x1c), region = 16 }
   0xf   : > { %s756_s21 = scalar_select %p30_p7, %s668_s7, %s32_s20  }
  0x15   : > { %96 = sbr.rel (!%p41_p5) target bundleno = 28 (0x1c), region = 20  ;;  %s98_s22 = sand.u32 (%p41_p5), 1, %s668_s7  }
  0x16   : > { %s534_s23 = sshll.u32 (%p41_p5), %s684_s11, 2  ;;  %s533_s24 = sshll.u32 (%p41_p5), %s98_s22, 1 }
  0x17   : > { %s102_s25 = sadd.s32 (%p41_p5), %s680_s10, %s534_s23  ;;  %s100_s29 = scalar_lea.vmem (%p41_p5), [#allocation2], %s533_s24 }
  0x18   : > { %s103_s28 = scalar_lea.vmem (%p41_p5), %s840_s0, %s102_s25 }
  0x19   : > { %v119_v0 = vld [vmem:[%s103_s28] sm:$0x1] (%p41_p5)  ;;  %v121_v1 = vld [vmem:[%s103_s28 + $0x2] sm:$0x1] (%p41_p5) }
  0x1a   : > { %120 = vst [vmem:[%s100_s29] sm:$0x1] (%p41_p5), %v119_v0  ;;  %122 = vst [vmem:[%s100_s29 + $0x1] sm:$0x1] (%p41_p5), %v121_v1 }
  0x1c PF: > { %p535_p9 = scmp.ge.s32.totalorder %s688_s12, 1  ;;  %p140_p10 = scmp.lt.s32.totalorder %s688_s12, 5 }
  0x1e   : > { %p141_p11 = pnand %p535_p9, %p140_p10 }
  0x1f   : > { %s147_s30 = sand.u32 (!%p141_p11), 1, %s664_s6   ;;  %v243_v2 = vlaneseq (!%p141_p11)  ;;  %vm325_vm0 = vcmask (!%p141_p11), 1040384   ;;  %vm328_vm1 = vcmask (!%p141_p11), 1041408   ;;  %vm331_vm2 = vcmask (!%p141_p11), 1042432  }
  0x20   : > { %144 = sbr.rel (%p141_p11) target bundleno = 76 (0x4c), region = 54  ;;  %s536_s2 = sshll.u32 (!%p141_p11), %s147_s30, 1  ;;  %vm334_vm3 = vcmask (!%p141_p11), 1043456   ;;  %vm337_vm4 = vcmask (!%p141_p11), 1044480   ;;  %vm340_vm5 = vcmask (!%p141_p11), 1045504   ;;  %vm343_vm6 = vcmask (!%p141_p11), 1046528  }
  0x21   : > { %v770_v3 = vshrl.u32 (!%p141_p11), %v243_v2, 7  ;;  %s149_s3 = scalar_lea.vmem (!%p141_p11), [#allocation2], %s536_s2  ;;  %s537_s4 = sshll.u32 (!%p141_p11), %s147_s30, 5 }
  0x22   : > { %v165_v4 = vld [vmem:[%s149_s3] sm:$0x1] (!%p141_p11)  ;;  %v166_v5 = vld [vmem:[%s149_s3 + $0x1] sm:$0x1] (!%p141_p11)  ;;  %s164_s5 = scalar_lea.vmem (!%p141_p11), [#allocation3], %s537_s4 }
  0x23   : > { %v772_v6 = vunpack.c.l.bf16 (!%p141_p11), %v165_v4  ;;  %v168_v7 = vunpack.c.l.bf16 (!%p141_p11), %v166_v5  ;;  %v775_v8 = vsub.s32 (!%p141_p11), 0, %v770_v3  ;;  %v317_v50 = vsub.s32 (!%p141_p11), 1, %v770_v3 }
  0x25   : > { %v169_v9 = vmul.f32 (!%p141_p11), 0.85714287, %v772_v6  ;;  %v170_v10 = vmul.f32 (!%p141_p11), 0.85714287, %v168_v7  ;;  %v171_v11 = vmul.f32 (!%p141_p11), 0.14285715, %v772_v6  ;;  %v318_v62 = vrot.slane (!%p141_p11), %v772_v6, %v317_v50 }
  0x26   : > { %v172_v12 = vmul.f32 (!%p141_p11), 0.14285715, %v168_v7  ;;  %v183_v13 = vmul.f32 (!%p141_p11), 0.71428573, %v772_v6  ;;  %v184_v14 = vmul.f32 (!%p141_p11), 0.71428573, %v168_v7  ;;  %v322_v63 = vrot.slane (!%p141_p11), %v168_v7, %v317_v50 }
  0x27   : > { %v538_v15 = vrot.slane %v171_v11, 9  ;;  %v185_v16 = vmul.f32 0.2857143, %v772_v6  ;;  %v186_v17 = vmul.f32 0.2857143, %v168_v7  ;;  %v548_v18 = vrot.slane %v169_v9, 9 }
  0x28   : > { %v539_v19 = vrot.slane %v172_v12, 9  ;;  %v197_v20 = vmul.f32 0.5714286, %v772_v6  ;;  %v198_v21 = vmul.f32 0.5714286, %v168_v7  ;;  %v546_v22 = vrot.slane %v183_v13, 9 }
  0x29   : > { %v181_v23 = vadd.f32 %v538_v15, %v169_v9  ;;  %v540_v24 = vrot.slane %v185_v16, 9  ;;  %v541_v25 = vrot.slane %v186_v17, 9  ;;  %v199_v26 = vmul.f32 0.42857143, %v772_v6  ;;  %s551_s6 = sshll.u32 (%p748_p6), %s676_s9, 4 }
  0x2a   : > { %v182_v27 = vadd.f32 %v539_v19, %v170_v10  ;;  %v200_v28 = vmul.f32 0.42857143, %v168_v7  ;;  %v544_v29 = vrot.slane %v197_v20, 9  ;;  %v545_v30 = vrot.slane %v198_v21, 9  ;;  %s388_s15 = sadd.s32 (%p748_p6), %s672_s8, %s551_s6 }
  0x2b   : > { %v195_v31 = vadd.f32 %v540_v24, %v183_v13  ;;  %v196_v32 = vadd.f32 %v541_v25, %v184_v14  ;;  %v542_v33 = vrot.slane %v199_v26, 9  ;;  %v547_v34 = vrot.slane %v184_v14, 9  ;;  %s552_s16 = sshll.u32 (%p748_p6), %s388_s15, 2 }
  0x2c   : > { %v543_v35 = vrot.slane %v200_v28, 9  ;;  %v219_v36 = vadd.f32 %v544_v29, %v199_v26  ;;  %v220_v37 = vadd.f32 %v545_v30, %v200_v28  ;;  %v229_v38 = vadd.f32 %v546_v22, %v185_v16  ;;  %s390_s20 = scalar_lea.vmem (%p748_p6), %s841_s1, %s552_s16 }
  0x2d   : > { %v209_v39 = vadd.f32 %v542_v33, %v197_v20  ;;  %v230_v40 = vadd.f32 %v547_v34, %v186_v17  ;;  %v549_v41 = vrot.slane %v170_v10, 9  ;;  %v239_v42 = vadd.f32 %v548_v18, %v171_v11 }
  0x2e   : > { %v210_v43 = vadd.f32 %v543_v35, %v198_v21  ;;  %v246_v44 = vrot.slane %v181_v23, %v775_v8  ;;  %v250_v45 = vrot.slane %v182_v27, %v775_v8  ;;  %v258_v46 = vrot.slane %v195_v31, %v775_v8 }
  0x2f   : > { %v240_v47 = vadd.f32 %v549_v41, %v172_v12  ;;  %v262_v48 = vrot.slane %v196_v32, %v775_v8  ;;  %v270_v49 = vrot.slane %v209_v39, %v775_v8  ;;  %v282_v52 = vrot.slane %v219_v36, %v775_v8 }
  0x30   : > { %v274_v51 = vrot.slane %v210_v43, %v775_v8  ;;  %v286_v53 = vrot.slane %v220_v37, %v775_v8  ;;  %v294_v54 = vrot.slane %v229_v38, %v775_v8  ;;  %v298_v55 = vrot.slane %v230_v40, %v775_v8 }
  0x31   : > { %v326_v56 = vsel %vm325_vm0, %v772_v6, %v246_v44  ;;  %v327_v57 = vsel %vm325_vm0, %v168_v7, %v250_v45  ;;  %v306_v58 = vrot.slane %v239_v42, %v775_v8  ;;  %v310_v59 = vrot.slane %v240_v47, %v775_v8 }
  0x32   : > { %v329_v60 = vsel %vm328_vm1, %v326_v56, %v258_v46  ;;  %v330_v61 = vsel %vm328_vm1, %v327_v57, %v262_v48 }
  0x33   : > { %v332_v0 = vsel %vm331_vm2, %v329_v60, %v270_v49  ;;  %v333_v1 = vsel %vm331_vm2, %v330_v61, %v274_v51 }
  0x34   : > { %v335_v2 = vsel %vm334_vm3, %v332_v0, %v282_v52  ;;  %v336_v3 = vsel %vm334_vm3, %v333_v1, %v286_v53 }
  0x35   : > { %v338_v4 = vsel %vm337_vm4, %v335_v2, %v294_v54  ;;  %v339_v5 = vsel %vm337_vm4, %v336_v3, %v298_v55 }
  0x36   : > { %v341_v8 = vsel %vm340_vm5, %v338_v4, %v306_v58  ;;  %v342_v9 = vsel %vm340_vm5, %v339_v5, %v310_v59 }
  0x37   : > { %v344_v6 = vsel %vm343_vm6, %v341_v8, %v318_v62  ;;  %v345_v7 = vsel %vm343_vm6, %v342_v9, %v322_v63 }
  0x38   : > { %v346_v10 = vmul.f32 0.85714287, %v344_v6  ;;  %v347_v11 = vmul.f32 0.14285715, %v345_v7  ;;  %v349_v12 = vmul.f32 0.71428573, %v344_v6 }
  0x39   : > { %v350_v13 = vmul.f32 0.2857143, %v345_v7  ;;  %v352_v14 = vmul.f32 0.5714286, %v344_v6  ;;  %v353_v15 = vmul.f32 0.42857143, %v345_v7 }
  0x3a   : > { %v348_v16 = vadd.f32 %v347_v11, %v346_v10  ;;  %v355_v17 = vmul.f32 0.42857143, %v344_v6  ;;  %v356_v18 = vmul.f32 0.5714286, %v345_v7  ;;  %v358_v19 = vmul.f32 0.2857143, %v344_v6 }
  0x3b   : > { %v351_v20 = vadd.f32 %v350_v13, %v349_v12  ;;  %v354_v21 = vadd.f32 %v353_v15, %v352_v14  ;;  %v359_v22 = vmul.f32 0.71428573, %v345_v7  ;;  %v361_v23 = vmul.f32 0.14285715, %v344_v6 }
  0x3c   : > { %v558_v24 = vpack.c.bf16 %v348_v16, %v344_v6  ;;  %v357_v25 = vadd.f32 %v356_v18, %v355_v17  ;;  %v362_v26 = vmul.f32 0.85714287, %v345_v7  ;;  %386 = sbr.rel (!%p748_p6) target bundleno = 76 (0x4c), region = 62 }
  0x3d   : > { %v563_v27 = vpack.c.bf16 %v354_v21, %v351_v20  ;;  %v360_v28 = vadd.f32 %v359_v22, %v358_v19 }
  0x3e   : > { %559 = vst [vmem:[%s164_s5] sm:$0xff] %v558_v24   ;;  %v363_v29 = vadd.f32 %v362_v26, %v361_v23 }
  0x3f   : > { %575 = vst [vmem:[%s164_s5 + $0x8] sm:$0xff] %v563_v27   ;;  %v568_v30 = vpack.c.bf16 %v360_v28, %v357_v25 }
  0x40   : > { %v573_v31 = vpack.c.bf16 %v345_v7, %v363_v29 }
  0x41   : > { %576 = vst [vmem:[%s164_s5 + $0x10] sm:$0xff] %v568_v30  }
  0x42   : > { %577 = vst [vmem:[%s164_s5 + $0x18] sm:$0xff] %v573_v31  }
  0x45   : > { %v406_v32 = vld [vmem:[%s164_s5] sm:$0xf]  ;;  %v408_v33 = vld [vmem:[%s164_s5 + $0x4] sm:$0xf] }
  0x46   : > { %v410_v34 = vld [vmem:[%s164_s5 + $0x8] sm:$0xf]  ;;  %v412_v35 = vld [vmem:[%s164_s5 + $0xc] sm:$0xf]  ;;  %407 = vst [vmem:[%s390_s20] sm:$0xf] %v406_v32 }
  0x47   : > { %409 = vst [vmem:[%s390_s20 + $0x8] sm:$0xf] %v408_v33  ;;  %411 = vst [vmem:[%s390_s20 + $0x10] sm:$0xf] %v410_v34 }
  0x48   : > { %v414_v36 = vld [vmem:[%s164_s5 + $0x10] sm:$0xf]  ;;  %v416_v37 = vld [vmem:[%s164_s5 + $0x14] sm:$0xf]  ;;  %413 = vst [vmem:[%s390_s20 + $0x18] sm:$0xf] %v412_v35 }
  0x49   : > { %v418_v38 = vld [vmem:[%s164_s5 + $0x18] sm:$0xf]  ;;  %v420_v39 = vld [vmem:[%s164_s5 + $0x1c] sm:$0xf]  ;;  %415 = vst [vmem:[%s390_s20 + $0x20] sm:$0xf] %v414_v36 }
  0x4a   : > { %417 = vst [vmem:[%s390_s20 + $0x28] sm:$0xf] %v416_v37  ;;  %419 = vst [vmem:[%s390_s20 + $0x30] sm:$0xf] %v418_v38 }
  0x4b   : > { %421 = vst [vmem:[%s390_s20 + $0x38] sm:$0xf] %v420_v39 }
  0x4c PF: > { %s11_s12 = sadd.s32 1, %s688_s12   ;;  %s843_s6 = smov %s668_s7 }
  0x4d   : > { %p8_p12 = scmp.ge.s32.totalorder %s11_s12, 6   ;;  %s844_s7 = smov %s756_s21 }
  0x4e   : > { %s845_s8 = smov %s680_s10  ;;  %s846_s9 = smov %s684_s11 }
  0x4f   : > { %s847_s10 = smov %s850_s13  ;;  %s848_s11 = smov %s854_s14 }
  0x50   :  { %10 = sbr.rel (!%p8_p12) target bundleno = 4 (0x4), region = 134 }

// kernel: leipnet_forward.17
= control target key start
LH: loop header
LB: loop body
LE: loop exit
PB: predicated region body
PF: predicated region fallthrough
CT: control target
= control target key end

     0   :  { %s1190_s12 = smov 0   ;;  %s1192_s13 = smov 0   ;;  %s1322_s0 = inlined_call_operand.vmem [shape: bf16[128,640], index: 0, kind: input, shape index: {}]   ;;  %s1323_s1 = inlined_call_operand.vmem [shape: bf16[640,128], index: 1, kind: input, shape index: {}]   ;;  %s1324_s2 = inlined_call_operand.vmem [shape: f32[1,128], index: 2, kind: input, shape index: {}]   ;;  %s1325_s3 = inlined_call_operand.vmem [shape: bf16[128,128], index: 3, kind: output, shape index: {}]  }
   0x1   :  { %s1194_s14 = smov 0   ;;  %s1196_s15 = smov 0  }
   0x2   :  { %s1198_s16 = smov 0  }
   0x3 LB: > { %s25_s17 = sadd.s32 1, %s1163_s15  ;;  %p48_p1 = scmp.ne.s32.totalorder %s1155_s13, %s1151_s12  ;;  %s1167_s16 = sphi %s1198_s16, %s13_s16   ;;  %s1163_s15 = sphi %s1196_s15, %s1329_s15   ;;  %s1159_s14 = sphi %s1194_s14, %s1328_s14   ;;  %s1155_s13 = sphi %s1192_s13, %s1327_s13   ;;  %s1151_s12 = sphi %s1190_s12, %s1326_s12  }
   0x4   : > { %p26_p0 = scmp.ge.s32.totalorder %s25_s17, 5  ;;  %p49_p2 = scmp.eq.s32.totalorder %s1167_s16, 0 }
   0x5   : > { %s41_s19 = sadd.s32 1, %s1155_s13  ;;  %p899_p5 = scmp.ge.s32.totalorder %s1167_s16, 5 }
   0x6   : > { %s1331_s17 = smov (%p26_p0, %s25_s17), 0  ;;  %p50_p3 = por %p49_p2, %p48_p1 }
   0x7   : > { %s37_s18 = ssub.s32 %s1163_s15, %s1331_s17  ;;  %162 = sbr.rel (%p899_p5) target bundleno = 28 (0x1c), region = 20 }
   0x8   : > { %p39_p4 = scmp.eq.s32.totalorder %s37_s18, 0 }
   0xa   : > { %s1225_s20 = scalar_select %p39_p4, %s1155_s13, %s41_s19  }
   0xe   : > { %165 = sbr.rel (!%p50_p3) target bundleno = 28 (0x1c), region = 24  ;;  %s167_s21 = sand.u32 (%p50_p3), 1, %s1155_s13  }
   0xf   : > { %s901_s22 = sshll.u32 (%p50_p3), %s1163_s15, 2  ;;  %s900_s23 = sshll.u32 (%p50_p3), %s167_s21, 6 }
  0x10   : > { %s1233_s26 = scalar_lea.vmem (%p50_p3), %s1322_s0, %s901_s22  ;;  %s169_s27 = scalar_lea.vmem (%p50_p3), [#allocation3], %s900_s23 }
  0x11   : > { %v190_v0 = vld [vmem:[%s1233_s26] sm:$0xf] (%p50_p3)  ;;  %v192_v1 = vld [vmem:[%s1233_s26 + $0x14] sm:$0xf] (%p50_p3)  ;;  %v194_v2 = vld [vmem:[%s1233_s26 + $0x28] sm:$0xf] (%p50_p3) }
  0x12   : > { %191 = vst [vmem:[%s169_s27] sm:$0xf] (%p50_p3), %v190_v0  ;;  %193 = vst [vmem:[%s169_s27 + $0x4] sm:$0xf] (%p50_p3), %v192_v1  ;;  %v196_v3 = vld [vmem:[%s1233_s26 + $0x3c] sm:$0xf] (%p50_p3) }
  0x13   : > { %v198_v4 = vld [vmem:[%s1233_s26 + $0x50] sm:$0xf] (%p50_p3)  ;;  %195 = vst [vmem:[%s169_s27 + $0x8] sm:$0xf] (%p50_p3), %v194_v2  ;;  %197 = vst [vmem:[%s169_s27 + $0xc] sm:$0xf] (%p50_p3), %v196_v3 }
  0x14   : > { %199 = vst [vmem:[%s169_s27 + $0x10] sm:$0xf] (%p50_p3), %v198_v4  ;;  %v200_v5 = vld [vmem:[%s1233_s26 + $0x64] sm:$0xf] (%p50_p3)  ;;  %v202_v6 = vld [vmem:[%s1233_s26 + $0x78] sm:$0xf] (%p50_p3) }
  0x15   : > { %v204_v7 = vld [vmem:[%s1233_s26 + $0x8c] sm:$0xf]  ;;  %201 = vst [vmem:[%s169_s27 + $0x14] sm:$0xf] %v200_v5  ;;  %203 = vst [vmem:[%s169_s27 + $0x18] sm:$0xf] %v202_v6 }
  0x16   : > { %205 = vst [vmem:[%s169_s27 + $0x1c] sm:$0xf] %v204_v7  ;;  %v206_v8 = vld [vmem:[%s1233_s26 + $0xa0] sm:$0xf]  ;;  %v208_v9 = vld [vmem:[%s1233_s26 + $0xb4] sm:$0xf] }
  0x17   : > { %v210_v10 = vld [vmem:[%s1233_s26 + $0xc8] sm:$0xf]  ;;  %207 = vst [vmem:[%s169_s27 + $0x20] sm:$0xf] %v206_v8  ;;  %209 = vst [vmem:[%s169_s27 + $0x24] sm:$0xf] %v208_v9 }
  0x18   : > { %211 = vst [vmem:[%s169_s27 + $0x28] sm:$0xf] %v210_v10  ;;  %v212_v11 = vld [vmem:[%s1233_s26 + $0xdc] sm:$0xf]  ;;  %v214_v12 = vld [vmem:[%s1233_s26 + $0xf0] sm:$0xf] }
  0x19   : > { %v216_v13 = vld [vmem:[%s1233_s26 + $0x104] sm:$0xf]  ;;  %213 = vst [vmem:[%s169_s27 + $0x2c] sm:$0xf] %v212_v11  ;;  %215 = vst [vmem:[%s169_s27 + $0x30] sm:$0xf] %v214_v12 }
  0x1a   : > { %217 = vst [vmem:[%s169_s27 + $0x34] sm:$0xf] %v216_v13  ;;  %v218_v14 = vld [vmem:[%s1233_s26 + $0x118] sm:$0xf]  ;;  %v220_v15 = vld [vmem:[%s1233_s26 + $0x12c] sm:$0xf] }
  0x1b   : > { %219 = vst [vmem:[%s169_s27 + $0x38] sm:$0xf] %v218_v14  ;;  %221 = vst [vmem:[%s169_s27 + $0x3c] sm:$0xf] %v220_v15 }
  0x1c PF: > { %p902_p6 = scmp.ge.s32.totalorder %s1167_s16, 1  ;;  %p287_p7 = scmp.lt.s32.totalorder %s1167_s16, 6 }
  0x1e   : > { %p288_p8 = pnand %p902_p6, %p287_p7 }
  0x1f   : > { %s294_s28 = sand.u32 (!%p288_p8), 1, %s1151_s12   ;;  %s904_s29 = sshll.u32 (!%p288_p8), %s1159_s14, 4 }
  0x20   : > { %291 = sbr.rel (%p288_p8) target bundleno = 323 (0x143), region = 69  ;;  %s903_s30 = sshll.u32 (!%p288_p8), %s294_s28, 6 }
  0x21   : > { %p333_p9 = scmp.lt.s32.totalorder (!%p288_p8), %s904_s29, 79  ;;  %s1260_s8 = scalar_lea.vmem (!%p288_p8), [#allocation3], %s903_s30 }
  0x22   : > { %p906_p10 = scmp.ne.s32.totalorder (!%p288_p8), %s1159_s14, 0 }
  0x27   : > { %s1333_s29 = smov (!%p333_p9, %s904_s29), 79  ;;  %357 = sbr.rel (%p906_p10) target bundleno = 49 (0x31), region = 77 }
  0x28   : > { %s905_s4 = sshll.u32 %s1333_s29, 2  ;;  %v1169_v16 = vmov (!%p906_p10), 0.0  }
  0x29   : > { %s1258_s7 = scalar_lea.vmem %s1323_s1, %s905_s4  ;;  %358 = vst [vmem:[#allocation2] sm:$0xff] (!%p906_p10), %v1169_v16  ;;  %359 = vst [vmem:[#allocation2 + $0x8] sm:$0xff] (!%p906_p10), %v1169_v16 }
  0x2a   : > { %360 = vst [vmem:[#allocation2 + $0x10] sm:$0xff] (!%p906_p10), %v1169_v16  ;;  %361 = vst [vmem:[#allocation2 + $0x18] sm:$0xff] (!%p906_p10), %v1169_v16 }
  0x2b   : > { %362 = vst [vmem:[#allocation2 + $0x20] sm:$0xff] (!%p906_p10), %v1169_v16  ;;  %363 = vst [vmem:[#allocation2 + $0x28] sm:$0xff] (!%p906_p10), %v1169_v16 }
  0x2c   : > { %364 = vst [vmem:[#allocation2 + $0x30] sm:$0xff] (!%p906_p10), %v1169_v16  ;;  %365 = vst [vmem:[#allocation2 + $0x38] sm:$0xff] (!%p906_p10), %v1169_v16 }
  0x2d   : > { %366 = vst [vmem:[#allocation2 + $0x40] sm:$0xff] (!%p906_p10), %v1169_v16  ;;  %367 = vst [vmem:[#allocation2 + $0x48] sm:$0xff] (!%p906_p10), %v1169_v16 }
  0x2e   : > { %368 = vst [vmem:[#allocation2 + $0x50] sm:$0xff] %v1169_v16  ;;  %369 = vst [vmem:[#allocation2 + $0x58] sm:$0xff] %v1169_v16 }
  0x2f   : > { %370 = vst [vmem:[#allocation2 + $0x60] sm:$0xff] %v1169_v16  ;;  %371 = vst [vmem:[#allocation2 + $0x68] sm:$0xff] %v1169_v16 }
  0x30   : > { %372 = vst [vmem:[#allocation2 + $0x70] sm:$0xff] %v1169_v16  ;;  %373 = vst [vmem:[#allocation2 + $0x78] sm:$0xff] %v1169_v16 }
  0x31 PF: > { %v1113_v17 = vld [vmem:[%s1258_s7] sm:$0xff]   ;;  %v1114_v18 = vld [vmem:[%s1258_s7 + $0x8] sm:$0xff]   ;;  %v1115_v19 = vld [vmem:[%s1258_s7 + $0x10] sm:$0xff]   ;;  %p923_p11 = scmp.ne.s32.totalorder %s1159_s14, 4 }
  0x32   : > { %1024 = vmatprep.subr.bf16.mxu0 %v1113_v17  ;;  %1056 = vmatprep.subr.bf16.mxu1 %v1113_v17  ;;  %v1116_v20 = vld [vmem:[%s1258_s7 + $0x18] sm:$0xff]   ;;  %v1121_v21 = vld [vmem:[%s1260_s8] sm:$0xff]   ;;  %v1118_v24 = vld [vmem:[%s1258_s7 + $0x28] sm:$0xff]  }
  0x33   : > { %1025 = vmatpush3.bf16.msra.mxu0 %v1113_v17  ;;  %1064 = vmatpush3.bf16.msra.mxu1 %v1113_v17  ;;  %v1122_v22 = vld [vmem:[%s1260_s8 + $0x20] sm:$0xff]   ;;  %v1119_v25 = vld [vmem:[%s1258_s7 + $0x30] sm:$0xff]   ;;  %v1120_v26 = vld [vmem:[%s1258_s7 + $0x38] sm:$0xff]  }
  0x34   : > { %1026 = vmatprep.subr.bf16.mxu0 %v1114_v18  ;;  %1057 = vmatprep.subr.bf16.mxu1 %v1114_v18  ;;  %v1117_v23 = vld [vmem:[%s1258_s7 + $0x20] sm:$0xff]   ;;  %v1123_v27 = vld [vmem:[%s1260_s8 + $0x8] sm:$0xff]   ;;  %v1125_v29 = vld [vmem:[%s1260_s8 + $0x10] sm:$0xff]  }
  0x35   : > { %1040 = vmatprep.mubr.bf16.mxu0 %v1121_v21  ;;  %1048 = vmatprep.mubr.bf16.mxu1 %v1122_v22  ;;  %v1124_v28 = vld [vmem:[%s1260_s8 + $0x28] sm:$0xff]   ;;  %v1126_v30 = vld [vmem:[%s1260_s8 + $0x30] sm:$0xff]   ;;  %v1127_v31 = vld [vmem:[%s1260_s8 + $0x18] sm:$0xff]  }
  0x36   : > { %v1128_v32 = vld [vmem:[%s1260_s8 + $0x38] sm:$0xff]   ;;  %v376_v33 = vld [vmem:[#allocation2 + $0x10] sm:$0xff]  ;;  %v374_v35 = vld [vmem:[#allocation2] sm:$0xff] }
  0x37   : > { %1027 = vmatpush3.bf16.msra.mxu0 %v1114_v18  ;;  %1065 = vmatpush3.bf16.msra.mxu1 %v1114_v18  ;;  %v384_v34 = vld [vmem:[#allocation2 + $0x50] sm:$0xff]  ;;  %v382_v36 = vld [vmem:[#allocation2 + $0x40] sm:$0xff]  ;;  %v377_v39 = vld [vmem:[#allocation2 + $0x18] sm:$0xff] }
  0x38   : > { %1028 = vmatprep.subr.bf16.mxu0 %v1115_v19  ;;  %1058 = vmatprep.subr.bf16.mxu1 %v1115_v19  ;;  %v385_v40 = vld [vmem:[#allocation2 + $0x58] sm:$0xff]  ;;  %v375_v45 = vld [vmem:[#allocation2 + $0x8] sm:$0xff]  ;;  %v380_v57 = vld [vmem:[#allocation2 + $0x30] sm:$0xff] }
  0x39   : > { %v383_v46 = vld [vmem:[#allocation2 + $0x48] sm:$0xff]  ;;  %v388_v58 = vld [vmem:[#allocation2 + $0x70] sm:$0xff]  ;;  %v378_v59 = vld [vmem:[#allocation2 + $0x20] sm:$0xff] }
  0x3a   : > { %v386_v60 = vld [vmem:[#allocation2 + $0x60] sm:$0xff]  ;;  %v381_v63 = vld [vmem:[#allocation2 + $0x38] sm:$0xff]  ;;  %v379_v5 = vld [vmem:[#allocation2 + $0x28] sm:$0xff] }
  0x3b   : > { %1029 = vmatpush3.bf16.msra.mxu0 %v1115_v19  ;;  %1066 = vmatpush3.bf16.msra.mxu1 %v1115_v19  ;;  %v389_v0 = vld [vmem:[#allocation2 + $0x78] sm:$0xff]  ;;  %v387_v6 = vld [vmem:[#allocation2 + $0x68] sm:$0xff]  ;;  %v924_v19 = vld [vmem:[%s1324_s2] ss:$0 sm:$0xff] (!%p923_p11) }
  0x3c   : > { %1030 = vmatprep.subr.bf16.mxu0 %v1116_v20  ;;  %1059 = vmatprep.subr.bf16.mxu1 %v1116_v20 }
  0x3f   : > { %1031 = vmatpush3.bf16.msra.mxu0 %v1116_v20  ;;  %1067 = vmatpush3.bf16.msra.mxu1 %v1116_v20 }
  0x40   : > { %1032 = vmatprep.subr.bf16.mxu0 %v1117_v23  ;;  %1060 = vmatprep.subr.bf16.mxu1 %v1117_v23 }
  0x43   : > { %1033 = vmatpush3.bf16.msra.mxu0 %v1117_v23  ;;  %1068 = vmatpush3.bf16.msra.mxu1 %v1117_v23 }
  0x44   : > { %1034 = vmatprep.subr.bf16.mxu0 %v1118_v24  ;;  %1061 = vmatprep.subr.bf16.mxu1 %v1118_v24 }
  0x47   : > { %1035 = vmatpush3.bf16.msra.mxu0 %v1118_v24  ;;  %1069 = vmatpush3.bf16.msra.mxu1 %v1118_v24 }
  0x48   : > { %1036 = vmatprep.subr.bf16.mxu0 %v1119_v25  ;;  %1062 = vmatprep.subr.bf16.mxu1 %v1119_v25 }
  0x4b   : > { %1037 = vmatpush3.bf16.msra.mxu0 %v1119_v25  ;;  %1070 = vmatpush3.bf16.msra.mxu1 %v1119_v25 }
  0x4c   : > { %1038 = vmatprep.subr.bf16.mxu0 %v1120_v26  ;;  %1063 = vmatprep.subr.bf16.mxu1 %v1120_v26 }
  0x4f   : > { %1039 = vmatpush3.bf16.msra.mxu0 %v1120_v26  ;;  %1071 = vmatpush3.bf16.msra.mxu1 %v1120_v26 }
  0x52   : > { %1041 = vmatmul.mubr.bf16.vlgmr.msra.gmra.mrb[0].mxu0 %v1123_v27  ;;  %1049 = vmatmul.mubr.bf16.vlgmr.msra.gmra.mrb[0].mxu1 %v1124_v28 }
  0x53   : > { %1044 = vmatprep.mubr.bf16.mxu0 %v1125_v29  ;;  %1052 = vmatprep.mubr.bf16.mxu1 %v1126_v30 }
  0x5a   : > { %1045 = vmatmul.mubr.bf16.gmra.mrb[4].mxu0 %v1127_v31  ;;  %1053 = vmatmul.mubr.bf16.gmra.mrb[4].mxu1 %v1128_v32 }
 0x125   : > { %v1042_v37 = vpop.f32.mrb[0].mxu0  ;;  %v1050_v38 = vpop.f32.mrb[0].mxu1 }
 0x126   : > { %v617_v41 = vadd.f32 %v1042_v37, %v376_v33  ;;  %v625_v42 = vadd.f32 %v1050_v38, %v384_v34  ;;  %v552_v43 = vpop.f32.mrb[1].mxu0  ;;  %v584_v44 = vpop.f32.mrb[1].mxu1 }
 0x127   : > { %v615_v47 = vadd.f32 %v552_v43, %v374_v35  ;;  %v623_v48 = vadd.f32 %v584_v44, %v382_v36  ;;  %v1043_v49 = vpop.f32.mrb[2].mxu0  ;;  %v1051_v50 = vpop.f32.mrb[2].mxu1 }
 0x128   : > { %633 = vst [vmem:[#allocation2 + $0x10] sm:$0xff] %v617_v41  ;;  %641 = vst [vmem:[#allocation2 + $0x50] sm:$0xff] %v625_v42  ;;  %v618_v51 = vadd.f32 %v1043_v49, %v377_v39  ;;  %v626_v52 = vadd.f32 %v1051_v50, %v385_v40  ;;  %v555_v53 = vpop.f32.mrb[3].mxu0  ;;  %v587_v54 = vpop.f32.mrb[3].mxu1 }
 0x129   : > { %631 = vst [vmem:[#allocation2] sm:$0xff] %v615_v47  ;;  %639 = vst [vmem:[#allocation2 + $0x40] sm:$0xff] %v623_v48  ;;  %v616_v55 = vadd.f32 %v555_v53, %v375_v45  ;;  %v624_v56 = vadd.f32 %v587_v54, %v383_v46 }
 0x12a   : > { %634 = vst [vmem:[#allocation2 + $0x18] sm:$0xff] %v618_v51  ;;  %642 = vst [vmem:[#allocation2 + $0x58] sm:$0xff] %v626_v52 }
 0x12b   : > { %632 = vst [vmem:[#allocation2 + $0x8] sm:$0xff] %v616_v55  ;;  %640 = vst [vmem:[#allocation2 + $0x48] sm:$0xff] %v624_v56 }
 0x12d   : > { %v1046_v61 = vpop.f32.mrb[4].mxu0  ;;  %v1054_v62 = vpop.f32.mrb[4].mxu1  ;;  %650 = sbr.rel (%p923_p11) target bundleno = 323 (0x143), region = 81 }
 0x12e   : > { %v621_v1 = vadd.f32 %v1046_v61, %v380_v57  ;;  %v629_v2 = vadd.f32 %v1054_v62, %v388_v58  ;;  %v568_v3 = vpop.f32.mrb[5].mxu0  ;;  %v600_v4 = vpop.f32.mrb[5].mxu1 }
 0x12f   : > { %v619_v7 = vadd.f32 %v568_v3, %v378_v59  ;;  %v627_v8 = vadd.f32 %v600_v4, %v386_v60  ;;  %v1047_v9 = vpop.f32.mrb[6].mxu0  ;;  %v1055_v10 = vpop.f32.mrb[6].mxu1  ;;  %v653_v22 = vld [vmem:[#allocation2 + $0x10] sm:$0xff] (!%p923_p11) }
 0x130   : > { %637 = vst [vmem:[#allocation2 + $0x30] sm:$0xff] %v621_v1  ;;  %645 = vst [vmem:[#allocation2 + $0x70] sm:$0xff] %v629_v2  ;;  %v622_v11 = vadd.f32 %v1047_v9, %v381_v63  ;;  %v630_v12 = vadd.f32 %v1055_v10, %v389_v0  ;;  %v571_v13 = vpop.f32.mrb[7].mxu0  ;;  %v603_v14 = vpop.f32.mrb[7].mxu1  ;;  %v651_v17 = vld [vmem:[#allocation2] sm:$0xff] (!%p923_p11)  ;;  %v676_v25 = vadd.f32 (!%p923_p11), %v924_v19, %v653_v22  ;;  %v661_v37 = vld [vmem:[#allocation2 + $0x50] sm:$0xff] (!%p923_p11) }
 0x131   : > { %635 = vst [vmem:[#allocation2 + $0x20] sm:$0xff] %v619_v7  ;;  %643 = vst [vmem:[#allocation2 + $0x60] sm:$0xff] %v627_v8  ;;  %v620_v15 = vadd.f32 %v571_v13, %v379_v5  ;;  %v628_v16 = vadd.f32 %v603_v14, %v387_v6  ;;  %v674_v20 = vadd.f32 (!%p923_p11), %v924_v19, %v651_v17  ;;  %v654_v23 = vld [vmem:[#allocation2 + $0x18] sm:$0xff] (!%p923_p11)  ;;  %v659_v35 = vld [vmem:[#allocation2 + $0x40] sm:$0xff] (!%p923_p11) }
 0x132   : > { %638 = vst [vmem:[#allocation2 + $0x38] sm:$0xff] %v622_v11  ;;  %646 = vst [vmem:[#allocation2 + $0x78] sm:$0xff] %v630_v12  ;;  %v652_v18 = vld [vmem:[#allocation2 + $0x8] sm:$0xff] (!%p923_p11)  ;;  %v677_v26 = vadd.f32 (!%p923_p11), %v924_v19, %v654_v23  ;;  %v692_v38 = vmax.f32 (!%p923_p11), %v676_v25, 0.0  ;;  %v662_v42 = vld [vmem:[#allocation2 + $0x58] sm:$0xff] (!%p923_p11)  ;;  %v682_v47 = vadd.f32 (!%p923_p11), %v924_v19, %v659_v35  ;;  %v684_v52 = vadd.f32 (!%p923_p11), %v924_v19, %v661_v37 }
 0x133   : > { %636 = vst [vmem:[#allocation2 + $0x28] sm:$0xff] %v620_v15  ;;  %644 = vst [vmem:[#allocation2 + $0x68] sm:$0xff] %v628_v16  ;;  %v675_v21 = vadd.f32 (!%p923_p11), %v924_v19, %v652_v18  ;;  %v690_v31 = vmax.f32 (!%p923_p11), %v674_v20, 0.0  ;;  %v660_v36 = vld [vmem:[#allocation2 + $0x48] sm:$0xff] (!%p923_p11)  ;;  %v685_v57 = vadd.f32 (!%p923_p11), %v924_v19, %v662_v42 }
 0x134   : > { %v693_v39 = vmax.f32 %v677_v26, 0.0  ;;  %v683_v51 = vadd.f32 %v924_v19, %v660_v36  ;;  %v698_v56 = vmax.f32 %v682_v47, 0.0  ;;  %v700_v61 = vmax.f32 %v684_v52, 0.0 }
 0x135   : > { %v691_v32 = vmax.f32 %v675_v21, 0.0  ;;  %v701_v63 = vmax.f32 %v685_v57, 0.0 }
 0x136   : > { %v969_v49 = vpack.c.bf16 %v693_v39, %v692_v38  ;;  %v699_v60 = vmax.f32 %v683_v51, 0.0 }
 0x137   : > { %v657_v29 = vld [vmem:[#allocation2 + $0x30] sm:$0xff]  ;;  %v964_v44 = vpack.c.bf16 %v691_v32, %v690_v31  ;;  %v989_v5 = vpack.c.bf16 %v701_v63, %v700_v61 }
 0x138   : > { %v655_v24 = vld [vmem:[#allocation2 + $0x20] sm:$0xff]  ;;  %v680_v34 = vadd.f32 %v924_v19, %v657_v29  ;;  %v665_v53 = vld [vmem:[#allocation2 + $0x70] sm:$0xff]  ;;  %1001 = vst [vmem:[%s1325_s3 + $0x8] sm:$0xff] %v969_v49   ;;  %v984_v3 = vpack.c.bf16 %v699_v60, %v698_v56 }
 0x139   : > { %v678_v28 = vadd.f32 %v924_v19, %v655_v24  ;;  %v658_v30 = vld [vmem:[#allocation2 + $0x38] sm:$0xff]  ;;  %v663_v43 = vld [vmem:[#allocation2 + $0x60] sm:$0xff]  ;;  %965 = vst [vmem:[%s1325_s3] sm:$0xff] %v964_v44   ;;  %v688_v1 = vadd.f32 %v924_v19, %v665_v53  ;;  %1005 = vst [vmem:[%s1325_s3 + $0x28] sm:$0xff] %v989_v5  }
 0x13a   : > { %v656_v27 = vld [vmem:[#allocation2 + $0x28] sm:$0xff]  ;;  %v681_v41 = vadd.f32 %v924_v19, %v658_v30  ;;  %v696_v46 = vmax.f32 %v680_v34, 0.0  ;;  %v666_v54 = vld [vmem:[#allocation2 + $0x78] sm:$0xff]  ;;  %v686_v58 = vadd.f32 %v924_v19, %v663_v43  ;;  %1004 = vst [vmem:[%s1325_s3 + $0x20] sm:$0xff] %v984_v3  }
 0x13b   : > { %v679_v33 = vadd.f32 %v924_v19, %v656_v27  ;;  %v694_v40 = vmax.f32 %v678_v28, 0.0  ;;  %v664_v48 = vld [vmem:[#allocation2 + $0x68] sm:$0xff]  ;;  %v689_v2 = vadd.f32 %v924_v19, %v666_v54  ;;  %v704_v6 = vmax.f32 %v688_v1, 0.0 }
 0x13c   : > { %v697_v50 = vmax.f32 %v681_v41, 0.0  ;;  %v687_v62 = vadd.f32 %v924_v19, %v664_v48  ;;  %v702_v0 = vmax.f32 %v686_v58, 0.0 }
 0x13d   : > { %v695_v45 = vmax.f32 %v679_v33, 0.0  ;;  %v705_v7 = vmax.f32 %v689_v2, 0.0 }
 0x13e   : > { %v979_v59 = vpack.c.bf16 %v697_v50, %v696_v46  ;;  %v703_v4 = vmax.f32 %v687_v62, 0.0 }
 0x13f   : > { %v974_v55 = vpack.c.bf16 %v695_v45, %v694_v40  ;;  %v999_v9 = vpack.c.bf16 %v705_v7, %v704_v6 }
 0x140   : > { %1003 = vst [vmem:[%s1325_s3 + $0x18] sm:$0xff] %v979_v59   ;;  %v994_v8 = vpack.c.bf16 %v703_v4, %v702_v0 }
 0x141   : > { %1002 = vst [vmem:[%s1325_s3 + $0x10] sm:$0xff] %v974_v55   ;;  %1007 = vst [vmem:[%s1325_s3 + $0x38] sm:$0xff] %v999_v9  }
 0x142   : > { %1006 = vst [vmem:[%s1325_s3 + $0x30] sm:$0xff] %v994_v8  }
 0x143 PF: > { %s13_s16 = sadd.s32 1, %s1167_s16   ;;  %s1326_s12 = smov %s1155_s13 }
 0x144   : > { %p10_p12 = scmp.ge.s32.totalorder %s13_s16, 7   ;;  %s1327_s13 = smov %s1225_s20 }
 0x145   : > { %s1328_s14 = smov %s1163_s15  ;;  %s1329_s15 = smov %s1331_s17 }
 0x146   :  { %12 = sbr.rel (!%p10_p12) target bundleno = 3 (0x3), region = 122 }

// kernel: leipnet_forward.20
= control target key start
LH: loop header
LB: loop body
LE: loop exit
PB: predicated region body
PF: predicated region fallthrough
CT: control target
= control target key end

     0   :  { %s534_s6 = smov 0   ;;  %s536_s7 = smov 0   ;;  %s638_s0 = inlined_call_operand.vmem [shape: bf16[2,8,8,64], index: 0, kind: input, shape index: {}]   ;;  %s639_s1 = inlined_call_operand.vmem [shape: bf16[2,8,8,64], index: 1, kind: output, shape index: {}]  }
   0x1   :  { %s538_s8 = smov 0  }
   0x2 LB: > { %s23_s9 = sadd.s32 1, %s518_s7  ;;  %p406_p0 = scmp.ge.s32.totalorder %s522_s8, 1  ;;  %s522_s8 = sphi %s538_s8, %s11_s8   ;;  %s518_s7 = sphi %s536_s7, %s641_s7   ;;  %s514_s6 = sphi %s534_s6, %s640_s6  }
   0x3   : > { %p25_p1 = scmp.ge.s32.totalorder %s23_s9, 2  ;;  %p106_p2 = scmp.lt.s32.totalorder %s522_s8, 3 }
   0x5   : > { %s643_s9 = smov (%p25_p1, %s23_s9), 0  ;;  %p107_p3 = pnand %p406_p0, %p106_p2 }
   0x6   : > { %p132_p4 = scmp.lt.s32.totalorder (!%p107_p3), %s514_s6, 1  ;;  %vm164_vm0 = vcmask (!%p107_p3), 523264   ;;  %vm310_vm1 = vcmask (!%p107_p3), 519168  }
   0x7   : > { %110 = sbr.rel (%p107_p3) target bundleno = 139 (0x8b), region = 24 }
   0xe   : > { %s645_s6 = smov (!%p132_p4, %s514_s6), 1 }
   0xf   : > { %s421_s10 = sshll.u32 %s645_s6, 5 }
  0x10   : > { %s139_s13 = scalar_lea.vmem %s638_s0, %s421_s10  ;;  %s147_s16 = scalar_lea.vmem %s639_s1, %s421_s10 }
  0x11   : > { %v424_v0 = vld [vmem:[%s139_s13] sm:$0xff]   ;;  %v439_v1 = vld [vmem:[%s139_s13 + $0x8] sm:$0xff]   ;;  %v440_v2 = vld [vmem:[%s139_s13 + $0x10] sm:$0xff]  }
  0x12   : > { %v560_v3 = vunpack.c.l.bf16 %v424_v0  ;;  %v562_v4 = vunpack.c.h.bf16 %v424_v0  ;;  %v564_v5 = vunpack.c.l.bf16 %v439_v1  ;;  %v566_v6 = vunpack.c.h.bf16 %v439_v1  ;;  %v441_v11 = vld [vmem:[%s139_s13 + $0x18] sm:$0xff]  }
  0x13   : > { %v568_v7 = vunpack.c.l.bf16 %v440_v2  ;;  %v576_v13 = vunpack.c.h.bf16 %v440_v2  ;;  %v580_v16 = vunpack.c.l.bf16 %v441_v11  ;;  %v584_v19 = vunpack.c.h.bf16 %v441_v11 }
  0x14   : > { %v165_v8 = vsel %vm164_vm0, %v560_v3, 0.0  ;;  %v166_v9 = vsel %vm164_vm0, %v562_v4, 0.0  ;;  %v168_v10 = vsel %vm164_vm0, %v564_v5, 0.0  ;;  %v170_v14 = vsel %vm164_vm0, %v566_v6, 0.0 }
  0x15   : > { %v167_v12 = vadd.f32 %v166_v9, %v165_v8  ;;  %v172_v17 = vsel %vm164_vm0, %v568_v7, 0.0  ;;  %v174_v20 = vsel %vm164_vm0, %v576_v13, 0.0  ;;  %v176_v22 = vsel %vm164_vm0, %v580_v16, 0.0 }
  0x16   : > { %v178_v24 = vsel %vm164_vm0, %v584_v19, 0.0 }
  0x17   : > { %v169_v15 = vadd.f32 %v168_v10, %v167_v12 }
  0x19   : > { %v171_v18 = vadd.f32 %v170_v14, %v169_v15 }
  0x1b   : > { %v173_v21 = vadd.f32 %v172_v17, %v171_v18 }
  0x1d   : > { %v175_v23 = vadd.f32 %v174_v20, %v173_v21 }
  0x1f   : > { %v177_v25 = vadd.f32 %v176_v22, %v175_v23 }
  0x21   : > { %v179_v26 = vadd.f32 %v178_v24, %v177_v25 }
  0x23   : > { %v180_v27 = vrot.slane %v179_v26, 4 }
  0x25   : > { %v181_v28 = vadd.f32 %v180_v27, %v179_v26 }
  0x27   : > { %v182_v29 = vrot.slane %v181_v28, 2 }
  0x29   : > { %v183_v30 = vadd.f32 %v182_v29, %v181_v28 }
  0x2b   : > { %v184_v31 = vrot.slane %v183_v30, 1 }
  0x2d   : > { %v185_v32 = vadd.f32 %v184_v31, %v183_v30 }
  0x2f   : > { %v187_v33 = vmul.f32 0.015625, %v185_v32 }
  0x31   : > { %v188_v34 = vsub.f32 %v560_v3, %v187_v33  ;;  %v189_v35 = vsub.f32 %v562_v4, %v187_v33  ;;  %v190_v36 = vsub.f32 %v564_v5, %v187_v33  ;;  %v191_v37 = vsub.f32 %v566_v6, %v187_v33 }
  0x32   : > { %v192_v38 = vsub.f32 %v568_v7, %v187_v33  ;;  %v193_v39 = vsub.f32 %v576_v13, %v187_v33  ;;  %v194_v44 = vsub.f32 %v580_v16, %v187_v33  ;;  %v195_v50 = vsub.f32 %v584_v19, %v187_v33 }
  0x33   : > { %v196_v40 = vmul.f32 %v188_v34, %v188_v34  ;;  %v197_v41 = vmul.f32 %v189_v35, %v189_v35  ;;  %v198_v42 = vmul.f32 %v190_v36, %v190_v36  ;;  %v199_v43 = vmul.f32 %v191_v37, %v191_v37 }
  0x34   : > { %v200_v45 = vmul.f32 %v192_v38, %v192_v38  ;;  %v201_v51 = vmul.f32 %v193_v39, %v193_v39  ;;  %v202_v54 = vmul.f32 %v194_v44, %v194_v44  ;;  %v203_v57 = vmul.f32 %v195_v50, %v195_v50 }
  0x35   : > { %v204_v46 = vsel %vm164_vm0, %v196_v40, 0.0  ;;  %v205_v47 = vsel %vm164_vm0, %v197_v41, 0.0  ;;  %v207_v48 = vsel %vm164_vm0, %v198_v42, 0.0  ;;  %v209_v52 = vsel %vm164_vm0, %v199_v43, 0.0 }
  0x36   : > { %v206_v49 = vadd.f32 %v205_v47, %v204_v46  ;;  %v211_v55 = vsel %vm164_vm0, %v200_v45, 0.0  ;;  %v213_v58 = vsel %vm164_vm0, %v201_v51, 0.0  ;;  %v215_v60 = vsel %vm164_vm0, %v202_v54, 0.0 }
  0x37   : > { %v217_v62 = vsel %vm164_vm0, %v203_v57, 0.0 }
  0x38   : > { %v208_v53 = vadd.f32 %v207_v48, %v206_v49 }
  0x3a   : > { %v210_v56 = vadd.f32 %v209_v52, %v208_v53 }
  0x3c   : > { %v212_v59 = vadd.f32 %v211_v55, %v210_v56 }
  0x3e   : > { %v214_v61 = vadd.f32 %v213_v58, %v212_v59 }
  0x40   : > { %v216_v63 = vadd.f32 %v215_v60, %v214_v61 }
  0x42   : > { %v218_v0 = vadd.f32 %v217_v62, %v216_v63 }
  0x44   : > { %v219_v1 = vrot.slane %v218_v0, 4 }
  0x46   : > { %v220_v2 = vadd.f32 %v219_v1, %v218_v0 }
  0x48   : > { %v221_v8 = vrot.slane %v220_v2, 2 }
  0x4a   : > { %v222_v9 = vadd.f32 %v221_v8, %v220_v2 }
  0x4c   : > { %v223_v10 = vrot.slane %v222_v9, 1 }
  0x4e   : > { %v224_v11 = vadd.f32 %v223_v10, %v222_v9 }
  0x50   : > { %v226_v12 = vmul.f32 0.015873017, %v224_v11 }
  0x52   : > { %v227_v14 = vadd.f32 0.0001, %v226_v12 }
  0x54   : > { %v228_v15 = vmul.f32 4.0, %v227_v14 }
  0x56   : > { %466 = vrcp.f32 %v228_v15 }
  0x60   : > { %v467_v17 = vpop.eup %466 }
  0x61   : > { %v230_v18 = vmul.f32 %v467_v17, %v196_v40  ;;  %v231_v20 = vmul.f32 %v467_v17, %v197_v41  ;;  %v232_v21 = vmul.f32 %v467_v17, %v198_v42  ;;  %v233_v22 = vmul.f32 %v467_v17, %v199_v43 }
  0x62   : > { %v234_v23 = vmul.f32 %v467_v17, %v200_v45  ;;  %v235_v24 = vmul.f32 %v467_v17, %v201_v51  ;;  %v236_v25 = vmul.f32 %v467_v17, %v202_v54  ;;  %v237_v26 = vmul.f32 %v467_v17, %v203_v57 }
  0x63   : > { %v238_v27 = vadd.f32 0.5, %v230_v18  ;;  %v239_v28 = vadd.f32 0.5, %v231_v20  ;;  %v240_v29 = vadd.f32 0.5, %v232_v21  ;;  %v241_v30 = vadd.f32 0.5, %v233_v22 }
  0x64   : > { %v242_v31 = vadd.f32 0.5, %v234_v23  ;;  %v243_v32 = vadd.f32 0.5, %v235_v24  ;;  %v244_v33 = vadd.f32 0.5, %v236_v25  ;;  %v245_v38 = vadd.f32 0.5, %v237_v26 }
  0x65   : > { %v411_v34 = vmul.f32 -1.442695, %v238_v27  ;;  %v412_v35 = vmul.f32 -1.442695, %v239_v28  ;;  %v413_v36 = vmul.f32 -1.442695, %v240_v29 }
  0x66   : > { %v414_v37 = vmul.f32 -1.442695, %v241_v30  ;;  %v415_v39 = vmul.f32 -1.442695, %v242_v31  ;;  %v416_v40 = vmul.f32 -1.442695, %v243_v32 }
  0x67   : > { %468 = vpow2.f32 %v411_v34  ;;  %v417_v41 = vmul.f32 -1.442695, %v244_v33  ;;  %v418_v42 = vmul.f32 -1.442695, %v245_v38 }
  0x68   : > { %470 = vpow2.f32 %v412_v35 }
  0x69   : > { %472 = vpow2.f32 %v413_v36 }
  0x6a   : > { %474 = vpow2.f32 %v414_v37 }
  0x6b   : > { %476 = vpow2.f32 %v415_v39 }
  0x6c   : > { %478 = vpow2.f32 %v416_v40 }
  0x6d   : > { %480 = vpow2.f32 %v417_v41 }
  0x6e   : > { %482 = vpow2.f32 %v418_v42 }
  0x71   : > { %v469_v43 = vpop.eup %468 }
  0x72   : > { %v471_v44 = vpop.eup %470  ;;  %v270_v45 = vadd.f32 1.0, %v469_v43 }
  0x73   : > { %v473_v46 = vpop.eup %472  ;;  %v271_v47 = vadd.f32 1.0, %v471_v44 }
  0x74   : > { %v475_v48 = vpop.eup %474  ;;  %484 = vrcp.f32 %v270_v45  ;;  %v272_v49 = vadd.f32 1.0, %v473_v46 }
  0x75   : > { %v477_v50 = vpop.eup %476  ;;  %486 = vrcp.f32 %v271_v47  ;;  %v273_v51 = vadd.f32 1.0, %v475_v48 }
  0x76   : > { %v479_v52 = vpop.eup %478  ;;  %488 = vrcp.f32 %v272_v49  ;;  %v274_v53 = vadd.f32 1.0, %v477_v50 }
  0x77   : > { %v481_v54 = vpop.eup %480  ;;  %490 = vrcp.f32 %v273_v51  ;;  %v275_v55 = vadd.f32 1.0, %v479_v52 }
  0x78   : > { %v483_v56 = vpop.eup %482  ;;  %492 = vrcp.f32 %v274_v53  ;;  %v276_v57 = vadd.f32 1.0, %v481_v54 }
  0x79   : > { %494 = vrcp.f32 %v275_v55  ;;  %v277_v58 = vadd.f32 1.0, %v483_v56 }
  0x7a   : > { %496 = vrcp.f32 %v276_v57 }
  0x7b   : > { %498 = vrcp.f32 %v277_v58 }
  0x7e   : > { %v485_v59 = vpop.eup %484 }
  0x7f   : > { %v487_v60 = vpop.eup %486  ;;  %v294_v61 = vmul.f32 %v485_v59, %v560_v3 }
  0x80   : > { %v489_v62 = vpop.eup %488  ;;  %v295_v63 = vmul.f32 %v487_v60, %v562_v4 }
  0x81   : > { %v491_v0 = vpop.eup %490  ;;  %v302_v1 = vpack.c.bf16 %v294_v61, %v294_v61  ;;  %v296_v2 = vmul.f32 %v489_v62, %v564_v5 }
  0x82   : > { %v493_v8 = vpop.eup %492  ;;  %v303_v9 = vpack.c.bf16 %v295_v63, %v295_v63  ;;  %v297_v10 = vmul.f32 %v491_v0, %v566_v6 }
  0x83   : > { %v495_v11 = vpop.eup %494  ;;  %311 = vst.msk [vmem:[%s147_s16] sm:$0xf] %vm310_vm1, %v302_v1  ;;  %v304_v3 = vpack.c.bf16 %v296_v2, %v296_v2  ;;  %v298_v12 = vmul.f32 %v493_v8, %v568_v7 }
  0x84   : > { %v497_v14 = vpop.eup %496  ;;  %312 = vst.msk [vmem:[%s147_s16 + $0x4] sm:$0xf] %vm310_vm1, %v303_v9  ;;  %v305_v15 = vpack.c.bf16 %v297_v10, %v297_v10  ;;  %v299_v4 = vmul.f32 %v495_v11, %v576_v13 }
  0x85   : > { %v499_v17 = vpop.eup %498  ;;  %313 = vst.msk [vmem:[%s147_s16 + $0x8] sm:$0xf] %vm310_vm1, %v304_v3  ;;  %v306_v5 = vpack.c.bf16 %v298_v12, %v298_v12  ;;  %v300_v18 = vmul.f32 %v497_v14, %v580_v16 }
  0x86   : > { %314 = vst.msk [vmem:[%s147_s16 + $0xc] sm:$0xf] %vm310_vm1, %v305_v15  ;;  %v307_v6 = vpack.c.bf16 %v299_v4, %v299_v4  ;;  %v301_v20 = vmul.f32 %v499_v17, %v584_v19 }
  0x87   : > { %315 = vst.msk [vmem:[%s147_s16 + $0x10] sm:$0xf] %vm310_vm1, %v306_v5  ;;  %v308_v7 = vpack.c.bf16 %v300_v18, %v300_v18 }
  0x88   : > { %316 = vst.msk [vmem:[%s147_s16 + $0x14] sm:$0xf] %vm310_vm1, %v307_v6  ;;  %v309_v21 = vpack.c.bf16 %v301_v20, %v301_v20 }
  0x89   : > { %317 = vst.msk [vmem:[%s147_s16 + $0x18] sm:$0xf] %vm310_vm1, %v308_v7 }
  0x8a   : > { %318 = vst.msk [vmem:[%s147_s16 + $0x1c] sm:$0xf] %vm310_vm1, %v309_v21 }
  0x8b PF: > { %s11_s8 = sadd.s32 1, %s522_s8   ;;  %s640_s6 = smov %s518_s7 }
  0x8c   : > { %p8_p5 = scmp.ge.s32.totalorder %s11_s8, 4   ;;  %s641_s7 = smov %s643_s9 }
  0x8e   :  { %10 = sbr.rel (!%p8_p5) target bundleno = 2 (0x2), region = 54 }

// kernel: leipnet_forward.28
= control target key start
LH: loop header
LB: loop body
LE: loop exit
PB: predicated region body
PF: predicated region fallthrough
CT: control target
= control target key end

     0   :  { %v1085_v1 = vmov 0   ;;  %vm526_vm0 = vcmask 523264   ;;  %s1483_s3 = inlined_call_operand.vmem [shape: bf16[256,256], index: 3, kind: input, shape index: {}]   ;;  %s1484_s1 = inlined_call_operand.vmem [shape: bf16[64,256], index: 1, kind: input, shape index: {}]   ;;  %s1485_s0 = inlined_call_operand.vmem [shape: bf16[128,64], index: 0, kind: input, shape index: {}]   ;;  %s1486_s2 = inlined_call_operand.vmem [shape: bf16[128,256], index: 2, kind: input, shape index: {}]   ;;  %s1487_s4 = inlined_call_operand.vmem [shape: f32[1,256], index: 4, kind: input, shape index: {}]   ;;  %s1488_s5 = inlined_call_operand.vmem [shape: bf16[128,256], index: 5, kind: output, shape index: {}]  }
   0x1   :  { %v993_v0 = vld [vmem:[%s1483_s3 + $0x4] ss:$8 sps:$4 sm:$0xff]   ;;  %583 = vmatprep.mubr.bf16.mxu0 %v1085_v1  ;;  %v995_v2 = vld [vmem:[%s1483_s3] ss:$8 sps:$4 sm:$0xff]   ;;  %v996_v3 = vld [vmem:[%s1483_s3 + $0x14] ss:$8 sps:$4 sm:$0xff]  }
   0x2   :  { %333 = vmatprep.subr.bf16.mxu1 %v993_v0  ;;  %v998_v4 = vld [vmem:[%s1483_s3 + $0x10] ss:$8 sps:$4 sm:$0xff]   ;;  %v999_v5 = vld [vmem:[%s1483_s3 + $0x24] ss:$8 sps:$4 sm:$0xff]   ;;  %v1001_v6 = vld [vmem:[%s1483_s3 + $0x20] ss:$8 sps:$4 sm:$0xff]  }
   0x3   :  { %334 = vmatpush1.bf16.msra.mxu1 %v995_v2  ;;  %v1002_v7 = vld [vmem:[%s1483_s3 + $0x34] ss:$8 sps:$4 sm:$0xff]   ;;  %v1004_v8 = vld [vmem:[%s1483_s3 + $0x30] ss:$8 sps:$4 sm:$0xff]   ;;  %v1005_v9 = vld [vmem:[%s1483_s3 + $0x44] ss:$8 sps:$4 sm:$0xff]  }
   0x4   :  { %335 = vmatprep.subr.bf16.mxu1 %v996_v3  ;;  %v1007_v10 = vld [vmem:[%s1483_s3 + $0x40] ss:$8 sps:$4 sm:$0xff]   ;;  %v1008_v11 = vld [vmem:[%s1483_s3 + $0x54] ss:$8 sps:$4 sm:$0xff]   ;;  %v1029_v12 = vld [vmem:[%s1484_s1 + $0x4] ss:$8 sps:$4 sm:$0xff]  }
   0x5   :  { %v1031_v13 = vld [vmem:[%s1484_s1] ss:$8 sps:$4 sm:$0xff]   ;;  %v1010_v14 = vld [vmem:[%s1483_s3 + $0x50] ss:$8 sps:$4 sm:$0xff]   ;;  %551 = vmatprep.subr.bf16.mxu0 %v1029_v12  ;;  %v1035_v15 = vld [vmem:[%s1484_s1 + $0x14] ss:$8 sps:$4 sm:$0xff]   ;;  %v666_v12 = vlaneseq }
   0x6   :  { %552 = vmatpush1.bf16.msra.mxu0 %v1031_v13  ;;  %v1037_v16 = vld [vmem:[%s1484_s1 + $0x10] ss:$8 sps:$4 sm:$0xff]   ;;  %v1011_v17 = vld [vmem:[%s1483_s3 + $0x64] ss:$8 sps:$4 sm:$0xff]   ;;  %v1013_v18 = vld [vmem:[%s1483_s3 + $0x60] ss:$8 sps:$4 sm:$0xff]  }
   0x7   :  { %336 = vmatpush1.bf16.msra.mxu1 %v998_v4  ;;  %553 = vmatprep.subr.bf16.mxu0 %v1035_v15  ;;  %v1041_v19 = vld [vmem:[%s1484_s1 + $0x24] ss:$8 sps:$4 sm:$0xff]   ;;  %v1014_v20 = vld [vmem:[%s1483_s3 + $0x74] ss:$8 sps:$4 sm:$0xff]   ;;  %v1043_v21 = vld [vmem:[%s1484_s1 + $0x20] ss:$8 sps:$4 sm:$0xff]  }
   0x8   :  { %337 = vmatprep.subr.bf16.mxu1 %v999_v5  ;;  %v1047_v22 = vld [vmem:[%s1484_s1 + $0x34] ss:$8 sps:$4 sm:$0xff]   ;;  %v1016_v23 = vld [vmem:[%s1483_s3 + $0x70] ss:$8 sps:$4 sm:$0xff]   ;;  %v1017_v25 = vld [vmem:[%s1483_s3 + $0x84] ss:$8 sps:$4 sm:$0xff]  }
   0x9   :  { %v1049_v24 = vld [vmem:[%s1484_s1 + $0x30] ss:$8 sps:$4 sm:$0xff]   ;;  %v1056_v26 = vld [vmem:[%s1486_s2 + $0x4] ss:$8 sps:$4 sm:$0xff]   ;;  %v1019_v28 = vld [vmem:[%s1483_s3 + $0x80] ss:$8 sps:$4 sm:$0xff]  }
   0xa   :  { %554 = vmatpush1.bf16.msra.mxu0 %v1037_v16  ;;  %v1053_v27 = vld [vmem:[%s1485_s0] sm:$0xff]   ;;  %365 = vmatprep.mubr.bf16.mxu1 %v1056_v26  ;;  %v1020_v29 = vld [vmem:[%s1483_s3 + $0x94] ss:$8 sps:$4 sm:$0xff]   ;;  %v1022_v30 = vld [vmem:[%s1483_s3 + $0x90] ss:$8 sps:$4 sm:$0xff]  }
   0xb   :  { %338 = vmatpush1.bf16.msra.mxu1 %v1001_v6  ;;  %555 = vmatprep.subr.bf16.mxu0 %v1041_v19  ;;  %v1023_v31 = vld [vmem:[%s1483_s3 + $0xa4] ss:$8 sps:$4 sm:$0xff]   ;;  %v1025_v33 = vld [vmem:[%s1483_s3 + $0xa0] ss:$8 sps:$4 sm:$0xff]   ;;  %v1026_v34 = vld [vmem:[%s1483_s3 + $0xb4] ss:$8 sps:$4 sm:$0xff]  }
   0xc   :  { %339 = vmatprep.subr.bf16.mxu1 %v1002_v7  ;;  %v1057_v32 = vld [vmem:[%s1485_s0 + $0x8] sm:$0xff]   ;;  %v1028_v35 = vld [vmem:[%s1483_s3 + $0xb0] ss:$8 sps:$4 sm:$0xff]   ;;  %v1038_v39 = vld [vmem:[%s1483_s3 + $0xd4] ss:$8 sps:$4 sm:$0xff]  }
   0xd   :  { %v1032_v36 = vld [vmem:[%s1483_s3 + $0xc4] ss:$8 sps:$4 sm:$0xff]   ;;  %v1061_v37 = vld [vmem:[%s1485_s0 + $0x10] sm:$0xff]   ;;  %v1034_v38 = vld [vmem:[%s1483_s3 + $0xc0] ss:$8 sps:$4 sm:$0xff]  }
   0xe   :  { %556 = vmatpush1.bf16.msra.mxu0 %v1043_v21  ;;  %v1040_v40 = vld [vmem:[%s1483_s3 + $0xd0] ss:$8 sps:$4 sm:$0xff]   ;;  %v1044_v41 = vld [vmem:[%s1483_s3 + $0xe4] ss:$8 sps:$4 sm:$0xff]   ;;  %v1046_v43 = vld [vmem:[%s1483_s3 + $0xe0] ss:$8 sps:$4 sm:$0xff]  }
   0xf   :  { %340 = vmatpush1.bf16.msra.mxu1 %v1004_v8  ;;  %557 = vmatprep.subr.bf16.mxu0 %v1047_v22  ;;  %v1065_v42 = vld [vmem:[%s1485_s0 + $0x18] sm:$0xff]   ;;  %v1054_v46 = vld [vmem:[%s1486_s2] ss:$8 sps:$4 sm:$0xff]   ;;  %v1062_v51 = vld [vmem:[%s1486_s2 + $0x24] ss:$8 sps:$4 sm:$0xff]  }
  0x10   :  { %341 = vmatprep.subr.bf16.mxu1 %v1005_v9  ;;  %v1050_v44 = vld [vmem:[%s1483_s3 + $0xf4] ss:$8 sps:$4 sm:$0xff]   ;;  %v1052_v45 = vld [vmem:[%s1483_s3 + $0xf0] ss:$8 sps:$4 sm:$0xff]   ;;  %v1069_v47 = vld [vmem:[%s1485_s0 + $0x20] sm:$0xff]  }
  0x11   :  { %v1058_v48 = vld [vmem:[%s1486_s2 + $0x14] ss:$8 sps:$4 sm:$0xff]   ;;  %v1060_v49 = vld [vmem:[%s1486_s2 + $0x10] ss:$8 sps:$4 sm:$0xff]   ;;  %v1073_v50 = vld [vmem:[%s1485_s0 + $0x28] sm:$0xff]  }
  0x12   :  { %558 = vmatpush1.bf16.msra.mxu0 %v1049_v24  ;;  %v1064_v52 = vld [vmem:[%s1486_s2 + $0x20] ss:$8 sps:$4 sm:$0xff]   ;;  %v1077_v53 = vld [vmem:[%s1485_s0 + $0x30] sm:$0xff]   ;;  %v1081_v56 = vld [vmem:[%s1485_s0 + $0x38] sm:$0xff]  }
  0x13   :  { %342 = vmatpush1.bf16.msra.mxu1 %v1007_v10  ;;  %v1066_v54 = vld [vmem:[%s1486_s2 + $0x34] ss:$8 sps:$4 sm:$0xff]   ;;  %v1068_v55 = vld [vmem:[%s1486_s2 + $0x30] ss:$8 sps:$4 sm:$0xff]   ;;  %v1070_v57 = vld [vmem:[%s1486_s2 + $0x44] ss:$8 sps:$4 sm:$0xff]  }
  0x14   :  { %343 = vmatprep.subr.bf16.mxu1 %v1008_v11  ;;  %v1072_v58 = vld [vmem:[%s1486_s2 + $0x40] ss:$8 sps:$4 sm:$0xff]   ;;  %v1074_v59 = vld [vmem:[%s1486_s2 + $0x54] ss:$8 sps:$4 sm:$0xff]   ;;  %v1076_v60 = vld [vmem:[%s1486_s2 + $0x50] ss:$8 sps:$4 sm:$0xff]  }
  0x15   :  { %920 = vmatmul.mubr.msk.bf16.vlgmr.msra.gmra.mrb[0].mxu0 %vm526_vm0, %v1053_v27  ;;  %v1078_v61 = vld [vmem:[%s1486_s2 + $0x64] ss:$8 sps:$4 sm:$0xff]   ;;  %v1080_v62 = vld [vmem:[%s1486_s2 + $0x60] ss:$8 sps:$4 sm:$0xff]   ;;  %v1082_v63 = vld [vmem:[%s1486_s2 + $0x74] ss:$8 sps:$4 sm:$0xff]  }
  0x16   :  { %593 = vmatprep.mubr.bf16.mxu0 %v1085_v1  ;;  %v1084_v0 = vld [vmem:[%s1486_s2 + $0x70] ss:$8 sps:$4 sm:$0xff]  }
  0x17   :  { %344 = vmatpush1.bf16.msra.mxu1 %v1010_v14  ;;  %v667_v14 = vshrl.u32 %v666_v12, 7 }
  0x18   :  { %345 = vmatprep.subr.bf16.mxu1 %v1011_v17 }
  0x19   :  { %v672_v21 = vsub.s32 1, %v667_v14 }
  0x1b   :  { %346 = vmatpush1.bf16.msra.mxu1 %v1013_v18  ;;  %v668_v18 = vsub.s32 0, %v667_v14 }
  0x1c   :  { %347 = vmatprep.subr.bf16.mxu1 %v1014_v20  ;;  %v664_v20 = vld [vmem:[%s1487_s4] sm:$0x3] }
  0x1d   :  { %921 = vmatmul.mubr.msk.bf16.gmra.mrb[4].mxu0 %vm526_vm0, %v1057_v32  ;;  %v1343_v22 = vrot.slane %v664_v20, %v668_v18  ;;  %v1345_v24 = vrot.slane %v664_v20, %v672_v21 }
  0x1e   :  { %603 = vmatprep.mubr.bf16.mxu0 %v1085_v1 }
  0x1f   :  { %348 = vmatpush1.bf16.msra.mxu1 %v1016_v23 }
  0x20   :  { %349 = vmatprep.subr.bf16.mxu1 %v1017_v25 }
  0x23   :  { %350 = vmatpush1.bf16.msra.mxu1 %v1019_v28 }
  0x24   :  { %351 = vmatprep.subr.bf16.mxu1 %v1020_v29 }
  0x25   :  { %922 = vmatmul.mubr.msk.bf16.gmra.mrb[8].mxu0 %vm526_vm0, %v1061_v37 }
  0x26   :  { %613 = vmatprep.mubr.bf16.mxu0 %v1085_v1 }
  0x27   :  { %352 = vmatpush1.bf16.msra.mxu1 %v1022_v30 }
  0x28   :  { %353 = vmatprep.subr.bf16.mxu1 %v1023_v31 }
  0x2b   :  { %354 = vmatpush1.bf16.msra.mxu1 %v1025_v33 }
  0x2c   :  { %355 = vmatprep.subr.bf16.mxu1 %v1026_v34 }
  0x2d   :  { %923 = vmatmul.mubr.msk.bf16.gmra.mrb[12].mxu0 %vm526_vm0, %v1065_v42 }
  0x2e   :  { %623 = vmatprep.mubr.bf16.mxu0 %v1085_v1 }
  0x2f   :  { %356 = vmatpush1.bf16.msra.mxu1 %v1028_v35 }
  0x30   :  { %357 = vmatprep.subr.bf16.mxu1 %v1032_v36 }
  0x33   :  { %358 = vmatpush1.bf16.msra.mxu1 %v1034_v38 }
  0x34   :  { %359 = vmatprep.subr.bf16.mxu1 %v1038_v39 }
  0x35   :  { %924 = vmatmul.mubr.msk.bf16.gmra.mrb[16].mxu0 %vm526_vm0, %v1069_v47 }
  0x36   :  { %633 = vmatprep.mubr.bf16.mxu0 %v1085_v1 }
  0x37   :  { %360 = vmatpush1.bf16.msra.mxu1 %v1040_v40 }
  0x38   :  { %361 = vmatprep.subr.bf16.mxu1 %v1044_v41 }
  0x3b   :  { %362 = vmatpush1.bf16.msra.mxu1 %v1046_v43 }
  0x3c   :  { %363 = vmatprep.subr.bf16.mxu1 %v1050_v44 }
  0x3d   :  { %925 = vmatmul.mubr.msk.bf16.gmra.mrb[20].mxu0 %vm526_vm0, %v1073_v50 }
  0x3e   :  { %643 = vmatprep.mubr.bf16.mxu0 %v1085_v1 }
  0x3f   :  { %364 = vmatpush1.bf16.msra.mxu1 %v1052_v45 }
  0x42   :  { %366 = vmatmul.mubr.bf16.vlgmr.msra.gmra.mrb[0].mxu1 %v1054_v46 }
  0x43   :  { %375 = vmatprep.mubr.bf16.mxu1 %v1058_v48 }
  0x45   :  { %926 = vmatmul.mubr.msk.bf16.gmra.mrb[24].mxu0 %vm526_vm0, %v1077_v53 }
  0x46   :  { %653 = vmatprep.mubr.bf16.mxu0 %v1085_v1 }
  0x4a   :  { %376 = vmatmul.mubr.bf16.gmra.mrb[4].mxu1 %v1060_v49 }
  0x4b   :  { %385 = vmatprep.mubr.bf16.mxu1 %v1062_v51 }
  0x4d   :  { %927 = vmatmul.mubr.msk.bf16.gmra.mrb[28].mxu0 %vm526_vm0, %v1081_v56 }
  0x52   :  { %386 = vmatmul.mubr.bf16.gmra.mrb[8].mxu1 %v1064_v52 }
  0x53   :  { %395 = vmatprep.mubr.bf16.mxu1 %v1066_v54 }
  0x5a   :  { %396 = vmatmul.mubr.bf16.gmra.mrb[12].mxu1 %v1068_v55 }
  0x5b   :  { %405 = vmatprep.mubr.bf16.mxu1 %v1070_v57 }
  0x62   :  { %406 = vmatmul.mubr.bf16.gmra.mrb[16].mxu1 %v1072_v58 }
  0x63   :  { %415 = vmatprep.mubr.bf16.mxu1 %v1074_v59 }
  0x6a   :  { %416 = vmatmul.mubr.bf16.gmra.mrb[20].mxu1 %v1076_v60 }
  0x6b   :  { %425 = vmatprep.mubr.bf16.mxu1 %v1078_v61 }
  0x72   :  { %426 = vmatmul.mubr.bf16.gmra.mrb[24].mxu1 %v1080_v62 }
  0x73   :  { %435 = vmatprep.mubr.bf16.mxu1 %v1082_v63 }
  0x7a   :  { %436 = vmatmul.mubr.bf16.gmra.mrb[28].mxu1 %v1084_v0 }
  0xe8   :  { %v585_v1 = vpop.f32.mrb[0].mxu0 }
  0xe9   :  { %v587_v2 = vpop.f32.mrb[1].mxu0 }
  0xea   :  { %v589_v3 = vpop.f32.mrb[2].mxu0 }
  0xeb   :  { %v591_v4 = vpop.f32.mrb[3].mxu0 }
  0xf0   :  { %v595_v5 = vpop.f32.mrb[4].mxu0 }
  0xf1   :  { %v597_v6 = vpop.f32.mrb[5].mxu0 }
  0xf2   :  { %v599_v7 = vpop.f32.mrb[6].mxu0 }
  0xf3   :  { %v601_v8 = vpop.f32.mrb[7].mxu0 }
  0xf8   :  { %v1324_v9 = vpop.f32.mrb[8].mxu0 }
  0xf9   :  { %v1326_v10 = vpop.f32.mrb[9].mxu0 }
  0xfa   :  { %v1328_v11 = vpop.f32.mrb[10].mxu0 }
  0xfb   :  { %v1330_v13 = vpop.f32.mrb[11].mxu0 }
 0x100   :  { %v1332_v15 = vpop.f32.mrb[12].mxu0 }
 0x101   :  { %v1334_v16 = vpop.f32.mrb[13].mxu0 }
 0x102   :  { %v1336_v17 = vpop.f32.mrb[14].mxu0 }
 0x103   :  { %v1338_v19 = vpop.f32.mrb[15].mxu0 }
 0x108   :  { %v1347_v25 = vpop.f32.mrb[16].mxu0 }
 0x109   :  { %v1349_v28 = vpop.f32.mrb[17].mxu0 }
 0x10a   :  { %v1351_v31 = vpop.f32.mrb[18].mxu0 }
 0x10b   :  { %v1354_v35 = vpop.f32.mrb[19].mxu0 }
 0x110   :  { %v1359_v46 = vpop.f32.mrb[20].mxu0 }
 0x111   :  { %v1361_v49 = vpop.f32.mrb[21].mxu0 }
 0x112   :  { %v1366_v53 = vpop.f32.mrb[22].mxu0 }
 0x113   :  { %v1369_v57 = vpop.f32.mrb[23].mxu0 }
 0x115   :  { %v367_v23 = vpop.f32.mrb[0].mxu1 }
 0x116   :  { %v586_v26 = vadd.f32 %v585_v1, %v367_v23  ;;  %v369_v27 = vpop.f32.mrb[1].mxu1 }
 0x117   :  { %v588_v29 = vadd.f32 %v587_v2, %v369_v27  ;;  %v371_v30 = vpop.f32.mrb[2].mxu1 }
 0x118   :  { %v676_v32 = vadd.f32 %v1343_v22, %v586_v26  ;;  %v590_v33 = vadd.f32 %v589_v3, %v371_v30  ;;  %v373_v34 = vpop.f32.mrb[3].mxu1 }
 0x119   :  { %v677_v36 = vadd.f32 %v1345_v24, %v588_v29  ;;  %v592_v37 = vadd.f32 %v591_v4, %v373_v34  ;;  %v1377_v4 = vpop.f32.mrb[24].mxu0 }
 0x11a   :  { %v708_v38 = vmax.f32 %v676_v32, 0.0  ;;  %v678_v39 = vadd.f32 %v1343_v22, %v590_v33 }
 0x11b   :  { %v709_v40 = vmax.f32 %v677_v36, 0.0  ;;  %v679_v41 = vadd.f32 %v1345_v24, %v592_v37 }
 0x11c   :  { %v710_v42 = vmax.f32 %v678_v39, 0.0 }
 0x11d   :  { %v944_v43 = vpack.c.bf16 %v709_v40, %v708_v38  ;;  %v711_v44 = vmax.f32 %v679_v41, 0.0  ;;  %v377_v45 = vpop.f32.mrb[4].mxu1 }
 0x11e   :  { %v596_v47 = vadd.f32 %v595_v5, %v377_v45  ;;  %v379_v48 = vpop.f32.mrb[5].mxu1 }
 0x11f   :  { %836 = vst [vmem:[%s1488_s5] sm:$0xff] %v944_v43  ;;  %v945_v50 = vpack.c.bf16 %v711_v44, %v710_v42  ;;  %v598_v51 = vadd.f32 %v597_v6, %v379_v48  ;;  %v381_v52 = vpop.f32.mrb[6].mxu1 }
 0x120   :  { %v680_v54 = vadd.f32 %v1343_v22, %v596_v47  ;;  %v600_v55 = vadd.f32 %v599_v7, %v381_v52  ;;  %v383_v56 = vpop.f32.mrb[7].mxu1  ;;  %v1380_v7 = vpop.f32.mrb[25].mxu0 }
 0x121   :  { %837 = vst [vmem:[%s1488_s5 + $0x8] sm:$0xff] %v945_v50  ;;  %v681_v58 = vadd.f32 %v1345_v24, %v598_v51  ;;  %v602_v59 = vadd.f32 %v601_v8, %v383_v56  ;;  %v1386_v18 = vpop.f32.mrb[26].mxu0 }
 0x122   :  { %v712_v60 = vmax.f32 %v680_v54, 0.0  ;;  %v682_v61 = vadd.f32 %v1343_v22, %v600_v55  ;;  %v1390_v26 = vpop.f32.mrb[27].mxu0 }
 0x123   :  { %v713_v62 = vmax.f32 %v681_v58, 0.0  ;;  %v683_v63 = vadd.f32 %v1345_v24, %v602_v59  ;;  %v1399_v37 = vpop.f32.mrb[28].mxu0 }
 0x124   :  { %v714_v0 = vmax.f32 %v682_v61, 0.0  ;;  %v1402_v40 = vpop.f32.mrb[29].mxu0 }
 0x125   :  { %v946_v1 = vpack.c.bf16 %v713_v62, %v712_v60  ;;  %v715_v2 = vmax.f32 %v683_v63, 0.0  ;;  %v387_v3 = vpop.f32.mrb[8].mxu1  ;;  %v1408_v43 = vpop.f32.mrb[30].mxu0 }
 0x126   :  { %v606_v5 = vadd.f32 %v1324_v9, %v387_v3  ;;  %v389_v6 = vpop.f32.mrb[9].mxu1  ;;  %v1412_v48 = vpop.f32.mrb[31].mxu0 }
 0x127   :  { %838 = vst [vmem:[%s1488_s5 + $0x10] sm:$0xff] %v946_v1  ;;  %v947_v8 = vpack.c.bf16 %v715_v2, %v714_v0  ;;  %v608_v12 = vadd.f32 %v1326_v10, %v389_v6  ;;  %v391_v14 = vpop.f32.mrb[10].mxu1 }
 0x128   :  { %v684_v20 = vadd.f32 %v1343_v22, %v606_v5  ;;  %v610_v21 = vadd.f32 %v1328_v11, %v391_v14  ;;  %v393_v23 = vpop.f32.mrb[11].mxu1 }
 0x129   :  { %839 = vst [vmem:[%s1488_s5 + $0x18] sm:$0xff] %v947_v8  ;;  %v685_v9 = vadd.f32 %v1345_v24, %v608_v12  ;;  %v612_v27 = vadd.f32 %v1330_v13, %v393_v23 }
 0x12a   :  { %v716_v29 = vmax.f32 %v684_v20, 0.0  ;;  %v686_v10 = vadd.f32 %v1343_v22, %v610_v21 }
 0x12b   :  { %v717_v30 = vmax.f32 %v685_v9, 0.0  ;;  %v687_v32 = vadd.f32 %v1345_v24, %v612_v27 }
 0x12c   :  { %v718_v33 = vmax.f32 %v686_v10, 0.0 }
 0x12d   :  { %v948_v34 = vpack.c.bf16 %v717_v30, %v716_v29  ;;  %v719_v11 = vmax.f32 %v687_v32, 0.0  ;;  %v397_v36 = vpop.f32.mrb[12].mxu1 }
 0x12e   :  { %v616_v38 = vadd.f32 %v1332_v15, %v397_v36  ;;  %v399_v39 = vpop.f32.mrb[13].mxu1 }
 0x12f   :  { %840 = vst [vmem:[%s1488_s5 + $0x20] sm:$0xff] %v948_v34  ;;  %v949_v13 = vpack.c.bf16 %v719_v11, %v718_v33  ;;  %v618_v41 = vadd.f32 %v1334_v16, %v399_v39  ;;  %v401_v42 = vpop.f32.mrb[14].mxu1 }
 0x130   :  { %v688_v44 = vadd.f32 %v1343_v22, %v616_v38  ;;  %v620_v45 = vadd.f32 %v1336_v17, %v401_v42  ;;  %v403_v47 = vpop.f32.mrb[15].mxu1 }
 0x131   :  { %841 = vst [vmem:[%s1488_s5 + $0x28] sm:$0xff] %v949_v13  ;;  %v689_v15 = vadd.f32 %v1345_v24, %v618_v41  ;;  %v622_v50 = vadd.f32 %v1338_v19, %v403_v47 }
 0x132   :  { %v720_v51 = vmax.f32 %v688_v44, 0.0  ;;  %v690_v16 = vadd.f32 %v1343_v22, %v620_v45 }
 0x133   :  { %v721_v52 = vmax.f32 %v689_v15, 0.0  ;;  %v691_v54 = vadd.f32 %v1345_v24, %v622_v50 }
 0x134   :  { %v722_v55 = vmax.f32 %v690_v16, 0.0 }
 0x135   :  { %v950_v56 = vpack.c.bf16 %v721_v52, %v720_v51  ;;  %v723_v17 = vmax.f32 %v691_v54, 0.0  ;;  %v407_v58 = vpop.f32.mrb[16].mxu1 }
 0x136   :  { %v626_v59 = vadd.f32 %v1347_v25, %v407_v58  ;;  %v409_v60 = vpop.f32.mrb[17].mxu1 }
 0x137   :  { %842 = vst [vmem:[%s1488_s5 + $0x30] sm:$0xff] %v950_v56  ;;  %v951_v61 = vpack.c.bf16 %v723_v17, %v722_v55  ;;  %v628_v19 = vadd.f32 %v1349_v28, %v409_v60  ;;  %v411_v62 = vpop.f32.mrb[18].mxu1 }
 0x138   :  { %v692_v63 = vadd.f32 %v1343_v22, %v626_v59  ;;  %v630_v0 = vadd.f32 %v1351_v31, %v411_v62  ;;  %v413_v1 = vpop.f32.mrb[19].mxu1 }
 0x139   :  { %843 = vst [vmem:[%s1488_s5 + $0x38] sm:$0xff] %v951_v61  ;;  %v693_v25 = vadd.f32 %v1345_v24, %v628_v19  ;;  %v632_v2 = vadd.f32 %v1354_v35, %v413_v1 }
 0x13a   :  { %v724_v3 = vmax.f32 %v692_v63, 0.0  ;;  %v694_v5 = vadd.f32 %v1343_v22, %v630_v0 }
 0x13b   :  { %v725_v6 = vmax.f32 %v693_v25, 0.0  ;;  %v695_v28 = vadd.f32 %v1345_v24, %v632_v2 }
 0x13c   :  { %v726_v8 = vmax.f32 %v694_v5, 0.0 }
 0x13d   :  { %v952_v12 = vpack.c.bf16 %v725_v6, %v724_v3  ;;  %v727_v14 = vmax.f32 %v695_v28, 0.0  ;;  %v417_v20 = vpop.f32.mrb[20].mxu1 }
 0x13e   :  { %v636_v31 = vadd.f32 %v1359_v46, %v417_v20  ;;  %v419_v21 = vpop.f32.mrb[21].mxu1 }
 0x13f   :  { %844 = vst [vmem:[%s1488_s5 + $0x40] sm:$0xff] %v952_v12  ;;  %v953_v23 = vpack.c.bf16 %v727_v14, %v726_v8  ;;  %v638_v35 = vadd.f32 %v1361_v49, %v419_v21  ;;  %v421_v9 = vpop.f32.mrb[22].mxu1 }
 0x140   :  { %v696_v27 = vadd.f32 %v1343_v22, %v636_v31  ;;  %v640_v29 = vadd.f32 %v1366_v53, %v421_v9  ;;  %v423_v10 = vpop.f32.mrb[23].mxu1 }
 0x141   :  { %845 = vst [vmem:[%s1488_s5 + $0x48] sm:$0xff] %v953_v23  ;;  %v697_v46 = vadd.f32 %v1345_v24, %v638_v35  ;;  %v642_v30 = vadd.f32 %v1369_v57, %v423_v10 }
 0x142   :  { %v728_v32 = vmax.f32 %v696_v27, 0.0  ;;  %v698_v33 = vadd.f32 %v1343_v22, %v640_v29 }
 0x143   :  { %v729_v34 = vmax.f32 %v697_v46, 0.0  ;;  %v699_v49 = vadd.f32 %v1345_v24, %v642_v30 }
 0x144   :  { %v730_v11 = vmax.f32 %v698_v33, 0.0 }
 0x145   :  { %v954_v36 = vpack.c.bf16 %v729_v34, %v728_v32  ;;  %v731_v38 = vmax.f32 %v699_v49, 0.0  ;;  %v427_v39 = vpop.f32.mrb[24].mxu1 }
 0x146   :  { %v646_v53 = vadd.f32 %v1377_v4, %v427_v39  ;;  %v429_v13 = vpop.f32.mrb[25].mxu1 }
 0x147   :  { %846 = vst [vmem:[%s1488_s5 + $0x50] sm:$0xff] %v954_v36  ;;  %v955_v41 = vpack.c.bf16 %v731_v38, %v730_v11  ;;  %v648_v57 = vadd.f32 %v1380_v7, %v429_v13  ;;  %v431_v42 = vpop.f32.mrb[26].mxu1 }
 0x148   :  { %v700_v44 = vadd.f32 %v1343_v22, %v646_v53  ;;  %v650_v45 = vadd.f32 %v1386_v18, %v431_v42  ;;  %v433_v47 = vpop.f32.mrb[27].mxu1 }
 0x149   :  { %847 = vst [vmem:[%s1488_s5 + $0x58] sm:$0xff] %v955_v41  ;;  %v701_v4 = vadd.f32 %v1345_v24, %v648_v57  ;;  %v652_v15 = vadd.f32 %v1390_v26, %v433_v47 }
 0x14a   :  { %v732_v50 = vmax.f32 %v700_v44, 0.0  ;;  %v702_v51 = vadd.f32 %v1343_v22, %v650_v45 }
 0x14b   :  { %v733_v16 = vmax.f32 %v701_v4, 0.0  ;;  %v703_v7 = vadd.f32 %v1345_v24, %v652_v15 }
 0x14c   :  { %v734_v52 = vmax.f32 %v702_v51, 0.0 }
 0x14d   :  { %v956_v54 = vpack.c.bf16 %v733_v16, %v732_v50  ;;  %v735_v55 = vmax.f32 %v703_v7, 0.0  ;;  %v437_v56 = vpop.f32.mrb[28].mxu1 }
 0x14e   :  { %v656_v18 = vadd.f32 %v1399_v37, %v437_v56  ;;  %v439_v17 = vpop.f32.mrb[29].mxu1 }
 0x14f   :  { %848 = vst [vmem:[%s1488_s5 + $0x60] sm:$0xff] %v956_v54  ;;  %v957_v58 = vpack.c.bf16 %v735_v55, %v734_v52  ;;  %v658_v26 = vadd.f32 %v1402_v40, %v439_v17  ;;  %v441_v59 = vpop.f32.mrb[30].mxu1 }
 0x150   :  { %v704_v60 = vadd.f32 %v1343_v22, %v656_v18  ;;  %v660_v61 = vadd.f32 %v1408_v43, %v441_v59  ;;  %v443_v19 = vpop.f32.mrb[31].mxu1 }
 0x151   :  { %849 = vst [vmem:[%s1488_s5 + $0x68] sm:$0xff] %v957_v58  ;;  %v705_v37 = vadd.f32 %v1345_v24, %v658_v26  ;;  %v662_v62 = vadd.f32 %v1412_v48, %v443_v19 }
 0x152   :  { %v736_v63 = vmax.f32 %v704_v60, 0.0  ;;  %v706_v0 = vadd.f32 %v1343_v22, %v660_v61 }
 0x153   :  { %v737_v1 = vmax.f32 %v705_v37, 0.0  ;;  %v707_v40 = vadd.f32 %v1345_v24, %v662_v62 }
 0x154   :  { %v738_v25 = vmax.f32 %v706_v0, 0.0 }
 0x155   :  { %v958_v2 = vpack.c.bf16 %v737_v1, %v736_v63  ;;  %v739_v3 = vmax.f32 %v707_v40, 0.0 }
 0x157   :  { %850 = vst [vmem:[%s1488_s5 + $0x70] sm:$0xff] %v958_v2  ;;  %v959_v43 = vpack.c.bf16 %v739_v3, %v738_v25 }
 0x159   :  { %851 = vst [vmem:[%s1488_s5 + $0x78] sm:$0xff] %v959_v43 }

// kernel: leipnet_forward.29
= control target key start
LH: loop header
LB: loop body
LE: loop exit
PB: predicated region body
PF: predicated region fallthrough
CT: control target
= control target key end

     0   :  { %s1340_s12 = smov 0   ;;  %s1342_s13 = smov 0   ;;  %s1488_s0 = inlined_call_operand.vmem [shape: bf16[128,2304], index: 0, kind: input, shape index: {}]   ;;  %s1489_s1 = inlined_call_operand.vmem [shape: bf16[2304,128], index: 1, kind: input, shape index: {}]   ;;  %s1490_s2 = inlined_call_operand.vmem [shape: f32[1,128], index: 2, kind: input, shape index: {}]   ;;  %s1491_s3 = inlined_call_operand.vmem [shape: bf16[128,128], index: 3, kind: output, shape index: {}]  }
   0x1   :  { %s1344_s14 = smov 0   ;;  %s1346_s15 = smov 0  }
   0x2   :  { %s1348_s16 = smov 0  }
   0x3 LB: > { %s25_s17 = sadd.s32 1, %s1313_s15  ;;  %p48_p1 = scmp.ne.s32.totalorder %s1305_s13, %s1301_s12  ;;  %s1317_s16 = sphi %s1348_s16, %s13_s16   ;;  %s1313_s15 = sphi %s1346_s15, %s1495_s15   ;;  %s1309_s14 = sphi %s1344_s14, %s1494_s14   ;;  %s1305_s13 = sphi %s1342_s13, %s1493_s13   ;;  %s1301_s12 = sphi %s1340_s12, %s1492_s12  }
   0x4   : > { %p26_p0 = scmp.ge.s32.totalorder %s25_s17, 9  ;;  %p49_p2 = scmp.eq.s32.totalorder %s1317_s16, 0 }
   0x5   : > { %s41_s19 = sadd.s32 1, %s1305_s13  ;;  %p991_p5 = scmp.ge.s32.totalorder %s1317_s16, 9 }
   0x6   : > { %s1497_s17 = smov (%p26_p0, %s25_s17), 0  ;;  %p50_p3 = por %p49_p2, %p48_p1 }
   0x7   : > { %s37_s18 = ssub.s32 %s1313_s15, %s1497_s17  ;;  %162 = sbr.rel (%p991_p5) target bundleno = 26 (0x1a), region = 20 }
   0x8   : > { %p39_p4 = scmp.eq.s32.totalorder %s37_s18, 0 }
   0xa   : > { %s1375_s20 = scalar_select %p39_p4, %s1305_s13, %s41_s19  }
   0xe   : > { %165 = sbr.rel (!%p50_p3) target bundleno = 26 (0x1a), region = 24  ;;  %s167_s21 = sand.u32 (%p50_p3), 1, %s1305_s13  }
   0xf   : > { %s1054_s22 = sshll.u32 (%p50_p3), %s1313_s15, 3  ;;  %s992_s23 = sshll.u32 (%p50_p3), %s167_s21, 7 }
  0x10   : > { %s1383_s26 = scalar_lea.vmem (%p50_p3), %s1488_s0, %s1054_s22  ;;  %s169_s27 = scalar_lea.vmem (%p50_p3), [#allocation3], %s992_s23 }
  0x11   : > { %v233_v0 = vld [vmem:[%s1383_s26] sm:$0xff] (%p50_p3)  ;;  %v235_v1 = vld [vmem:[%s1383_s26 + $0x48] sm:$0xff] (%p50_p3)  ;;  %v237_v2 = vld [vmem:[%s1383_s26 + $0x90] sm:$0xff] (%p50_p3) }
  0x12   : > { %234 = vst [vmem:[%s169_s27] sm:$0xff] (%p50_p3), %v233_v0  ;;  %236 = vst [vmem:[%s169_s27 + $0x8] sm:$0xff] (%p50_p3), %v235_v1  ;;  %v239_v3 = vld [vmem:[%s1383_s26 + $0xd8] sm:$0xff] (%p50_p3)  ;;  %v241_v4 = vld [vmem:[%s1383_s26 + $0x120] sm:$0xff] (%p50_p3) }
  0x13   : > { %238 = vst [vmem:[%s169_s27 + $0x10] sm:$0xff] (%p50_p3), %v237_v2  ;;  %v243_v5 = vld [vmem:[%s1383_s26 + $0x168] sm:$0xff] (%p50_p3)  ;;  %240 = vst [vmem:[%s169_s27 + $0x18] sm:$0xff] (%p50_p3), %v239_v3  ;;  %v245_v6 = vld [vmem:[%s1383_s26 + $0x1b0] sm:$0xff] (%p50_p3) }
  0x14   : > { %242 = vst [vmem:[%s169_s27 + $0x20] sm:$0xff] (%p50_p3), %v241_v4  ;;  %244 = vst [vmem:[%s169_s27 + $0x28] sm:$0xff] (%p50_p3), %v243_v5  ;;  %v247_v7 = vld [vmem:[%s1383_s26 + $0x1f8] sm:$0xff] (%p50_p3)  ;;  %v249_v8 = vld [vmem:[%s1383_s26 + $0x240] sm:$0xff] (%p50_p3) }
  0x15   : > { %246 = vst [vmem:[%s169_s27 + $0x30] sm:$0xff] %v245_v6  ;;  %248 = vst [vmem:[%s169_s27 + $0x38] sm:$0xff] %v247_v7  ;;  %v251_v9 = vld [vmem:[%s1383_s26 + $0x288] sm:$0xff]  ;;  %v253_v10 = vld [vmem:[%s1383_s26 + $0x2d0] sm:$0xff] }
  0x16   : > { %250 = vst [vmem:[%s169_s27 + $0x40] sm:$0xff] %v249_v8  ;;  %v255_v11 = vld [vmem:[%s1383_s26 + $0x318] sm:$0xff]  ;;  %252 = vst [vmem:[%s169_s27 + $0x48] sm:$0xff] %v251_v9  ;;  %v257_v12 = vld [vmem:[%s1383_s26 + $0x360] sm:$0xff] }
  0x17   : > { %254 = vst [vmem:[%s169_s27 + $0x50] sm:$0xff] %v253_v10  ;;  %256 = vst [vmem:[%s169_s27 + $0x58] sm:$0xff] %v255_v11  ;;  %v259_v13 = vld [vmem:[%s1383_s26 + $0x3a8] sm:$0xff]  ;;  %v261_v14 = vld [vmem:[%s1383_s26 + $0x3f0] sm:$0xff] }
  0x18   : > { %258 = vst [vmem:[%s169_s27 + $0x60] sm:$0xff] %v257_v12  ;;  %260 = vst [vmem:[%s169_s27 + $0x68] sm:$0xff] %v259_v13  ;;  %v263_v15 = vld [vmem:[%s1383_s26 + $0x438] sm:$0xff] }
  0x19   : > { %262 = vst [vmem:[%s169_s27 + $0x70] sm:$0xff] %v261_v14  ;;  %264 = vst [vmem:[%s169_s27 + $0x78] sm:$0xff] %v263_v15 }
  0x1a PF: > { %p995_p6 = scmp.ge.s32.totalorder %s1317_s16, 1  ;;  %p281_p7 = scmp.lt.s32.totalorder %s1317_s16, 10 }
  0x1c   : > { %p282_p8 = pnand %p995_p6, %p281_p7 }
  0x1d   : > { %s288_s28 = sand.u32 (!%p282_p8), 1, %s1301_s12   ;;  %s997_s29 = sshll.u32 (!%p282_p8), %s1309_s14, 5 }
  0x1e   : > { %285 = sbr.rel (%p282_p8) target bundleno = 339 (0x153), region = 66  ;;  %s996_s30 = sshll.u32 (!%p282_p8), %s288_s28, 7 }
  0x1f   : > { %p328_p9 = scmp.lt.s32.totalorder (!%p282_p8), %s997_s29, 287  ;;  %s1410_s8 = scalar_lea.vmem (!%p282_p8), [#allocation3], %s996_s30 }
  0x20   : > { %p999_p10 = scmp.ne.s32.totalorder (!%p282_p8), %s1309_s14, 0 }
  0x25   : > { %s1499_s29 = smov (!%p328_p9, %s997_s29), 287  ;;  %352 = sbr.rel (%p999_p10) target bundleno = 47 (0x2f), region = 74 }
  0x26   : > { %s998_s4 = sshll.u32 %s1499_s29, 2  ;;  %v1319_v16 = vmov (!%p999_p10), 0.0  }
  0x27   : > { %s1408_s7 = scalar_lea.vmem %s1489_s1, %s998_s4  ;;  %353 = vst [vmem:[#allocation2] sm:$0xff] (!%p999_p10), %v1319_v16  ;;  %354 = vst [vmem:[#allocation2 + $0x8] sm:$0xff] (!%p999_p10), %v1319_v16 }
  0x28   : > { %355 = vst [vmem:[#allocation2 + $0x10] sm:$0xff] (!%p999_p10), %v1319_v16  ;;  %356 = vst [vmem:[#allocation2 + $0x18] sm:$0xff] (!%p999_p10), %v1319_v16 }
  0x29   : > { %357 = vst [vmem:[#allocation2 + $0x20] sm:$0xff] (!%p999_p10), %v1319_v16  ;;  %358 = vst [vmem:[#allocation2 + $0x28] sm:$0xff] (!%p999_p10), %v1319_v16 }
  0x2a   : > { %359 = vst [vmem:[#allocation2 + $0x30] sm:$0xff] (!%p999_p10), %v1319_v16  ;;  %360 = vst [vmem:[#allocation2 + $0x38] sm:$0xff] (!%p999_p10), %v1319_v16 }
  0x2b   : > { %361 = vst [vmem:[#allocation2 + $0x40] sm:$0xff] (!%p999_p10), %v1319_v16  ;;  %362 = vst [vmem:[#allocation2 + $0x48] sm:$0xff] (!%p999_p10), %v1319_v16 }
  0x2c   : > { %363 = vst [vmem:[#allocation2 + $0x50] sm:$0xff] %v1319_v16  ;;  %364 = vst [vmem:[#allocation2 + $0x58] sm:$0xff] %v1319_v16 }
  0x2d   : > { %365 = vst [vmem:[#allocation2 + $0x60] sm:$0xff] %v1319_v16  ;;  %366 = vst [vmem:[#allocation2 + $0x68] sm:$0xff] %v1319_v16 }
  0x2e   : > { %367 = vst [vmem:[#allocation2 + $0x70] sm:$0xff] %v1319_v16  ;;  %368 = vst [vmem:[#allocation2 + $0x78] sm:$0xff] %v1319_v16 }
  0x2f PF: > { %v1239_v17 = vld [vmem:[%s1408_s7 + $0x40] sm:$0xff]   ;;  %v1241_v19 = vld [vmem:[%s1408_s7 + $0x48] sm:$0xff]   ;;  %v1243_v21 = vld [vmem:[%s1408_s7 + $0x50] sm:$0xff]   ;;  %p1032_p11 = scmp.ne.s32.totalorder %s1309_s14, 8 }
  0x30   : > { %v1240_v18 = vld [vmem:[%s1408_s7] sm:$0xff]   ;;  %1118 = vmatprep.subr.bf16.mxu0 %v1239_v17  ;;  %1182 = vmatprep.subr.bf16.mxu1 %v1239_v17  ;;  %v1242_v20 = vld [vmem:[%s1408_s7 + $0x8] sm:$0xff]   ;;  %v1244_v22 = vld [vmem:[%s1408_s7 + $0x10] sm:$0xff]  }
  0x31   : > { %1119 = vmatpush3.bf16.msra.mxu0 %v1240_v18  ;;  %1190 = vmatpush3.bf16.msra.mxu1 %v1240_v18  ;;  %v1245_v23 = vld [vmem:[%s1408_s7 + $0x58] sm:$0xff]   ;;  %v1247_v25 = vld [vmem:[%s1408_s7 + $0x60] sm:$0xff]   ;;  %v1249_v27 = vld [vmem:[%s1408_s7 + $0x68] sm:$0xff]  }
  0x32   : > { %1120 = vmatprep.subr.bf16.mxu0 %v1241_v19  ;;  %1183 = vmatprep.subr.bf16.mxu1 %v1241_v19  ;;  %v1246_v24 = vld [vmem:[%s1408_s7 + $0x18] sm:$0xff]   ;;  %v1248_v26 = vld [vmem:[%s1408_s7 + $0x20] sm:$0xff]   ;;  %v1250_v30 = vld [vmem:[%s1408_s7 + $0x28] sm:$0xff]  }
  0x33   : > { %v1257_v28 = vld [vmem:[%s1410_s8 + $0x4] ss:$8 sps:$4 sm:$0xff]   ;;  %v1251_v31 = vld [vmem:[%s1408_s7 + $0x70] sm:$0xff]   ;;  %v1253_v33 = vld [vmem:[%s1408_s7 + $0x78] sm:$0xff]  }
  0x34   : > { %v1260_v29 = vld [vmem:[%s1410_s8 + $0x44] ss:$8 sps:$4 sm:$0xff]   ;;  %641 = vmatprep.mubr.bf16.mxu0 %v1257_v28  ;;  %v1252_v32 = vld [vmem:[%s1408_s7 + $0x30] sm:$0xff]   ;;  %v1254_v34 = vld [vmem:[%s1408_s7 + $0x38] sm:$0xff]  }
  0x35   : > { %1121 = vmatpush3.bf16.msra.mxu0 %v1242_v20  ;;  %1191 = vmatpush3.bf16.msra.mxu1 %v1242_v20  ;;  %v1255_v35 = vld [vmem:[%s1410_s8] ss:$8 sps:$4 sm:$0xff]   ;;  %v1261_v37 = vld [vmem:[%s1410_s8 + $0x14] ss:$8 sps:$4 sm:$0xff]   ;;  %v1265_v39 = vld [vmem:[%s1410_s8 + $0x10] ss:$8 sps:$4 sm:$0xff]  }
  0x36   : > { %1122 = vmatprep.subr.bf16.mxu0 %v1243_v21  ;;  %1184 = vmatprep.subr.bf16.mxu1 %v1243_v21  ;;  %v1258_v36 = vld [vmem:[%s1410_s8 + $0x40] ss:$8 sps:$4 sm:$0xff]   ;;  %v1263_v38 = vld [vmem:[%s1410_s8 + $0x54] ss:$8 sps:$4 sm:$0xff]   ;;  %v1266_v40 = vld [vmem:[%s1410_s8 + $0x50] ss:$8 sps:$4 sm:$0xff]  }
  0x37   : > { %673 = vmatprep.mubr.bf16.mxu1 %v1260_v29  ;;  %v1267_v41 = vld [vmem:[%s1410_s8 + $0x24] ss:$8 sps:$4 sm:$0xff]   ;;  %v1271_v43 = vld [vmem:[%s1410_s8 + $0x20] ss:$8 sps:$4 sm:$0xff]   ;;  %v1273_v45 = vld [vmem:[%s1410_s8 + $0x34] ss:$8 sps:$4 sm:$0xff]  }
  0x38   : > { %v1269_v42 = vld [vmem:[%s1410_s8 + $0x64] ss:$8 sps:$4 sm:$0xff]   ;;  %v1272_v44 = vld [vmem:[%s1410_s8 + $0x60] ss:$8 sps:$4 sm:$0xff]   ;;  %v1275_v46 = vld [vmem:[%s1410_s8 + $0x74] ss:$8 sps:$4 sm:$0xff]  }
  0x39   : > { %1123 = vmatpush3.bf16.msra.mxu0 %v1244_v22  ;;  %1192 = vmatpush3.bf16.msra.mxu1 %v1244_v22  ;;  %v1277_v47 = vld [vmem:[%s1410_s8 + $0x30] ss:$8 sps:$4 sm:$0xff]   ;;  %v369_v51 = vld [vmem:[#allocation2] sm:$0xff]  ;;  %v370_v59 = vld [vmem:[#allocation2 + $0x8] sm:$0xff] }
  0x3a   : > { %1124 = vmatprep.subr.bf16.mxu0 %v1245_v23  ;;  %1185 = vmatprep.subr.bf16.mxu1 %v1245_v23  ;;  %v1278_v48 = vld [vmem:[%s1410_s8 + $0x70] ss:$8 sps:$4 sm:$0xff]   ;;  %v377_v53 = vld [vmem:[#allocation2 + $0x40] sm:$0xff]  ;;  %v378_v61 = vld [vmem:[#allocation2 + $0x48] sm:$0xff] }
  0x3b   : > { %v371_v7 = vld [vmem:[#allocation2 + $0x10] sm:$0xff]  ;;  %v372_v15 = vld [vmem:[#allocation2 + $0x18] sm:$0xff]  ;;  %v381_v29 = vld [vmem:[#allocation2 + $0x60] sm:$0xff] }
  0x3c   : > { %v379_v9 = vld [vmem:[#allocation2 + $0x50] sm:$0xff]  ;;  %v380_v17 = vld [vmem:[#allocation2 + $0x58] sm:$0xff] }
  0x3d   : > { %1125 = vmatpush3.bf16.msra.mxu0 %v1246_v24  ;;  %1193 = vmatpush3.bf16.msra.mxu1 %v1246_v24 }
  0x3e   : > { %1126 = vmatprep.subr.bf16.mxu0 %v1247_v25  ;;  %1186 = vmatprep.subr.bf16.mxu1 %v1247_v25 }
  0x41   : > { %1127 = vmatpush3.bf16.msra.mxu0 %v1248_v26  ;;  %1194 = vmatpush3.bf16.msra.mxu1 %v1248_v26 }
  0x42   : > { %1128 = vmatprep.subr.bf16.mxu0 %v1249_v27  ;;  %1187 = vmatprep.subr.bf16.mxu1 %v1249_v27  ;;  %v373_v27 = vld [vmem:[#allocation2 + $0x20] sm:$0xff] }
  0x45   : > { %1129 = vmatpush3.bf16.msra.mxu0 %v1250_v30  ;;  %1195 = vmatpush3.bf16.msra.mxu1 %v1250_v30 }
  0x46   : > { %1130 = vmatprep.subr.bf16.mxu0 %v1251_v31  ;;  %1188 = vmatprep.subr.bf16.mxu1 %v1251_v31 }
  0x49   : > { %1131 = vmatpush3.bf16.msra.mxu0 %v1252_v32  ;;  %1196 = vmatpush3.bf16.msra.mxu1 %v1252_v32 }
  0x4a   : > { %1132 = vmatprep.subr.bf16.mxu0 %v1253_v33  ;;  %1189 = vmatprep.subr.bf16.mxu1 %v1253_v33 }
  0x4d   : > { %1133 = vmatpush3.bf16.msra.mxu0 %v1254_v34  ;;  %1197 = vmatpush3.bf16.msra.mxu1 %v1254_v34 }
  0x50   : > { %642 = vmatmul.mubr.bf16.vlgmr.msra.gmra.mrb[0].mxu0 %v1255_v35  ;;  %674 = vmatmul.mubr.bf16.vlgmr.msra.gmra.mrb[0].mxu1 %v1258_v36  ;;  %v374_v35 = vld [vmem:[#allocation2 + $0x28] sm:$0xff] }
  0x51   : > { %649 = vmatprep.mubr.bf16.mxu0 %v1261_v37  ;;  %681 = vmatprep.mubr.bf16.mxu1 %v1263_v38  ;;  %v382_v37 = vld [vmem:[#allocation2 + $0x68] sm:$0xff] }
  0x58   : > { %650 = vmatmul.mubr.bf16.gmra.mrb[4].mxu0 %v1265_v39  ;;  %682 = vmatmul.mubr.bf16.gmra.mrb[4].mxu1 %v1266_v40 }
  0x59   : > { %657 = vmatprep.mubr.bf16.mxu0 %v1267_v41  ;;  %689 = vmatprep.mubr.bf16.mxu1 %v1269_v42 }
  0x60   : > { %658 = vmatmul.mubr.bf16.gmra.mrb[8].mxu0 %v1271_v43  ;;  %690 = vmatmul.mubr.bf16.gmra.mrb[8].mxu1 %v1272_v44 }
  0x61   : > { %665 = vmatprep.mubr.bf16.mxu0 %v1273_v45  ;;  %697 = vmatprep.mubr.bf16.mxu1 %v1275_v46 }
  0x68   : > { %666 = vmatmul.mubr.bf16.gmra.mrb[12].mxu0 %v1277_v47  ;;  %698 = vmatmul.mubr.bf16.gmra.mrb[12].mxu1 %v1278_v48  ;;  %v375_v47 = vld [vmem:[#allocation2 + $0x30] sm:$0xff] }
 0x123   : > { %v1134_v49 = vpop.f32.mrb[0].mxu0  ;;  %v1158_v50 = vpop.f32.mrb[0].mxu1 }
 0x124   : > { %v1135_v52 = vpop.f32.mrb[1].mxu0  ;;  %v1159_v54 = vpop.f32.mrb[1].mxu1 }
 0x125   : > { %v1136_v55 = vadd.f32 %v1135_v52, %v1134_v49  ;;  %v1160_v56 = vadd.f32 %v1159_v54, %v1158_v50  ;;  %v1137_v57 = vpop.f32.mrb[2].mxu0  ;;  %v1161_v58 = vpop.f32.mrb[2].mxu1  ;;  %v383_v49 = vld [vmem:[#allocation2 + $0x70] sm:$0xff] }
 0x126   : > { %v1138_v60 = vpop.f32.mrb[3].mxu0  ;;  %v1162_v62 = vpop.f32.mrb[3].mxu1 }
 0x127   : > { %v706_v63 = vadd.f32 %v1136_v55, %v369_v51  ;;  %v714_v0 = vadd.f32 %v1160_v56, %v377_v53  ;;  %v1139_v1 = vadd.f32 %v1138_v60, %v1137_v57  ;;  %v1163_v2 = vadd.f32 %v1162_v62, %v1161_v58  ;;  %v376_v55 = vld [vmem:[#allocation2 + $0x38] sm:$0xff] }
 0x128   : > { %v384_v57 = vld [vmem:[#allocation2 + $0x78] sm:$0xff] }
 0x129   : > { %722 = vst [vmem:[#allocation2] sm:$0xff] %v706_v63  ;;  %730 = vst [vmem:[#allocation2 + $0x40] sm:$0xff] %v714_v0  ;;  %v707_v3 = vadd.f32 %v1139_v1, %v370_v59  ;;  %v715_v4 = vadd.f32 %v1163_v2, %v378_v61 }
 0x12b   : > { %723 = vst [vmem:[#allocation2 + $0x8] sm:$0xff] %v707_v3  ;;  %731 = vst [vmem:[#allocation2 + $0x48] sm:$0xff] %v715_v4  ;;  %v1140_v5 = vpop.f32.mrb[4].mxu0  ;;  %v1164_v6 = vpop.f32.mrb[4].mxu1  ;;  %v1033_v3 = vld [vmem:[%s1490_s2] ss:$0 sm:$0xff] (!%p1032_p11) }
 0x12c   : > { %v1141_v8 = vpop.f32.mrb[5].mxu0  ;;  %v1165_v10 = vpop.f32.mrb[5].mxu1 }
 0x12d   : > { %v1142_v11 = vadd.f32 %v1141_v8, %v1140_v5  ;;  %v1166_v12 = vadd.f32 %v1165_v10, %v1164_v6  ;;  %v1143_v13 = vpop.f32.mrb[6].mxu0  ;;  %v1167_v14 = vpop.f32.mrb[6].mxu1 }
 0x12e   : > { %v1144_v16 = vpop.f32.mrb[7].mxu0  ;;  %v1168_v18 = vpop.f32.mrb[7].mxu1 }
 0x12f   : > { %v708_v19 = vadd.f32 %v1142_v11, %v371_v7  ;;  %v716_v20 = vadd.f32 %v1166_v12, %v379_v9  ;;  %v1145_v21 = vadd.f32 %v1144_v16, %v1143_v13  ;;  %v1169_v22 = vadd.f32 %v1168_v18, %v1167_v14 }
 0x130   : > { %v742_v1 = vld [vmem:[#allocation2] sm:$0xff] (!%p1032_p11) }
 0x131   : > { %724 = vst [vmem:[#allocation2 + $0x10] sm:$0xff] %v708_v19  ;;  %732 = vst [vmem:[#allocation2 + $0x50] sm:$0xff] %v716_v20  ;;  %v709_v23 = vadd.f32 %v1145_v21, %v372_v15  ;;  %v717_v24 = vadd.f32 %v1169_v22, %v380_v17  ;;  %v765_v4 = vadd.f32 (!%p1032_p11), %v1033_v3, %v742_v1  ;;  %v750_v19 = vld [vmem:[#allocation2 + $0x40] sm:$0xff] (!%p1032_p11) }
 0x132   : > { %v743_v2 = vld [vmem:[#allocation2 + $0x8] sm:$0xff] (!%p1032_p11) }
 0x133   : > { %725 = vst [vmem:[#allocation2 + $0x18] sm:$0xff] %v709_v23  ;;  %733 = vst [vmem:[#allocation2 + $0x58] sm:$0xff] %v717_v24  ;;  %v1146_v25 = vpop.f32.mrb[8].mxu0  ;;  %v1170_v26 = vpop.f32.mrb[8].mxu1  ;;  %v766_v5 = vadd.f32 (!%p1032_p11), %v1033_v3, %v743_v2  ;;  %v781_v15 = vmax.f32 (!%p1032_p11), %v765_v4, 0.0  ;;  %v751_v20 = vld [vmem:[#allocation2 + $0x48] sm:$0xff] (!%p1032_p11) }
 0x134   : > { %v1147_v28 = vpop.f32.mrb[9].mxu0  ;;  %v1171_v30 = vpop.f32.mrb[9].mxu1 }
 0x135   : > { %v1148_v31 = vadd.f32 %v1147_v28, %v1146_v25  ;;  %v1172_v32 = vadd.f32 %v1171_v30, %v1170_v26  ;;  %v1149_v33 = vpop.f32.mrb[10].mxu0  ;;  %v1173_v34 = vpop.f32.mrb[10].mxu1  ;;  %v782_v16 = vmax.f32 (!%p1032_p11), %v766_v5, 0.0 }
 0x136   : > { %v1150_v36 = vpop.f32.mrb[11].mxu0  ;;  %v1174_v38 = vpop.f32.mrb[11].mxu1 }
 0x137   : > { %v710_v39 = vadd.f32 %v1148_v31, %v373_v27  ;;  %v718_v40 = vadd.f32 %v1172_v32, %v381_v29  ;;  %v1151_v41 = vadd.f32 %v1150_v36, %v1149_v33  ;;  %v1175_v42 = vadd.f32 %v1174_v38, %v1173_v34 }
 0x138   : > { %v744_v6 = vld [vmem:[#allocation2 + $0x10] sm:$0xff] (!%p1032_p11)  ;;  %v1074_v28 = vpack.c.bf16 (!%p1032_p11), %v782_v16, %v781_v15  ;;  %v773_v31 = vadd.f32 (!%p1032_p11), %v1033_v3, %v750_v19 }
 0x139   : > { %726 = vst [vmem:[#allocation2 + $0x20] sm:$0xff] %v710_v39  ;;  %734 = vst [vmem:[#allocation2 + $0x60] sm:$0xff] %v718_v40  ;;  %v711_v43 = vadd.f32 %v1151_v41, %v374_v35  ;;  %v719_v44 = vadd.f32 %v1175_v42, %v382_v37  ;;  %v767_v9 = vadd.f32 (!%p1032_p11), %v1033_v3, %v744_v6  ;;  %v752_v21 = vld [vmem:[#allocation2 + $0x50] sm:$0xff] (!%p1032_p11) }
 0x13a   : > { %v745_v7 = vld [vmem:[#allocation2 + $0x18] sm:$0xff] (!%p1032_p11)  ;;  %v774_v35 = vadd.f32 (!%p1032_p11), %v1033_v3, %v751_v20  ;;  %v775_v36 = vadd.f32 (!%p1032_p11), %v1033_v3, %v752_v21  ;;  %1075 = vst [vmem:[%s1491_s3] sm:$0xff] (!%p1032_p11), %v1074_v28   ;;  %v789_v40 = vmax.f32 (!%p1032_p11), %v773_v31, 0.0 }
 0x13b   : > { %727 = vst [vmem:[#allocation2 + $0x28] sm:$0xff] %v711_v43  ;;  %735 = vst [vmem:[#allocation2 + $0x68] sm:$0xff] %v719_v44  ;;  %v1152_v45 = vpop.f32.mrb[12].mxu0  ;;  %v1176_v46 = vpop.f32.mrb[12].mxu1  ;;  %v768_v10 = vadd.f32 (!%p1032_p11), %v1033_v3, %v745_v7  ;;  %v783_v22 = vmax.f32 (!%p1032_p11), %v767_v9, 0.0  ;;  %v753_v26 = vld [vmem:[#allocation2 + $0x58] sm:$0xff] (!%p1032_p11) }
 0x13c   : > { %v1153_v48 = vpop.f32.mrb[13].mxu0  ;;  %v1177_v50 = vpop.f32.mrb[13].mxu1  ;;  %v776_v41 = vadd.f32 (!%p1032_p11), %v1033_v3, %v753_v26  ;;  %v790_v44 = vmax.f32 (!%p1032_p11), %v774_v35, 0.0 }
 0x13d   : > { %v1154_v51 = vadd.f32 %v1153_v48, %v1152_v45  ;;  %v1178_v52 = vadd.f32 %v1177_v50, %v1176_v46  ;;  %v1155_v53 = vpop.f32.mrb[14].mxu0  ;;  %v1179_v54 = vpop.f32.mrb[14].mxu1  ;;  %741 = sbr.rel (%p1032_p11) target bundleno = 339 (0x153), region = 78  ;;  %v784_v23 = vmax.f32 (!%p1032_p11), %v768_v10, 0.0  ;;  %v791_v45 = vmax.f32 (!%p1032_p11), %v775_v36, 0.0 }
 0x13e   : > { %v1156_v56 = vpop.f32.mrb[15].mxu0  ;;  %v1180_v58 = vpop.f32.mrb[15].mxu1 }
 0x13f   : > { %v712_v59 = vadd.f32 %v1154_v51, %v375_v47  ;;  %v720_v60 = vadd.f32 %v1178_v52, %v383_v49  ;;  %v1157_v61 = vadd.f32 %v1156_v56, %v1155_v53  ;;  %v1181_v62 = vadd.f32 %v1180_v58, %v1179_v54 }
 0x140   : > { %v746_v8 = vld [vmem:[#allocation2 + $0x20] sm:$0xff] (!%p1032_p11)  ;;  %v1079_v33 = vpack.c.bf16 (!%p1032_p11), %v784_v23, %v783_v22  ;;  %v792_v47 = vmax.f32 (!%p1032_p11), %v776_v41, 0.0  ;;  %v1094_v51 = vpack.c.bf16 (!%p1032_p11), %v790_v44, %v789_v40 }
 0x141   : > { %728 = vst [vmem:[#allocation2 + $0x30] sm:$0xff] %v712_v59  ;;  %736 = vst [vmem:[#allocation2 + $0x70] sm:$0xff] %v720_v60  ;;  %v713_v63 = vadd.f32 %v1157_v61, %v376_v55  ;;  %v721_v0 = vadd.f32 %v1181_v62, %v384_v57  ;;  %v769_v12 = vadd.f32 (!%p1032_p11), %v1033_v3, %v746_v8  ;;  %v754_v27 = vld [vmem:[#allocation2 + $0x60] sm:$0xff] (!%p1032_p11) }
 0x142   : > { %v747_v11 = vld [vmem:[#allocation2 + $0x28] sm:$0xff] (!%p1032_p11)  ;;  %v777_v42 = vadd.f32 (!%p1032_p11), %v1033_v3, %v754_v27  ;;  %1111 = vst [vmem:[%s1491_s3 + $0x8] sm:$0xff] (!%p1032_p11), %v1079_v33   ;;  %v1099_v53 = vpack.c.bf16 (!%p1032_p11), %v792_v47, %v791_v45  ;;  %1114 = vst [vmem:[%s1491_s3 + $0x20] sm:$0xff] (!%p1032_p11), %v1094_v51  }
 0x143   : > { %729 = vst [vmem:[#allocation2 + $0x38] sm:$0xff] %v713_v63  ;;  %737 = vst [vmem:[#allocation2 + $0x78] sm:$0xff] %v721_v0  ;;  %v770_v17 = vadd.f32 (!%p1032_p11), %v1033_v3, %v747_v11  ;;  %v785_v24 = vmax.f32 (!%p1032_p11), %v769_v12, 0.0  ;;  %v755_v32 = vld [vmem:[#allocation2 + $0x68] sm:$0xff] (!%p1032_p11) }
 0x144   : > { %v778_v46 = vadd.f32 %v1033_v3, %v755_v32  ;;  %v793_v48 = vmax.f32 %v777_v42, 0.0  ;;  %1115 = vst [vmem:[%s1491_s3 + $0x28] sm:$0xff] %v1099_v53  }
 0x145   : > { %v786_v29 = vmax.f32 %v770_v17, 0.0 }
 0x146   : > { %v794_v52 = vmax.f32 %v778_v46, 0.0 }
 0x147   : > { %v1084_v39 = vpack.c.bf16 %v786_v29, %v785_v24 }
 0x148   : > { %v748_v13 = vld [vmem:[#allocation2 + $0x30] sm:$0xff]  ;;  %v1104_v56 = vpack.c.bf16 %v794_v52, %v793_v48 }
 0x149   : > { %v771_v18 = vadd.f32 %v1033_v3, %v748_v13  ;;  %v756_v37 = vld [vmem:[#allocation2 + $0x70] sm:$0xff]  ;;  %1112 = vst [vmem:[%s1491_s3 + $0x10] sm:$0xff] %v1084_v39  }
 0x14a   : > { %v749_v14 = vld [vmem:[#allocation2 + $0x38] sm:$0xff]  ;;  %v779_v49 = vadd.f32 %v1033_v3, %v756_v37  ;;  %1116 = vst [vmem:[%s1491_s3 + $0x30] sm:$0xff] %v1104_v56  }
 0x14b   : > { %v772_v25 = vadd.f32 %v1033_v3, %v749_v14  ;;  %v787_v30 = vmax.f32 %v771_v18, 0.0  ;;  %v757_v38 = vld [vmem:[#allocation2 + $0x78] sm:$0xff] }
 0x14c   : > { %v780_v50 = vadd.f32 %v1033_v3, %v757_v38  ;;  %v795_v54 = vmax.f32 %v779_v49, 0.0 }
 0x14d   : > { %v788_v34 = vmax.f32 %v772_v25, 0.0 }
 0x14e   : > { %v796_v55 = vmax.f32 %v780_v50, 0.0 }
 0x14f   : > { %v1089_v43 = vpack.c.bf16 %v788_v34, %v787_v30 }
 0x150   : > { %v1109_v57 = vpack.c.bf16 %v796_v55, %v795_v54 }
 0x151   : > { %1113 = vst [vmem:[%s1491_s3 + $0x18] sm:$0xff] %v1089_v43  }
 0x152   : > { %1117 = vst [vmem:[%s1491_s3 + $0x38] sm:$0xff] %v1109_v57  }
 0x153 PF: > { %s13_s16 = sadd.s32 1, %s1317_s16   ;;  %s1492_s12 = smov %s1305_s13 }
 0x154   : > { %p10_p12 = scmp.ge.s32.totalorder %s13_s16, 11   ;;  %s1493_s13 = smov %s1375_s20 }
 0x155   : > { %s1494_s14 = smov %s1313_s15  ;;  %s1495_s15 = smov %s1497_s17 }
 0x156   :  { %12 = sbr.rel (!%p10_p12) target bundleno = 3 (0x3), region = 119 }

// kernel: leipnet_forward.30
= control target key start
LH: loop header
LB: loop body
LE: loop exit
PB: predicated region body
PF: predicated region fallthrough
CT: control target
= control target key end

     0   :  { %s586_s1 = inlined_call_operand.vmem [shape: bf16[128,128], index: 1, kind: input, shape index: {}]   ;;  %s587_s0 = inlined_call_operand.vmem [shape: bf16[128,128], index: 0, kind: input, shape index: {}]   ;;  %s588_s2 = inlined_call_operand.vmem [shape: f32[1,128], index: 2, kind: input, shape index: {}]   ;;  %s589_s3 = inlined_call_operand.vmem [shape: f32[128,128], index: 3, kind: output, shape index: {}]  }
   0x1   :  { %v451_v0 = vld [vmem:[%s586_s1] sm:$0xff]   ;;  %v452_v1 = vld [vmem:[%s586_s1 + $0x8] sm:$0xff]   ;;  %v453_v2 = vld [vmem:[%s586_s1 + $0x10] sm:$0xff]  }
   0x2   :  { %403 = vmatprep.subr.bf16.mxu0 %v451_v0  ;;  %435 = vmatprep.subr.bf16.mxu1 %v451_v0  ;;  %v454_v3 = vld [vmem:[%s586_s1 + $0x18] sm:$0xff]   ;;  %v459_v4 = vld [vmem:[%s587_s0] sm:$0xff]   ;;  %v456_v7 = vld [vmem:[%s586_s1 + $0x28] sm:$0xff]  }
   0x3   :  { %404 = vmatpush3.bf16.msra.mxu0 %v451_v0  ;;  %443 = vmatpush3.bf16.msra.mxu1 %v451_v0  ;;  %v460_v5 = vld [vmem:[%s587_s0 + $0x20] sm:$0xff]   ;;  %v457_v8 = vld [vmem:[%s586_s1 + $0x30] sm:$0xff]   ;;  %v458_v9 = vld [vmem:[%s586_s1 + $0x38] sm:$0xff]  }
   0x4   :  { %405 = vmatprep.subr.bf16.mxu0 %v452_v1  ;;  %436 = vmatprep.subr.bf16.mxu1 %v452_v1  ;;  %v455_v6 = vld [vmem:[%s586_s1 + $0x20] sm:$0xff]   ;;  %v461_v10 = vld [vmem:[%s587_s0 + $0x8] sm:$0xff]   ;;  %v463_v12 = vld [vmem:[%s587_s0 + $0x10] sm:$0xff]  }
   0x5   :  { %419 = vmatprep.mubr.bf16.mxu0 %v459_v4  ;;  %427 = vmatprep.mubr.bf16.mxu1 %v460_v5  ;;  %v462_v11 = vld [vmem:[%s587_s0 + $0x28] sm:$0xff]   ;;  %v464_v13 = vld [vmem:[%s587_s0 + $0x30] sm:$0xff]   ;;  %v465_v14 = vld [vmem:[%s587_s0 + $0x18] sm:$0xff]  }
   0x6   :  { %v466_v15 = vld [vmem:[%s587_s0 + $0x38] sm:$0xff]   ;;  %v386_v16 = vld [vmem:[%s588_s2] ss:$0 sm:$0xff] }
   0x7   :  { %406 = vmatpush3.bf16.msra.mxu0 %v452_v1  ;;  %444 = vmatpush3.bf16.msra.mxu1 %v452_v1 }
   0x8   :  { %407 = vmatprep.subr.bf16.mxu0 %v453_v2  ;;  %437 = vmatprep.subr.bf16.mxu1 %v453_v2 }
   0xb   :  { %408 = vmatpush3.bf16.msra.mxu0 %v453_v2  ;;  %445 = vmatpush3.bf16.msra.mxu1 %v453_v2 }
   0xc   :  { %409 = vmatprep.subr.bf16.mxu0 %v454_v3  ;;  %438 = vmatprep.subr.bf16.mxu1 %v454_v3 }
   0xf   :  { %410 = vmatpush3.bf16.msra.mxu0 %v454_v3  ;;  %446 = vmatpush3.bf16.msra.mxu1 %v454_v3 }
  0x10   :  { %411 = vmatprep.subr.bf16.mxu0 %v455_v6  ;;  %439 = vmatprep.subr.bf16.mxu1 %v455_v6 }
  0x13   :  { %412 = vmatpush3.bf16.msra.mxu0 %v455_v6  ;;  %447 = vmatpush3.bf16.msra.mxu1 %v455_v6 }
  0x14   :  { %413 = vmatprep.subr.bf16.mxu0 %v456_v7  ;;  %440 = vmatprep.subr.bf16.mxu1 %v456_v7 }
  0x17   :  { %414 = vmatpush3.bf16.msra.mxu0 %v456_v7  ;;  %448 = vmatpush3.bf16.msra.mxu1 %v456_v7 }
  0x18   :  { %415 = vmatprep.subr.bf16.mxu0 %v457_v8  ;;  %441 = vmatprep.subr.bf16.mxu1 %v457_v8 }
  0x1b   :  { %416 = vmatpush3.bf16.msra.mxu0 %v457_v8  ;;  %449 = vmatpush3.bf16.msra.mxu1 %v457_v8 }
  0x1c   :  { %417 = vmatprep.subr.bf16.mxu0 %v458_v9  ;;  %442 = vmatprep.subr.bf16.mxu1 %v458_v9 }
  0x1f   :  { %418 = vmatpush3.bf16.msra.mxu0 %v458_v9  ;;  %450 = vmatpush3.bf16.msra.mxu1 %v458_v9 }
  0x22   :  { %420 = vmatmul.mubr.bf16.vlgmr.msra.gmra.mrb[0].mxu0 %v461_v10  ;;  %428 = vmatmul.mubr.bf16.vlgmr.msra.gmra.mrb[0].mxu1 %v462_v11 }
  0x23   :  { %423 = vmatprep.mubr.bf16.mxu0 %v463_v12  ;;  %431 = vmatprep.mubr.bf16.mxu1 %v464_v13 }
  0x2a   :  { %424 = vmatmul.mubr.bf16.gmra.mrb[4].mxu0 %v465_v14  ;;  %432 = vmatmul.mubr.bf16.gmra.mrb[4].mxu1 %v466_v15 }
  0xf5   :  { %v421_v17 = vpop.f32.mrb[0].mxu0  ;;  %v429_v18 = vpop.f32.mrb[0].mxu1 }
  0xf6   :  { %v336_v19 = vadd.f32 %v421_v17, %v386_v16  ;;  %v344_v20 = vadd.f32 %v429_v18, %v386_v16  ;;  %v213_v21 = vpop.f32.mrb[1].mxu0  ;;  %v245_v22 = vpop.f32.mrb[1].mxu1 }
  0xf7   :  { %v334_v23 = vadd.f32 %v386_v16, %v213_v21  ;;  %v342_v24 = vadd.f32 %v386_v16, %v245_v22  ;;  %v422_v25 = vpop.f32.mrb[2].mxu0  ;;  %v430_v26 = vpop.f32.mrb[2].mxu1 }
  0xf8   :  { %352 = vst [vmem:[%s589_s3 + $0x10] sm:$0xff] %v336_v19  ;;  %360 = vst [vmem:[%s589_s3 + $0x50] sm:$0xff] %v344_v20  ;;  %v337_v27 = vadd.f32 %v422_v25, %v386_v16  ;;  %v345_v28 = vadd.f32 %v430_v26, %v386_v16  ;;  %v216_v29 = vpop.f32.mrb[3].mxu0  ;;  %v248_v30 = vpop.f32.mrb[3].mxu1 }
  0xf9   :  { %350 = vst [vmem:[%s589_s3] sm:$0xff] %v334_v23  ;;  %358 = vst [vmem:[%s589_s3 + $0x40] sm:$0xff] %v342_v24  ;;  %v335_v31 = vadd.f32 %v386_v16, %v216_v29  ;;  %v343_v32 = vadd.f32 %v386_v16, %v248_v30 }
  0xfa   :  { %353 = vst [vmem:[%s589_s3 + $0x18] sm:$0xff] %v337_v27  ;;  %361 = vst [vmem:[%s589_s3 + $0x58] sm:$0xff] %v345_v28 }
  0xfb   :  { %351 = vst [vmem:[%s589_s3 + $0x8] sm:$0xff] %v335_v31  ;;  %359 = vst [vmem:[%s589_s3 + $0x48] sm:$0xff] %v343_v32 }
  0xfd   :  { %v425_v33 = vpop.f32.mrb[4].mxu0  ;;  %v433_v34 = vpop.f32.mrb[4].mxu1 }
  0xfe   :  { %v340_v35 = vadd.f32 %v425_v33, %v386_v16  ;;  %v348_v36 = vadd.f32 %v433_v34, %v386_v16  ;;  %v229_v37 = vpop.f32.mrb[5].mxu0  ;;  %v261_v38 = vpop.f32.mrb[5].mxu1 }
  0xff   :  { %v338_v39 = vadd.f32 %v386_v16, %v229_v37  ;;  %v346_v40 = vadd.f32 %v386_v16, %v261_v38  ;;  %v426_v41 = vpop.f32.mrb[6].mxu0  ;;  %v434_v42 = vpop.f32.mrb[6].mxu1 }
 0x100   :  { %356 = vst [vmem:[%s589_s3 + $0x30] sm:$0xff] %v340_v35  ;;  %364 = vst [vmem:[%s589_s3 + $0x70] sm:$0xff] %v348_v36  ;;  %v341_v43 = vadd.f32 %v426_v41, %v386_v16  ;;  %v349_v44 = vadd.f32 %v434_v42, %v386_v16  ;;  %v232_v45 = vpop.f32.mrb[7].mxu0  ;;  %v264_v46 = vpop.f32.mrb[7].mxu1 }
 0x101   :  { %354 = vst [vmem:[%s589_s3 + $0x20] sm:$0xff] %v338_v39  ;;  %362 = vst [vmem:[%s589_s3 + $0x60] sm:$0xff] %v346_v40  ;;  %v339_v47 = vadd.f32 %v386_v16, %v232_v45  ;;  %v347_v48 = vadd.f32 %v386_v16, %v264_v46 }
 0x102   :  { %357 = vst [vmem:[%s589_s3 + $0x38] sm:$0xff] %v341_v43  ;;  %365 = vst [vmem:[%s589_s3 + $0x78] sm:$0xff] %v349_v44 }
 0x103   :  { %355 = vst [vmem:[%s589_s3 + $0x28] sm:$0xff] %v339_v47  ;;  %363 = vst [vmem:[%s589_s3 + $0x68] sm:$0xff] %v347_v48 }

// kernel: leipnet_forward.31
= control target key start
LH: loop header
LB: loop body
LE: loop exit
PB: predicated region body
PF: predicated region fallthrough
CT: control target
= control target key end

     0   :  { %6 = vsyncpa [#allocation3], 0  ;;  %s867_s0 = inlined_call_operand.vmem [shape: f32[4,8,8], index: 0, kind: input, shape index: {}]   ;;  %s868_s1 = inlined_call_operand.hbm [shape: f32[4,32,32], index: 1, kind: output, shape index: {}]  }
   0x1   :  { %8 = vsyncpa [#allocation3 + $0x1], 0  ;;  %s638_s6 = smov 0   ;;  %s640_s7 = smov 0  }
   0x2   :  { %s642_s8 = smov 0   ;;  %s644_s9 = smov 0  }
   0x3 LB: > { %s659_s10 = sadd.s32 4294967295, %s608_s9   ;;  %s478_s11 = sadd.s32 4294967294, %s608_s9   ;;  %s608_s9 = sphi %s644_s9, %s874_s9   ;;  %s604_s8 = sphi %s642_s8, %s873_s8   ;;  %s600_s7 = sphi %s640_s7, %s872_s7   ;;  %s596_s6 = sphi %s638_s6, %s871_s6  }
   0x4   : > { %s663_s12 = sadd.s32 1, %s608_s9   ;;  %s47_s13 = sadd.s32 1, %s604_s8 }
   0x5   : > { %s44_s14 = ssub.s32 %s608_s9, %s663_s12  ;;  %p57_p0 = scmp.ne.s32.totalorder %s604_s8, %s600_s7 }
   0x6   : > { %p45_p1 = scmp.eq.s32.totalorder %s44_s14, 0  ;;  %p58_p2 = scmp.eq.s32.totalorder %s659_s10, 3 }
   0x7   : > { %p63_p3 = scmp.ne.s32.totalorder %s600_s7, %s596_s6  ;;  %p64_p4 = scmp.eq.s32.totalorder %s478_s11, 3 }
   0x8   : > { %s674_s15 = scalar_select %p45_p1, %s604_s8, %s47_s13  }
   0x9   : > { %p676_p5 = por %p58_p2, %p57_p0  ;;  %p680_p6 = por %p64_p4, %p63_p3 }
   0xa   : > { %p481_p7 = scmp.ge.s32.totalorder %s608_s9, 1  ;;  %p89_p8 = scmp.lt.s32.totalorder %s608_s9, 5 }
   0xc   : > { %p90_p9 = pnand %p481_p7, %p89_p8 }
   0xd   : > { %p108_p10 = scmp.lt.s32.totalorder (!%p90_p9), %s659_s10, 3  ;;  %s610_s23 = smov (!%p90_p9), 127   ;;  %vm187_vm0 = vcmask (!%p90_p9), 7168   ;;  %vm189_vm1 = vcmask (!%p90_p9), 15360   ;;  %vm191_vm2 = vcmask (!%p90_p9), 23552   ;;  %vm193_vm3 = vcmask (!%p90_p9), 31744  }
   0xe   : > { %93 = sbr.rel (%p90_p9) target bundleno = 442 (0x1ba), region = 24  ;;  %s611_s24 = smov (!%p90_p9), 125   ;;  %vm195_vm4 = vcmask (!%p90_p9), 39936   ;;  %vm197_vm5 = vcmask (!%p90_p9), 48128   ;;  %vm199_vm6 = vcmask (!%p90_p9), 56320   ;;  %vm201_vm7 = vcmask (!%p90_p9), 64512  }
   0xf   : > { %s612_s25 = smov (!%p90_p9), 126   ;;  %s613_s26 = smov (!%p90_p9), 1   ;;  %vm203_vm8 = vcmask (!%p90_p9), 72704   ;;  %vm205_vm9 = vcmask (!%p90_p9), 80896   ;;  %vm207_vm10 = vcmask (!%p90_p9), 89088   ;;  %vm209_vm11 = vcmask (!%p90_p9), 97280  }
  0x10   : > { %s614_s27 = smov (!%p90_p9), 2   ;;  %s615_s28 = smov (!%p90_p9), 3   ;;  %vm211_vm12 = vcmask (!%p90_p9), 105472   ;;  %vm213_vm13 = vcmask (!%p90_p9), 113664   ;;  %vm215_vm14 = vcmask (!%p90_p9), 121856   ;;  %vm281_vm15 = vcmask (!%p90_p9), 130048  }
  0x11   : > { %s616_s29 = smov (!%p90_p9), 4   ;;  %s617_s30 = smov (!%p90_p9), 5  }
  0x12   : > { %s618_s2 = smov (!%p90_p9), 6   ;;  %s619_s3 = smov (!%p90_p9), 7  }
  0x13   : > { %s620_s4 = smov (!%p90_p9), 8   ;;  %s621_s5 = smov (!%p90_p9), 9  }
  0x14   : > { %s622_s11 = smov (!%p90_p9), 10   ;;  %s623_s13 = smov (!%p90_p9), 11  }
  0x15   : > { %s109_s18 = scalar_select %p108_p10, %s659_s10, 3 }
  0x16   : > { %s624_s14 = smov 12   ;;  %s489_s21 = sshll.u32 %s659_s10, 9 }
  0x17   : > { %s483_s19 = sshll.u32 %s109_s18, 3  ;;  %s625_s18 = smov 16  }
  0x18   : > { %s111_s22 = scalar_lea.vmem %s867_s0, %s483_s19  ;;  %s105_s19 = sand.u32 1, %s600_s7  }
  0x19   : > { %v691_v0 = vld [vmem:[%s111_s22] sm:$0xff]  ;;  %s482_s20 = sshll.u32 %s105_s19, 5 }
  0x1a   : > { %v120_v1 = vmul.f32 0.625, %v691_v0  ;;  %v114_v2 = vmul.f32 0.125, %v691_v0  ;;  %v113_v3 = vmul.f32 0.875, %v691_v0  ;;  %v121_v4 = vmul.f32 0.375, %v691_v0  ;;  %s107_s22 = scalar_lea.vmem [#allocation2], %s482_s20 }
  0x1c   : > { %128 = vrot.lane.b32.xlu0 %v120_v1, %s610_s23  ;;  %116 = vrot.lane.b32.xlu1 %v114_v2, %s610_s23 }
  0x20   : > { %133 = vrot.lane.b32.xlu0 %v113_v3, %s610_s23  ;;  %123 = vrot.lane.b32.xlu1 %v121_v4, %s610_s23 }
  0x8e   : > { %v129_v5 = vpop.permute.xlu0 %128  ;;  %v117_v6 = vpop.permute.xlu1 %116 }
  0x8f   : > { %v697_v7 = vadd.f32 %v129_v5, %v121_v4  ;;  %v119_v8 = vadd.f32 %v117_v6, %v113_v3 }
  0x91   : > { %217 = vrot.lane.b32.xlu0 %v697_v7, %s611_s24 }
  0x92   : > { %v134_v9 = vpop.permute.xlu0 %133  ;;  %v124_v10 = vpop.permute.xlu1 %123 }
  0x93   : > { %v136_v11 = vadd.f32 %v134_v9, %v114_v2  ;;  %v126_v12 = vadd.f32 %v124_v10, %v120_v1 }
  0x95   : > { %220 = vrot.lane.b32.xlu1 %v136_v11, %s612_s25  ;;  %223 = vrot.lane.b32.xlu0 %v119_v8, %s612_s25  ;;  %s815_s25 = scalar_lea.hbm %s868_s1, %s489_s21 }
  0x99   : > { %226 = vrot.lane.b32.xlu1 %v126_v12, %s610_s23  ;;  %229 = vrot.lane.b32.xlu0 %v136_v11, %s613_s26  ;;  %s416_s23 = sshll.u32 %s107_s22, 4  ;;  %s819_s23 = int_to_ptr.vmem [resolvable:$true] %s416_s23 }
  0x9d   : > { %232 = vrot.lane.b32.xlu1 %v119_v8, %s613_s26  ;;  %235 = vrot.lane.b32.xlu0 %v126_v12, %s614_s27 }
  0xa1   : > { %238 = vrot.lane.b32.xlu1 %v697_v7, %s615_s28  ;;  %241 = vrot.lane.b32.xlu0 %v136_v11, %s616_s29 }
  0xa5   : > { %244 = vrot.lane.b32.xlu1 %v119_v8, %s616_s29  ;;  %247 = vrot.lane.b32.xlu0 %v126_v12, %s617_s30 }
  0xa9   : > { %250 = vrot.lane.b32.xlu1 %v697_v7, %s618_s2  ;;  %253 = vrot.lane.b32.xlu0 %v136_v11, %s619_s3 }
  0xad   : > { %256 = vrot.lane.b32.xlu1 %v691_v0, %s619_s3  ;;  %259 = vrot.lane.b32.xlu0 %v691_v0, %s620_s4 }
  0xb1   : > { %138 = vrot.lane.b32.xlu1 %v691_v0, %s613_s26  ;;  %142 = vrot.lane.b32.xlu0 %v119_v8, %s614_s27  ;;  %s825_s26 = scalar_lea.sflag [#allocation3], %s105_s19  ;;  %s546_s27 = scalar_lea.vmem %s819_s23, 512 }
  0xb2   : > { %p547_p11 = scmp.ne.s32.totalorder %s819_s23, %s546_s27 }
  0xb4   : > { %p548_p12 = pnand %p547_p11, %p676_p5 }
  0xb5   : > { %146 = vrot.lane.b32.xlu1 %v126_v12, %s615_s28  ;;  %150 = vrot.lane.b32.xlu0 %v697_v7, %s616_s29  ;;  %s626_s28 = smov [#allocation2]  }
  0xb6   : > { %p549_p13 = pneg %p548_p12  ;;  %s550_s29 = sshll.u32 %s626_s28, 4  ;;  %s551_s29 = int_to_ptr.vmem [resolvable:$false] %s550_s29 }
  0xb7   : > { %p553_p0 = scmp.lt.s32.totalorder %s819_s23, %s551_s29 }
  0xb9   : > { %154 = vrot.lane.b32.xlu1 %v136_v11, %s617_s30  ;;  %157 = vrot.lane.b32.xlu0 %v119_v8, %s617_s30  ;;  %s552_s30 = scalar_lea.vmem %s551_s29, 1024 }
  0xba   : > { %p554_p1 = scmp.lt.s32.totalorder %s552_s30, %s546_s27 }
  0xbc   : > { %p555_p2 = por %p554_p1, %p553_p0 }
  0xbd   : > { %160 = vrot.lane.b32.xlu1 %v126_v12, %s618_s2  ;;  %163 = vrot.lane.b32.xlu0 %v697_v7, %s619_s3 }
  0xbe   : > { %p556_p3 = pnand %p555_p2, %p549_p13 }
  0xc1   : > { %166 = vrot.lane.b32.xlu1 %v136_v11, %s620_s4  ;;  %169 = vrot.lane.b32.xlu0 %v119_v8, %s620_s4 }
  0xc5   : > { %172 = vrot.lane.b32.xlu1 %v126_v12, %s621_s5  ;;  %175 = vrot.lane.b32.xlu0 %v697_v7, %s622_s11 }
  0xc9   : > { %178 = vrot.lane.b32.xlu1 %v136_v11, %s623_s13  ;;  %181 = vrot.lane.b32.xlu0 %v119_v8, %s623_s13 }
  0xcd   : > { %184 = vrot.lane.b32.xlu1 %v126_v12, %s624_s14 }
 0x103   : > { %v218_v13 = vpop.permute.xlu0 %217 }
 0x107   : > { %v221_v14 = vpop.permute.xlu1 %220  ;;  %v224_v15 = vpop.permute.xlu0 %223 }
 0x108   : > { %v262_v16 = vsel %vm187_vm0, %v218_v13, %v221_v14 }
 0x109   : > { %v263_v17 = vsel %vm189_vm1, %v262_v16, %v224_v15 }
 0x10b   : > { %v227_v18 = vpop.permute.xlu1 %226  ;;  %v230_v19 = vpop.permute.xlu0 %229 }
 0x10c   : > { %v264_v20 = vsel %vm191_vm2, %v263_v17, %v227_v18 }
 0x10d   : > { %v265_v21 = vsel %vm193_vm3, %v264_v20, %v697_v7 }
 0x10e   : > { %v266_v22 = vsel %vm195_vm4, %v265_v21, %v230_v19 }
 0x10f   : > { %v233_v23 = vpop.permute.xlu1 %232  ;;  %v236_v24 = vpop.permute.xlu0 %235 }
 0x110   : > { %v267_v25 = vsel %vm197_vm5, %v266_v22, %v233_v23 }
 0x111   : > { %v268_v26 = vsel %vm199_vm6, %v267_v25, %v236_v24 }
 0x113   : > { %v239_v27 = vpop.permute.xlu1 %238  ;;  %v242_v28 = vpop.permute.xlu0 %241 }
 0x114   : > { %v269_v29 = vsel %vm201_vm7, %v268_v26, %v239_v27 }
 0x115   : > { %v270_v30 = vsel %vm203_vm8, %v269_v29, %v242_v28 }
 0x117   : > { %v245_v31 = vpop.permute.xlu1 %244  ;;  %v248_v32 = vpop.permute.xlu0 %247 }
 0x118   : > { %v271_v33 = vsel %vm205_vm9, %v270_v30, %v245_v31 }
 0x119   : > { %v272_v34 = vsel %vm207_vm10, %v271_v33, %v248_v32 }
 0x11b   : > { %v251_v35 = vpop.permute.xlu1 %250  ;;  %v254_v36 = vpop.permute.xlu0 %253 }
 0x11c   : > { %v273_v37 = vsel %vm209_vm11, %v272_v34, %v251_v35 }
 0x11d   : > { %v274_v38 = vsel %vm211_vm12, %v273_v37, %v254_v36 }
 0x11f   : > { %v257_v39 = vpop.permute.xlu1 %256  ;;  %v260_v40 = vpop.permute.xlu0 %259 }
 0x120   : > { %v275_v41 = vsel %vm213_vm13, %v274_v38, %v257_v39 }
 0x121   : > { %v276_v42 = vsel %vm215_vm14, %v275_v41, %v260_v40 }
 0x122   : > { %278 = vrot.lane.b32.xlu0 %v276_v42, %s625_s18 }
 0x123   : > { %v139_v43 = vpop.permute.xlu1 %138  ;;  %v143_v44 = vpop.permute.xlu0 %142 }
 0x124   : > { %v188_v45 = vsel %vm187_vm0, %v691_v0, %v139_v43  ;;  %vm334_vm0 = vcmask 1040384  }
 0x125   : > { %v190_v46 = vsel %vm189_vm1, %v188_v45, %v143_v44  ;;  %vm336_vm1 = vcmask 1041408  }
 0x127   : > { %v147_v47 = vpop.permute.xlu1 %146  ;;  %v151_v48 = vpop.permute.xlu0 %150 }
 0x128   : > { %v192_v49 = vsel %vm191_vm2, %v190_v46, %v147_v47  ;;  %vm338_vm2 = vcmask 1042432  }
 0x129   : > { %v194_v50 = vsel %vm193_vm3, %v192_v49, %v151_v48  ;;  %vm340_vm3 = vcmask 1043456  }
 0x12b   : > { %v155_v51 = vpop.permute.xlu1 %154  ;;  %v158_v52 = vpop.permute.xlu0 %157 }
 0x12c   : > { %v196_v53 = vsel %vm195_vm4, %v194_v50, %v155_v51  ;;  %vm342_vm4 = vcmask 1044480  }
 0x12d   : > { %v198_v54 = vsel %vm197_vm5, %v196_v53, %v158_v52  ;;  %vm344_vm5 = vcmask 1045504  }
 0x12f   : > { %v161_v55 = vpop.permute.xlu1 %160  ;;  %v164_v56 = vpop.permute.xlu0 %163 }
 0x130   : > { %v200_v57 = vsel %vm199_vm6, %v198_v54, %v161_v55  ;;  %vm346_vm6 = vcmask 1046528  }
 0x131   : > { %v202_v58 = vsel %vm201_vm7, %v200_v57, %v164_v56  ;;  %vm397_vm7 = vcmask 261120  }
 0x133   : > { %v167_v59 = vpop.permute.xlu1 %166  ;;  %v170_v60 = vpop.permute.xlu0 %169 }
 0x134   : > { %v204_v61 = vsel %vm203_vm8, %v202_v58, %v167_v59 }
 0x135   : > { %v206_v62 = vsel %vm205_vm9, %v204_v61, %v170_v60 }
 0x137   : > { %v173_v63 = vpop.permute.xlu1 %172  ;;  %v176_v0 = vpop.permute.xlu0 %175 }
 0x138   : > { %v208_v1 = vsel %vm207_vm10, %v206_v62, %v173_v63 }
 0x139   : > { %v210_v2 = vsel %vm209_vm11, %v208_v1, %v176_v0 }
 0x13b   : > { %v179_v3 = vpop.permute.xlu1 %178  ;;  %v182_v4 = vpop.permute.xlu0 %181 }
 0x13c   : > { %v212_v5 = vsel %vm211_vm12, %v210_v2, %v179_v3 }
 0x13d   : > { %v214_v6 = vsel %vm213_vm13, %v212_v5, %v182_v4 }
 0x13f   : > { %v185_v7 = vpop.permute.xlu1 %184 }
 0x140   : > { %v216_v8 = vsel %vm215_vm14, %v214_v6, %v185_v7 }
 0x194   : > { %v279_v9 = vpop.permute.xlu0 %278 }
 0x195   : > { %v743_v10 = vsel %vm281_vm15, %v216_v8, %v279_v9 }
 0x196   : > { %v283_v11 = vmul.f32 0.875, %v743_v10  ;;  %v284_v12 = vmul.f32 0.125, %v743_v10  ;;  %v289_v13 = vmul.f32 0.625, %v743_v10  ;;  %v290_v14 = vmul.f32 0.375, %v743_v10 }
 0x197   : > { %v304_v15 = vrot.slane %v743_v10, 7  ;;  %v381_v24 = vrot.slane %v743_v10, 1 }
 0x198   : > { %v286_v16 = vrot.slane %v284_v12, 1  ;;  %v292_v17 = vrot.slane %v290_v14, 1  ;;  %v296_v18 = vrot.slane %v289_v13, 1  ;;  %v300_v19 = vrot.slane %v283_v11, 1 }
 0x199   : > { %v335_v28 = vsel %vm334_vm0, %v743_v10, %v304_v15 }
 0x19a   : > { %v750_v20 = vadd.f32 %v286_v16, %v283_v11  ;;  %v752_v21 = vadd.f32 %v292_v17, %v289_v13  ;;  %v298_v22 = vadd.f32 %v296_v18, %v290_v14  ;;  %v754_v23 = vadd.f32 %v300_v19, %v284_v12 }
 0x19c   : > { %v307_v25 = vrot.slane %v750_v20, 6  ;;  %v310_v26 = vrot.slane %v752_v21, 5  ;;  %v322_v27 = vrot.slane %v298_v22, 1  ;;  %v313_v29 = vrot.slane %v298_v22, 4 }
 0x19d   : > { %v324_v30 = vrot.slane %v752_v21, 7  ;;  %v355_v31 = vrot.slane %v298_v22, 3  ;;  %v357_v32 = vrot.slane %v754_v23, 2  ;;  %v359_v35 = vrot.slane %v750_v20, 2 }
 0x19e   : > { %v337_v33 = vsel %vm336_vm1, %v335_v28, %v307_v25  ;;  %v348_v34 = vsel %vm334_vm0, %v322_v27, %v754_v23  ;;  %v369_v36 = vrot.slane %v298_v22, 5  ;;  %v371_v39 = vrot.slane %v754_v23, 4 }
 0x19f   : > { %v339_v37 = vsel %vm338_vm2, %v337_v33, %v310_v26  ;;  %v349_v38 = vsel %vm336_vm1, %v348_v34, %v750_v20  ;;  %v373_v40 = vrot.slane %v750_v20, 4  ;;  %v361_v43 = vrot.slane %v752_v21, 1 }
 0x1a0   : > { %v341_v41 = vsel %vm340_vm3, %v339_v37, %v313_v29  ;;  %v350_v42 = vsel %vm338_vm2, %v349_v38, %v324_v30  ;;  %v375_v44 = vrot.slane %v752_v21, 3  ;;  %v377_v45 = vrot.slane %v298_v22, 2 }
 0x1a1   : > { %v379_v46 = vrot.slane %v754_v23, 1  ;;  %v383_v47 = vsel %vm334_vm0, %v355_v31, %v357_v32  ;;  %v390_v48 = vsel %vm334_vm0, %v369_v36, %v371_v39  ;;  %v316_v51 = vrot.slane %v754_v23, 3 }
 0x1a2   : > { %v384_v49 = vsel %vm336_vm1, %v383_v47, %v359_v35  ;;  %v391_v50 = vsel %vm336_vm1, %v390_v48, %v373_v40  ;;  %v318_v52 = vrot.slane %v750_v20, 3  ;;  %v320_v55 = vrot.slane %v752_v21, 2 }
 0x1a3   : > { %v385_v53 = vsel %vm338_vm2, %v384_v49, %v361_v43  ;;  %v392_v54 = vsel %vm338_vm2, %v391_v50, %v375_v44  ;;  %v326_v56 = vrot.slane %v298_v22, 6  ;;  %v328_v58 = vrot.slane %v754_v23, 5 }
 0x1a4   : > { %v393_v57 = vsel %vm340_vm3, %v392_v54, %v377_v45  ;;  %v330_v59 = vrot.slane %v750_v20, 5  ;;  %v343_v60 = vsel %vm342_vm4, %v341_v41, %v316_v51  ;;  %v332_v62 = vrot.slane %v752_v21, 4 }
 0x1a5   : > { %v394_v61 = vsel %vm342_vm4, %v393_v57, %v379_v46  ;;  %v345_v63 = vsel %vm344_vm5, %v343_v60, %v318_v52  ;;  %v351_v0 = vsel %vm340_vm3, %v350_v42, %v326_v56  ;;  %v363_v4 = vrot.slane %v754_v23, 7 }
 0x1a6   : > { %v395_v1 = vsel %vm344_vm5, %v394_v61, %v381_v24  ;;  %v347_v2 = vsel %vm346_vm6, %v345_v63, %v320_v55  ;;  %v352_v3 = vsel %vm342_vm4, %v351_v0, %v328_v58  ;;  %v365_v7 = vrot.slane %v750_v20, 7 }
 0x1a7   : > { %v396_v5 = vsel %vm346_vm6, %v395_v1, %v743_v10  ;;  %v353_v6 = vsel %vm344_vm5, %v352_v3, %v330_v59  ;;  %v386_v8 = vsel %vm340_vm3, %v385_v53, %v298_v22  ;;  %398 = vst.msk [vmem:[%s107_s22] sm:$0xff] %vm397_vm7, %v347_v2  ;;  %v367_v11 = vrot.slane %v752_v21, 6 }
 0x1a8   : > { %v354_v9 = vsel %vm346_vm6, %v353_v6, %v332_v62  ;;  %v387_v12 = vsel %vm342_vm4, %v386_v8, %v363_v4  ;;  %401 = vst.msk [vmem:[%s107_s22 + $0x18] sm:$0xff] %vm397_vm7, %v396_v5 }
 0x1a9   : > { %v388_v10 = vsel %vm344_vm5, %v387_v12, %v365_v7  ;;  %399 = vst.msk [vmem:[%s107_s22 + $0x8] sm:$0xff] %vm397_vm7, %v354_v9 }
 0x1aa   : > { %v389_v13 = vsel %vm346_vm6, %v388_v10, %v367_v11 }
 0x1ab   : > { %400 = vst.msk [vmem:[%s107_s22 + $0x10] sm:$0xff] %vm397_vm7, %v389_v13 }
 0x1ac   : > { %559 = shalt.err (!%p556_p3)
}
 0x1ad   : > { %s560_s2 = scalar_lea.hbm %s815_s25, 512  ;;  %s564_s11 = scalar_lea.hbm %s868_s1, 2048 }
 0x1ae   : > { %p561_p4 = scmp.ne.s32.totalorder %s815_s25, %s560_s2  ;;  %p565_p9 = scmp.lt.u32.totalorder %s815_s25, %s868_s1 }
 0x1af   : > { %p566_p10 = scmp.lt.u32.totalorder %s564_s11, %s560_s2  ;;  %p568_p12 = scmp.lt.u32.totalorder %s560_s2, %s815_s25 }
 0x1b0   : > { %p562_p7 = pnand %p561_p4, %p676_p5 }
 0x1b1   : > { %p567_p11 = por %p566_p10, %p565_p9 }
 0x1b2   : > { %p563_p8 = pneg %p562_p7 }
 0x1b3   : > { %p569_p13 = por %p568_p12, %p567_p11 }
 0x1b5   : > { %p570_p0 = pnand %p569_p13, %p563_p8 }
 0x1b7   : > { %573 = shalt.err (!%p570_p0)
}
 0x1b8   : > { %s627_s18 = smov 128  }
 0x1b9   : > { %490 = dma.vmem_to_hbm [thread:$0]  (%p676_p5), %s819_s23, 512, %s815_s25, %s825_s26, %s627_s18, %s627_s18, %s620_s4  }
 0x1ba PF: > { %p496_p1 = scmp.ge.s32.totalorder %s608_s9, 2  ;;  %s431_s19 = sand.u32 1, %s596_s6  }
 0x1bb   : > { %s432_s20 = scalar_lea.sflag [#allocation3], %s431_s19 }
 0x1bc   : > { %p493_p2 = pnand %p496_p1, %p680_p6 }
 0x1be   : > { %591 = dma.done.wait (!%p493_p2), %s432_s20, 512  }
 0x1bf   : > { %593 = vsyncadd (!%p493_p2), %s432_s20, 4294966784  ;;  %p11_p3 = scmp.ge.s32.totalorder %s663_s12, 6   ;;  %s871_s6 = smov %s600_s7 }
 0x1c0   : > { %s872_s7 = smov %s604_s8  ;;  %s873_s8 = smov %s674_s15 }
 0x1c1   : > { %s874_s9 = smov %s663_s12  ;;  %13 = sbr.rel (!%p11_p3) target bundleno = 3 (0x3), region = 59 }
 0x1c8   :  { %437 = vsyncpa [#allocation3], 1 }
 0x1c9   :  { %439 = vsyncpa [#allocation3 + $0x1], 1 }

</bundles_post_ra>
